<compile_context>
chip_gen: v7x
topology: tpu7x:2x2x1
jax: 0.10.0
libtpu: 0.0.40
codegen_flags: <defaults>
</compile_context>

<pallas_src>
import math

import jax
import jax.numpy as jnp
from jax.experimental import pallas as pl
from jax.experimental.pallas import tpu as pltpu

F32 = jnp.float32
BF16 = jnp.bfloat16
FREQ_DIM = 256   # TimestepEmbedder.frequency_embedding_size
TEMB_DIM = 256   # TimestepEmbedder hidden size (FilmMlpv2 hardcodes TimestepEmbedder(256))


def _layer_norm(h, gamma, beta, eps=1e-5):
    mu = jnp.mean(h, axis=-1, keepdims=True)
    var = jnp.mean((h - mu) ** 2, axis=-1, keepdims=True)
    return (h - mu) * jax.lax.rsqrt(var + eps) * gamma + beta


def _erf(x):
    # Abramowitz & Stegun 7.1.26 rational approximation, |err| <= 1.5e-7.
    # Uses only exp / mul / add / where, all of which lower cleanly on the TPU VPU/EUP,
    # so the kernel keeps the exact-erf GELU semantics of F.gelu (default).
    p = 0.3275911
    a1, a2, a3, a4, a5 = 0.254829592, -0.284496736, 1.421413741, -1.453152027, 1.061405429
    s = jnp.where(x >= 0.0, 1.0, -1.0)
    ax = jnp.abs(x)
    t = 1.0 / (1.0 + p * ax)
    poly = ((((a5 * t + a4) * t + a3) * t + a2) * t + a1) * t
    return s * (1.0 - poly * jnp.exp(-ax * ax))


def _gelu_exact(x):
    return 0.5 * x * (1.0 + _erf(x * 0.7071067811865476))


def _film_mlp_kernel(
    x_ref, cond_ref, tfreq_ref,
    w_t1_ref, b_t1_ref, w_t2_ref, b_t2_ref,            # TimestepEmbedder MLP
    w1x_ref, w1c_ref, b1_ref, g1_ref, be1_ref,         # fc1 (split x/cond parts) + norm1
    wf1s_ref, bf1s_ref, wf1h_ref, bf1h_ref,            # film1 (de-interleaved scale/shift)
    w2_ref, b2_ref, g2_ref, be2_ref,                   # fc2 + norm2
    wf2s_ref, bf2s_ref, wf2h_ref, bf2h_ref,            # film2
    w3_ref, b3_ref,                                    # fc3
    y_ref,
):
    def mm(a_f32, w_ref, b_ref):
        # bf16 MXU matmul with f32 accumulation; bias add in f32.
        return jnp.dot(a_f32.astype(BF16), w_ref[...],
                       preferred_element_type=F32) + b_ref[...]

    # ---- TimestepEmbedder MLP: Linear -> SiLU -> Linear ----
    h = mm(tfreq_ref[...], w_t1_ref, b_t1_ref)                     # [TB, 256] f32
    h = h * (1.0 / (1.0 + jnp.exp(-h)))                            # SiLU in f32
    t_emb = mm(h, w_t2_ref, b_t2_ref)                              # [TB, 256]

    # ---- fc1 on cat(x, cond): split weight avoids an in-kernel concat ----
    y = (jnp.dot(x_ref[...].astype(BF16), w1x_ref[...], preferred_element_type=F32)
         + jnp.dot(cond_ref[...].astype(BF16), w1c_ref[...], preferred_element_type=F32)
         + b1_ref[...])
    y = _gelu_exact(_layer_norm(y, g1_ref[...], be1_ref[...]))

    scale = mm(t_emb, wf1s_ref, bf1s_ref)
    shift = mm(t_emb, wf1h_ref, bf1h_ref)
    y = y * (1.0 - scale) + shift

    y = mm(y, w2_ref, b2_ref)
    y = _gelu_exact(_layer_norm(y, g2_ref[...], be2_ref[...]))

    scale = mm(t_emb, wf2s_ref, bf2s_ref)
    shift = mm(t_emb, wf2h_ref, bf2h_ref)
    y = y * (1.0 - scale) + shift

    y = mm(y, w3_ref, b3_ref)                                      # [TB, Dout]
    y_ref[...] = y.astype(y_ref.dtype)


def film_mlp_pallas(x, t, cond, params, *, block_b=128):
    B, Din = x.shape
    _, Dc = cond.shape
    H = params["w2"].shape[0]
    Dout = params["w3"].shape[1]

    # Sinusoidal timestep features (TimestepEmbedder.timestep_embedding) — tiny trig
    # prep kept in the wrapper; the MLP on top of it runs inside the kernel.
    half = FREQ_DIM // 2
    freqs = jnp.exp(-math.log(10000.0) * jnp.arange(half, dtype=F32) / half)
    args = t.astype(F32)[:, None] * freqs[None, :]
    t_freq = jnp.concatenate([jnp.cos(args), jnp.sin(args)], axis=-1)   # [B, 256] f32

    # ---- host-side weight layout prep (no math changes) ----
    w1, w_f1, b_f1, w_f2, b_f2 = (params["w1"], params["w_f1"], params["b_f1"],
                                  params["w_f2"], params["b_f2"])
    weights = [
        params["w_t1"], params["b_t1"], params["w_t2"], params["b_t2"],
        w1[:Din], w1[Din:], params["b1"], params["g1"], params["be1"],
        # einops 'b (n a) -> a b n', a=2  =>  scale = cols 0::2, shift = cols 1::2
        w_f1[:, 0::2], b_f1[:, 0::2], w_f1[:, 1::2], b_f1[:, 1::2],
        params["w2"], params["b2"], params["g2"], params["be2"],
        w_f2[:, 0::2], b_f2[:, 0::2], w_f2[:, 1::2], b_f2[:, 1::2],
        params["w3"], params["b3"],
    ]

    tb = min(block_b, B)
    assert B % tb == 0, "batch must be divisible by the batch block"
    grid = (B // tb,)

    def rep_spec(a):  # grid-invariant weights / vector params
        return pl.BlockSpec(a.shape, lambda b: (0, 0))

    in_specs = (
        [pl.BlockSpec((tb, Din), lambda b: (b, 0)),
         pl.BlockSpec((tb, Dc), lambda b: (b, 0)),
         pl.BlockSpec((tb, FREQ_DIM), lambda b: (b, 0))]
        + [rep_spec(w) for w in weights]
    )

    flops = 2 * B * (FREQ_DIM * TEMB_DIM + TEMB_DIM * TEMB_DIM + 4 * TEMB_DIM * H
                     + (Din + Dc) * H + H * H + H * Dout)
    transcendentals = B * (TEMB_DIM + 2 * H)
    bytes_accessed = int(
        x.size * x.dtype.itemsize + cond.size * cond.dtype.itemsize
        + t_freq.size * t_freq.dtype.itemsize
        + sum(int(w.size) * w.dtype.itemsize for w in weights)
        + B * Dout * x.dtype.itemsize)

    return pl.pallas_call(
        _film_mlp_kernel,
        out_shape=jax.ShapeDtypeStruct((B, Dout), x.dtype),
        grid_spec=pltpu.PrefetchScalarGridSpec(
            num_scalar_prefetch=0,
            grid=grid,
            in_specs=in_specs,
            out_specs=pl.BlockSpec((tb, Dout), lambda b: (b, 0)),
        ),
        compiler_params=pltpu.CompilerParams(dimension_semantics=("parallel",)),
        cost_estimate=pl.CostEstimate(flops=flops, transcendentals=transcendentals,
                                      bytes_accessed=bytes_accessed),
    )(x, cond, t_freq, *weights)


def film_mlp_reference(x, t, cond, params):
    """Pure-JAX f32 reference mirroring the PyTorch forward (interleaved FiLM layout)."""
    up = lambda a: a.astype(F32)
    half = FREQ_DIM // 2
    freqs = jnp.exp(-math.log(10000.0) * jnp.arange(half, dtype=F32) / half)
    args = t.astype(F32)[:, None] * freqs[None, :]
    t_freq = jnp.concatenate([jnp.cos(args), jnp.sin(args)], axis=-1)

    h = t_freq @ up(params["w_t1"]) + params["b_t1"]
    h = jax.nn.silu(h)
    t_emb = h @ up(params["w_t2"]) + params["b_t2"]

    xc = jnp.concatenate([x, cond], axis=-1)
    y = xc @ up(params["w1"]) + params["b1"]
    y = jax.nn.gelu(_layer_norm(y, params["g1"], params["be1"]), approximate=False)
    film1 = t_emb @ up(params["w_f1"]) + params["b_f1"]
    scale, shift = film1[:, 0::2], film1[:, 1::2]     # einops 'b (n a) -> a b n', a=2
    y = y * (1.0 - scale) + shift

    y = y @ up(params["w2"]) + params["b2"]
    y = jax.nn.gelu(_layer_norm(y, params["g2"], params["be2"]), approximate=False)
    film2 = t_emb @ up(params["w_f2"]) + params["b_f2"]
    scale, shift = film2[:, 0::2], film2[:, 1::2]
    y = y * (1.0 - scale) + shift

    return y @ up(params["w3"]) + params["b3"]


def init_params(key, in_features, cond_features, hidden_features, out_features):
    ks = jax.random.split(key, 14)
    H = hidden_features

    def lin_w(k, din, dout, std):   # matmul weights stored bf16 (kernel + reference share them)
        return (jax.random.normal(k, (din, dout), F32) * std).astype(BF16)

    def vec(k, d, std=0.02):
        return jax.random.normal(k, (1, d), F32) * std

    return {
        # TimestepEmbedder.mlp: Linear(256,256) -> SiLU -> Linear(256,256)
        "w_t1": lin_w(ks[0], FREQ_DIM, TEMB_DIM, 0.02), "b_t1": vec(ks[1], TEMB_DIM),
        "w_t2": lin_w(ks[2], TEMB_DIM, TEMB_DIM, 0.02), "b_t2": vec(ks[3], TEMB_DIM),
        # fc1 / norm1
        "w1": lin_w(ks[4], in_features + cond_features, H, 0.05), "b1": vec(ks[5], H),
        "g1": jnp.ones((1, H), F32), "be1": jnp.zeros((1, H), F32),
        # film1 (interleaved [scale, shift]); PyTorch inits these to 0 — use non-zero
        # values here so the FiLM path is actually exercised by the test.
        "w_f1": lin_w(ks[6], TEMB_DIM, 2 * H, 0.5), "b_f1": vec(ks[7], 2 * H, 0.1),
        # fc2 / norm2
        "w2": lin_w(ks[8], H, H, 0.05), "b2": vec(ks[9], H),
        "g2": jnp.ones((1, H), F32), "be2": jnp.zeros((1, H), F32),
        # film2
        "w_f2": lin_w(ks[10], TEMB_DIM, 2 * H, 0.5), "b_f2": vec(ks[11], 2 * H, 0.1),
        # fc3
        "w3": lin_w(ks[12], H, out_features, 0.05), "b3": vec(ks[13], out_features),
    }


if __name__ == "__main__":
    # Small but MXU/lane-friendly shapes: 128-row batch blocks, 128/256-wide features.
    B = 256
    in_features, cond_features = 128, 128
    hidden_features, out_features = 256, 128

    key = jax.random.PRNGKey(0)
    kx, kc, kt, kp = jax.random.split(key, 4)
    x = jax.random.normal(kx, (B, in_features), F32)
    cond = jax.random.normal(kc, (B, cond_features), F32)
    t = jax.random.uniform(kt, (B,), F32, 0.0, 1000.0)
    params = init_params(kp, in_features, cond_features, hidden_features, out_features)

    out = jax.block_until_ready(film_mlp_pallas(x, t, cond, params))
    ref = jax.block_until_ready(film_mlp_reference(x, t, cond, params))

    assert out.shape == (B, out_features)
    max_err = float(jnp.max(jnp.abs(out - ref)))
    assert jnp.allclose(out, ref, atol=3e-2, rtol=3e-2), \
        f"mismatch vs JAX reference (max abs err {max_err})"

    print("KERNEL_OK")
</pallas_src>

<mosaic_0001>
module attributes {stable_mosaic.version = 11 : i64} {
  func.func @_film_mlp_kernel(%arg0: i32, %arg1: memref<128x128xf32, #tpu.memory_space<vmem>>, %arg2: memref<128x128xf32, #tpu.memory_space<vmem>>, %arg3: memref<128x256xf32, #tpu.memory_space<vmem>>, %arg4: memref<256x256xbf16, #tpu.memory_space<vmem>>, %arg5: memref<1x256xf32, #tpu.memory_space<vmem>>, %arg6: memref<256x256xbf16, #tpu.memory_space<vmem>>, %arg7: memref<1x256xf32, #tpu.memory_space<vmem>>, %arg8: memref<128x256xbf16, #tpu.memory_space<vmem>>, %arg9: memref<128x256xbf16, #tpu.memory_space<vmem>>, %arg10: memref<1x256xf32, #tpu.memory_space<vmem>>, %arg11: memref<1x256xf32, #tpu.memory_space<vmem>>, %arg12: memref<1x256xf32, #tpu.memory_space<vmem>>, %arg13: memref<256x256xbf16, #tpu.memory_space<vmem>>, %arg14: memref<1x256xf32, #tpu.memory_space<vmem>>, %arg15: memref<256x256xbf16, #tpu.memory_space<vmem>>, %arg16: memref<1x256xf32, #tpu.memory_space<vmem>>, %arg17: memref<256x256xbf16, #tpu.memory_space<vmem>>, %arg18: memref<1x256xf32, #tpu.memory_space<vmem>>, %arg19: memref<1x256xf32, #tpu.memory_space<vmem>>, %arg20: memref<1x256xf32, #tpu.memory_space<vmem>>, %arg21: memref<256x256xbf16, #tpu.memory_space<vmem>>, %arg22: memref<1x256xf32, #tpu.memory_space<vmem>>, %arg23: memref<256x256xbf16, #tpu.memory_space<vmem>>, %arg24: memref<1x256xf32, #tpu.memory_space<vmem>>, %arg25: memref<256x128xbf16, #tpu.memory_space<vmem>>, %arg26: memref<1x128xf32, #tpu.memory_space<vmem>>, %arg27: memref<128x128xf32, #tpu.memory_space<vmem>>) attributes {dimension_semantics = [#tpu.dimension_semantics<parallel>], iteration_bounds = array<i64: 2>, scalar_prefetch = 0 : i64, scratch_operands = 0 : i64, tpu.core_type = #tpu.core_type<tc>, window_params = [{transform_indices = @transform_0, window_bounds = array<i64: 128, 128>}, {transform_indices = @transform_1, window_bounds = array<i64: 128, 128>}, {transform_indices = @transform_2, window_bounds = array<i64: 128, 256>}, {pipeline_mode = #tpu.pipeline_mode<synchronous>, transform_indices = @transform_3, window_bounds = array<i64: 256, 256>}, {pipeline_mode = #tpu.pipeline_mode<synchronous>, transform_indices = @transform_4, window_bounds = array<i64: 1, 256>}, {pipeline_mode = #tpu.pipeline_mode<synchronous>, transform_indices = @transform_5, window_bounds = array<i64: 256, 256>}, {pipeline_mode = #tpu.pipeline_mode<synchronous>, transform_indices = @transform_6, window_bounds = array<i64: 1, 256>}, {pipeline_mode = #tpu.pipeline_mode<synchronous>, transform_indices = @transform_7, window_bounds = array<i64: 128, 256>}, {pipeline_mode = #tpu.pipeline_mode<synchronous>, transform_indices = @transform_8, window_bounds = array<i64: 128, 256>}, {pipeline_mode = #tpu.pipeline_mode<synchronous>, transform_indices = @transform_9, window_bounds = array<i64: 1, 256>}, {pipeline_mode = #tpu.pipeline_mode<synchronous>, transform_indices = @transform_10, window_bounds = array<i64: 1, 256>}, {pipeline_mode = #tpu.pipeline_mode<synchronous>, transform_indices = @transform_11, window_bounds = array<i64: 1, 256>}, {pipeline_mode = #tpu.pipeline_mode<synchronous>, transform_indices = @transform_12, window_bounds = array<i64: 256, 256>}, {pipeline_mode = #tpu.pipeline_mode<synchronous>, transform_indices = @transform_13, window_bounds = array<i64: 1, 256>}, {pipeline_mode = #tpu.pipeline_mode<synchronous>, transform_indices = @transform_14, window_bounds = array<i64: 256, 256>}, {pipeline_mode = #tpu.pipeline_mode<synchronous>, transform_indices = @transform_15, window_bounds = array<i64: 1, 256>}, {pipeline_mode = #tpu.pipeline_mode<synchronous>, transform_indices = @transform_16, window_bounds = array<i64: 256, 256>}, {pipeline_mode = #tpu.pipeline_mode<synchronous>, transform_indices = @transform_17, window_bounds = array<i64: 1, 256>}, {pipeline_mode = #tpu.pipeline_mode<synchronous>, transform_indices = @transform_18, window_bounds = array<i64: 1, 256>}, {pipeline_mode = #tpu.pipeline_mode<synchronous>, transform_indices = @transform_19, window_bounds = array<i64: 1, 256>}, {pipeline_mode = #tpu.pipeline_mode<synchronous>, transform_indices = @transform_20, window_bounds = array<i64: 256, 256>}, {pipeline_mode = #tpu.pipeline_mode<synchronous>, transform_indices = @transform_21, window_bounds = array<i64: 1, 256>}, {pipeline_mode = #tpu.pipeline_mode<synchronous>, transform_indices = @transform_22, window_bounds = array<i64: 256, 256>}, {pipeline_mode = #tpu.pipeline_mode<synchronous>, transform_indices = @transform_23, window_bounds = array<i64: 1, 256>}, {pipeline_mode = #tpu.pipeline_mode<synchronous>, transform_indices = @transform_24, window_bounds = array<i64: 256, 128>}, {pipeline_mode = #tpu.pipeline_mode<synchronous>, transform_indices = @transform_25, window_bounds = array<i64: 1, 128>}, {transform_indices = @transform_26, window_bounds = array<i64: 128, 128>}]} {
    %c0 = arith.constant 0 : index
    %c0_0 = arith.constant 0 : index
    %0 = vector.load %arg3[%c0, %c0_0] : memref<128x256xf32, #tpu.memory_space<vmem>>, vector<128x256xf32>
    %1 = arith.truncf %0 : vector<128x256xf32> to vector<128x256xbf16>
    %c0_1 = arith.constant 0 : index
    %c0_2 = arith.constant 0 : index
    %2 = vector.load %arg4[%c0_1, %c0_2] : memref<256x256xbf16, #tpu.memory_space<vmem>>, vector<256x256xbf16>
    %cst = arith.constant dense<0.000000e+00> : vector<128x256xf32>
    %3 = tpu.matmul %1, %2, %cst {dimension_numbers = #tpu.dot_dimension_numbers<[1], [0], [0], [1], [0, 0, 1, 1], [], []>} : vector<128x256xbf16>, vector<256x256xbf16>, vector<128x256xf32> -> vector<128x256xf32>
    %c0_3 = arith.constant 0 : index
    %c0_4 = arith.constant 0 : index
    %4 = vector.load %arg5[%c0_3, %c0_4] : memref<1x256xf32, #tpu.memory_space<vmem>>, vector<1x256xf32>
    %5 = vector.broadcast %4 : vector<1x256xf32> to vector<128x256xf32>
    %6 = arith.addf %3, %5 : vector<128x256xf32>
    %cst_5 = arith.constant 0.000000e+00 : f32
    %7 = vector.broadcast %cst_5 : f32 to vector<128x256xf32>
    %8 = arith.subf %7, %6 : vector<128x256xf32>
    %9 = math.exp %8 : vector<128x256xf32>
    %cst_6 = arith.constant 1.000000e+00 : f32
    %10 = vector.broadcast %cst_6 : f32 to vector<128x256xf32>
    %11 = arith.addf %10, %9 : vector<128x256xf32>
    %cst_7 = arith.constant 1.000000e+00 : f32
    %12 = vector.broadcast %cst_7 : f32 to vector<128x256xf32>
    %13 = arith.divf %12, %11 : vector<128x256xf32>
    %14 = arith.mulf %6, %13 : vector<128x256xf32>
    %15 = arith.truncf %14 : vector<128x256xf32> to vector<128x256xbf16>
    %c0_8 = arith.constant 0 : index
    %c0_9 = arith.constant 0 : index
    %16 = vector.load %arg6[%c0_8, %c0_9] : memref<256x256xbf16, #tpu.memory_space<vmem>>, vector<256x256xbf16>
    %cst_10 = arith.constant dense<0.000000e+00> : vector<128x256xf32>
    %17 = tpu.matmul %15, %16, %cst_10 {dimension_numbers = #tpu.dot_dimension_numbers<[1], [0], [0], [1], [0, 0, 1, 1], [], []>} : vector<128x256xbf16>, vector<256x256xbf16>, vector<128x256xf32> -> vector<128x256xf32>
    %c0_11 = arith.constant 0 : index
    %c0_12 = arith.constant 0 : index
    %18 = vector.load %arg7[%c0_11, %c0_12] : memref<1x256xf32, #tpu.memory_space<vmem>>, vector<1x256xf32>
    %19 = vector.broadcast %18 : vector<1x256xf32> to vector<128x256xf32>
    %20 = arith.addf %17, %19 : vector<128x256xf32>
    %c0_13 = arith.constant 0 : index
    %c0_14 = arith.constant 0 : index
    %21 = vector.load %arg1[%c0_13, %c0_14] : memref<128x128xf32, #tpu.memory_space<vmem>>, vector<128x128xf32>
    %22 = arith.truncf %21 : vector<128x128xf32> to vector<128x128xbf16>
    %c0_15 = arith.constant 0 : index
    %c0_16 = arith.constant 0 : index
    %23 = vector.load %arg8[%c0_15, %c0_16] : memref<128x256xbf16, #tpu.memory_space<vmem>>, vector<128x256xbf16>
    %cst_17 = arith.constant dense<0.000000e+00> : vector<128x256xf32>
    %24 = tpu.matmul %22, %23, %cst_17 {dimension_numbers = #tpu.dot_dimension_numbers<[1], [0], [0], [1], [0, 0, 1, 1], [], []>} : vector<128x128xbf16>, vector<128x256xbf16>, vector<128x256xf32> -> vector<128x256xf32>
    %c0_18 = arith.constant 0 : index
    %c0_19 = arith.constant 0 : index
    %25 = vector.load %arg2[%c0_18, %c0_19] : memref<128x128xf32, #tpu.memory_space<vmem>>, vector<128x128xf32>
    %26 = arith.truncf %25 : vector<128x128xf32> to vector<128x128xbf16>
    %c0_20 = arith.constant 0 : index
    %c0_21 = arith.constant 0 : index
    %27 = vector.load %arg9[%c0_20, %c0_21] : memref<128x256xbf16, #tpu.memory_space<vmem>>, vector<128x256xbf16>
    %cst_22 = arith.constant dense<0.000000e+00> : vector<128x256xf32>
    %28 = tpu.matmul %26, %27, %cst_22 {dimension_numbers = #tpu.dot_dimension_numbers<[1], [0], [0], [1], [0, 0, 1, 1], [], []>} : vector<128x128xbf16>, vector<128x256xbf16>, vector<128x256xf32> -> vector<128x256xf32>
    %29 = arith.addf %24, %28 : vector<128x256xf32>
    %c0_23 = arith.constant 0 : index
    %c0_24 = arith.constant 0 : index
    %30 = vector.load %arg10[%c0_23, %c0_24] : memref<1x256xf32, #tpu.memory_space<vmem>>, vector<1x256xf32>
    %31 = vector.broadcast %30 : vector<1x256xf32> to vector<128x256xf32>
    %32 = arith.addf %29, %31 : vector<128x256xf32>
    %c0_25 = arith.constant 0 : index
    %c0_26 = arith.constant 0 : index
    %33 = vector.load %arg11[%c0_25, %c0_26] : memref<1x256xf32, #tpu.memory_space<vmem>>, vector<1x256xf32>
    %c0_27 = arith.constant 0 : index
    %c0_28 = arith.constant 0 : index
    %34 = vector.load %arg12[%c0_27, %c0_28] : memref<1x256xf32, #tpu.memory_space<vmem>>, vector<1x256xf32>
    %cst_29 = arith.constant dense<0.000000e+00> : vector<128xf32>
    %35 = vector.multi_reduction <add>, %32, %cst_29 [1] : vector<128x256xf32> to vector<128xf32>
    %36 = vector.shape_cast %35 : vector<128xf32> to vector<128x1xf32>
    %cst_30 = arith.constant 2.560000e+02 : f32
    %37 = vector.broadcast %cst_30 : f32 to vector<128x1xf32>
    %38 = arith.divf %36, %37 : vector<128x1xf32>
    %39 = vector.broadcast %38 : vector<128x1xf32> to vector<128x256xf32>
    %40 = arith.subf %32, %39 : vector<128x256xf32>
    %41 = arith.mulf %40, %40 : vector<128x256xf32>
    %cst_31 = arith.constant dense<0.000000e+00> : vector<128xf32>
    %42 = vector.multi_reduction <add>, %41, %cst_31 [1] : vector<128x256xf32> to vector<128xf32>
    %43 = vector.shape_cast %42 : vector<128xf32> to vector<128x1xf32>
    %cst_32 = arith.constant 2.560000e+02 : f32
    %44 = vector.broadcast %cst_32 : f32 to vector<128x1xf32>
    %45 = arith.divf %43, %44 : vector<128x1xf32>
    %46 = vector.broadcast %38 : vector<128x1xf32> to vector<128x256xf32>
    %47 = arith.subf %32, %46 : vector<128x256xf32>
    %cst_33 = arith.constant 9.99999974E-6 : f32
    %48 = vector.broadcast %cst_33 : f32 to vector<128x1xf32>
    %49 = arith.addf %45, %48 : vector<128x1xf32>
    %50 = math.rsqrt %49 : vector<128x1xf32>
    %51 = vector.broadcast %50 : vector<128x1xf32> to vector<128x256xf32>
    %52 = arith.mulf %47, %51 : vector<128x256xf32>
    %53 = vector.broadcast %33 : vector<1x256xf32> to vector<128x256xf32>
    %54 = arith.mulf %52, %53 : vector<128x256xf32>
    %55 = vector.broadcast %34 : vector<1x256xf32> to vector<128x256xf32>
    %56 = arith.addf %54, %55 : vector<128x256xf32>
    %cst_34 = arith.constant 5.000000e-01 : f32
    %57 = vector.broadcast %cst_34 : f32 to vector<128x256xf32>
    %58 = arith.mulf %57, %56 : vector<128x256xf32>
    %cst_35 = arith.constant 0.707106769 : f32
    %59 = vector.broadcast %cst_35 : f32 to vector<128x256xf32>
    %60 = arith.mulf %56, %59 : vector<128x256xf32>
    %cst_36 = arith.constant 0.000000e+00 : f32
    %61 = vector.broadcast %cst_36 : f32 to vector<128x256xf32>
    %62 = arith.cmpf oge, %60, %61 : vector<128x256xf32>
    %cst_37 = arith.constant 1.000000e+00 : f32
    %cst_38 = arith.constant -1.000000e+00 : f32
    %63 = vector.broadcast %cst_37 : f32 to vector<128x256xf32>
    %64 = vector.broadcast %cst_38 : f32 to vector<128x256xf32>
    %65 = arith.select %62, %63, %64 : vector<128x256xi1>, vector<128x256xf32>
    %66 = math.absf %60 : vector<128x256xf32>
    %cst_39 = arith.constant 0.327591091 : f32
    %67 = vector.broadcast %cst_39 : f32 to vector<128x256xf32>
    %68 = arith.mulf %67, %66 : vector<128x256xf32>
    %cst_40 = arith.constant 1.000000e+00 : f32
    %69 = vector.broadcast %cst_40 : f32 to vector<128x256xf32>
    %70 = arith.addf %69, %68 : vector<128x256xf32>
    %cst_41 = arith.constant 1.000000e+00 : f32
    %71 = vector.broadcast %cst_41 : f32 to vector<128x256xf32>
    %72 = arith.divf %71, %70 : vector<128x256xf32>
    %cst_42 = arith.constant 1.06140542 : f32
    %73 = vector.broadcast %cst_42 : f32 to vector<128x256xf32>
    %74 = arith.mulf %73, %72 : vector<128x256xf32>
    %cst_43 = arith.constant -1.45315206 : f32
    %75 = vector.broadcast %cst_43 : f32 to vector<128x256xf32>
    %76 = arith.addf %74, %75 : vector<128x256xf32>
    %77 = arith.mulf %76, %72 : vector<128x256xf32>
    %cst_44 = arith.constant 1.42141378 : f32
    %78 = vector.broadcast %cst_44 : f32 to vector<128x256xf32>
    %79 = arith.addf %77, %78 : vector<128x256xf32>
    %80 = arith.mulf %79, %72 : vector<128x256xf32>
    %cst_45 = arith.constant -0.284496725 : f32
    %81 = vector.broadcast %cst_45 : f32 to vector<128x256xf32>
    %82 = arith.addf %80, %81 : vector<128x256xf32>
    %83 = arith.mulf %82, %72 : vector<128x256xf32>
    %cst_46 = arith.constant 0.254829586 : f32
    %84 = vector.broadcast %cst_46 : f32 to vector<128x256xf32>
    %85 = arith.addf %83, %84 : vector<128x256xf32>
    %86 = arith.mulf %85, %72 : vector<128x256xf32>
    %cst_47 = arith.constant 0.000000e+00 : f32
    %87 = vector.broadcast %cst_47 : f32 to vector<128x256xf32>
    %88 = arith.subf %87, %66 : vector<128x256xf32>
    %89 = arith.mulf %88, %66 : vector<128x256xf32>
    %90 = math.exp %89 : vector<128x256xf32>
    %91 = arith.mulf %86, %90 : vector<128x256xf32>
    %cst_48 = arith.constant 1.000000e+00 : f32
    %92 = vector.broadcast %cst_48 : f32 to vector<128x256xf32>
    %93 = arith.subf %92, %91 : vector<128x256xf32>
    %94 = arith.mulf %65, %93 : vector<128x256xf32>
    %cst_49 = arith.constant 1.000000e+00 : f32
    %95 = vector.broadcast %cst_49 : f32 to vector<128x256xf32>
    %96 = arith.addf %95, %94 : vector<128x256xf32>
    %97 = arith.mulf %58, %96 : vector<128x256xf32>
    %98 = arith.truncf %20 : vector<128x256xf32> to vector<128x256xbf16>
    %c0_50 = arith.constant 0 : index
    %c0_51 = arith.constant 0 : index
    %99 = vector.load %arg13[%c0_50, %c0_51] : memref<256x256xbf16, #tpu.memory_space<vmem>>, vector<256x256xbf16>
    %cst_52 = arith.constant dense<0.000000e+00> : vector<128x256xf32>
    %100 = tpu.matmul %98, %99, %cst_52 {dimension_numbers = #tpu.dot_dimension_numbers<[1], [0], [0], [1], [0, 0, 1, 1], [], []>} : vector<128x256xbf16>, vector<256x256xbf16>, vector<128x256xf32> -> vector<128x256xf32>
    %c0_53 = arith.constant 0 : index
    %c0_54 = arith.constant 0 : index
    %101 = vector.load %arg14[%c0_53, %c0_54] : memref<1x256xf32, #tpu.memory_space<vmem>>, vector<1x256xf32>
    %102 = vector.broadcast %101 : vector<1x256xf32> to vector<128x256xf32>
    %103 = arith.addf %100, %102 : vector<128x256xf32>
    %104 = arith.truncf %20 : vector<128x256xf32> to vector<128x256xbf16>
    %c0_55 = arith.constant 0 : index
    %c0_56 = arith.constant 0 : index
    %105 = vector.load %arg15[%c0_55, %c0_56] : memref<256x256xbf16, #tpu.memory_space<vmem>>, vector<256x256xbf16>
    %cst_57 = arith.constant dense<0.000000e+00> : vector<128x256xf32>
    %106 = tpu.matmul %104, %105, %cst_57 {dimension_numbers = #tpu.dot_dimension_numbers<[1], [0], [0], [1], [0, 0, 1, 1], [], []>} : vector<128x256xbf16>, vector<256x256xbf16>, vector<128x256xf32> -> vector<128x256xf32>
    %c0_58 = arith.constant 0 : index
    %c0_59 = arith.constant 0 : index
    %107 = vector.load %arg16[%c0_58, %c0_59] : memref<1x256xf32, #tpu.memory_space<vmem>>, vector<1x256xf32>
    %108 = vector.broadcast %107 : vector<1x256xf32> to vector<128x256xf32>
    %109 = arith.addf %106, %108 : vector<128x256xf32>
    %cst_60 = arith.constant 1.000000e+00 : f32
    %110 = vector.broadcast %cst_60 : f32 to vector<128x256xf32>
    %111 = arith.subf %110, %103 : vector<128x256xf32>
    %112 = arith.mulf %97, %111 : vector<128x256xf32>
    %113 = arith.addf %112, %109 : vector<128x256xf32>
    %114 = arith.truncf %113 : vector<128x256xf32> to vector<128x256xbf16>
    %c0_61 = arith.constant 0 : index
    %c0_62 = arith.constant 0 : index
    %115 = vector.load %arg17[%c0_61, %c0_62] : memref<256x256xbf16, #tpu.memory_space<vmem>>, vector<256x256xbf16>
    %cst_63 = arith.constant dense<0.000000e+00> : vector<128x256xf32>
    %116 = tpu.matmul %114, %115, %cst_63 {dimension_numbers = #tpu.dot_dimension_numbers<[1], [0], [0], [1], [0, 0, 1, 1], [], []>} : vector<128x256xbf16>, vector<256x256xbf16>, vector<128x256xf32> -> vector<128x256xf32>
    %c0_64 = arith.constant 0 : index
    %c0_65 = arith.constant 0 : index
    %117 = vector.load %arg18[%c0_64, %c0_65] : memref<1x256xf32, #tpu.memory_space<vmem>>, vector<1x256xf32>
    %118 = vector.broadcast %117 : vector<1x256xf32> to vector<128x256xf32>
    %119 = arith.addf %116, %118 : vector<128x256xf32>
    %c0_66 = arith.constant 0 : index
    %c0_67 = arith.constant 0 : index
    %120 = vector.load %arg19[%c0_66, %c0_67] : memref<1x256xf32, #tpu.memory_space<vmem>>, vector<1x256xf32>
    %c0_68 = arith.constant 0 : index
    %c0_69 = arith.constant 0 : index
    %121 = vector.load %arg20[%c0_68, %c0_69] : memref<1x256xf32, #tpu.memory_space<vmem>>, vector<1x256xf32>
    %cst_70 = arith.constant dense<0.000000e+00> : vector<128xf32>
    %122 = vector.multi_reduction <add>, %119, %cst_70 [1] : vector<128x256xf32> to vector<128xf32>
    %123 = vector.shape_cast %122 : vector<128xf32> to vector<128x1xf32>
    %cst_71 = arith.constant 2.560000e+02 : f32
    %124 = vector.broadcast %cst_71 : f32 to vector<128x1xf32>
    %125 = arith.divf %123, %124 : vector<128x1xf32>
    %126 = vector.broadcast %125 : vector<128x1xf32> to vector<128x256xf32>
    %127 = arith.subf %119, %126 : vector<128x256xf32>
    %128 = arith.mulf %127, %127 : vector<128x256xf32>
    %cst_72 = arith.constant dense<0.000000e+00> : vector<128xf32>
    %129 = vector.multi_reduction <add>, %128, %cst_72 [1] : vector<128x256xf32> to vector<128xf32>
    %130 = vector.shape_cast %129 : vector<128xf32> to vector<128x1xf32>
    %cst_73 = arith.constant 2.560000e+02 : f32
    %131 = vector.broadcast %cst_73 : f32 to vector<128x1xf32>
    %132 = arith.divf %130, %131 : vector<128x1xf32>
    %133 = vector.broadcast %125 : vector<128x1xf32> to vector<128x256xf32>
    %134 = arith.subf %119, %133 : vector<128x256xf32>
    %cst_74 = arith.constant 9.99999974E-6 : f32
    %135 = vector.broadcast %cst_74 : f32 to vector<128x1xf32>
    %136 = arith.addf %132, %135 : vector<128x1xf32>
    %137 = math.rsqrt %136 : vector<128x1xf32>
    %138 = vector.broadcast %137 : vector<128x1xf32> to vector<128x256xf32>
    %139 = arith.mulf %134, %138 : vector<128x256xf32>
    %140 = vector.broadcast %120 : vector<1x256xf32> to vector<128x256xf32>
    %141 = arith.mulf %139, %140 : vector<128x256xf32>
    %142 = vector.broadcast %121 : vector<1x256xf32> to vector<128x256xf32>
    %143 = arith.addf %141, %142 : vector<128x256xf32>
    %cst_75 = arith.constant 5.000000e-01 : f32
    %144 = vector.broadcast %cst_75 : f32 to vector<128x256xf32>
    %145 = arith.mulf %144, %143 : vector<128x256xf32>
    %cst_76 = arith.constant 0.707106769 : f32
    %146 = vector.broadcast %cst_76 : f32 to vector<128x256xf32>
    %147 = arith.mulf %143, %146 : vector<128x256xf32>
    %cst_77 = arith.constant 0.000000e+00 : f32
    %148 = vector.broadcast %cst_77 : f32 to vector<128x256xf32>
    %149 = arith.cmpf oge, %147, %148 : vector<128x256xf32>
    %cst_78 = arith.constant 1.000000e+00 : f32
    %cst_79 = arith.constant -1.000000e+00 : f32
    %150 = vector.broadcast %cst_78 : f32 to vector<128x256xf32>
    %151 = vector.broadcast %cst_79 : f32 to vector<128x256xf32>
    %152 = arith.select %149, %150, %151 : vector<128x256xi1>, vector<128x256xf32>
    %153 = math.absf %147 : vector<128x256xf32>
    %cst_80 = arith.constant 0.327591091 : f32
    %154 = vector.broadcast %cst_80 : f32 to vector<128x256xf32>
    %155 = arith.mulf %154, %153 : vector<128x256xf32>
    %cst_81 = arith.constant 1.000000e+00 : f32
    %156 = vector.broadcast %cst_81 : f32 to vector<128x256xf32>
    %157 = arith.addf %156, %155 : vector<128x256xf32>
    %cst_82 = arith.constant 1.000000e+00 : f32
    %158 = vector.broadcast %cst_82 : f32 to vector<128x256xf32>
    %159 = arith.divf %158, %157 : vector<128x256xf32>
    %cst_83 = arith.constant 1.06140542 : f32
    %160 = vector.broadcast %cst_83 : f32 to vector<128x256xf32>
    %161 = arith.mulf %160, %159 : vector<128x256xf32>
    %cst_84 = arith.constant -1.45315206 : f32
    %162 = vector.broadcast %cst_84 : f32 to vector<128x256xf32>
    %163 = arith.addf %161, %162 : vector<128x256xf32>
    %164 = arith.mulf %163, %159 : vector<128x256xf32>
    %cst_85 = arith.constant 1.42141378 : f32
    %165 = vector.broadcast %cst_85 : f32 to vector<128x256xf32>
    %166 = arith.addf %164, %165 : vector<128x256xf32>
    %167 = arith.mulf %166, %159 : vector<128x256xf32>
    %cst_86 = arith.constant -0.284496725 : f32
    %168 = vector.broadcast %cst_86 : f32 to vector<128x256xf32>
    %169 = arith.addf %167, %168 : vector<128x256xf32>
    %170 = arith.mulf %169, %159 : vector<128x256xf32>
    %cst_87 = arith.constant 0.254829586 : f32
    %171 = vector.broadcast %cst_87 : f32 to vector<128x256xf32>
    %172 = arith.addf %170, %171 : vector<128x256xf32>
    %173 = arith.mulf %172, %159 : vector<128x256xf32>
    %cst_88 = arith.constant 0.000000e+00 : f32
    %174 = vector.broadcast %cst_88 : f32 to vector<128x256xf32>
    %175 = arith.subf %174, %153 : vector<128x256xf32>
    %176 = arith.mulf %175, %153 : vector<128x256xf32>
    %177 = math.exp %176 : vector<128x256xf32>
    %178 = arith.mulf %173, %177 : vector<128x256xf32>
    %cst_89 = arith.constant 1.000000e+00 : f32
    %179 = vector.broadcast %cst_89 : f32 to vector<128x256xf32>
    %180 = arith.subf %179, %178 : vector<128x256xf32>
    %181 = arith.mulf %152, %180 : vector<128x256xf32>
    %cst_90 = arith.constant 1.000000e+00 : f32
    %182 = vector.broadcast %cst_90 : f32 to vector<128x256xf32>
    %183 = arith.addf %182, %181 : vector<128x256xf32>
    %184 = arith.mulf %145, %183 : vector<128x256xf32>
    %185 = arith.truncf %20 : vector<128x256xf32> to vector<128x256xbf16>
    %c0_91 = arith.constant 0 : index
    %c0_92 = arith.constant 0 : index
    %186 = vector.load %arg21[%c0_91, %c0_92] : memref<256x256xbf16, #tpu.memory_space<vmem>>, vector<256x256xbf16>
    %cst_93 = arith.constant dense<0.000000e+00> : vector<128x256xf32>
    %187 = tpu.matmul %185, %186, %cst_93 {dimension_numbers = #tpu.dot_dimension_numbers<[1], [0], [0], [1], [0, 0, 1, 1], [], []>} : vector<128x256xbf16>, vector<256x256xbf16>, vector<128x256xf32> -> vector<128x256xf32>
    %c0_94 = arith.constant 0 : index
    %c0_95 = arith.constant 0 : index
    %188 = vector.load %arg22[%c0_94, %c0_95] : memref<1x256xf32, #tpu.memory_space<vmem>>, vector<1x256xf32>
    %189 = vector.broadcast %188 : vector<1x256xf32> to vector<128x256xf32>
    %190 = arith.addf %187, %189 : vector<128x256xf32>
    %191 = arith.truncf %20 : vector<128x256xf32> to vector<128x256xbf16>
    %c0_96 = arith.constant 0 : index
    %c0_97 = arith.constant 0 : index
    %192 = vector.load %arg23[%c0_96, %c0_97] : memref<256x256xbf16, #tpu.memory_space<vmem>>, vector<256x256xbf16>
    %cst_98 = arith.constant dense<0.000000e+00> : vector<128x256xf32>
    %193 = tpu.matmul %191, %192, %cst_98 {dimension_numbers = #tpu.dot_dimension_numbers<[1], [0], [0], [1], [0, 0, 1, 1], [], []>} : vector<128x256xbf16>, vector<256x256xbf16>, vector<128x256xf32> -> vector<128x256xf32>
    %c0_99 = arith.constant 0 : index
    %c0_100 = arith.constant 0 : index
    %194 = vector.load %arg24[%c0_99, %c0_100] : memref<1x256xf32, #tpu.memory_space<vmem>>, vector<1x256xf32>
    %195 = vector.broadcast %194 : vector<1x256xf32> to vector<128x256xf32>
    %196 = arith.addf %193, %195 : vector<128x256xf32>
    %cst_101 = arith.constant 1.000000e+00 : f32
    %197 = vector.broadcast %cst_101 : f32 to vector<128x256xf32>
    %198 = arith.subf %197, %190 : vector<128x256xf32>
    %199 = arith.mulf %184, %198 : vector<128x256xf32>
    %200 = arith.addf %199, %196 : vector<128x256xf32>
    %201 = arith.truncf %200 : vector<128x256xf32> to vector<128x256xbf16>
    %c0_102 = arith.constant 0 : index
    %c0_103 = arith.constant 0 : index
    %202 = vector.load %arg25[%c0_102, %c0_103] : memref<256x128xbf16, #tpu.memory_space<vmem>>, vector<256x128xbf16>
    %cst_104 = arith.constant dense<0.000000e+00> : vector<128x128xf32>
    %203 = tpu.matmul %201, %202, %cst_104 {dimension_numbers = #tpu.dot_dimension_numbers<[1], [0], [0], [1], [0, 0, 1, 1], [], []>} : vector<128x256xbf16>, vector<256x128xbf16>, vector<128x128xf32> -> vector<128x128xf32>
    %c0_105 = arith.constant 0 : index
    %c0_106 = arith.constant 0 : index
    %204 = vector.load %arg26[%c0_105, %c0_106] : memref<1x128xf32, #tpu.memory_space<vmem>>, vector<1x128xf32>
    %205 = vector.broadcast %204 : vector<1x128xf32> to vector<128x128xf32>
    %206 = arith.addf %203, %205 : vector<128x128xf32>
    %c0_107 = arith.constant 0 : index
    %c0_108 = arith.constant 0 : index
    %207 = vector.load %arg27[%c0_107, %c0_108] : memref<128x128xf32, #tpu.memory_space<vmem>>, vector<128x128xf32>
    tpu.vector_store %arg27[%c0_107, %c0_108], %206 {strides = array<i32>} : memref<128x128xf32, #tpu.memory_space<vmem>>, vector<128x128xf32>,
    return
  }
  func.func @transform_0(%arg0: i32) -> (i32, i32) {
    %c0_i32 = arith.constant 0 : i32
    %c0_i32_0 = arith.constant 0 : i32
    return %arg0, %c0_i32 : i32, i32
  }
  func.func @transform_1(%arg0: i32) -> (i32, i32) {
    %c0_i32 = arith.constant 0 : i32
    %c0_i32_0 = arith.constant 0 : i32
    return %arg0, %c0_i32 : i32, i32
  }
  func.func @transform_2(%arg0: i32) -> (i32, i32) {
    %c0_i32 = arith.constant 0 : i32
    %c0_i32_0 = arith.constant 0 : i32
    return %arg0, %c0_i32 : i32, i32
  }
  func.func @transform_3(%arg0: i32) -> (i32, i32) {
    %c0_i32 = arith.constant 0 : i32
    %c0_i32_0 = arith.constant 0 : i32
    %c0_i32_1 = arith.constant 0 : i32
    return %c0_i32, %c0_i32_0 : i32, i32
  }
  func.func @transform_4(%arg0: i32) -> (i32, i32) {
    %c0_i32 = arith.constant 0 : i32
    %c0_i32_0 = arith.constant 0 : i32
    %c0_i32_1 = arith.constant 0 : i32
    return %c0_i32, %c0_i32_0 : i32, i32
  }
  func.func @transform_5(%arg0: i32) -> (i32, i32) {
    %c0_i32 = arith.constant 0 : i32
    %c0_i32_0 = arith.constant 0 : i32
    %c0_i32_1 = arith.constant 0 : i32
    return %c0_i32, %c0_i32_0 : i32, i32
  }
  func.func @transform_6(%arg0: i32) -> (i32, i32) {
    %c0_i32 = arith.constant 0 : i32
    %c0_i32_0 = arith.constant 0 : i32
    %c0_i32_1 = arith.constant 0 : i32
    return %c0_i32, %c0_i32_0 : i32, i32
  }
  func.func @transform_7(%arg0: i32) -> (i32, i32) {
    %c0_i32 = arith.constant 0 : i32
    %c0_i32_0 = arith.constant 0 : i32
    %c0_i32_1 = arith.constant 0 : i32
    return %c0_i32, %c0_i32_0 : i32, i32
  }
  func.func @transform_8(%arg0: i32) -> (i32, i32) {
    %c0_i32 = arith.constant 0 : i32
    %c0_i32_0 = arith.constant 0 : i32
    %c0_i32_1 = arith.constant 0 : i32
    return %c0_i32, %c0_i32_0 : i32, i32
  }
  func.func @transform_9(%arg0: i32) -> (i32, i32) {
    %c0_i32 = arith.constant 0 : i32
    %c0_i32_0 = arith.constant 0 : i32
    %c0_i32_1 = arith.constant 0 : i32
    return %c0_i32, %c0_i32_0 : i32, i32
  }
  func.func @transform_10(%arg0: i32) -> (i32, i32) {
    %c0_i32 = arith.constant 0 : i32
    %c0_i32_0 = arith.constant 0 : i32
    %c0_i32_1 = arith.constant 0 : i32
    return %c0_i32, %c0_i32_0 : i32, i32
  }
  func.func @transform_11(%arg0: i32) -> (i32, i32) {
    %c0_i32 = arith.constant 0 : i32
    %c0_i32_0 = arith.constant 0 : i32
    %c0_i32_1 = arith.constant 0 : i32
    return %c0_i32, %c0_i32_0 : i32, i32
  }
  func.func @transform_12(%arg0: i32) -> (i32, i32) {
    %c0_i32 = arith.constant 0 : i32
    %c0_i32_0 = arith.constant 0 : i32
    %c0_i32_1 = arith.constant 0 : i32
    return %c0_i32, %c0_i32_0 : i32, i32
  }
  func.func @transform_13(%arg0: i32) -> (i32, i32) {
    %c0_i32 = arith.constant 0 : i32
    %c0_i32_0 = arith.constant 0 : i32
    %c0_i32_1 = arith.constant 0 : i32
    return %c0_i32, %c0_i32_0 : i32, i32
  }
  func.func @transform_14(%arg0: i32) -> (i32, i32) {
    %c0_i32 = arith.constant 0 : i32
    %c0_i32_0 = arith.constant 0 : i32
    %c0_i32_1 = arith.constant 0 : i32
    return %c0_i32, %c0_i32_0 : i32, i32
  }
  func.func @transform_15(%arg0: i32) -> (i32, i32) {
    %c0_i32 = arith.constant 0 : i32
    %c0_i32_0 = arith.constant 0 : i32
    %c0_i32_1 = arith.constant 0 : i32
    return %c0_i32, %c0_i32_0 : i32, i32
  }
  func.func @transform_16(%arg0: i32) -> (i32, i32) {
    %c0_i32 = arith.constant 0 : i32
    %c0_i32_0 = arith.constant 0 : i32
    %c0_i32_1 = arith.constant 0 : i32
    return %c0_i32, %c0_i32_0 : i32, i32
  }
  func.func @transform_17(%arg0: i32) -> (i32, i32) {
    %c0_i32 = arith.constant 0 : i32
    %c0_i32_0 = arith.constant 0 : i32
    %c0_i32_1 = arith.constant 0 : i32
    return %c0_i32, %c0_i32_0 : i32, i32
  }
  func.func @transform_18(%arg0: i32) -> (i32, i32) {
    %c0_i32 = arith.constant 0 : i32
    %c0_i32_0 = arith.constant 0 : i32
    %c0_i32_1 = arith.constant 0 : i32
    return %c0_i32, %c0_i32_0 : i32, i32
  }
  func.func @transform_19(%arg0: i32) -> (i32, i32) {
    %c0_i32 = arith.constant 0 : i32
    %c0_i32_0 = arith.constant 0 : i32
    %c0_i32_1 = arith.constant 0 : i32
    return %c0_i32, %c0_i32_0 : i32, i32
  }
  func.func @transform_20(%arg0: i32) -> (i32, i32) {
    %c0_i32 = arith.constant 0 : i32
    %c0_i32_0 = arith.constant 0 : i32
    %c0_i32_1 = arith.constant 0 : i32
    return %c0_i32, %c0_i32_0 : i32, i32
  }
  func.func @transform_21(%arg0: i32) -> (i32, i32) {
    %c0_i32 = arith.constant 0 : i32
    %c0_i32_0 = arith.constant 0 : i32
    %c0_i32_1 = arith.constant 0 : i32
    return %c0_i32, %c0_i32_0 : i32, i32
  }
  func.func @transform_22(%arg0: i32) -> (i32, i32) {
    %c0_i32 = arith.constant 0 : i32
    %c0_i32_0 = arith.constant 0 : i32
    %c0_i32_1 = arith.constant 0 : i32
    return %c0_i32, %c0_i32_0 : i32, i32
  }
  func.func @transform_23(%arg0: i32) -> (i32, i32) {
    %c0_i32 = arith.constant 0 : i32
    %c0_i32_0 = arith.constant 0 : i32
    %c0_i32_1 = arith.constant 0 : i32
    return %c0_i32, %c0_i32_0 : i32, i32
  }
  func.func @transform_24(%arg0: i32) -> (i32, i32) {
    %c0_i32 = arith.constant 0 : i32
    %c0_i32_0 = arith.constant 0 : i32
    %c0_i32_1 = arith.constant 0 : i32
    return %c0_i32, %c0_i32_0 : i32, i32
  }
  func.func @transform_25(%arg0: i32) -> (i32, i32) {
    %c0_i32 = arith.constant 0 : i32
    %c0_i32_0 = arith.constant 0 : i32
    %c0_i32_1 = arith.constant 0 : i32
    return %c0_i32, %c0_i32_0 : i32, i32
  }
  func.func @transform_26(%arg0: i32) -> (i32, i32) {
    %c0_i32 = arith.constant 0 : i32
    %c0_i32_0 = arith.constant 0 : i32
    return %arg0, %c0_i32 : i32, i32
  }
}

</mosaic_0001>

<bundles_post_ra>
// kernel: tpu_custom_call.1
= control target key start
LH: loop header
LB: loop body
LE: loop exit
PB: predicated region body
PF: predicated region fallthrough
CT: control target
= control target key end

     0   :  { %s13334_s0 = inlined_call_operand.hbm [shape: f32[256,128], index: 0, kind: input, shape index: {}]   ;;  %s13335_s1 = inlined_call_operand.hbm [shape: f32[256,128], index: 1, kind: input, shape index: {}]   ;;  %s13336_s2 = inlined_call_operand.hbm [shape: f32[256,256], index: 2, kind: input, shape index: {}]   ;;  %s13337_s3 = inlined_call_operand.hbm [shape: bf16[256,256], index: 3, kind: input, shape index: {}]   ;;  %s13338_s4 = inlined_call_operand.vmem [shape: f32[1,256], index: 4, kind: input, shape index: {}]   ;;  %s13339_s5 = inlined_call_operand.hbm [shape: bf16[256,256], index: 5, kind: input, shape index: {}]   ;;  %s13340_s6 = inlined_call_operand.vmem [shape: f32[1,256], index: 6, kind: input, shape index: {}]   ;;  %s13341_s7 = inlined_call_operand.hbm [shape: bf16[128,256], index: 7, kind: input, shape index: {}]   ;;  %s13342_s8 = inlined_call_operand.hbm [shape: bf16[128,256], index: 8, kind: input, shape index: {}]   ;;  %s13343_s9 = inlined_call_operand.vmem [shape: f32[1,256], index: 9, kind: input, shape index: {}]   ;;  %s13344_s10 = inlined_call_operand.vmem [shape: f32[1,256], index: 10, kind: input, shape index: {}]   ;;  %s13345_s11 = inlined_call_operand.vmem [shape: f32[1,256], index: 11, kind: input, shape index: {}]   ;;  %s13346_s12 = inlined_call_operand.hbm [shape: bf16[256,256], index: 12, kind: input, shape index: {}]   ;;  %s13347_s13 = inlined_call_operand.vmem [shape: f32[1,256], index: 13, kind: input, shape index: {}]   ;;  %s13348_s14 = inlined_call_operand.hbm [shape: bf16[256,256], index: 14, kind: input, shape index: {}]   ;;  %s13349_s15 = inlined_call_operand.vmem [shape: f32[1,256], index: 15, kind: input, shape index: {}]   ;;  %s13350_s16 = inlined_call_operand.hbm [shape: bf16[256,256], index: 16, kind: input, shape index: {}]   ;;  %s13351_s17 = inlined_call_operand.vmem [shape: f32[1,256], index: 17, kind: input, shape index: {}]   ;;  %s13352_s18 = inlined_call_operand.vmem [shape: f32[1,256], index: 18, kind: input, shape index: {}]   ;;  %s13353_s19 = inlined_call_operand.vmem [shape: f32[1,256], index: 19, kind: input, shape index: {}]   ;;  %s13354_s20 = inlined_call_operand.hbm [shape: bf16[256,256], index: 20, kind: input, shape index: {}]   ;;  %s13355_s21 = inlined_call_operand.vmem [shape: f32[1,256], index: 21, kind: input, shape index: {}]   ;;  %s13356_s22 = inlined_call_operand.hbm [shape: bf16[256,256], index: 22, kind: input, shape index: {}]   ;;  %s13357_s23 = inlined_call_operand.vmem [shape: f32[1,256], index: 23, kind: input, shape index: {}]   ;;  %s13358_s24 = inlined_call_operand.hbm [shape: bf16[256,128], index: 24, kind: input, shape index: {}]   ;;  %s13359_s25 = inlined_call_operand.vmem [shape: f32[1,128], index: 25, kind: input, shape index: {}]   ;;  %s13360_s26 = inlined_call_operand.hbm [shape: f32[256,128], index: 26, kind: output, shape index: {}]  }
   0x1   :  { %13464 = sst [smem:[#allocation129_spill]] %s13334_s0 }
   0x2   :  { %13465 = sst [smem:[#allocation130_spill]] %s13335_s1 }
   0x3   :  { %13466 = sst [smem:[#allocation131_spill]] %s13336_s2 }
   0x4   :  { %13467 = sst [smem:[#allocation132_spill]] %s13337_s3 }
   0x5   :  { %13468 = sst [smem:[#allocation133_spill]] %s13338_s4 }
   0x6   :  { %13469 = sst [smem:[#allocation134_spill]] %s13339_s5 }
   0x7   :  { %13470 = sst [smem:[#allocation135_spill]] %s13340_s6 }
   0x8   :  { %13471 = sst [smem:[#allocation136_spill]] %s13341_s7 }
   0x9   :  { %13472 = sst [smem:[#allocation137_spill]] %s13342_s8 }
   0xa   :  { %13473 = sst [smem:[#allocation138_spill]] %s13343_s9 }
   0xb   :  { %13474 = sst [smem:[#allocation139_spill]] %s13344_s10 }
   0xc   :  { %13475 = sst [smem:[#allocation140_spill]] %s13346_s12 }
   0xd   :  { %13476 = sst [smem:[#allocation141_spill]] %s13347_s13 }
   0xe   :  { %13477 = sst [smem:[#allocation142_spill]] %s13349_s15 }
   0xf   :  { %13478 = sst [smem:[#allocation143_spill]] %s13350_s16 }
  0x10   :  { %13479 = sst [smem:[#allocation144_spill]] %s13351_s17 }
  0x11   :  { %13480 = sst [smem:[#allocation145_spill]] %s13352_s18 }
  0x12   :  { %13481 = sst [smem:[#allocation146_spill]] %s13353_s19 }
  0x13   :  { %13482 = sst [smem:[#allocation147_spill]] %s13355_s21 }
  0x14   :  { %13483 = sst [smem:[#allocation148_spill]] %s13356_s22 }
  0x15   :  { %13484 = sst [smem:[#allocation149_spill]] %s13357_s23 }
  0x16   :  { %13485 = sst [smem:[#allocation150_spill]] %s13359_s25 }
  0x17   :  { %13486 = sst [smem:[#allocation151_spill]] %s13360_s26 }
  0x18   :  { %31 = vsyncpa [#allocation3], 0 }
  0x19   :  { %33 = vsyncpa [#allocation3 + $0x1], 0 }
  0x1a   :  { %34 = vsyncpa [#allocation6], 0 }
  0x1b   :  { %36 = vsyncpa [#allocation6 + $0x1], 0 }
  0x1c   :  { %37 = vsyncpa [#allocation9], 0 }
  0x1d   :  { %38 = vsyncpa [#allocation12], 0 }
  0x1e   :  { %39 = vsyncpa [#allocation15], 0 }
  0x1f   :  { %40 = vsyncpa [#allocation18], 0 }
  0x20   :  { %41 = vsyncpa [#allocation21], 0 }
  0x21   :  { %42 = vsyncpa [#allocation4], 0 }
  0x22   :  { %44 = vsyncpa [#allocation4 + $0x1], 0  ;;  %s9238_s27 = smov 0   ;;  %s9240_s3 = smov 0  }
  0x23   :  { %s9242_s7 = smov 0   ;;  %s9244_s28 = smov 0  }
  0x24 LB: > { %13487 = sst [smem:[#allocation32_spill]] %s9065_s27  ;;  %s9079_s8 = smov [#allocation8]   ;;  %s9077_s28 = sphi %s9244_s28, %s14042_s28   ;;  %s9073_s7 = sphi %s9242_s7, %s14044_s7   ;;  %s9069_s3 = sphi %s9240_s3, %s14046_s3   ;;  %s9065_s27 = sphi %s9238_s27, %s14045_s27  }
  0x25   : > { %13488 = sst [smem:[#allocation33_spill]] %s9073_s7  ;;  %s654_s4 = sshll.u32 %s9079_s8, 4  ;;  %s9264_s4 = int_to_ptr.vmem [resolvable:$true] %s654_s4 }
  0x26   : > { %s9259_s29 = sadd.s32 4294967295, %s9077_s28   ;;  %p7186_p0 = scmp.ge.s32.totalorder %s9077_s28, 1 }
  0x27   : > { %p13370_p1 = scmp.eq.s32.totalorder %s9259_s29, 0  ;;  %p642_p2 = scmp.lt.s32.totalorder %s9077_s28, 3 }
  0x28   : > { %s9080_s9 = smov [#allocation11]   ;;  %s9081_s5 = smov [#allocation14]  }
  0x29   : > { %p9266_p3 = pnand %p7186_p0, %p642_p2  ;;  %s686_s30 = sshll.u32 %s9080_s9, 4  ;;  %s9279_s30 = int_to_ptr.vmem [resolvable:$true] %s686_s30 }
  0x2a   : > { %s721_s10 = sshll.u32 %s9081_s5, 4  ;;  %s13491_s8 = sld [smem:[#allocation132_spill]]  ;;  %s9281_s10 = int_to_ptr.vmem [resolvable:$true] %s721_s10 }
  0x2b   : > { %s13489_s0 = scalar_select %p9266_p3, 1, 0 }
  0x2c   : > { %p7650_p5 = pneg %p9266_p3 }
  0x2e   : > { %p9275_p6 = pnand %p7650_p5, %p13370_p1 }
  0x30   : > { %s13490_s2 = scalar_select %p9275_p6, 1, 0 }
  0x31   : > { %s8617_s26 = scalar_lea.hbm %s13491_s8, 4096  ;;  %p9291_p8 = pneg %p9275_p6 }
  0x32   : > { %p8618_p7 = scmp.ne.s32.totalorder %s13491_s8, %s8617_s26  ;;  %p8624_p11 = scmp.lt.u32.totalorder %s8617_s26, %s13491_s8 }
  0x33   : > { %s13492_s9 = scalar_select %p9291_p8, 1, 0 }
  0x34   : > { %p8620_p9 = pnand %p9291_p8, %p8618_p7 }
  0x36   : > { %p8621_p10 = pneg %p8620_p9 }
  0x38   : > { %p8626_p12 = pnand %p8624_p11, %p8621_p10 }
  0x3a   : > { %8629 = shalt.err (!%p8626_p12)
}
  0x3b   : > { %s8630_s19 = scalar_lea.vmem %s9264_s4, 4096  ;;  %p8638_p5 = scmp.lt.s32.totalorder %s9264_s4, %s9264_s4 }
  0x3c   : > { %p8631_p13 = scmp.ne.s32.totalorder %s9264_s4, %s8630_s19  ;;  %p8639_p4 = scmp.lt.s32.totalorder %s8630_s19, %s8630_s19 }
  0x3e   : > { %p8633_p0 = pnand %p8631_p13, %p9291_p8  ;;  %p8640_p7 = por %p8639_p4, %p8638_p5 }
  0x40   : > { %p8634_p2 = pneg %p8633_p0 }
  0x42   : > { %p8641_p9 = pnand %p8640_p7, %p8634_p2 }
  0x44   : > { %8644 = shalt.err (!%p8641_p9)
}
  0x45   : > { %s13372_s25 = smov 128   ;;  %s13374_s18 = smov 8  }
  0x46   : > { %7653 = dma.hbm_to_vmem [thread:$0]  (!%p9275_p6), %s13491_s8, 4096, %s9264_s4, [#allocation9], %s13372_s25, %s13372_s25, %s13374_s18  }
  0x47   : > { %s13493_s23 = sld [smem:[#allocation136_spill]] }
  0x4d   : > { %s8645_s19 = scalar_lea.hbm %s13493_s23, 2048 }
  0x4e   : > { %p8646_p4 = scmp.ne.s32.totalorder %s13493_s23, %s8645_s19  ;;  %p8652_p12 = scmp.lt.u32.totalorder %s8645_s19, %s13493_s23 }
  0x50   : > { %p8648_p10 = pnand %p8646_p4, %p9291_p8 }
  0x52   : > { %p8649_p11 = pneg %p8648_p10 }
  0x54   : > { %p8654_p13 = pnand %p8652_p12, %p8649_p11 }
  0x56   : > { %8657 = shalt.err (!%p8654_p13)
}
  0x57   : > { %s8658_s4 = scalar_lea.vmem %s9279_s30, 2048  ;;  %p8666_p7 = scmp.lt.s32.totalorder %s9279_s30, %s9279_s30 }
  0x58   : > { %p8659_p0 = scmp.ne.s32.totalorder %s9279_s30, %s8658_s4  ;;  %p8667_p9 = scmp.lt.s32.totalorder %s8658_s4, %s8658_s4 }
  0x5a   : > { %p8661_p2 = pnand %p8659_p0, %p9291_p8  ;;  %p8668_p4 = por %p8667_p9, %p8666_p7 }
  0x5c   : > { %p8662_p5 = pneg %p8661_p2 }
  0x5e   : > { %p8669_p10 = pnand %p8668_p4, %p8662_p5 }
  0x60   : > { %8672 = shalt.err (!%p8669_p10)
}
  0x61   : > { %7659 = dma.hbm_to_vmem [thread:$0]  (!%p9275_p6), %s13493_s23, 2048, %s9279_s30, [#allocation12], %s13372_s25, %s13372_s25, %s13374_s18  }
  0x62   : > { %s13494_s12 = sld [smem:[#allocation140_spill]] }
  0x68   : > { %s8673_s26 = scalar_lea.hbm %s13494_s12, 4096 }
  0x69   : > { %p8674_p11 = scmp.ne.s32.totalorder %s13494_s12, %s8673_s26  ;;  %p8680_p0 = scmp.lt.u32.totalorder %s8673_s26, %s13494_s12 }
  0x6b   : > { %p8676_p12 = pnand %p8674_p11, %p9291_p8 }
  0x6d   : > { %p8677_p13 = pneg %p8676_p12 }
  0x6f   : > { %p8682_p2 = pnand %p8680_p0, %p8677_p13 }
  0x71   : > { %8685 = shalt.err (!%p8682_p2)
}
  0x72   : > { %s8686_s30 = scalar_lea.vmem %s9281_s10, 4096  ;;  %p8694_p4 = scmp.lt.s32.totalorder %s9281_s10, %s9281_s10 }
  0x73   : > { %p8687_p5 = scmp.ne.s32.totalorder %s9281_s10, %s8686_s30  ;;  %p8695_p10 = scmp.lt.s32.totalorder %s8686_s30, %s8686_s30 }
  0x75   : > { %p8689_p7 = pnand %p8687_p5, %p9291_p8  ;;  %p8696_p11 = por %p8695_p10, %p8694_p4 }
  0x77   : > { %p8690_p9 = pneg %p8689_p7 }
  0x79   : > { %p8697_p12 = pnand %p8696_p11, %p8690_p9 }
  0x7b   : > { %8700 = shalt.err (!%p8697_p12)
}
  0x7c   : > { %7665 = dma.hbm_to_vmem [thread:$0]  (!%p9275_p6), %s13494_s12, 4096, %s9281_s10, [#allocation15], %s13372_s25, %s13372_s25, %s13374_s18  }
  0x7d   : > { %s9084_s15 = smov [#allocation17]   ;;  %s9085_s21 = smov [#allocation20]  }
  0x7e   : > { %s753_s17 = sshll.u32 %s9084_s15, 4  ;;  %s791_s26 = sshll.u32 %s9085_s21, 4  ;;  %s754_s17 = int_to_ptr.vmem [resolvable:$true] %s753_s17  ;;  %s792_s26 = int_to_ptr.vmem [resolvable:$true] %s791_s26 }
  0x7f   : > { %s13495_s16 = sld [smem:[#allocation143_spill]] }
  0x85   : > { %s8701_s5 = scalar_lea.hbm %s13495_s16, 4096 }
  0x86   : > { %p8702_p13 = scmp.ne.s32.totalorder %s13495_s16, %s8701_s5  ;;  %p8708_p5 = scmp.lt.u32.totalorder %s8701_s5, %s13495_s16 }
  0x88   : > { %p8704_p0 = pnand %p8702_p13, %p9291_p8 }
  0x8a   : > { %p8705_p2 = pneg %p8704_p0 }
  0x8c   : > { %p8710_p7 = pnand %p8708_p5, %p8705_p2 }
  0x8e   : > { %8713 = shalt.err (!%p8710_p7)
}
  0x8f   : > { %s8714_s10 = scalar_lea.vmem %s754_s17, 4096  ;;  %p8722_p11 = scmp.lt.s32.totalorder %s754_s17, %s754_s17 }
  0x90   : > { %p8715_p9 = scmp.ne.s32.totalorder %s754_s17, %s8714_s10  ;;  %p8723_p12 = scmp.lt.s32.totalorder %s8714_s10, %s8714_s10 }
  0x92   : > { %p8717_p4 = pnand %p8715_p9, %p9291_p8  ;;  %p8724_p1 = por %p8723_p12, %p8722_p11 }
  0x94   : > { %p8718_p10 = pneg %p8717_p4 }
  0x96   : > { %p8725_p3 = pnand %p8724_p1, %p8718_p10 }
  0x98   : > { %8728 = shalt.err (!%p8725_p3)
}
  0x99   : > { %7671 = dma.hbm_to_vmem [thread:$0]  (!%p9275_p6), %s13495_s16, 4096, %s754_s17, [#allocation18], %s13372_s25, %s13372_s25, %s13374_s18  }
  0x9a   : > { %s13496_s22 = sld [smem:[#allocation148_spill]] }
  0xa0   : > { %s8729_s6 = scalar_lea.hbm %s13496_s22, 4096 }
  0xa1   : > { %p8730_p1 = scmp.ne.s32.totalorder %s13496_s22, %s8729_s6  ;;  %p8736_p0 = scmp.lt.u32.totalorder %s8729_s6, %s13496_s22 }
  0xa3   : > { %p8732_p3 = pnand %p8730_p1, %p9291_p8 }
  0xa5   : > { %p8733_p13 = pneg %p8732_p3 }
  0xa7   : > { %p8738_p2 = pnand %p8736_p0, %p8733_p13 }
  0xa9   : > { %8741 = shalt.err (!%p8738_p2)
}
  0xaa   : > { %s8742_s4 = scalar_lea.vmem %s792_s26, 4096  ;;  %p8750_p4 = scmp.lt.s32.totalorder %s792_s26, %s792_s26 }
  0xab   : > { %p8743_p5 = scmp.ne.s32.totalorder %s792_s26, %s8742_s4  ;;  %p8751_p10 = scmp.lt.s32.totalorder %s8742_s4, %s8742_s4 }
  0xad   : > { %p8745_p7 = pnand %p8743_p5, %p9291_p8  ;;  %p8752_p11 = por %p8751_p10, %p8750_p4 }
  0xaf   : > { %p8746_p9 = pneg %p8745_p7 }
  0xb1   : > { %p8753_p12 = pnand %p8752_p11, %p8746_p9 }
  0xb3   : > { %8756 = shalt.err (!%p8753_p12)
}
  0xb4   : > { %7677 = dma.hbm_to_vmem [thread:$0]  (!%p9275_p6), %s13496_s22, 4096, %s792_s26, [#allocation21], %s13372_s25, %s13372_s25, %s13374_s18  }
  0xb5   : > { %s7185_s8 = sadd.s32 4294967294, %s9077_s28   ;;  %s9411_s13 = sadd.s32 1, %s9077_s28  }
  0xb6   : > { %13497 = sst [smem:[#allocation34_spill]] %s9411_s13  ;;  %s57_s15 = sadd.s32 1, %s9073_s7 }
  0xb7   : > { %s54_s21 = ssub.s32 %s9077_s28, %s9411_s13  ;;  %p64_p1 = scmp.ne.s32.totalorder %s9073_s7, %s9069_s3 }
  0xb8   : > { %p55_p3 = scmp.eq.s32.totalorder %s54_s21, 0  ;;  %p65_p13 = scmp.eq.s32.totalorder %s9077_s28, 0 }
  0xb9   : > { %p70_p0 = scmp.ne.s32.totalorder %s9069_s3, %s9065_s27  ;;  %p629_p2 = scmp.eq.s32.totalorder %s9259_s29, 1 }
  0xba   : > { %s9423_s6 = scalar_select %p55_p3, %s9073_s7, %s57_s15  }
  0xbb   : > { %p66_p5 = por %p65_p13, %p64_p1  ;;  %p13499_p7 = scmp.eq.s32.totalorder %s9259_s29, 0 }
  0xbc   : > { %13498 = sst [smem:[#allocation35_spill]] %s9423_s6  ;;  %p9431_p4 = por %p629_p2, %p64_p1 }
  0xbd   : > { %p9427_p9 = por %p13499_p7, %p70_p0  ;;  %p635_p10 = scmp.eq.s32.totalorder %s7185_s8, 1 }
  0xbe   : > { %s13501_s1 = scalar_select %p9431_p4, 1, 0 }
  0xbf   : > { %s13500_s26 = scalar_select %p9427_p9, 1, 0 }
  0xc0   : > { %13502 = sst [smem:[#allocation36_spill]] %s13501_s1  ;;  %p7705_p11 = scmp.lt.s32.totalorder %s9077_s28, 2 }
  0xc1   : > { %s9437_s5 = sand.u32 1, %s9073_s7   ;;  %p9439_p12 = por %p635_p10, %p70_p0 }
  0xc2   : > { %s13377_s30 = sshll.u32 %s9437_s5, 7  ;;  %s13378_s4 = sshll.u32 %s9077_s28, 11 }
  0xc3   : > { %s13503_s19 = scalar_select %p9439_p12, 1, 0 }
  0xc4   : > { %p9445_p3 = pnand %p7705_p11, %p66_p5  ;;  %s845_s10 = sand.u32 1, %s9077_s28  }
  0xc5   : > { %13504 = sst [smem:[#allocation37_spill]] %s13503_s19  ;;  %s13506_s21 = sld [smem:[#allocation130_spill]] }
  0xc6   : > { %s13505_s17 = scalar_select %p9445_p3, 1, 0 }
  0xc7   : > { %s849_s18 = scalar_lea.vmem [#allocation5], %s13377_s30  ;;  %s9461_s16 = scalar_lea.sflag [#allocation6], %s845_s10 }
  0xc8   : > { %s856_s12 = sshll.u32 %s849_s18, 4  ;;  %p9467_p13 = pneg %p9445_p3  ;;  %s9459_s12 = int_to_ptr.vmem [resolvable:$true] %s856_s12 }
  0xca   : > { %s13507_s23 = scalar_select %p9467_p13, 1, 0 }
  0xcb   : > { %s9455_s25 = scalar_lea.hbm %s13506_s21, %s13378_s4  ;;  %s8762_s30 = scalar_lea.hbm %s13506_s21, 4096 }
  0xcc   : > { %s8757_s22 = scalar_lea.hbm %s9455_s25, 2048  ;;  %p8763_p5 = scmp.lt.u32.totalorder %s9455_s25, %s13506_s21 }
  0xcd   : > { %p8758_p1 = scmp.ne.s32.totalorder %s9455_s25, %s8757_s22  ;;  %p8764_p7 = scmp.lt.u32.totalorder %s8762_s30, %s8757_s22 }
  0xce   : > { %p8766_p11 = scmp.lt.u32.totalorder %s8757_s22, %s9455_s25 }
  0xcf   : > { %p8760_p0 = pnand %p9467_p13, %p8758_p1  ;;  %p8765_p10 = por %p8764_p7, %p8763_p5 }
  0xd1   : > { %p8761_p2 = pneg %p8760_p0  ;;  %p8767_p12 = por %p8766_p11, %p8765_p10 }
  0xd3   : > { %p8768_p4 = pnand %p8767_p12, %p8761_p2 }
  0xd5   : > { %8771 = shalt.err (!%p8768_p4)
}
  0xd6   : > { %s8772_s10 = scalar_lea.vmem %s9459_s12, 2048  ;;  %s9086_s15 = smov [#allocation5]  }
  0xd7   : > { %p8773_p1 = scmp.ne.s32.totalorder %s9459_s12, %s8772_s10  ;;  %s8777_s8 = sshll.u32 %s9086_s15, 4  ;;  %s8778_s8 = int_to_ptr.vmem [resolvable:$false] %s8777_s8 }
  0xd8   : > { %s8779_s4 = scalar_lea.vmem %s8778_s8, 4096  ;;  %p8780_p6 = scmp.lt.s32.totalorder %s9459_s12, %s8778_s8 }
  0xd9   : > { %p8775_p0 = pnand %p8773_p1, %p9467_p13  ;;  %p8781_p8 = scmp.lt.s32.totalorder %s8779_s4, %s8772_s10 }
  0xdb   : > { %p8776_p9 = pneg %p8775_p0  ;;  %p8782_p5 = por %p8781_p8, %p8780_p6 }
  0xdd   : > { %p8783_p7 = pnand %p8782_p5, %p8776_p9 }
  0xdf   : > { %8786 = shalt.err (!%p8783_p7)
}
  0xe0   : > { %s13508_s22 = smov 8   ;;  %s13509_s30 = smov 128  }
  0xe1   : > { %7687 = dma.hbm_to_vmem [thread:$0]  (!%p9445_p3), %s9455_s25, 2048, %s9459_s12, %s9461_s16, %s13509_s30, %s13509_s30, %s13508_s22  }
  0xe2   : > { %s9087_s18 = smov [#allocation10]   ;;  %s9088_s15 = smov [#allocation13]  }
  0xe3   : > { %s670_s21 = sshll.u32 %s9087_s18, 4  ;;  %s699_s6 = sshll.u32 %s9088_s15, 4  ;;  %s671_s21 = int_to_ptr.vmem [resolvable:$true] %s670_s21  ;;  %s700_s6 = int_to_ptr.vmem [resolvable:$true] %s699_s6 }
  0xe4   : > { %s13510_s4 = sld [smem:[#allocation134_spill]]  ;;  %p13511_p8 = scmp.ne.s32.totalorder %s13492_s9, 0 }
  0xea   : > { %s8787_s7 = scalar_lea.hbm %s13510_s4, 4096 }
  0xeb   : > { %p8788_p6 = scmp.ne.s32.totalorder %s13510_s4, %s8787_s7  ;;  %p8794_p12 = scmp.lt.u32.totalorder %s8787_s7, %s13510_s4 }
  0xed   : > { %p8790_p9 = pnand %p8788_p6, %p13511_p8 }
  0xef   : > { %p8791_p4 = pneg %p8790_p9 }
  0xf1   : > { %p8796_p2 = pnand %p8794_p12, %p8791_p4 }
  0xf3   : > { %8799 = shalt.err (!%p8796_p2)
}
  0xf4   : > { %s8800_s12 = scalar_lea.vmem %s671_s21, 4096  ;;  %p8808_p0 = scmp.lt.s32.totalorder %s671_s21, %s671_s21 }
  0xf5   : > { %p8801_p10 = scmp.ne.s32.totalorder %s671_s21, %s8800_s12  ;;  %p8809_p5 = scmp.lt.s32.totalorder %s8800_s12, %s8800_s12 }
  0xf7   : > { %p8803_p11 = pnand %p8801_p10, %p13511_p8  ;;  %p8810_p7 = por %p8809_p5, %p8808_p0 }
  0xf9   : > { %p8804_p1 = pneg %p8803_p11 }
  0xfb   : > { %p8811_p3 = pnand %p8810_p7, %p8804_p1 }
  0xfd   : > { %8814 = shalt.err (!%p8811_p3)
}
  0xfe   : > { %p13512_p6 = scmp.ne.s32.totalorder %s13490_s2, 0  ;;  %s13513_s1 = sld [smem:[#allocation137_spill]] }
 0x100   : > { %7656 = dma.hbm_to_vmem [thread:$0]  (!%p13512_p6), %s13510_s4, 4096, %s671_s21, [#allocation9], %s13509_s30, %s13509_s30, %s13508_s22  }
 0x104   : > { %s8815_s19 = scalar_lea.hbm %s13513_s1, 2048 }
 0x105   : > { %p8816_p9 = scmp.ne.s32.totalorder %s13513_s1, %s8815_s19  ;;  %p8822_p12 = scmp.lt.u32.totalorder %s8815_s19, %s13513_s1 }
 0x107   : > { %p8818_p3 = pnand %p8816_p9, %p13511_p8 }
 0x109   : > { %p8819_p4 = pneg %p8818_p3 }
 0x10b   : > { %p8824_p2 = pnand %p8822_p12, %p8819_p4 }
 0x10d   : > { %8827 = shalt.err (!%p8824_p2)
}
 0x10e   : > { %s8828_s12 = scalar_lea.vmem %s700_s6, 2048  ;;  %p8836_p0 = scmp.lt.s32.totalorder %s700_s6, %s700_s6 }
 0x10f   : > { %p8829_p10 = scmp.ne.s32.totalorder %s700_s6, %s8828_s12  ;;  %p8837_p5 = scmp.lt.s32.totalorder %s8828_s12, %s8828_s12 }
 0x111   : > { %p8831_p11 = pnand %p8829_p10, %p13511_p8  ;;  %p8838_p7 = por %p8837_p5, %p8836_p0 }
 0x113   : > { %p8832_p1 = pneg %p8831_p11 }
 0x115   : > { %p8839_p13 = pnand %p8838_p7, %p8832_p1 }
 0x117   : > { %8842 = shalt.err (!%p8839_p13)
}
 0x118   : > { %7662 = dma.hbm_to_vmem [thread:$0]  (!%p13512_p6), %s13513_s1, 2048, %s700_s6, [#allocation12], %s13509_s30, %s13509_s30, %s13508_s22  }
 0x119   : > { %s9089_s7 = smov [#allocation16]   ;;  %s9090_s13 = smov [#allocation19]  }
 0x11a   : > { %s737_s25 = sshll.u32 %s9089_s7, 4  ;;  %s775_s19 = sshll.u32 %s9090_s13, 4  ;;  %s738_s25 = int_to_ptr.vmem [resolvable:$true] %s737_s25  ;;  %s776_s19 = int_to_ptr.vmem [resolvable:$true] %s775_s19 }
 0x11b   : > { %s8843_s8 = scalar_lea.hbm %s13348_s14, 4096 }
 0x11c   : > { %p8844_p13 = scmp.ne.s32.totalorder %s13348_s14, %s8843_s8  ;;  %p8850_p4 = scmp.lt.u32.totalorder %s8843_s8, %s13348_s14 }
 0x11e   : > { %p8846_p9 = pnand %p8844_p13, %p13511_p8 }
 0x120   : > { %p8847_p3 = pneg %p8846_p9 }
 0x122   : > { %p8852_p12 = pnand %p8850_p4, %p8847_p3 }
 0x124   : > { %8855 = shalt.err (!%p8852_p12)
}
 0x125   : > { %s8856_s6 = scalar_lea.vmem %s738_s25, 4096  ;;  %p8864_p1 = scmp.lt.s32.totalorder %s738_s25, %s738_s25 }
 0x126   : > { %p8857_p2 = scmp.ne.s32.totalorder %s738_s25, %s8856_s6  ;;  %p8865_p0 = scmp.lt.s32.totalorder %s8856_s6, %s8856_s6 }
 0x128   : > { %p8859_p10 = pnand %p8857_p2, %p13511_p8  ;;  %p8866_p5 = por %p8865_p0, %p8864_p1 }
 0x12a   : > { %p8860_p11 = pneg %p8859_p10 }
 0x12c   : > { %p8867_p7 = pnand %p8866_p5, %p8860_p11 }
 0x12e   : > { %8870 = shalt.err (!%p8867_p7)
}
 0x12f   : > { %7668 = dma.hbm_to_vmem [thread:$0]  (!%p13512_p6), %s13348_s14, 4096, %s738_s25, [#allocation15], %s13509_s30, %s13509_s30, %s13508_s22  }
 0x130   : > { %s8871_s18 = scalar_lea.hbm %s13354_s20, 4096 }
 0x131   : > { %p8872_p13 = scmp.ne.s32.totalorder %s13354_s20, %s8871_s18  ;;  %p8878_p4 = scmp.lt.u32.totalorder %s8871_s18, %s13354_s20 }
 0x133   : > { %p8874_p9 = pnand %p8872_p13, %p13511_p8 }
 0x135   : > { %p8875_p3 = pneg %p8874_p9 }
 0x137   : > { %p8880_p12 = pnand %p8878_p4, %p8875_p3 }
 0x139   : > { %8883 = shalt.err (!%p8880_p12)
}
 0x13a   : > { %s8884_s21 = scalar_lea.vmem %s776_s19, 4096  ;;  %p8892_p1 = scmp.lt.s32.totalorder %s776_s19, %s776_s19 }
 0x13b   : > { %p8885_p2 = scmp.ne.s32.totalorder %s776_s19, %s8884_s21  ;;  %p8893_p0 = scmp.lt.s32.totalorder %s8884_s21, %s8884_s21 }
 0x13d   : > { %p8887_p10 = pnand %p8885_p2, %p13511_p8  ;;  %p8894_p5 = por %p8893_p0, %p8892_p1 }
 0x13f   : > { %p8888_p11 = pneg %p8887_p10 }
 0x141   : > { %p8895_p7 = pnand %p8894_p5, %p8888_p11 }
 0x143   : > { %8898 = shalt.err (!%p8895_p7)
}
 0x144   : > { %7674 = dma.hbm_to_vmem [thread:$0]  (!%p13512_p6), %s13354_s20, 4096, %s776_s19, [#allocation18], %s13509_s30, %s13509_s30, %s13508_s22  }
 0x145   : > { %s9091_s4 = smov [#allocation22]   ;;  %s8899_s18 = scalar_lea.hbm %s13358_s24, 2048 }
 0x146   : > { %s807_s27 = sshll.u32 %s9091_s4, 4  ;;  %p8900_p13 = scmp.ne.s32.totalorder %s13358_s24, %s8899_s18  ;;  %s808_s27 = int_to_ptr.vmem [resolvable:$true] %s807_s27 }
 0x147   : > { %p8906_p4 = scmp.lt.u32.totalorder %s8899_s18, %s13358_s24 }
 0x148   : > { %p8902_p9 = pnand %p8900_p13, %p13511_p8 }
 0x14a   : > { %p8903_p3 = pneg %p8902_p9 }
 0x14c   : > { %p8908_p12 = pnand %p8906_p4, %p8903_p3 }
 0x14e   : > { %8911 = shalt.err (!%p8908_p12)
}
 0x14f   : > { %s8912_s19 = scalar_lea.vmem %s808_s27, 2048  ;;  %p8920_p1 = scmp.lt.s32.totalorder %s808_s27, %s808_s27 }
 0x150   : > { %p8913_p2 = scmp.ne.s32.totalorder %s808_s27, %s8912_s19  ;;  %p8921_p0 = scmp.lt.s32.totalorder %s8912_s19, %s8912_s19 }
 0x152   : > { %p8915_p10 = pnand %p8913_p2, %p13511_p8  ;;  %p8922_p5 = por %p8921_p0, %p8920_p1 }
 0x154   : > { %p8916_p11 = pneg %p8915_p10 }
 0x156   : > { %p8923_p7 = pnand %p8922_p5, %p8916_p11 }
 0x158   : > { %8926 = shalt.err (!%p8923_p7)
}
 0x159   : > { %s9092_s21 = smov 64   ;;  %s9093_s25 = smov 4  }
 0x15a   : > { %7680 = dma.hbm_to_vmem [thread:$0]  (!%p13512_p6), %s13358_s24, 2048, %s808_s27, [#allocation21], %s9092_s21, %s9092_s21, %s9093_s25  }
 0x15b   : > { %s13514_s9 = sshll.u32 %s9077_s28, 11  ;;  %s13515_s18 = sld [smem:[#allocation129_spill]] }
 0x15c   : > { %s13516_s8 = sshll.u32 %s9437_s5, 7  ;;  %s7204_s2 = sshll.u32 %s9437_s5, 8 }
 0x15d   : > { %s828_s10 = scalar_lea.vmem [#allocation2], %s13516_s8  ;;  %s825_s19 = scalar_lea.sflag [#allocation3], %s9437_s5 }
 0x15e   : > { %s835_s12 = sshll.u32 %s828_s10, 4  ;;  %p13517_p6 = scmp.ne.s32.totalorder %s13507_s23, 0  ;;  %s9605_s12 = int_to_ptr.vmem [resolvable:$true] %s835_s12 }
 0x161   : > { %s9601_s15 = scalar_lea.hbm %s13515_s18, %s13514_s9  ;;  %s8932_s25 = scalar_lea.hbm %s13515_s18, 4096 }
 0x162   : > { %s8927_s1 = scalar_lea.hbm %s9601_s15, 2048  ;;  %p8933_p3 = scmp.lt.u32.totalorder %s9601_s15, %s13515_s18 }
 0x163   : > { %p8928_p8 = scmp.ne.s32.totalorder %s9601_s15, %s8927_s1  ;;  %p8934_p4 = scmp.lt.u32.totalorder %s8932_s25, %s8927_s1 }
 0x164   : > { %p8936_p2 = scmp.lt.u32.totalorder %s8927_s1, %s9601_s15 }
 0x165   : > { %p8930_p13 = pnand %p8928_p8, %p13517_p6  ;;  %p8935_p12 = por %p8934_p4, %p8933_p3 }
 0x167   : > { %p8931_p9 = pneg %p8930_p13  ;;  %p8937_p10 = por %p8936_p2, %p8935_p12 }
 0x169   : > { %p8938_p11 = pnand %p8937_p10, %p8931_p9 }
 0x16b   : > { %8941 = shalt.err (!%p8938_p11)
}
 0x16c   : > { %s8942_s9 = scalar_lea.vmem %s9605_s12, 2048  ;;  %s9094_s7 = smov [#allocation2]  }
 0x16d   : > { %p8943_p1 = scmp.ne.s32.totalorder %s9605_s12, %s8942_s9  ;;  %s8947_s13 = sshll.u32 %s9094_s7, 4  ;;  %s8948_s13 = int_to_ptr.vmem [resolvable:$false] %s8947_s13 }
 0x16e   : > { %s8949_s8 = scalar_lea.vmem %s8948_s13, 4096  ;;  %p8950_p7 = scmp.lt.s32.totalorder %s9605_s12, %s8948_s13 }
 0x16f   : > { %p8945_p0 = pnand %p8943_p1, %p13517_p6  ;;  %p8951_p8 = scmp.lt.s32.totalorder %s8949_s8, %s8942_s9 }
 0x171   : > { %p8946_p5 = pneg %p8945_p0  ;;  %p8952_p13 = por %p8951_p8, %p8950_p7 }
 0x173   : > { %p8953_p3 = pnand %p8952_p13, %p8946_p5 }
 0x175   : > { %8956 = shalt.err (!%p8953_p3)
}
 0x176   : > { %p13518_p9 = scmp.ne.s32.totalorder %s13505_s17, 0  ;;  %s7504_s1 = sshll.u32 %s9077_s28, 12 }
 0x177   : > { %s13519_s21 = sld [smem:[#allocation131_spill]]  ;;  %s870_s6 = scalar_lea.vmem [#allocation7], %s7204_s2 }
 0x178   : > { %7684 = dma.hbm_to_vmem [thread:$0]  (!%p13518_p9), %s9601_s15, 2048, %s9605_s12, %s825_s19, %s13509_s30, %s13509_s30, %s13508_s22  }
 0x179   : > { %s878_s4 = sshll.u32 %s870_s6, 4  ;;  %s9643_s4 = int_to_ptr.vmem [resolvable:$true] %s878_s4 }
 0x17d   : > { %s9639_s25 = scalar_lea.hbm %s13519_s21, %s7504_s1  ;;  %s8962_s15 = scalar_lea.hbm %s13519_s21, 8192 }
 0x17e   : > { %s8957_s9 = scalar_lea.hbm %s9639_s25, 4096  ;;  %p8963_p10 = scmp.lt.u32.totalorder %s9639_s25, %s13519_s21 }
 0x17f   : > { %p8958_p4 = scmp.ne.s32.totalorder %s9639_s25, %s8957_s9  ;;  %p8964_p11 = scmp.lt.u32.totalorder %s8962_s15, %s8957_s9 }
 0x180   : > { %p8966_p0 = scmp.lt.u32.totalorder %s8957_s9, %s9639_s25 }
 0x181   : > { %p8960_p12 = pnand %p8958_p4, %p13517_p6  ;;  %p8965_p1 = por %p8964_p11, %p8963_p10 }
 0x183   : > { %p8961_p2 = pneg %p8960_p12  ;;  %p8967_p5 = por %p8966_p0, %p8965_p1 }
 0x185   : > { %p8968_p7 = pnand %p8967_p5, %p8961_p2 }
 0x187   : > { %8971 = shalt.err (!%p8968_p7)
}
 0x188   : > { %s8972_s5 = scalar_lea.vmem %s9643_s4, 4096  ;;  %s9095_s2 = smov [#allocation7]  }
 0x189   : > { %p8973_p8 = scmp.ne.s32.totalorder %s9643_s4, %s8972_s5  ;;  %s8977_s7 = sshll.u32 %s9095_s2, 4  ;;  %s8978_s7 = int_to_ptr.vmem [resolvable:$false] %s8977_s7 }
 0x18a   : > { %s8979_s13 = scalar_lea.vmem %s8978_s7, 8192  ;;  %p8980_p4 = scmp.lt.s32.totalorder %s9643_s4, %s8978_s7 }
 0x18b   : > { %p8975_p13 = pnand %p8973_p8, %p13517_p6  ;;  %p8981_p12 = scmp.lt.s32.totalorder %s8979_s13, %s8972_s5 }
 0x18d   : > { %p8976_p3 = pneg %p8975_p13  ;;  %p8982_p10 = por %p8981_p12, %p8980_p4 }
 0x18f   : > { %p8983_p11 = pnand %p8982_p10, %p8976_p3 }
 0x191   : > { %8986 = shalt.err (!%p8983_p11)
}
 0x192   : > { %s9096_s8 = smov 256   ;;  %s9097_s1 = smov 16  }
 0x193   : > { %7690 = dma.hbm_to_vmem [thread:$0]  (!%p13518_p9), %s9639_s25, 4096, %s9643_s4, %s9461_s16, %s9096_s8, %s9096_s8, %s9097_s1  }
 0x194   : > { %p13520_p6 = scmp.ne.s32.totalorder %s13489_s0, 0 }
 0x196   : > { %890 = sbr.rel (%p13520_p6) target bundleno = 2464 (0x9a0), region = 124 }
 0x19d   : > { %s9670_s23 = sand.u32 1, %s9069_s3   ;;  %p13521_p2 = scmp.ne.s32.totalorder %s13500_s26, 0 }
 0x19e   : > { %s9673_s10 = sshll.u32 %s9670_s23, 7  ;;  %s893_s27 = scalar_lea.sflag [#allocation3], %s9670_s23 }
 0x19f   : > { %s9677_s6 = scalar_lea.vmem [#allocation2], %s9673_s10 }
 0x1a0   : > { %9032 = dma.done.wait (%p13521_p2), %s893_s27, 2048  }
 0x1a1   : > { %9034 = vsyncadd (%p13521_p2), %s893_s27, 4294965248  ;;  %s901_s16 = sand.u32 1, %s9259_s29   ;;  %s9685_s17 = scalar_lea.vmem [#allocation5], %s9673_s10 }
 0x1a2   : > { %s902_s0 = scalar_lea.sflag [#allocation6], %s901_s16 }
 0x1a3   : > { %9036 = dma.done.wait (%p13521_p2), %s902_s0, 6144  }
 0x1a4   : > { %9038 = vsyncadd (%p13521_p2), %s902_s0, 4294961152  ;;  %s7211_s25 = sshll.u32 %s9670_s23, 8  ;;  %p13522_p9 = scmp.eq.s32.totalorder %s9259_s29, 0 }
 0x1a5   : > { %s9692_s4 = scalar_lea.vmem [#allocation7], %s7211_s25 }
 0x1a6   : > { %9040 = dma.done.wait (%p13522_p9), [#allocation9], 8192   ;;  %p13523_p1 = pmov %p13522_p9 }
 0x1a8   : > { %9042 = vsyncadd (%p13523_p1), [#allocation9], 4294959104  ;;  %p13524_p0 = pmov %p13523_p1 }
 0x1aa   : > { %9044 = dma.done.wait (%p13524_p0), [#allocation12], 4096   ;;  %p13525_p5 = pmov %p13524_p0 }
 0x1ab   : > { %p13526_p7 = pmov %p13524_p0 }
 0x1ac   : > { %9046 = vsyncadd (%p13525_p5), [#allocation12], 4294963200 }
 0x1ad   : > { %9048 = dma.done.wait (%p13526_p7), [#allocation15], 8192   ;;  %p13527_p8 = pmov %p13524_p0 }
 0x1ae   : > { %p13528_p13 = pmov %p13524_p0 }
 0x1af   : > { %9050 = vsyncadd (%p13527_p8), [#allocation15], 4294959104 }
 0x1b0   : > { %9052 = dma.done.wait (%p13528_p13), [#allocation18], 8192   ;;  %p13529_p3 = pmov %p13524_p0 }
 0x1b1   : > { %p13530_p4 = pmov %p13524_p0 }
 0x1b2   : > { %9054 = vsyncadd (%p13529_p3), [#allocation18], 4294959104 }
 0x1b3   : > { %9056 = dma.done.wait (%p13530_p4), [#allocation21], 6144   ;;  %p13531_p12 = pmov %p13524_p0 }
 0x1b4   : > { %v7769_v0 = vld [vmem:[#allocation8 + $0x4] ss:$8 sps:$4 sm:$0xff]   ;;  %v7771_v1 = vld [vmem:[#allocation8] ss:$8 sps:$4 sm:$0xff]   ;;  %v7772_v2 = vld [vmem:[#allocation8 + $0x14] ss:$8 sps:$4 sm:$0xff]  }
 0x1b5   : > { %9058 = vsyncadd (%p13531_p12), [#allocation21], 4294961152  ;;  %1290 = vmatprep.subr.bf16.mxu0 %v7769_v0  ;;  %v7774_v3 = vld [vmem:[#allocation8 + $0x10] ss:$8 sps:$4 sm:$0xff]   ;;  %v7775_v4 = vld [vmem:[#allocation8 + $0x24] ss:$8 sps:$4 sm:$0xff]  }
 0x1b6   : > { %1291 = vmatpush1.bf16.msra.mxu0 %v7771_v1  ;;  %v7777_v5 = vld [vmem:[#allocation8 + $0x20] ss:$8 sps:$4 sm:$0xff]   ;;  %v7778_v6 = vld [vmem:[#allocation8 + $0x34] ss:$8 sps:$4 sm:$0xff]   ;;  %v7780_v7 = vld [vmem:[#allocation8 + $0x30] ss:$8 sps:$4 sm:$0xff]  }
 0x1b7   : > { %1292 = vmatprep.subr.bf16.mxu0 %v7772_v2  ;;  %v7781_v8 = vld [vmem:[#allocation8 + $0x44] ss:$8 sps:$4 sm:$0xff]   ;;  %v7783_v9 = vld [vmem:[#allocation8 + $0x40] ss:$8 sps:$4 sm:$0xff]   ;;  %v7784_v10 = vld [vmem:[#allocation8 + $0x54] ss:$8 sps:$4 sm:$0xff]  }
 0x1b8   : > { %v7786_v11 = vld [vmem:[#allocation8 + $0x50] ss:$8 sps:$4 sm:$0xff]   ;;  %v7787_v12 = vld [vmem:[#allocation8 + $0x64] ss:$8 sps:$4 sm:$0xff]   ;;  %v7789_v16 = vld [vmem:[#allocation8 + $0x60] ss:$8 sps:$4 sm:$0xff]  }
 0x1b9   : > { %v1039_v13 = vld [vmem:[%s9692_s4 + $0x8] sm:$0xff]  ;;  %v1041_v14 = vld [vmem:[%s9692_s4 + $0x18] sm:$0xff]  ;;  %v1038_v35 = vld [vmem:[%s9692_s4] sm:$0xff]  ;;  %s13533_s22 = sld [smem:[#allocation133_spill]]  ;;  %s13535_s12 = sld [smem:[#allocation138_spill]] }
 0x1ba   : > { %1293 = vmatpush1.bf16.msra.mxu0 %v7774_v3  ;;  %v1071_v15 = vpack.c.bf16 %v1041_v14, %v1039_v13  ;;  %v7790_v17 = vld [vmem:[#allocation8 + $0x74] ss:$8 sps:$4 sm:$0xff]   ;;  %v7792_v18 = vld [vmem:[#allocation8 + $0x70] ss:$8 sps:$4 sm:$0xff]   ;;  %v7793_v19 = vld [vmem:[#allocation8 + $0x84] ss:$8 sps:$4 sm:$0xff]  }
 0x1bb   : > { %1294 = vmatprep.subr.bf16.mxu0 %v7775_v4  ;;  %v7795_v20 = vld [vmem:[#allocation8 + $0x80] ss:$8 sps:$4 sm:$0xff]   ;;  %v7796_v21 = vld [vmem:[#allocation8 + $0x94] ss:$8 sps:$4 sm:$0xff]   ;;  %v7798_v22 = vld [vmem:[#allocation8 + $0x90] ss:$8 sps:$4 sm:$0xff]  }
 0x1bc   : > { %1322 = vmatprep.mubr.bf16.mxu0 %v1071_v15  ;;  %v7799_v23 = vld [vmem:[#allocation8 + $0xa4] ss:$8 sps:$4 sm:$0xff]   ;;  %v7801_v24 = vld [vmem:[#allocation8 + $0xa0] ss:$8 sps:$4 sm:$0xff]   ;;  %v7802_v25 = vld [vmem:[#allocation8 + $0xb4] ss:$8 sps:$4 sm:$0xff]  }
 0x1bd   : > { %v7804_v26 = vld [vmem:[#allocation8 + $0xb0] ss:$8 sps:$4 sm:$0xff]   ;;  %v7805_v27 = vld [vmem:[#allocation8 + $0xc4] ss:$8 sps:$4 sm:$0xff]   ;;  %v7807_v28 = vld [vmem:[#allocation8 + $0xc0] ss:$8 sps:$4 sm:$0xff]  }
 0x1be   : > { %1295 = vmatpush1.bf16.msra.mxu0 %v7777_v5  ;;  %v7808_v29 = vld [vmem:[#allocation8 + $0xd4] ss:$8 sps:$4 sm:$0xff]   ;;  %v7810_v30 = vld [vmem:[#allocation8 + $0xd0] ss:$8 sps:$4 sm:$0xff]   ;;  %v7811_v31 = vld [vmem:[#allocation8 + $0xe4] ss:$8 sps:$4 sm:$0xff]  }
 0x1bf   : > { %1296 = vmatprep.subr.bf16.mxu0 %v7778_v6  ;;  %v7813_v32 = vld [vmem:[#allocation8 + $0xe0] ss:$8 sps:$4 sm:$0xff]   ;;  %v7814_v33 = vld [vmem:[#allocation8 + $0xf4] ss:$8 sps:$4 sm:$0xff]   ;;  %v7816_v34 = vld [vmem:[#allocation8 + $0xf0] ss:$8 sps:$4 sm:$0xff]  }
 0x1c0   : > { %v1040_v36 = vld [vmem:[%s9692_s4 + $0x10] sm:$0xff]  ;;  %v1043_v37 = vld [vmem:[%s9692_s4 + $0x28] sm:$0xff]  ;;  %v1045_v38 = vld [vmem:[%s9692_s4 + $0x38] sm:$0xff]  ;;  %s13536_s2 = sld [smem:[#allocation135_spill]]  ;;  %s13561_s8 = sld [smem:[#allocation139_spill]] }
 0x1c1   : > { %v7819_v39 = vld [vmem:[#allocation13 + $0x4] ss:$8 sps:$4 sm:$0xff]   ;;  %v7817_v40 = vld [vmem:[#allocation13] ss:$8 sps:$4 sm:$0xff]   ;;  %v1070_v41 = vpack.c.bf16 %v1040_v36, %v1038_v35  ;;  %v7822_v42 = vld [vmem:[#allocation13 + $0x14] ss:$8 sps:$4 sm:$0xff]   ;;  %v1073_v43 = vpack.c.bf16 %v1045_v38, %v1043_v37 }
 0x1c2   : > { %1297 = vmatpush1.bf16.msra.mxu0 %v7780_v7  ;;  %v1042_v44 = vld [vmem:[%s9692_s4 + $0x20] sm:$0xff]  ;;  %v1044_v45 = vld [vmem:[%s9692_s4 + $0x30] sm:$0xff]  ;;  %v1047_v46 = vld [vmem:[%s9692_s4 + $0x48] sm:$0xff]  ;;  %v9098_v36 = vmov 0   ;;  %s13562_s0 = sld [smem:[#allocation141_spill]]  ;;  %s13250_s25 = scalar_lea.vmem [#allocation23], %s9673_s10 }
 0x1c3   : > { %1298 = vmatprep.subr.bf16.mxu0 %v7781_v8  ;;  %v1049_v47 = vld [vmem:[%s9692_s4 + $0x58] sm:$0xff]  ;;  %v7825_v49 = vld [vmem:[#allocation13 + $0x24] ss:$8 sps:$4 sm:$0xff]   ;;  %v7823_v50 = vld [vmem:[#allocation13 + $0x20] ss:$8 sps:$4 sm:$0xff]   ;;  %v1072_v51 = vpack.c.bf16 %v1044_v45, %v1042_v44  ;;  %s14035_s10 = sld [smem:[#allocation36_spill]] }
 0x1c4   : > { %v7820_v48 = vld [vmem:[#allocation13 + $0x10] ss:$8 sps:$4 sm:$0xff]   ;;  %v7828_v52 = vld [vmem:[#allocation13 + $0x34] ss:$8 sps:$4 sm:$0xff]   ;;  %v1075_v53 = vpack.c.bf16 %v1049_v47, %v1047_v46  ;;  %v1046_v54 = vld [vmem:[%s9692_s4 + $0x40] sm:$0xff]  ;;  %s6974_s26 = sshll.u32 %s13250_s25, 4  ;;  %s13287_s26 = int_to_ptr.vmem [resolvable:$true] %s6974_s26 }
 0x1c5   : > { %v1048_v55 = vld [vmem:[%s9692_s4 + $0x50] sm:$0xff]  ;;  %v1051_v56 = vld [vmem:[%s9692_s4 + $0x68] sm:$0xff]  ;;  %v1053_v57 = vld [vmem:[%s9692_s4 + $0x78] sm:$0xff]  ;;  %s14036_s30 = sld [smem:[#allocation151_spill]]  ;;  %s9100_s19 = smov [#allocation23]  }
 0x1c6   : > { %1299 = vmatpush1.bf16.msra.mxu0 %v7783_v9  ;;  %v7826_v58 = vld [vmem:[#allocation13 + $0x30] ss:$8 sps:$4 sm:$0xff]   ;;  %v7831_v59 = vld [vmem:[#allocation13 + $0x44] ss:$8 sps:$4 sm:$0xff]   ;;  %v7829_v60 = vld [vmem:[#allocation13 + $0x40] ss:$8 sps:$4 sm:$0xff]   ;;  %v1074_v61 = vpack.c.bf16 %v1048_v55, %v1046_v54  ;;  %v1077_v63 = vpack.c.bf16 %v1053_v57, %v1051_v56 }
 0x1c7   : > { %1300 = vmatprep.subr.bf16.mxu0 %v7784_v10  ;;  %v7834_v62 = vld [vmem:[#allocation13 + $0x54] ss:$8 sps:$4 sm:$0xff]   ;;  %v1050_v0 = vld [vmem:[%s9692_s4 + $0x60] sm:$0xff]  ;;  %v1055_v2 = vld [vmem:[%s9692_s4 + $0x88] sm:$0xff]  ;;  %s8991_s5 = sshll.u32 %s9100_s19, 4  ;;  %s8992_s5 = int_to_ptr.vmem [resolvable:$false] %s8991_s5 }
 0x1c8   : > { %v1052_v1 = vld [vmem:[%s9692_s4 + $0x70] sm:$0xff]  ;;  %v1057_v3 = vld [vmem:[%s9692_s4 + $0x98] sm:$0xff]  ;;  %v7837_v5 = vld [vmem:[#allocation13 + $0x64] ss:$8 sps:$4 sm:$0xff]   ;;  %p8994_p9 = scmp.lt.s32.totalorder %s13287_s26, %s8992_s5 }
 0x1c9   : > { %v7832_v4 = vld [vmem:[#allocation13 + $0x50] ss:$8 sps:$4 sm:$0xff]   ;;  %v7835_v6 = vld [vmem:[#allocation13 + $0x60] ss:$8 sps:$4 sm:$0xff]   ;;  %v1076_v7 = vpack.c.bf16 %v1052_v1, %v1050_v0  ;;  %v7840_v8 = vld [vmem:[#allocation13 + $0x74] ss:$8 sps:$4 sm:$0xff]   ;;  %v1079_v9 = vpack.c.bf16 %v1057_v3, %v1055_v2 }
 0x1ca   : > { %1301 = vmatpush1.bf16.msra.mxu0 %v7786_v11  ;;  %v1054_v10 = vld [vmem:[%s9692_s4 + $0x80] sm:$0xff]  ;;  %v1056_v11 = vld [vmem:[%s9692_s4 + $0x90] sm:$0xff]  ;;  %v1061_v13 = vld [vmem:[%s9692_s4 + $0xb8] sm:$0xff]  ;;  %p14037_p11 = scmp.ne.s32.totalorder %s14035_s10, 0 }
 0x1cb   : > { %1302 = vmatprep.subr.bf16.mxu0 %v7787_v12  ;;  %v1059_v12 = vld [vmem:[%s9692_s4 + $0xa8] sm:$0xff]  ;;  %v7838_v14 = vld [vmem:[#allocation13 + $0x70] ss:$8 sps:$4 sm:$0xff]   ;;  %v7868_v35 = vld [vmem:[#allocation10 + $0x14] ss:$8 sps:$4 sm:$0xff]  }
 0x1cc   : > { %v7843_v15 = vld [vmem:[#allocation11 + $0x4] ss:$8 sps:$4 sm:$0xff]   ;;  %v7873_v44 = vld [vmem:[#allocation10 + $0x20] ss:$8 sps:$4 sm:$0xff]   ;;  %v7874_v45 = vld [vmem:[#allocation10 + $0x34] ss:$8 sps:$4 sm:$0xff]  }
 0x1cd   : > { %v2000_v37 = vld [vmem:[%s9685_s17] sm:$0xff]  ;;  %v2001_v38 = vld [vmem:[%s9685_s17 + $0x8] sm:$0xff]  ;;  %v2002_v46 = vld [vmem:[%s9685_s17 + $0x10] sm:$0xff] }
 0x1ce   : > { %1303 = vmatpush1.bf16.msra.mxu0 %v7789_v16  ;;  %v1078_v16 = vpack.c.bf16 %v1056_v11, %v1054_v10  ;;  %v2003_v47 = vld [vmem:[%s9685_s17 + $0x18] sm:$0xff]  ;;  %v7879_v55 = vld [vmem:[#allocation10 + $0x40] ss:$8 sps:$4 sm:$0xff]   ;;  %v2006_v2 = vld [vmem:[%s9685_s17 + $0x30] sm:$0xff] }
 0x1cf   : > { %1304 = vmatprep.subr.bf16.mxu0 %v7790_v17  ;;  %v1081_v17 = vpack.c.bf16 %v1061_v13, %v1059_v12  ;;  %v7852_v54 = vld [vmem:[#allocation11 + $0x34] ss:$8 sps:$4 sm:$0xff]   ;;  %v2004_v57 = vld [vmem:[%s9685_s17 + $0x20] sm:$0xff]  ;;  %v7888_v10 = vld [vmem:[#allocation10 + $0x70] ss:$8 sps:$4 sm:$0xff]  }
 0x1d0   : > { %v7880_v56 = vld [vmem:[#allocation10 + $0x54] ss:$8 sps:$4 sm:$0xff]   ;;  %v7853_v0 = vld [vmem:[#allocation11 + $0x40] ss:$8 sps:$4 sm:$0xff]   ;;  %v7889_v13 = vld [vmem:[#allocation10 + $0x84] ss:$8 sps:$4 sm:$0xff]  }
 0x1d1   : > { %v7858_v1 = vld [vmem:[#allocation11 + $0x54] ss:$8 sps:$4 sm:$0xff]   ;;  %v2008_v12 = vld [vmem:[%s9685_s17 + $0x40] sm:$0xff] }
 0x1d2   : > { %1305 = vmatpush1.bf16.msra.mxu0 %v7792_v18  ;;  %v1058_v18 = vld [vmem:[%s9692_s4 + $0xa0] sm:$0xff]  ;;  %v2007_v3 = vld [vmem:[%s9685_s17 + $0x38] sm:$0xff] }
 0x1d3   : > { %1306 = vmatprep.subr.bf16.mxu0 %v7793_v19  ;;  %v1060_v19 = vld [vmem:[%s9692_s4 + $0xb0] sm:$0xff] }
 0x1d4   : > { %v7864_v11 = vld [vmem:[#allocation11 + $0x74] ss:$8 sps:$4 sm:$0xff]  }
 0x1d6   : > { %1307 = vmatpush1.bf16.msra.mxu0 %v7795_v20  ;;  %v1063_v20 = vld [vmem:[%s9692_s4 + $0xc8] sm:$0xff] }
 0x1d7   : > { %1308 = vmatprep.subr.bf16.mxu0 %v7796_v21  ;;  %v1065_v21 = vld [vmem:[%s9692_s4 + $0xd8] sm:$0xff] }
 0x1da   : > { %1309 = vmatpush1.bf16.msra.mxu0 %v7798_v22  ;;  %v1080_v22 = vpack.c.bf16 %v1060_v19, %v1058_v18  ;;  %v7892_v18 = vld [vmem:[#allocation10 + $0x94] ss:$8 sps:$4 sm:$0xff]   ;;  %v7894_v19 = vld [vmem:[#allocation10 + $0x90] ss:$8 sps:$4 sm:$0xff]  }
 0x1db   : > { %1310 = vmatprep.subr.bf16.mxu0 %v7799_v23  ;;  %v1083_v23 = vpack.c.bf16 %v1065_v21, %v1063_v20  ;;  %v7895_v20 = vld [vmem:[#allocation10 + $0xa4] ss:$8 sps:$4 sm:$0xff]   ;;  %v2010_v21 = vld [vmem:[%s9685_s17 + $0x50] sm:$0xff] }
 0x1de   : > { %1311 = vmatpush1.bf16.msra.mxu0 %v7801_v24  ;;  %v1062_v24 = vld [vmem:[%s9692_s4 + $0xc0] sm:$0xff] }
 0x1df   : > { %1312 = vmatprep.subr.bf16.mxu0 %v7802_v25  ;;  %v1064_v25 = vld [vmem:[%s9692_s4 + $0xd0] sm:$0xff] }
 0x1e2   : > { %1313 = vmatpush1.bf16.msra.mxu0 %v7804_v26  ;;  %v1067_v26 = vld [vmem:[%s9692_s4 + $0xe8] sm:$0xff] }
 0x1e3   : > { %1314 = vmatprep.subr.bf16.mxu0 %v7805_v27  ;;  %v1069_v27 = vld [vmem:[%s9692_s4 + $0xf8] sm:$0xff] }
 0x1e6   : > { %1315 = vmatpush1.bf16.msra.mxu0 %v7807_v28  ;;  %v1082_v28 = vpack.c.bf16 %v1064_v25, %v1062_v24  ;;  %v7898_v25 = vld [vmem:[#allocation10 + $0xb4] ss:$8 sps:$4 sm:$0xff]  }
 0x1e7   : > { %1316 = vmatprep.subr.bf16.mxu0 %v7808_v29  ;;  %v1085_v29 = vpack.c.bf16 %v1069_v27, %v1067_v26  ;;  %v7900_v26 = vld [vmem:[#allocation10 + $0xb0] ss:$8 sps:$4 sm:$0xff]   ;;  %v2012_v27 = vld [vmem:[%s9685_s17 + $0x60] sm:$0xff] }
 0x1ea   : > { %1317 = vmatpush1.bf16.msra.mxu0 %v7810_v30  ;;  %v1066_v30 = vld [vmem:[%s9692_s4 + $0xe0] sm:$0xff] }
 0x1eb   : > { %1318 = vmatprep.subr.bf16.mxu0 %v7811_v31  ;;  %v1068_v31 = vld [vmem:[%s9692_s4 + $0xf0] sm:$0xff]  ;;  %s13733_s4 = sld [smem:[#allocation142_spill]] }
 0x1ee   : > { %1319 = vmatpush1.bf16.msra.mxu0 %v7813_v32  ;;  %v1084_v32 = vpack.c.bf16 %v1068_v31, %v1066_v30  ;;  %v7903_v30 = vld [vmem:[#allocation10 + $0xc0] ss:$8 sps:$4 sm:$0xff]  }
 0x1ef   : > { %1320 = vmatprep.subr.bf16.mxu0 %v7814_v33  ;;  %v7865_v33 = vld [vmem:[#allocation10 + $0x4] ss:$8 sps:$4 sm:$0xff]  }
 0x1f0   : > { %1847 = vmatprep.subr.bf16.mxu1 %v7865_v33  ;;  %v7906_v33 = vld [vmem:[#allocation10 + $0xd0] ss:$8 sps:$4 sm:$0xff]  }
 0x1f2   : > { %1321 = vmatpush1.bf16.msra.mxu0 %v7816_v34  ;;  %v7867_v34 = vld [vmem:[#allocation10] ss:$8 sps:$4 sm:$0xff]  }
 0x1f3   : > { %2120 = vmatprep.subr.bf16.mxu0 %v7819_v39  ;;  %v7841_v39 = vld [vmem:[#allocation11] ss:$8 sps:$4 sm:$0xff]   ;;  %1848 = vmatpush1.bf16.msra.mxu1 %v7867_v34  ;;  %v2014_v34 = vld [vmem:[%s9685_s17 + $0x70] sm:$0xff] }
 0x1f4   : > { %1849 = vmatprep.subr.bf16.mxu1 %v7868_v35  ;;  %v2015_v35 = vld [vmem:[%s9685_s17 + $0x78] sm:$0xff] }
 0x1f5   : > { %1323 = vmatmul.mubr.bf16.vlgmr.msra.gmra.mrb[0].mxu0 %v1070_v41  ;;  %v2016_v41 = vpack.c.bf16 %v2001_v38, %v2000_v37  ;;  %v7907_v37 = vld [vmem:[#allocation10 + $0xe4] ss:$8 sps:$4 sm:$0xff]   ;;  %v7909_v38 = vld [vmem:[#allocation10 + $0xe0] ss:$8 sps:$4 sm:$0xff]  }
 0x1f6   : > { %1332 = vmatprep.mubr.bf16.mxu0 %v1073_v43  ;;  %2121 = vmatpush1.bf16.msra.mxu0 %v7817_v40  ;;  %v7870_v40 = vld [vmem:[#allocation10 + $0x10] ss:$8 sps:$4 sm:$0xff]   ;;  %v7871_v43 = vld [vmem:[#allocation10 + $0x24] ss:$8 sps:$4 sm:$0xff]  }
 0x1f7   : > { %2122 = vmatprep.subr.bf16.mxu0 %v7822_v42  ;;  %v7846_v42 = vld [vmem:[#allocation11 + $0x14] ss:$8 sps:$4 sm:$0xff]   ;;  %1850 = vmatpush1.bf16.msra.mxu1 %v7870_v40 }
 0x1f8   : > { %1851 = vmatprep.subr.bf16.mxu1 %v7871_v43  ;;  %v7910_v40 = vld [vmem:[#allocation10 + $0xf4] ss:$8 sps:$4 sm:$0xff]   ;;  %v1961_v43 = vld [vmem:[%s9677_s6 + $0x8] sm:$0xff] }
 0x1fa   : > { %2123 = vmatpush1.bf16.msra.mxu0 %v7820_v48  ;;  %v7844_v48 = vld [vmem:[#allocation11 + $0x10] ss:$8 sps:$4 sm:$0xff]  }
 0x1fb   : > { %2124 = vmatprep.subr.bf16.mxu0 %v7825_v49  ;;  %v7849_v49 = vld [vmem:[#allocation11 + $0x24] ss:$8 sps:$4 sm:$0xff]   ;;  %1852 = vmatpush1.bf16.msra.mxu1 %v7873_v44 }
 0x1fc   : > { %1853 = vmatprep.subr.bf16.mxu1 %v7874_v45  ;;  %v1962_v45 = vld [vmem:[%s9677_s6 + $0x10] sm:$0xff] }
 0x1fd   : > { %1333 = vmatmul.mubr.bf16.gmra.mrb[4].mxu0 %v1072_v51  ;;  %v7877_v51 = vld [vmem:[#allocation10 + $0x44] ss:$8 sps:$4 sm:$0xff]  }
 0x1fe   : > { %1342 = vmatprep.mubr.bf16.mxu0 %v1075_v53  ;;  %2125 = vmatpush1.bf16.msra.mxu0 %v7823_v50  ;;  %v7876_v50 = vld [vmem:[#allocation10 + $0x30] ss:$8 sps:$4 sm:$0xff]   ;;  %v2017_v53 = vpack.c.bf16 %v2003_v47, %v2002_v46 }
 0x1ff   : > { %2126 = vmatprep.subr.bf16.mxu0 %v7828_v52  ;;  %v7847_v52 = vld [vmem:[#allocation11 + $0x20] ss:$8 sps:$4 sm:$0xff]   ;;  %1854 = vmatpush1.bf16.msra.mxu1 %v7876_v50  ;;  %v1963_v46 = vld [vmem:[%s9677_s6 + $0x18] sm:$0xff] }
 0x200   : > { %1855 = vmatprep.subr.bf16.mxu1 %v7877_v51  ;;  %v1977_v47 = vpack.c.bf16 %v1963_v46, %v1962_v45  ;;  %v1966_v51 = vld [vmem:[%s9677_s6 + $0x30] sm:$0xff] }
 0x202   : > { %2127 = vmatpush1.bf16.msra.mxu0 %v7826_v58  ;;  %v2005_v58 = vld [vmem:[%s9685_s17 + $0x28] sm:$0xff] }
 0x203   : > { %2128 = vmatprep.subr.bf16.mxu0 %v7831_v59  ;;  %v7850_v59 = vld [vmem:[#allocation11 + $0x30] ss:$8 sps:$4 sm:$0xff]   ;;  %1856 = vmatpush1.bf16.msra.mxu1 %v7879_v55  ;;  %v1969_v55 = vld [vmem:[%s9677_s6 + $0x48] sm:$0xff] }
 0x204   : > { %1857 = vmatprep.subr.bf16.mxu1 %v7880_v56 }
 0x205   : > { %1343 = vmatmul.mubr.bf16.gmra.mrb[8].mxu0 %v1074_v61  ;;  %v7882_v61 = vld [vmem:[#allocation10 + $0x50] ss:$8 sps:$4 sm:$0xff]  }
 0x206   : > { %1352 = vmatprep.mubr.bf16.mxu0 %v1077_v63  ;;  %2129 = vmatpush1.bf16.msra.mxu0 %v7829_v60  ;;  %v7855_v60 = vld [vmem:[#allocation11 + $0x44] ss:$8 sps:$4 sm:$0xff]   ;;  %v2018_v63 = vpack.c.bf16 %v2005_v58, %v2004_v57  ;;  %v1970_v57 = vld [vmem:[%s9677_s6 + $0x50] sm:$0xff]  ;;  %v1971_v58 = vld [vmem:[%s9677_s6 + $0x58] sm:$0xff] }
 0x207   : > { %2130 = vmatprep.subr.bf16.mxu0 %v7834_v62  ;;  %v7883_v62 = vld [vmem:[#allocation10 + $0x64] ss:$8 sps:$4 sm:$0xff]   ;;  %1858 = vmatpush1.bf16.msra.mxu1 %v7882_v61 }
 0x208   : > { %1859 = vmatprep.subr.bf16.mxu1 %v7883_v62  ;;  %v1973_v61 = vld [vmem:[%s9677_s6 + $0x68] sm:$0xff] }
 0x20a   : > { %2131 = vmatpush1.bf16.msra.mxu0 %v7832_v4  ;;  %v7856_v4 = vld [vmem:[#allocation11 + $0x50] ss:$8 sps:$4 sm:$0xff]  }
 0x20b   : > { %2132 = vmatprep.subr.bf16.mxu0 %v7837_v5  ;;  %v7885_v5 = vld [vmem:[#allocation10 + $0x60] ss:$8 sps:$4 sm:$0xff]  }
 0x20c   : > { %1860 = vmatpush1.bf16.msra.mxu1 %v7885_v5  ;;  %v1118_v5 = vld [vmem:[%s13533_s22] sm:$0x3]  ;;  %s13788_s22 = sld [smem:[#allocation147_spill]] }
 0x20d   : > { %1353 = vmatmul.mubr.bf16.gmra.mrb[12].mxu0 %v1076_v7  ;;  %v2019_v7 = vpack.c.bf16 %v2007_v3, %v2006_v2  ;;  %v1120_v2 = vlaneseq }
 0x20e   : > { %1362 = vmatprep.mubr.bf16.mxu0 %v1079_v9  ;;  %2133 = vmatpush1.bf16.msra.mxu0 %v7835_v6  ;;  %v7861_v6 = vld [vmem:[#allocation11 + $0x64] ss:$8 sps:$4 sm:$0xff]   ;;  %v7859_v9 = vld [vmem:[#allocation11 + $0x60] ss:$8 sps:$4 sm:$0xff]  }
 0x20f   : > { %2134 = vmatprep.subr.bf16.mxu0 %v7840_v8  ;;  %v7886_v8 = vld [vmem:[#allocation10 + $0x74] ss:$8 sps:$4 sm:$0xff]   ;;  %v1121_v3 = vshrl.u32 %v1120_v2, 7 }
 0x210   : > { %1861 = vmatprep.subr.bf16.mxu1 %v7886_v8 }
 0x211   : > { %1862 = vmatpush1.bf16.msra.mxu1 %v7888_v10 }
 0x212   : > { %2135 = vmatpush1.bf16.msra.mxu0 %v7838_v14  ;;  %v2009_v14 = vld [vmem:[%s9685_s17 + $0x48] sm:$0xff]  ;;  %1863 = vmatprep.subr.bf16.mxu1 %v7889_v13 }
 0x213   : > { %2313 = vmatprep.subr.bf16.mxu0 %v7843_v15  ;;  %v7862_v15 = vld [vmem:[#allocation11 + $0x70] ss:$8 sps:$4 sm:$0xff]  }
 0x215   : > { %1363 = vmatmul.mubr.bf16.gmra.mrb[16].mxu0 %v1078_v16  ;;  %v7891_v16 = vld [vmem:[#allocation10 + $0x80] ss:$8 sps:$4 sm:$0xff]  }
 0x216   : > { %1372 = vmatprep.mubr.bf16.mxu0 %v1081_v17  ;;  %1864 = vmatpush1.bf16.msra.mxu1 %v7891_v16  ;;  %v2020_v17 = vpack.c.bf16 %v2009_v14, %v2008_v12 }
 0x217   : > { %1865 = vmatprep.subr.bf16.mxu1 %v7892_v18 }
 0x21a   : > { %1866 = vmatpush1.bf16.msra.mxu1 %v7894_v19 }
 0x21b   : > { %1867 = vmatprep.subr.bf16.mxu1 %v7895_v20 }
 0x21d   : > { %1373 = vmatmul.mubr.bf16.gmra.mrb[20].mxu0 %v1080_v22  ;;  %v2011_v22 = vld [vmem:[%s9685_s17 + $0x58] sm:$0xff] }
 0x21e   : > { %1382 = vmatprep.mubr.bf16.mxu0 %v1083_v23  ;;  %v7897_v23 = vld [vmem:[#allocation10 + $0xa0] ss:$8 sps:$4 sm:$0xff]   ;;  %v2021_v24 = vpack.c.bf16 %v2011_v22, %v2010_v21 }
 0x21f   : > { %1868 = vmatpush1.bf16.msra.mxu1 %v7897_v23 }
 0x220   : > { %1869 = vmatprep.subr.bf16.mxu1 %v7898_v25 }
 0x223   : > { %1870 = vmatpush1.bf16.msra.mxu1 %v7900_v26 }
 0x225   : > { %1383 = vmatmul.mubr.bf16.gmra.mrb[24].mxu0 %v1082_v28  ;;  %v2013_v28 = vld [vmem:[%s9685_s17 + $0x68] sm:$0xff]  ;;  %s14034_s17 = sld [smem:[#allocation150_spill]] }
 0x226   : > { %1392 = vmatprep.mubr.bf16.mxu0 %v1085_v29  ;;  %v7901_v29 = vld [vmem:[#allocation10 + $0xc4] ss:$8 sps:$4 sm:$0xff]   ;;  %v2022_v31 = vpack.c.bf16 %v2013_v28, %v2012_v27 }
 0x227   : > { %1871 = vmatprep.subr.bf16.mxu1 %v7901_v29 }
 0x228   : > { %1872 = vmatpush1.bf16.msra.mxu1 %v7903_v30 }
 0x22d   : > { %1393 = vmatmul.mubr.bf16.gmra.mrb[28].mxu0 %v1084_v32  ;;  %v7904_v32 = vld [vmem:[#allocation10 + $0xd4] ss:$8 sps:$4 sm:$0xff]  }
 0x22e   : > { %2152 = vmatprep.mubr.bf16.mxu0 %v9098_v36  ;;  %1873 = vmatprep.subr.bf16.mxu1 %v7904_v32 }
 0x22f   : > { %1874 = vmatpush1.bf16.msra.mxu1 %v7906_v33 }
 0x230   : > { %1875 = vmatprep.subr.bf16.mxu1 %v7907_v37 }
 0x233   : > { %1876 = vmatpush1.bf16.msra.mxu1 %v7909_v38 }
 0x234   : > { %1877 = vmatprep.subr.bf16.mxu1 %v7910_v40 }
 0x235   : > { %2153 = vmatmul.mubr.bf16.vlgmr.msra.gmra.mrb[32].mxu0 %v2016_v41  ;;  %v7912_v41 = vld [vmem:[#allocation10 + $0xf0] ss:$8 sps:$4 sm:$0xff]  }
 0x236   : > { %2162 = vmatprep.mubr.bf16.mxu0 %v9098_v36  ;;  %2314 = vmatpush1.bf16.msra.mxu0 %v7841_v39  ;;  %v2023_v39 = vpack.c.bf16 %v2015_v35, %v2014_v34 }
 0x237   : > { %2315 = vmatprep.subr.bf16.mxu0 %v7846_v42  ;;  %v1960_v42 = vld [vmem:[%s9677_s6] sm:$0xff]  ;;  %1878 = vmatpush1.bf16.msra.mxu1 %v7912_v41 }
 0x238   : > { %v1976_v44 = vpack.c.bf16 %v1961_v43, %v1960_v42 }
 0x23a   : > { %2316 = vmatpush1.bf16.msra.mxu0 %v7844_v48  ;;  %v1964_v48 = vld [vmem:[%s9677_s6 + $0x20] sm:$0xff] }
 0x23b   : > { %2317 = vmatprep.subr.bf16.mxu0 %v7849_v49  ;;  %v1965_v49 = vld [vmem:[%s9677_s6 + $0x28] sm:$0xff] }
 0x23c   : > { %v1978_v50 = vpack.c.bf16 %v1965_v49, %v1964_v48 }
 0x23d   : > { %2163 = vmatmul.mubr.bf16.gmra.mrb[36].mxu0 %v2017_v53 }
 0x23e   : > { %2172 = vmatprep.mubr.bf16.mxu0 %v9098_v36  ;;  %2318 = vmatpush1.bf16.msra.mxu0 %v7847_v52  ;;  %v1967_v52 = vld [vmem:[%s9677_s6 + $0x38] sm:$0xff] }
 0x23f   : > { %2319 = vmatprep.subr.bf16.mxu0 %v7852_v54  ;;  %v1979_v53 = vpack.c.bf16 %v1967_v52, %v1966_v51  ;;  %v1968_v54 = vld [vmem:[%s9677_s6 + $0x40] sm:$0xff] }
 0x240   : > { %v1980_v56 = vpack.c.bf16 %v1969_v55, %v1968_v54 }
 0x242   : > { %2320 = vmatpush1.bf16.msra.mxu0 %v7850_v59  ;;  %v1981_v59 = vpack.c.bf16 %v1971_v58, %v1970_v57 }
 0x243   : > { %2321 = vmatprep.subr.bf16.mxu0 %v7855_v60  ;;  %v1972_v60 = vld [vmem:[%s9677_s6 + $0x60] sm:$0xff] }
 0x244   : > { %v1982_v62 = vpack.c.bf16 %v1973_v61, %v1972_v60 }
 0x245   : > { %2173 = vmatmul.mubr.bf16.gmra.mrb[40].mxu0 %v2018_v63  ;;  %v1974_v63 = vld [vmem:[%s9677_s6 + $0x70] sm:$0xff] }
 0x246   : > { %2182 = vmatprep.mubr.bf16.mxu0 %v9098_v36  ;;  %2322 = vmatpush1.bf16.msra.mxu0 %v7853_v0  ;;  %v1975_v0 = vld [vmem:[%s9677_s6 + $0x78] sm:$0xff]  ;;  %s13908_s6 = sld [smem:[#allocation146_spill]] }
 0x247   : > { %2323 = vmatprep.subr.bf16.mxu0 %v7858_v1  ;;  %v1983_v1 = vpack.c.bf16 %v1975_v0, %v1974_v63 }
 0x24a   : > { %2324 = vmatpush1.bf16.msra.mxu0 %v7856_v4  ;;  %v9794_v4 = vsub.s32 0, %v1121_v3 }
 0x24b   : > { %2325 = vmatprep.subr.bf16.mxu0 %v7861_v6  ;;  %v9799_v6 = vsub.s32 1, %v1121_v3 }
 0x24c   : > { %13532 = vst [vmem:[#allocation38_spill] sm:$0xff] %v9794_v4 }
 0x24d   : > { %2183 = vmatmul.mubr.bf16.gmra.mrb[44].mxu0 %v2019_v7  ;;  %13534 = vst [vmem:[#allocation39_spill] sm:$0xff] %v9799_v6  ;;  %v9802_v7 = vrot.slane %v1118_v5, %v9794_v4  ;;  %v9805_v8 = vrot.slane %v1118_v5, %v9799_v6 }
 0x24e   : > { %2192 = vmatprep.mubr.bf16.mxu0 %v9098_v36  ;;  %2326 = vmatpush1.bf16.msra.mxu0 %v7859_v9 }
 0x24f   : > { %2327 = vmatprep.subr.bf16.mxu0 %v7864_v11 }
 0x252   : > { %2328 = vmatpush1.bf16.msra.mxu0 %v7862_v15 }
 0x255   : > { %2193 = vmatmul.mubr.bf16.gmra.mrb[48].mxu0 %v2020_v17 }
 0x256   : > { %2202 = vmatprep.mubr.bf16.mxu0 %v9098_v36 }
 0x25d   : > { %2203 = vmatmul.mubr.bf16.gmra.mrb[52].mxu0 %v2021_v24 }
 0x25e   : > { %2212 = vmatprep.mubr.bf16.mxu0 %v9098_v36 }
 0x265   : > { %2213 = vmatmul.mubr.bf16.gmra.mrb[56].mxu0 %v2022_v31 }
 0x266   : > { %2222 = vmatprep.mubr.bf16.mxu0 %v9098_v36 }
 0x26d   : > { %2223 = vmatmul.mubr.bf16.gmra.mrb[60].mxu0 %v2023_v39 }
 0x26e   : > { %2345 = vmatprep.mubr.bf16.mxu0 %v9098_v36 }
 0x275   : > { %2346 = vmatmul.mubr.bf16.vlgmr.msra.gmra.mrb[32].mxu0 %v1976_v44 }
 0x276   : > { %2355 = vmatprep.mubr.bf16.mxu0 %v9098_v36 }
 0x27d   : > { %2356 = vmatmul.mubr.bf16.gmra.mrb[36].mxu0 %v1977_v47 }
 0x27e   : > { %2365 = vmatprep.mubr.bf16.mxu0 %v9098_v36 }
 0x285   : > { %2366 = vmatmul.mubr.bf16.gmra.mrb[40].mxu0 %v1978_v50 }
 0x286   : > { %2375 = vmatprep.mubr.bf16.mxu0 %v9098_v36 }
 0x28d   : > { %2376 = vmatmul.mubr.bf16.gmra.mrb[44].mxu0 %v1979_v53 }
 0x28e   : > { %2385 = vmatprep.mubr.bf16.mxu0 %v9098_v36 }
 0x295   : > { %2386 = vmatmul.mubr.bf16.gmra.mrb[48].mxu0 %v1980_v56 }
 0x296   : > { %2395 = vmatprep.mubr.bf16.mxu0 %v9098_v36 }
 0x29d   : > { %2396 = vmatmul.mubr.bf16.gmra.mrb[52].mxu0 %v1981_v59 }
 0x29e   : > { %2405 = vmatprep.mubr.bf16.mxu0 %v9098_v36 }
 0x2a5   : > { %2406 = vmatmul.mubr.bf16.gmra.mrb[56].mxu0 %v1982_v62 }
 0x2a6   : > { %2415 = vmatprep.mubr.bf16.mxu0 %v9098_v36 }
 0x2ad   : > { %2416 = vmatmul.mubr.bf16.gmra.mrb[60].mxu0 %v1983_v1 }
 0x2c8   : > { %v1324_v36 = vpop.f32.mrb[0].mxu0 }
 0x2c9   : > { %v9808_v9 = vadd.f32 %v1324_v36, %v9802_v7  ;;  %v1326_v10 = vpop.f32.mrb[1].mxu0 }
 0x2ca   : > { %v9811_v11 = vadd.f32 %v1326_v10, %v9805_v8  ;;  %v1328_v12 = vpop.f32.mrb[2].mxu0 }
 0x2cb   : > { %v1403_v13 = vsub.f32 0.0, %v9808_v9  ;;  %v9815_v14 = vadd.f32 %v1328_v12, %v9802_v7  ;;  %v1330_v15 = vpop.f32.mrb[3].mxu0 }
 0x2cc   : > { %v1404_v16 = vsub.f32 0.0, %v9811_v11  ;;  %v9819_v17 = vadd.f32 %v1330_v15, %v9805_v8 }
 0x2cd   : > { %v1435_v18 = vmul.f32 1.442695, %v1403_v13  ;;  %v1405_v19 = vsub.f32 0.0, %v9815_v14 }
 0x2ce   : > { %v1437_v20 = vmul.f32 1.442695, %v1404_v16  ;;  %v1406_v21 = vsub.f32 0.0, %v9819_v17 }
 0x2cf   : > { %8169 = vpow2.f32 %v1435_v18  ;;  %v1439_v22 = vmul.f32 1.442695, %v1405_v19 }
 0x2d0   : > { %8171 = vpow2.f32 %v1437_v20  ;;  %v1441_v23 = vmul.f32 1.442695, %v1406_v21  ;;  %v1334_v24 = vpop.f32.mrb[4].mxu0 }
 0x2d1   : > { %8173 = vpow2.f32 %v1439_v22  ;;  %v9824_v25 = vadd.f32 %v1334_v24, %v9802_v7  ;;  %v1336_v26 = vpop.f32.mrb[5].mxu0 }
 0x2d2   : > { %8175 = vpow2.f32 %v1441_v23  ;;  %v9827_v27 = vadd.f32 %v1336_v26, %v9805_v8  ;;  %v1338_v28 = vpop.f32.mrb[6].mxu0 }
 0x2d3   : > { %v1407_v29 = vsub.f32 0.0, %v9824_v25  ;;  %v9831_v30 = vadd.f32 %v1338_v28, %v9802_v7  ;;  %v1340_v31 = vpop.f32.mrb[7].mxu0 }
 0x2d4   : > { %v1408_v32 = vsub.f32 0.0, %v9827_v27  ;;  %v9835_v33 = vadd.f32 %v1340_v31, %v9805_v8 }
 0x2d5   : > { %v1443_v34 = vmul.f32 1.442695, %v1407_v29  ;;  %v1409_v35 = vsub.f32 0.0, %v9831_v30 }
 0x2d6   : > { %v1445_v37 = vmul.f32 1.442695, %v1408_v32  ;;  %v1410_v38 = vsub.f32 0.0, %v9835_v33 }
 0x2d7   : > { %8177 = vpow2.f32 %v1443_v34  ;;  %v1447_v39 = vmul.f32 1.442695, %v1409_v35 }
 0x2d8   : > { %8179 = vpow2.f32 %v1445_v37  ;;  %v1449_v40 = vmul.f32 1.442695, %v1410_v38  ;;  %v1344_v41 = vpop.f32.mrb[8].mxu0 }
 0x2d9   : > { %v8170_v42 = vpop.eup %8169  ;;  %8181 = vpow2.f32 %v1447_v39  ;;  %v9840_v43 = vadd.f32 %v1344_v41, %v9802_v7  ;;  %v1346_v44 = vpop.f32.mrb[9].mxu0 }
 0x2da   : > { %v8172_v45 = vpop.eup %8171  ;;  %v1499_v46 = vadd.f32 1.0, %v8170_v42  ;;  %8183 = vpow2.f32 %v1449_v40  ;;  %v9843_v47 = vadd.f32 %v1346_v44, %v9805_v8  ;;  %v1348_v48 = vpop.f32.mrb[10].mxu0 }
 0x2db   : > { %v8174_v49 = vpop.eup %8173  ;;  %v1500_v50 = vadd.f32 1.0, %v8172_v45  ;;  %v1411_v51 = vsub.f32 0.0, %v9840_v43  ;;  %v9847_v52 = vadd.f32 %v1348_v48, %v9802_v7  ;;  %v1350_v53 = vpop.f32.mrb[11].mxu0 }
 0x2dc   : > { %v8176_v54 = vpop.eup %8175  ;;  %8185 = vrcp.f32 %v1499_v46  ;;  %v1501_v55 = vadd.f32 1.0, %v8174_v49  ;;  %v1412_v56 = vsub.f32 0.0, %v9843_v47  ;;  %v9851_v57 = vadd.f32 %v1350_v53, %v9805_v8 }
 0x2dd   : > { %8187 = vrcp.f32 %v1500_v50  ;;  %v1502_v58 = vadd.f32 1.0, %v8176_v54  ;;  %v1451_v59 = vmul.f32 1.442695, %v1411_v51  ;;  %v1413_v60 = vsub.f32 0.0, %v9847_v52 }
 0x2de   : > { %8189 = vrcp.f32 %v1501_v55  ;;  %v1453_v61 = vmul.f32 1.442695, %v1412_v56  ;;  %v1414_v62 = vsub.f32 0.0, %v9851_v57 }
 0x2df   : > { %8191 = vrcp.f32 %v1502_v58  ;;  %v1455_v63 = vmul.f32 1.442695, %v1413_v60 }
 0x2e0   : > { %8193 = vpow2.f32 %v1451_v59  ;;  %v1457_v0 = vmul.f32 1.442695, %v1414_v62  ;;  %v1354_v1 = vpop.f32.mrb[12].mxu0 }
 0x2e1   : > { %v8178_v2 = vpop.eup %8177  ;;  %8195 = vpow2.f32 %v1453_v61  ;;  %v9856_v3 = vadd.f32 %v1354_v1, %v9802_v7  ;;  %v1356_v5 = vpop.f32.mrb[13].mxu0 }
 0x2e2   : > { %v8180_v36 = vpop.eup %8179  ;;  %v1503_v10 = vadd.f32 1.0, %v8178_v2  ;;  %8197 = vpow2.f32 %v1455_v63  ;;  %v9859_v12 = vadd.f32 %v1356_v5, %v9805_v8  ;;  %v1358_v13 = vpop.f32.mrb[14].mxu0 }
 0x2e3   : > { %v8182_v15 = vpop.eup %8181  ;;  %v1504_v16 = vadd.f32 1.0, %v8180_v36  ;;  %8199 = vpow2.f32 %v1457_v0  ;;  %v1415_v18 = vsub.f32 0.0, %v9856_v3  ;;  %v9863_v19 = vadd.f32 %v1358_v13, %v9802_v7  ;;  %v1360_v20 = vpop.f32.mrb[15].mxu0 }
 0x2e4   : > { %v8184_v21 = vpop.eup %8183  ;;  %8201 = vrcp.f32 %v1503_v10  ;;  %v1505_v22 = vadd.f32 1.0, %v8182_v15  ;;  %v1416_v23 = vsub.f32 0.0, %v9859_v12  ;;  %v9867_v24 = vadd.f32 %v1360_v20, %v9805_v8 }
 0x2e5   : > { %8203 = vrcp.f32 %v1504_v16  ;;  %v1506_v26 = vadd.f32 1.0, %v8184_v21  ;;  %v1459_v28 = vmul.f32 1.442695, %v1415_v18  ;;  %v1417_v29 = vsub.f32 0.0, %v9863_v19 }
 0x2e6   : > { %v8186_v31 = vpop.eup %8185  ;;  %8205 = vrcp.f32 %v1505_v22  ;;  %v1461_v32 = vmul.f32 1.442695, %v1416_v23  ;;  %v1418_v34 = vsub.f32 0.0, %v9867_v24 }
 0x2e7   : > { %v8188_v35 = vpop.eup %8187  ;;  %8207 = vrcp.f32 %v1506_v26  ;;  %v1463_v37 = vmul.f32 1.442695, %v1417_v29  ;;  %v1595_v42 = vmul.f32 %v8186_v31, %v9808_v9 }
 0x2e8   : > { %v8190_v38 = vpop.eup %8189  ;;  %8209 = vpow2.f32 %v1459_v28  ;;  %v1465_v39 = vmul.f32 1.442695, %v1418_v34  ;;  %v1364_v40 = vpop.f32.mrb[16].mxu0  ;;  %v1596_v46 = vmul.f32 %v8188_v35, %v9811_v11 }
 0x2e9   : > { %v8192_v41 = vpop.eup %8191  ;;  %8211 = vpow2.f32 %v1461_v32  ;;  %v9873_v44 = vadd.f32 %v1364_v40, %v9802_v7  ;;  %v1366_v45 = vpop.f32.mrb[17].mxu0  ;;  %v1597_v49 = vmul.f32 %v8190_v38, %v9815_v14 }
 0x2ea   : > { %v8194_v48 = vpop.eup %8193  ;;  %8213 = vpow2.f32 %v1463_v37  ;;  %v9878_v50 = vadd.f32 %v1366_v45, %v9805_v8  ;;  %v1368_v51 = vpop.f32.mrb[18].mxu0  ;;  %v1598_v53 = vmul.f32 %v8192_v41, %v9819_v17 }
 0x2eb   : > { %v8196_v54 = vpop.eup %8195  ;;  %v1507_v55 = vadd.f32 1.0, %v8194_v48  ;;  %8215 = vpow2.f32 %v1465_v39  ;;  %v1419_v9 = vsub.f32 0.0, %v9873_v44  ;;  %v9883_v56 = vadd.f32 %v1368_v51, %v9802_v7  ;;  %v1370_v58 = vpop.f32.mrb[19].mxu0 }
 0x2ec   : > { %v8198_v11 = vpop.eup %8197  ;;  %v1508_v59 = vadd.f32 1.0, %v8196_v54  ;;  %v1420_v14 = vsub.f32 0.0, %v9878_v50  ;;  %v9887_v60 = vadd.f32 %v1370_v58, %v9805_v8  ;;  %v1628_v61 = vpack.c.bf16 %v1598_v53, %v1596_v46 }
 0x2ed   : > { %v8200_v62 = vpop.eup %8199  ;;  %8217 = vrcp.f32 %v1507_v55  ;;  %v1509_v17 = vadd.f32 1.0, %v8198_v11  ;;  %v1467_v63 = vmul.f32 1.442695, %v1419_v9  ;;  %v1421_v0 = vsub.f32 0.0, %v9883_v56 }
 0x2ee   : > { %v8202_v1 = vpop.eup %8201  ;;  %8219 = vrcp.f32 %v1508_v59  ;;  %v1510_v2 = vadd.f32 1.0, %v8200_v62  ;;  %v1469_v5 = vmul.f32 1.442695, %v1420_v14  ;;  %v1422_v36 = vsub.f32 0.0, %v9887_v60  ;;  %1879 = vmatprep.mubr.bf16.mxu1 %v1628_v61 }
 0x2ef   : > { %v8204_v10 = vpop.eup %8203  ;;  %8221 = vrcp.f32 %v1509_v17  ;;  %v1471_v13 = vmul.f32 1.442695, %v1421_v0  ;;  %v1627_v15 = vpack.c.bf16 %v1597_v49, %v1595_v42  ;;  %v1599_v22 = vmul.f32 %v8202_v1, %v9824_v25 }
 0x2f0   : > { %v8206_v16 = vpop.eup %8205  ;;  %8223 = vrcp.f32 %v1510_v2  ;;  %v1473_v18 = vmul.f32 1.442695, %v1422_v36  ;;  %v1374_v20 = vpop.f32.mrb[20].mxu0  ;;  %v1600_v23 = vmul.f32 %v8204_v10, %v9827_v27 }
 0x2f1   : > { %v8208_v21 = vpop.eup %8207  ;;  %8225 = vpow2.f32 %v1467_v63  ;;  %1880 = vmatmul.mubr.bf16.vlgmr.msra.gmra.mrb[0].mxu1 %v1627_v15  ;;  %v9894_v26 = vadd.f32 %v1374_v20, %v9802_v7  ;;  %v1376_v28 = vpop.f32.mrb[21].mxu0  ;;  %v1601_v31 = vmul.f32 %v8206_v16, %v9831_v30 }
 0x2f2   : > { %v8210_v29 = vpop.eup %8209  ;;  %v1602_v32 = vmul.f32 %v8208_v21, %v9835_v33  ;;  %8227 = vpow2.f32 %v1469_v5  ;;  %v9899_v34 = vadd.f32 %v1376_v28, %v9805_v8  ;;  %v1378_v35 = vpop.f32.mrb[22].mxu0 }
 0x2f3   : > { %v8212_v37 = vpop.eup %8211  ;;  %v1511_v25 = vadd.f32 1.0, %v8210_v29  ;;  %8229 = vpow2.f32 %v1471_v13  ;;  %v1423_v27 = vsub.f32 0.0, %v9894_v26  ;;  %v9903_v38 = vadd.f32 %v1378_v35, %v9802_v7  ;;  %v1380_v39 = vpop.f32.mrb[23].mxu0 }
 0x2f4   : > { %v8214_v40 = vpop.eup %8213  ;;  %v1512_v41 = vadd.f32 1.0, %v8212_v37  ;;  %8231 = vpow2.f32 %v1473_v18  ;;  %v1424_v30 = vsub.f32 0.0, %v9899_v34  ;;  %v9907_v33 = vadd.f32 %v1380_v39, %v9805_v8 }
 0x2f5   : > { %v8216_v42 = vpop.eup %8215  ;;  %8233 = vrcp.f32 %v1511_v25  ;;  %v1513_v45 = vadd.f32 1.0, %v8214_v40  ;;  %v1475_v46 = vmul.f32 1.442695, %v1423_v27  ;;  %v1425_v48 = vsub.f32 0.0, %v9903_v38 }
 0x2f6   : > { %8235 = vrcp.f32 %v1512_v41  ;;  %v1514_v49 = vadd.f32 1.0, %v8216_v42  ;;  %v1477_v51 = vmul.f32 1.442695, %v1424_v30  ;;  %v1426_v53 = vsub.f32 0.0, %v9907_v33 }
 0x2f7   : > { %v8218_v54 = vpop.eup %8217  ;;  %8237 = vrcp.f32 %v1513_v45  ;;  %v1479_v55 = vmul.f32 1.442695, %v1425_v48  ;;  %v1630_v9 = vpack.c.bf16 %v1602_v32, %v1600_v23  ;;  %v1629_v58 = vpack.c.bf16 %v1601_v31, %v1599_v22 }
 0x2f8   : > { %v8220_v11 = vpop.eup %8219  ;;  %8239 = vrcp.f32 %v1514_v49  ;;  %v1481_v59 = vmul.f32 1.442695, %v1426_v53  ;;  %v1384_v14 = vpop.f32.mrb[24].mxu0  ;;  %v1603_v22 = vmul.f32 %v8218_v54, %v9840_v43 }
 0x2f9   : > { %v8222_v61 = vpop.eup %8221  ;;  %8241 = vpow2.f32 %v1475_v46  ;;  %1889 = vmatprep.mubr.bf16.mxu1 %v1630_v9  ;;  %v9912_v62 = vadd.f32 %v1384_v14, %v9802_v7  ;;  %v1386_v17 = vpop.f32.mrb[25].mxu0  ;;  %v1604_v0 = vmul.f32 %v8220_v11, %v9843_v47 }
 0x2fa   : > { %v8224_v63 = vpop.eup %8223  ;;  %v1605_v1 = vmul.f32 %v8222_v61, %v9847_v52  ;;  %8243 = vpow2.f32 %v1477_v51  ;;  %1890 = vmatmul.mubr.bf16.gmra.mrb[4].mxu1 %v1629_v58  ;;  %v9917_v2 = vadd.f32 %v1386_v17, %v9805_v8  ;;  %v1388_v5 = vpop.f32.mrb[26].mxu0 }
 0x2fb   : > { %v8226_v36 = vpop.eup %8225  ;;  %v1606_v10 = vmul.f32 %v8224_v63, %v9851_v57  ;;  %8245 = vpow2.f32 %v1479_v55  ;;  %v1427_v13 = vsub.f32 0.0, %v9912_v62  ;;  %v9922_v15 = vadd.f32 %v1388_v5, %v9802_v7  ;;  %v1390_v16 = vpop.f32.mrb[27].mxu0 }
 0x2fc   : > { %v8228_v18 = vpop.eup %8227  ;;  %v1515_v47 = vadd.f32 1.0, %v8226_v36  ;;  %8247 = vpow2.f32 %v1481_v59  ;;  %v1428_v52 = vsub.f32 0.0, %v9917_v2  ;;  %v9926_v20 = vadd.f32 %v1390_v16, %v9805_v8 }
 0x2fd   : > { %v8230_v21 = vpop.eup %8229  ;;  %v1516_v23 = vadd.f32 1.0, %v8228_v18  ;;  %v1429_v57 = vsub.f32 0.0, %v9922_v15  ;;  %v1632_v28 = vpack.c.bf16 %v1606_v10, %v1604_v0  ;;  %v1483_v32 = vmul.f32 1.442695, %v1427_v13 }
 0x2fe   : > { %v8232_v29 = vpop.eup %8231  ;;  %8249 = vrcp.f32 %v1515_v47  ;;  %v1517_v31 = vadd.f32 1.0, %v8230_v21  ;;  %v1430_v35 = vsub.f32 0.0, %v9926_v20  ;;  %v1485_v27 = vmul.f32 1.442695, %v1428_v52  ;;  %v7913_v52 = vld [vmem:[#allocation14] ss:$8 sps:$4 sm:$0xff]  }
 0x2ff   : > { %v8234_v37 = vpop.eup %8233  ;;  %8251 = vrcp.f32 %v1516_v23  ;;  %v1518_v25 = vadd.f32 1.0, %v8232_v29  ;;  %1899 = vmatprep.mubr.bf16.mxu1 %v1632_v28  ;;  %v1631_v39 = vpack.c.bf16 %v1605_v1, %v1603_v22  ;;  %v1487_v41 = vmul.f32 1.442695, %v1429_v57  ;;  %v7918_v23 = vld [vmem:[#allocation14 + $0x14] ss:$8 sps:$4 sm:$0xff]  }
 0x300   : > { %v8236_v40 = vpop.eup %8235  ;;  %8253 = vrcp.f32 %v1517_v31  ;;  %v1394_v43 = vpop.f32.mrb[28].mxu0  ;;  %v1489_v42 = vmul.f32 1.442695, %v1430_v35  ;;  %v1607_v49 = vmul.f32 %v8234_v37, %v9856_v3 }
 0x301   : > { %v8238_v30 = vpop.eup %8237  ;;  %8255 = vrcp.f32 %v1518_v25  ;;  %v9932_v45 = vadd.f32 %v1394_v43, %v9802_v7  ;;  %v1396_v46 = vpop.f32.mrb[29].mxu0  ;;  %v1608_v63 = vmul.f32 %v8236_v40, %v9859_v12  ;;  %v7915_v12 = vld [vmem:[#allocation14 + $0x4] ss:$8 sps:$4 sm:$0xff]  }
 0x302   : > { %v8240_v48 = vpop.eup %8239  ;;  %v1609_v51 = vmul.f32 %v8238_v30, %v9863_v19  ;;  %8257 = vpow2.f32 %v1483_v32  ;;  %1900 = vmatmul.mubr.bf16.gmra.mrb[8].mxu1 %v1631_v39  ;;  %v9937_v53 = vadd.f32 %v1396_v46, %v9805_v8  ;;  %v1398_v54 = vpop.f32.mrb[30].mxu0  ;;  %3899 = vmatprep.subr.bf16.mxu1 %v7915_v12  ;;  %v7916_v32 = vld [vmem:[#allocation14 + $0x10] ss:$8 sps:$4 sm:$0xff]   ;;  %v7919_v46 = vld [vmem:[#allocation14 + $0x20] ss:$8 sps:$4 sm:$0xff]  }
 0x303   : > { %v8242_v55 = vpop.eup %8241  ;;  %v1610_v9 = vmul.f32 %v8240_v48, %v9867_v24  ;;  %8259 = vpow2.f32 %v1485_v27  ;;  %v1431_v58 = vsub.f32 0.0, %v9932_v45  ;;  %v9942_v11 = vadd.f32 %v1398_v54, %v9802_v7  ;;  %v1400_v59 = vpop.f32.mrb[31].mxu0  ;;  %3900 = vmatpush1.bf16.msra.mxu1 %v7913_v52  ;;  %v7921_v27 = vld [vmem:[#allocation14 + $0x24] ss:$8 sps:$4 sm:$0xff]  }
 0x304   : > { %v8244_v14 = vpop.eup %8243  ;;  %v1519_v3 = vadd.f32 1.0, %v8242_v55  ;;  %8261 = vpow2.f32 %v1487_v41  ;;  %v1432_v19 = vsub.f32 0.0, %v9937_v53  ;;  %v9946_v61 = vadd.f32 %v1400_v59, %v9805_v8  ;;  %3901 = vmatprep.subr.bf16.mxu1 %v7918_v23  ;;  %v7933_v52 = vld [vmem:[#allocation14 + $0x64] ss:$8 sps:$4 sm:$0xff]  }
 0x305   : > { %v8246_v17 = vpop.eup %8245  ;;  %v1520_v0 = vadd.f32 1.0, %v8244_v14  ;;  %8263 = vpow2.f32 %v1489_v42  ;;  %v1433_v24 = vsub.f32 0.0, %v9942_v11  ;;  %v1491_v5 = vmul.f32 1.442695, %v1431_v58  ;;  %v7922_v58 = vld [vmem:[#allocation14 + $0x30] ss:$8 sps:$4 sm:$0xff]  }
 0x306   : > { %v8248_v1 = vpop.eup %8247  ;;  %8265 = vrcp.f32 %v1519_v3  ;;  %v1521_v7 = vadd.f32 1.0, %v8246_v17  ;;  %v1434_v36 = vsub.f32 0.0, %v9946_v61  ;;  %v1493_v13 = vmul.f32 1.442695, %v1432_v19  ;;  %v7927_v19 = vld [vmem:[#allocation14 + $0x44] ss:$8 sps:$4 sm:$0xff]  }
 0x307   : > { %8267 = vrcp.f32 %v1520_v0  ;;  %v1522_v10 = vadd.f32 1.0, %v8248_v1  ;;  %v1634_v16 = vpack.c.bf16 %v1610_v9, %v1608_v63  ;;  %v1495_v8 = vmul.f32 1.442695, %v1433_v24  ;;  %3902 = vmatpush1.bf16.msra.mxu1 %v7916_v32 }
 0x308   : > { %v8250_v18 = vpop.eup %8249  ;;  %8269 = vrcp.f32 %v1521_v7  ;;  %v1633_v47 = vpack.c.bf16 %v1609_v51, %v1607_v49  ;;  %v1497_v22 = vmul.f32 1.442695, %v1434_v36  ;;  %3903 = vmatprep.subr.bf16.mxu1 %v7921_v27 }
 0x309   : > { %v8252_v21 = vpop.eup %8251  ;;  %8271 = vrcp.f32 %v1522_v10  ;;  %1909 = vmatprep.mubr.bf16.mxu1 %v1634_v16  ;;  %v1611_v29 = vmul.f32 %v8250_v18, %v9873_v44  ;;  %v7928_v16 = vld [vmem:[#allocation14 + $0x50] ss:$8 sps:$4 sm:$0xff]  }
 0x30a   : > { %v8254_v57 = vpop.eup %8253  ;;  %8273 = vpow2.f32 %v1491_v5  ;;  %1910 = vmatmul.mubr.bf16.gmra.mrb[12].mxu1 %v1633_v47  ;;  %v1612_v37 = vmul.f32 %v8252_v21, %v9878_v50 }
 0x30b   : > { %v8256_v28 = vpop.eup %8255  ;;  %v1613_v31 = vmul.f32 %v8254_v57, %v9883_v56  ;;  %8275 = vpow2.f32 %v1493_v13  ;;  %3904 = vmatpush1.bf16.msra.mxu1 %v7919_v46  ;;  %v7931_v57 = vld [vmem:[#allocation14 + $0x60] ss:$8 sps:$4 sm:$0xff]  }
 0x30c   : > { %v8258_v35 = vpop.eup %8257  ;;  %v1614_v25 = vmul.f32 %v8256_v28, %v9887_v60  ;;  %8277 = vpow2.f32 %v1495_v8  ;;  %v7924_v60 = vld [vmem:[#allocation14 + $0x34] ss:$8 sps:$4 sm:$0xff]   ;;  %v2426_v46 = vld [vmem:[%s13535_s12] sm:$0x3]  ;;  %s13845_s12 = sld [smem:[#allocation144_spill]] }
 0x30d   : > { %v8260_v39 = vpop.eup %8259  ;;  %v1523_v40 = vadd.f32 1.0, %v8258_v35  ;;  %8279 = vpow2.f32 %v1497_v22  ;;  %v1635_v41 = vpack.c.bf16 %v1613_v31, %v1611_v29  ;;  %3905 = vmatprep.subr.bf16.mxu1 %v7924_v60  ;;  %v7936_v28 = vld [vmem:[#allocation14 + $0x74] ss:$8 sps:$4 sm:$0xff]   ;;  %v7957_v60 = vld [vmem:[#allocation14 + $0xe4] ss:$8 sps:$4 sm:$0xff]  }
 0x30e   : > { %v8262_v43 = vpop.eup %8261  ;;  %v1524_v30 = vadd.f32 1.0, %v8260_v39  ;;  %v1636_v44 = vpack.c.bf16 %v1614_v25, %v1612_v37 }
 0x30f   : > { %v8264_v42 = vpop.eup %8263  ;;  %8281 = vrcp.f32 %v1523_v40  ;;  %v1525_v56 = vadd.f32 1.0, %v8262_v43  ;;  %3906 = vmatpush1.bf16.msra.mxu1 %v7922_v58  ;;  %v7937_v40 = vld [vmem:[#allocation14 + $0x80] ss:$8 sps:$4 sm:$0xff]   ;;  %v7940_v43 = vld [vmem:[#allocation14 + $0x90] ss:$8 sps:$4 sm:$0xff]  }
 0x310   : > { %v8266_v48 = vpop.eup %8265  ;;  %8283 = vrcp.f32 %v1524_v30  ;;  %v1526_v50 = vadd.f32 1.0, %v8264_v42  ;;  %1919 = vmatprep.mubr.bf16.mxu1 %v1636_v44  ;;  %3907 = vmatprep.subr.bf16.mxu1 %v7927_v19  ;;  %v7948_v30 = vld [vmem:[#allocation14 + $0xb4] ss:$8 sps:$4 sm:$0xff]   ;;  %v7949_v44 = vld [vmem:[#allocation14 + $0xc0] ss:$8 sps:$4 sm:$0xff]  }
 0x311   : > { %v8268_v49 = vpop.eup %8267  ;;  %8285 = vrcp.f32 %v1525_v56  ;;  %v1615_v55 = vmul.f32 %v8266_v48, %v9894_v26  ;;  %v7954_v42 = vld [vmem:[#allocation14 + $0xd4] ss:$8 sps:$4 sm:$0xff]   ;;  %v7952_v56 = vld [vmem:[#allocation14 + $0xd0] ss:$8 sps:$4 sm:$0xff]   ;;  %v9971_v48 = vrot.slane %v2426_v46, %v9794_v4 }
 0x312   : > { %v8270_v51 = vpop.eup %8269  ;;  %8287 = vrcp.f32 %v1526_v50  ;;  %1920 = vmatmul.mubr.bf16.gmra.mrb[16].mxu1 %v1635_v41  ;;  %v1616_v14 = vmul.f32 %v8268_v49, %v9899_v34  ;;  %v7930_v34 = vld [vmem:[#allocation14 + $0x54] ss:$8 sps:$4 sm:$0xff]   ;;  %v7955_v50 = vld [vmem:[#allocation14 + $0xe0] ss:$8 sps:$4 sm:$0xff]   ;;  %v9974_v49 = vrot.slane %v2426_v46, %v9799_v6 }
 0x313   : > { %v8272_v54 = vpop.eup %8271  ;;  %v1617_v9 = vmul.f32 %v8270_v51, %v9903_v38  ;;  %v7925_v38 = vld [vmem:[#allocation14 + $0x40] ss:$8 sps:$4 sm:$0xff]   ;;  %v7942_v41 = vld [vmem:[#allocation14 + $0x94] ss:$8 sps:$4 sm:$0xff]  }
 0x314   : > { %v8274_v59 = vpop.eup %8273  ;;  %v1618_v3 = vmul.f32 %v8272_v54, %v9907_v33  ;;  %3908 = vmatpush1.bf16.msra.mxu1 %v7925_v38 }
 0x315   : > { %v8276_v17 = vpop.eup %8275  ;;  %v1527_v63 = vadd.f32 1.0, %v8274_v59  ;;  %v1637_v0 = vpack.c.bf16 %v1617_v9, %v1615_v55  ;;  %3909 = vmatprep.subr.bf16.mxu1 %v7930_v34  ;;  %v7958_v59 = vld [vmem:[#allocation14 + $0xf0] ss:$8 sps:$4 sm:$0xff]  }
 0x316   : > { %v8278_v24 = vpop.eup %8277  ;;  %v1528_v1 = vadd.f32 1.0, %v8276_v17  ;;  %v1638_v7 = vpack.c.bf16 %v1618_v3, %v1616_v14  ;;  %v7960_v14 = vld [vmem:[#allocation14 + $0xf4] ss:$8 sps:$4 sm:$0xff]  }
 0x317   : > { %v8280_v5 = vpop.eup %8279  ;;  %8289 = vrcp.f32 %v1527_v63  ;;  %v1529_v26 = vadd.f32 1.0, %v8278_v24 }
 0x318   : > { %8291 = vrcp.f32 %v1528_v1  ;;  %v1530_v36 = vadd.f32 1.0, %v8280_v5  ;;  %1929 = vmatprep.mubr.bf16.mxu1 %v1638_v7  ;;  %3910 = vmatpush1.bf16.msra.mxu1 %v7928_v16 }
 0x319   : > { %v8282_v10 = vpop.eup %8281  ;;  %8293 = vrcp.f32 %v1529_v26  ;;  %3911 = vmatprep.subr.bf16.mxu1 %v7933_v52 }
 0x31a   : > { %v8284_v33 = vpop.eup %8283  ;;  %8295 = vrcp.f32 %v1530_v36  ;;  %1930 = vmatmul.mubr.bf16.gmra.mrb[20].mxu1 %v1637_v0  ;;  %v1619_v8 = vmul.f32 %v8282_v10, %v9912_v62  ;;  %v7934_v62 = vld [vmem:[#allocation14 + $0x70] ss:$8 sps:$4 sm:$0xff]   ;;  %v7963_v0 = vld [vmem:[#allocation16 + $0x4] ss:$8 sps:$4 sm:$0xff]  }
 0x31b   : > { %v8286_v13 = vpop.eup %8285  ;;  %v1620_v12 = vmul.f32 %v8284_v33, %v9917_v2 }
 0x31c   : > { %v8288_v18 = vpop.eup %8287  ;;  %v1621_v47 = vmul.f32 %v8286_v13, %v9922_v15  ;;  %3912 = vmatpush1.bf16.msra.mxu1 %v7931_v57 }
 0x31d   : > { %v1622_v21 = vmul.f32 %v8288_v18, %v9926_v20  ;;  %3913 = vmatprep.subr.bf16.mxu1 %v7936_v28  ;;  %v7939_v20 = vld [vmem:[#allocation14 + $0x84] ss:$8 sps:$4 sm:$0xff]  }
 0x31e   : > { %v1639_v22 = vpack.c.bf16 %v1621_v47, %v1619_v8 }
 0x31f   : > { %v1640_v23 = vpack.c.bf16 %v1622_v21, %v1620_v12 }
 0x320   : > { %3914 = vmatpush1.bf16.msra.mxu1 %v7934_v62 }
 0x321   : > { %v8290_v29 = vpop.eup %8289  ;;  %1939 = vmatprep.mubr.bf16.mxu1 %v1640_v23  ;;  %3915 = vmatprep.subr.bf16.mxu1 %v7939_v20 }
 0x322   : > { %v8292_v31 = vpop.eup %8291  ;;  %1940 = vmatmul.mubr.bf16.gmra.mrb[24].mxu1 %v1639_v22  ;;  %v1623_v35 = vmul.f32 %v8290_v29, %v9932_v45  ;;  %v7945_v45 = vld [vmem:[#allocation14 + $0xa4] ss:$8 sps:$4 sm:$0xff]  }
 0x323   : > { %v8294_v32 = vpop.eup %8293  ;;  %v1624_v37 = vmul.f32 %v8292_v31, %v9937_v53  ;;  %v7946_v53 = vld [vmem:[#allocation14 + $0xb0] ss:$8 sps:$4 sm:$0xff]  }
 0x324   : > { %v8296_v15 = vpop.eup %8295  ;;  %v1625_v2 = vmul.f32 %v8294_v32, %v9942_v11  ;;  %3916 = vmatpush1.bf16.msra.mxu1 %v7937_v40  ;;  %v7943_v11 = vld [vmem:[#allocation14 + $0xa0] ss:$8 sps:$4 sm:$0xff]  }
 0x325   : > { %v1626_v25 = vmul.f32 %v8296_v15, %v9946_v61  ;;  %3917 = vmatprep.subr.bf16.mxu1 %v7942_v41  ;;  %v7951_v61 = vld [vmem:[#allocation14 + $0xc4] ss:$8 sps:$4 sm:$0xff]  }
 0x326   : > { %v1641_v27 = vpack.c.bf16 %v1625_v2, %v1623_v35 }
 0x327   : > { %v1642_v39 = vpack.c.bf16 %v1626_v25, %v1624_v37 }
 0x328   : > { %3918 = vmatpush1.bf16.msra.mxu1 %v7940_v43 }
 0x329   : > { %1949 = vmatprep.mubr.bf16.mxu1 %v1642_v39  ;;  %3919 = vmatprep.subr.bf16.mxu1 %v7945_v45 }
 0x32a   : > { %1950 = vmatmul.mubr.bf16.gmra.mrb[28].mxu1 %v1641_v27 }
 0x32c   : > { %3920 = vmatpush1.bf16.msra.mxu1 %v7943_v11 }
 0x32d   : > { %3921 = vmatprep.subr.bf16.mxu1 %v7948_v30 }
 0x330   : > { %3922 = vmatpush1.bf16.msra.mxu1 %v7946_v53 }
 0x331   : > { %3923 = vmatprep.subr.bf16.mxu1 %v7951_v61 }
 0x334   : > { %3924 = vmatpush1.bf16.msra.mxu1 %v7949_v44 }
 0x335   : > { %3925 = vmatprep.subr.bf16.mxu1 %v7954_v42 }
 0x338   : > { %3926 = vmatpush1.bf16.msra.mxu1 %v7952_v56 }
 0x339   : > { %3927 = vmatprep.subr.bf16.mxu1 %v7957_v60 }
 0x33c   : > { %3928 = vmatpush1.bf16.msra.mxu1 %v7955_v50 }
 0x33d   : > { %3929 = vmatprep.subr.bf16.mxu1 %v7960_v14 }
 0x340   : > { %3930 = vmatpush1.bf16.msra.mxu1 %v7958_v59 }
 0x341   : > { %4216 = vmatprep.subr.bf16.mxu1 %v7963_v0 }
 0x348   : > { %v2347_v51 = vpop.f32.mrb[32].mxu0 }
 0x349   : > { %v9977_v54 = vadd.f32 %v9971_v48, %v2347_v51  ;;  %v2349_v55 = vpop.f32.mrb[33].mxu0 }
 0x34a   : > { %v9980_v9 = vadd.f32 %v9974_v49, %v2349_v55  ;;  %v2351_v58 = vpop.f32.mrb[34].mxu0 }
 0x34b   : > { %v2353_v3 = vpop.f32.mrb[35].mxu0  ;;  %v9983_v19 = vadd.f32 %v9971_v48, %v2351_v58 }
 0x34c   : > { %v9986_v17 = vadd.f32 %v9974_v49, %v2353_v3  ;;  %v2472_v63 = vadd.f32 %v9980_v9, %v9977_v54 }
 0x34e   : > { %2473 = vadd.xlane.f32.xlu0 %v2472_v63  ;;  %v2475_v1 = vadd.f32 %v9986_v17, %v9983_v19 }
 0x350   : > { %v2357_v24 = vpop.f32.mrb[36].mxu0 }
 0x351   : > { %v9993_v7 = vadd.f32 %v9971_v48, %v2357_v24  ;;  %v2359_v5 = vpop.f32.mrb[37].mxu0 }
 0x352   : > { %v9996_v26 = vadd.f32 %v9974_v49, %v2359_v5  ;;  %2476 = vadd.xlane.f32.xlu0 %v2475_v1  ;;  %v2361_v38 = vpop.f32.mrb[38].mxu0 }
 0x353   : > { %v2363_v36 = vpop.f32.mrb[39].mxu0  ;;  %v9999_v34 = vadd.f32 %v9971_v48, %v2361_v38 }
 0x354   : > { %v10002_v10 = vadd.f32 %v9974_v49, %v2363_v36  ;;  %v2478_v33 = vadd.f32 %v9996_v26, %v9993_v7 }
 0x356   : > { %2479 = vadd.xlane.f32.xlu1 %v2478_v33  ;;  %v2481_v16 = vadd.f32 %v10002_v10, %v9999_v34 }
 0x358   : > { %v2367_v13 = vpop.f32.mrb[40].mxu0 }
 0x359   : > { %v10009_v18 = vadd.f32 %v9971_v48, %v2367_v13  ;;  %v2369_v8 = vpop.f32.mrb[41].mxu0 }
 0x35a   : > { %v10012_v47 = vadd.f32 %v9974_v49, %v2369_v8  ;;  %2482 = vadd.xlane.f32.xlu1 %v2481_v16  ;;  %v2371_v52 = vpop.f32.mrb[42].mxu0 }
 0x35b   : > { %v10015_v12 = vadd.f32 %v9971_v48, %v2371_v52  ;;  %v2373_v21 = vpop.f32.mrb[43].mxu0 }
 0x35c   : > { %v10018_v22 = vadd.f32 %v9974_v49, %v2373_v21  ;;  %v2484_v23 = vadd.f32 %v10012_v47, %v10009_v18 }
 0x35e   : > { %2485 = vadd.xlane.f32.xlu0 %v2484_v23  ;;  %v2487_v57 = vadd.f32 %v10018_v22, %v10015_v12 }
 0x360   : > { %2488 = vadd.xlane.f32.xlu1 %v2487_v57  ;;  %v2377_v28 = vpop.f32.mrb[44].mxu0 }
 0x361   : > { %v10025_v29 = vadd.f32 %v9971_v48, %v2377_v28  ;;  %v2379_v31 = vpop.f32.mrb[45].mxu0 }
 0x362   : > { %v10028_v32 = vadd.f32 %v9974_v49, %v2379_v31  ;;  %v2381_v62 = vpop.f32.mrb[46].mxu0 }
 0x363   : > { %v10031_v15 = vadd.f32 %v9971_v48, %v2381_v62  ;;  %v2383_v35 = vpop.f32.mrb[47].mxu0  ;;  %v1675_v62 = vld [vmem:[%s13536_s2] sm:$0x3]  ;;  %s13854_s2 = sld [smem:[#allocation149_spill]] }
 0x364   : > { %v10034_v2 = vadd.f32 %v9974_v49, %v2383_v35  ;;  %v2490_v20 = vadd.f32 %v10028_v32, %v10025_v29  ;;  %v10108_v35 = vrot.slane %v1675_v62, %v9794_v4 }
 0x366   : > { %2491 = vadd.xlane.f32.xlu0 %v2490_v20  ;;  %v2493_v37 = vadd.f32 %v10034_v2, %v10031_v15  ;;  %v10111_v20 = vrot.slane %v1675_v62, %v9799_v6 }
 0x368   : > { %2494 = vadd.xlane.f32.xlu1 %v2493_v37  ;;  %v2387_v25 = vpop.f32.mrb[48].mxu0 }
 0x369   : > { %v10041_v27 = vadd.f32 %v9971_v48, %v2387_v25  ;;  %v2389_v39 = vpop.f32.mrb[49].mxu0 }
 0x36a   : > { %v10044_v40 = vadd.f32 %v9974_v49, %v2389_v39  ;;  %v2391_v41 = vpop.f32.mrb[50].mxu0 }
 0x36b   : > { %v10047_v43 = vadd.f32 %v9971_v48, %v2391_v41  ;;  %v2393_v45 = vpop.f32.mrb[51].mxu0 }
 0x36c   : > { %v10050_v11 = vadd.f32 %v9974_v49, %v2393_v45  ;;  %v2496_v30 = vadd.f32 %v10044_v40, %v10041_v27 }
 0x36e   : > { %2497 = vadd.xlane.f32.xlu0 %v2496_v30  ;;  %v2499_v53 = vadd.f32 %v10050_v11, %v10047_v43 }
 0x370   : > { %2500 = vadd.xlane.f32.xlu1 %v2499_v53  ;;  %v2397_v61 = vpop.f32.mrb[52].mxu0 }
 0x371   : > { %v10057_v44 = vadd.f32 %v9971_v48, %v2397_v61  ;;  %v2399_v42 = vpop.f32.mrb[53].mxu0 }
 0x372   : > { %v10060_v56 = vadd.f32 %v9974_v49, %v2399_v42  ;;  %v2401_v46 = vpop.f32.mrb[54].mxu0  ;;  %v7961_v42 = vld [vmem:[#allocation16] ss:$8 sps:$4 sm:$0xff]  }
 0x373   : > { %v10063_v50 = vadd.f32 %v9971_v48, %v2401_v46  ;;  %v2403_v60 = vpop.f32.mrb[55].mxu0  ;;  %v7966_v46 = vld [vmem:[#allocation16 + $0x14] ss:$8 sps:$4 sm:$0xff]  }
 0x374   : > { %v10066_v51 = vadd.f32 %v9974_v49, %v2403_v60  ;;  %v2502_v55 = vadd.f32 %v10060_v56, %v10057_v44 }
 0x376   : > { %2503 = vadd.xlane.f32.xlu0 %v2502_v55  ;;  %v2505_v58 = vadd.f32 %v10066_v51, %v10063_v50 }
 0x378   : > { %2506 = vadd.xlane.f32.xlu1 %v2505_v58  ;;  %v2407_v59 = vpop.f32.mrb[56].mxu0  ;;  %v7964_v58 = vld [vmem:[#allocation16 + $0x10] ss:$8 sps:$4 sm:$0xff]  }
 0x379   : > { %v10073_v14 = vadd.f32 %v9971_v48, %v2407_v59  ;;  %v2409_v3 = vpop.f32.mrb[57].mxu0 }
 0x37a   : > { %v10076_v63 = vadd.f32 %v9974_v49, %v2409_v3  ;;  %v2411_v0 = vpop.f32.mrb[58].mxu0  ;;  %v7969_v3 = vld [vmem:[#allocation16 + $0x24] ss:$8 sps:$4 sm:$0xff]  }
 0x37b   : > { %v10079_v24 = vadd.f32 %v9971_v48, %v2411_v0  ;;  %v2413_v1 = vpop.f32.mrb[59].mxu0 }
 0x37c   : > { %v10082_v5 = vadd.f32 %v9974_v49, %v2413_v1  ;;  %v2508_v38 = vadd.f32 %v10076_v63, %v10073_v14 }
 0x37e   : > { %2509 = vadd.xlane.f32.xlu0 %v2508_v38  ;;  %v2511_v36 = vadd.f32 %v10082_v5, %v10079_v24 }
 0x380   : > { %2512 = vadd.xlane.f32.xlu1 %v2511_v36  ;;  %v2417_v33 = vpop.f32.mrb[60].mxu0 }
 0x381   : > { %v10089_v13 = vadd.f32 %v9971_v48, %v2417_v33  ;;  %v2419_v16 = vpop.f32.mrb[61].mxu0 }
 0x382   : > { %v10092_v8 = vadd.f32 %v9974_v49, %v2419_v16  ;;  %v2421_v52 = vpop.f32.mrb[62].mxu0 }
 0x383   : > { %v10095_v21 = vadd.f32 %v9971_v48, %v2421_v52  ;;  %v2423_v23 = vpop.f32.mrb[63].mxu0 }
 0x384   : > { %v10098_v57 = vadd.f32 %v9974_v49, %v2423_v23  ;;  %v2514_v28 = vadd.f32 %v10092_v8, %v10089_v13  ;;  %v7967_v23 = vld [vmem:[#allocation16 + $0x20] ss:$8 sps:$4 sm:$0xff]  }
 0x386   : > { %2515 = vadd.xlane.f32.xlu0 %v2514_v28  ;;  %v2517_v31 = vadd.f32 %v10098_v57, %v10095_v21  ;;  %v7972_v28 = vld [vmem:[#allocation16 + $0x34] ss:$8 sps:$4 sm:$0xff]  }
 0x388   : > { %2518 = vadd.xlane.f32.xlu1 %v2517_v31 }
 0x3c4   : > { %v1881_v48 = vpop.f32.mrb[0].mxu1 }
 0x3c5   : > { %v1883_v49 = vpop.f32.mrb[1].mxu1  ;;  %v1882_v25 = vadd.f32 %v1881_v48, %v10108_v35 }
 0x3c6   : > { %v1885_v37 = vpop.f32.mrb[2].mxu1  ;;  %v1884_v45 = vadd.f32 %v1883_v49, %v10111_v20  ;;  %v7970_v49 = vld [vmem:[#allocation16 + $0x30] ss:$8 sps:$4 sm:$0xff]  }
 0x3c7   : > { %v1886_v39 = vadd.f32 %v1885_v37, %v10108_v35  ;;  %v1887_v41 = vpop.f32.mrb[3].mxu1 }
 0x3c8   : > { %v1888_v30 = vadd.f32 %v1887_v41, %v10111_v20  ;;  %v7975_v41 = vld [vmem:[#allocation16 + $0x44] ss:$8 sps:$4 sm:$0xff]  }
 0x3c9   : > { %v10117_v53 = vpack.c.bf16 %v1886_v39, %v1882_v25 }
 0x3ca   : > { %v10119_v61 = vpack.c.bf16 %v1888_v30, %v1884_v45 }
 0x3cb   : > { %13537 = vst [vmem:[#allocation40_spill] sm:$0xff] %v10117_v53 }
 0x3cc   : > { %13538 = vst [vmem:[#allocation41_spill] sm:$0xff] %v10119_v61  ;;  %3931 = vmatprep.mubr.bf16.mxu1 %v10119_v61 }
 0x3cd   : > { %v1891_v60 = vpop.f32.mrb[4].mxu1  ;;  %3932 = vmatmul.mubr.bf16.vlgmr.msra.gmra.mrb[32].mxu1 %v10117_v53 }
 0x3ce   : > { %v1893_v55 = vpop.f32.mrb[5].mxu1  ;;  %4217 = vmatpush1.bf16.msra.mxu1 %v7961_v42  ;;  %v1892_v0 = vadd.f32 %v1891_v60, %v10108_v35  ;;  %v7973_v60 = vld [vmem:[#allocation16 + $0x40] ss:$8 sps:$4 sm:$0xff]  }
 0x3cf   : > { %v1895_v59 = vpop.f32.mrb[6].mxu1  ;;  %4218 = vmatprep.subr.bf16.mxu1 %v7966_v46  ;;  %v1894_v36 = vadd.f32 %v1893_v55, %v10111_v20 }
 0x3d0   : > { %v1896_v1 = vadd.f32 %v1895_v59, %v10108_v35  ;;  %v1897_v38 = vpop.f32.mrb[7].mxu1  ;;  %v7978_v59 = vld [vmem:[#allocation16 + $0x54] ss:$8 sps:$4 sm:$0xff]  }
 0x3d1   : > { %v1898_v33 = vadd.f32 %v1897_v38, %v10111_v20 }
 0x3d2   : > { %v10127_v16 = vpack.c.bf16 %v1896_v1, %v1892_v0  ;;  %4219 = vmatpush1.bf16.msra.mxu1 %v7964_v58 }
 0x3d3   : > { %v10129_v52 = vpack.c.bf16 %v1898_v33, %v1894_v36  ;;  %4220 = vmatprep.subr.bf16.mxu1 %v7969_v3 }
 0x3d4   : > { %13539 = vst [vmem:[#allocation42_spill] sm:$0xff] %v10127_v16 }
 0x3d5   : > { %13540 = vst [vmem:[#allocation43_spill] sm:$0xff] %v10129_v52  ;;  %v1901_v31 = vpop.f32.mrb[8].mxu1  ;;  %3941 = vmatprep.mubr.bf16.mxu1 %v10129_v52 }
 0x3d6   : > { %v1903_v62 = vpop.f32.mrb[9].mxu1  ;;  %3942 = vmatmul.mubr.bf16.gmra.mrb[36].mxu1 %v10127_v16  ;;  %v1902_v37 = vadd.f32 %v1901_v31, %v10108_v35 }
 0x3d7   : > { %4221 = vmatpush1.bf16.msra.mxu1 %v7967_v23  ;;  %v1905_v48 = vpop.f32.mrb[10].mxu1  ;;  %v1904_v45 = vadd.f32 %v1903_v62, %v10111_v20  ;;  %v7976_v23 = vld [vmem:[#allocation16 + $0x50] ss:$8 sps:$4 sm:$0xff]  }
 0x3d8   : > { %v1906_v25 = vadd.f32 %v1905_v48, %v10108_v35  ;;  %v1907_v39 = vpop.f32.mrb[11].mxu1  ;;  %4222 = vmatprep.subr.bf16.mxu1 %v7972_v28 }
 0x3d9   : > { %v1908_v30 = vadd.f32 %v1907_v39, %v10111_v20 }
 0x3da   : > { %v10137_v42 = vpack.c.bf16 %v1906_v25, %v1902_v37 }
 0x3db   : > { %v10139_v46 = vpack.c.bf16 %v1908_v30, %v1904_v45  ;;  %4223 = vmatpush1.bf16.msra.mxu1 %v7970_v49  ;;  %v2474_v55 = vpop.xlane.xlu0 %2473  ;;  %v7981_v49 = vld [vmem:[#allocation16 + $0x64] ss:$8 sps:$4 sm:$0xff]  }
 0x3dc   : > { %13541 = vst [vmem:[#allocation44_spill] sm:$0xff] %v10137_v42  ;;  %4224 = vmatprep.subr.bf16.mxu1 %v7975_v41  ;;  %v2521_v58 = vmul.f32 0.00390625, %v2474_v55  ;;  %v7979_v55 = vld [vmem:[#allocation16 + $0x60] ss:$8 sps:$4 sm:$0xff]  }
 0x3dd   : > { %13542 = vst [vmem:[#allocation45_spill] sm:$0xff] %v10139_v46  ;;  %v1911_v3 = vpop.f32.mrb[12].mxu1  ;;  %3951 = vmatprep.mubr.bf16.mxu1 %v10139_v46 }
 0x3de   : > { %v10143_v0 = vsub.f32 %v9977_v54, %v2521_v58  ;;  %v10146_v1 = vsub.f32 %v9980_v9, %v2521_v58  ;;  %v1913_v38 = vpop.f32.mrb[13].mxu1  ;;  %3952 = vmatmul.mubr.bf16.gmra.mrb[40].mxu1 %v10137_v42  ;;  %v1912_v36 = vadd.f32 %v1911_v3, %v10108_v35  ;;  %v7984_v3 = vld [vmem:[#allocation16 + $0x74] ss:$8 sps:$4 sm:$0xff]  }
 0x3df   : > { %4225 = vmatpush1.bf16.msra.mxu1 %v7973_v60  ;;  %v1915_v33 = vpop.f32.mrb[14].mxu1  ;;  %v2477_v28 = vpop.xlane.xlu0 %2476  ;;  %v1914_v37 = vadd.f32 %v1913_v38, %v10111_v20 }
 0x3e0   : > { %v1916_v31 = vadd.f32 %v1915_v33, %v10108_v35  ;;  %v1917_v62 = vpop.f32.mrb[15].mxu1  ;;  %4226 = vmatprep.subr.bf16.mxu1 %v7978_v59  ;;  %v2522_v48 = vmul.f32 0.00390625, %v2477_v28  ;;  %v2569_v54 = vmul.f32 %v10143_v0, %v10143_v0  ;;  %v2570_v9 = vmul.f32 %v10146_v1, %v10146_v1 }
 0x3e1   : > { %v1918_v25 = vadd.f32 %v1917_v62, %v10111_v20 }
 0x3e2   : > { %v10157_v39 = vpack.c.bf16 %v1916_v31, %v1912_v36  ;;  %v10160_v41 = vsub.f32 %v9983_v19, %v2522_v48  ;;  %v10163_v45 = vsub.f32 %v9986_v17, %v2522_v48  ;;  %v2601_v30 = vadd.f32 %v2570_v9, %v2569_v54  ;;  %v7982_v48 = vld [vmem:[#allocation16 + $0x70] ss:$8 sps:$4 sm:$0xff]  }
 0x3e3   : > { %v10165_v60 = vpack.c.bf16 %v1918_v25, %v1914_v37  ;;  %4227 = vmatpush1.bf16.msra.mxu1 %v7976_v23  ;;  %v2480_v58 = vpop.xlane.xlu1 %2479 }
 0x3e4   : > { %13543 = vst [vmem:[#allocation46_spill] sm:$0xff] %v10157_v39  ;;  %4228 = vmatprep.subr.bf16.mxu1 %v7981_v49  ;;  %v2523_v59 = vmul.f32 0.00390625, %v2480_v58  ;;  %2602 = vadd.xlane.f32.xlu0 %v2601_v30  ;;  %v2571_v38 = vmul.f32 %v10160_v41, %v10160_v41  ;;  %v2572_v19 = vmul.f32 %v10163_v45, %v10163_v45 }
 0x3e5   : > { %13544 = vst [vmem:[#allocation47_spill] sm:$0xff] %v10165_v60  ;;  %v1921_v36 = vpop.f32.mrb[16].mxu1  ;;  %3961 = vmatprep.mubr.bf16.mxu1 %v10165_v60 }
 0x3e6   : > { %v10173_v17 = vsub.f32 %v9993_v7, %v2523_v59  ;;  %v10176_v33 = vsub.f32 %v9996_v26, %v2523_v59  ;;  %v1923_v23 = vpop.f32.mrb[17].mxu1  ;;  %3962 = vmatmul.mubr.bf16.gmra.mrb[44].mxu1 %v10157_v39  ;;  %v2604_v28 = vadd.f32 %v2572_v19, %v2571_v38  ;;  %v1922_v31 = vadd.f32 %v1921_v36, %v10108_v35  ;;  %v7987_v7 = vld [vmem:[#allocation16 + $0x84] ss:$8 sps:$4 sm:$0xff]   ;;  %v7985_v36 = vld [vmem:[#allocation16 + $0x80] ss:$8 sps:$4 sm:$0xff]  }
 0x3e7   : > { %4229 = vmatpush1.bf16.msra.mxu1 %v7979_v55  ;;  %v1925_v62 = vpop.f32.mrb[18].mxu1  ;;  %v2483_v49 = vpop.xlane.xlu1 %2482  ;;  %v1924_v30 = vadd.f32 %v1923_v23, %v10111_v20  ;;  %v7990_v23 = vld [vmem:[#allocation16 + $0x94] ss:$8 sps:$4 sm:$0xff]  }
 0x3e8   : > { %v1926_v54 = vadd.f32 %v1925_v62, %v10108_v35  ;;  %v1927_v9 = vpop.f32.mrb[19].mxu1  ;;  %4230 = vmatprep.subr.bf16.mxu1 %v7984_v3  ;;  %v2524_v37 = vmul.f32 0.00390625, %v2483_v49  ;;  %2605 = vadd.xlane.f32.xlu1 %v2604_v28  ;;  %v2573_v26 = vmul.f32 %v10173_v17, %v10173_v17  ;;  %v2574_v25 = vmul.f32 %v10176_v33, %v10176_v33 }
 0x3e9   : > { %v1928_v55 = vadd.f32 %v1927_v9, %v10111_v20 }
 0x3ea   : > { %v10187_v58 = vpack.c.bf16 %v1926_v54, %v1922_v31  ;;  %v10190_v59 = vsub.f32 %v9999_v34, %v2524_v37  ;;  %v10193_v3 = vsub.f32 %v10002_v10, %v2524_v37  ;;  %v2607_v38 = vadd.f32 %v2574_v25, %v2573_v26  ;;  %v7988_v25 = vld [vmem:[#allocation16 + $0x90] ss:$8 sps:$4 sm:$0xff]  }
 0x3eb   : > { %v10195_v19 = vpack.c.bf16 %v1928_v55, %v1924_v30  ;;  %4231 = vmatpush1.bf16.msra.mxu1 %v7982_v48  ;;  %v2486_v28 = vpop.xlane.xlu0 %2485 }
 0x3ec   : > { %13545 = vst [vmem:[#allocation48_spill] sm:$0xff] %v10187_v58  ;;  %4232 = vmatprep.subr.bf16.mxu1 %v7987_v7  ;;  %v2525_v62 = vmul.f32 0.00390625, %v2486_v28  ;;  %2608 = vadd.xlane.f32.xlu0 %v2607_v38  ;;  %v2575_v31 = vmul.f32 %v10190_v59, %v10190_v59  ;;  %v2576_v34 = vmul.f32 %v10193_v3, %v10193_v3  ;;  %v7993_v28 = vld [vmem:[#allocation16 + $0xa4] ss:$8 sps:$4 sm:$0xff]  }
 0x3ed   : > { %13546 = vst [vmem:[#allocation49_spill] sm:$0xff] %v10195_v19  ;;  %v1931_v49 = vpop.f32.mrb[20].mxu1  ;;  %3971 = vmatprep.mubr.bf16.mxu1 %v10195_v19  ;;  %v2489_v10 = vpop.xlane.xlu1 %2488 }
 0x3ee   : > { %v10203_v54 = vsub.f32 %v10009_v18, %v2525_v62  ;;  %v10206_v48 = vsub.f32 %v10012_v47, %v2525_v62  ;;  %v1933_v9 = vpop.f32.mrb[21].mxu1  ;;  %3972 = vmatmul.mubr.bf16.gmra.mrb[48].mxu1 %v10187_v58  ;;  %v2526_v37 = vmul.f32 0.00390625, %v2489_v10  ;;  %v1932_v7 = vadd.f32 %v1931_v49, %v10108_v35  ;;  %v7991_v10 = vld [vmem:[#allocation16 + $0xa0] ss:$8 sps:$4 sm:$0xff]  }
 0x3ef   : > { %4233 = vmatpush1.bf16.msra.mxu1 %v7985_v36  ;;  %v1935_v26 = vpop.f32.mrb[22].mxu1  ;;  %v2610_v30 = vadd.f32 %v2576_v34, %v2575_v31  ;;  %v1934_v49 = vadd.f32 %v1933_v9, %v10111_v20 }
 0x3f0   : > { %13547 = vst [vmem:[#allocation50_spill] sm:$0xff] %v10203_v54  ;;  %v1936_v55 = vadd.f32 %v1935_v26, %v10108_v35  ;;  %v10212_v38 = vsub.f32 %v10015_v12, %v2526_v37  ;;  %v10215_v18 = vsub.f32 %v10018_v22, %v2526_v37  ;;  %v1937_v47 = vpop.f32.mrb[23].mxu1  ;;  %4234 = vmatprep.subr.bf16.mxu1 %v7990_v23 }
 0x3f1   : > { %v2577_v62 = vmul.f32 %v10203_v54, %v10203_v54  ;;  %v1938_v36 = vadd.f32 %v1937_v47, %v10111_v20  ;;  %2611 = vadd.xlane.f32.xlu1 %v2610_v30  ;;  %v2578_v31 = vmul.f32 %v10206_v48, %v10206_v48  ;;  %v7996_v47 = vld [vmem:[#allocation16 + $0xb4] ss:$8 sps:$4 sm:$0xff]  }
 0x3f2   : > { %13548 = vst [vmem:[#allocation51_spill] sm:$0xff] %v10215_v18  ;;  %v10223_v34 = vpack.c.bf16 %v1936_v55, %v1932_v7  ;;  %v2579_v12 = vmul.f32 %v10212_v38, %v10212_v38  ;;  %v2580_v22 = vmul.f32 %v10215_v18, %v10215_v18 }
 0x3f3   : > { %v10229_v23 = vpack.c.bf16 %v1938_v36, %v1934_v49  ;;  %4235 = vmatpush1.bf16.msra.mxu1 %v7988_v25  ;;  %v2492_v37 = vpop.xlane.xlu0 %2491  ;;  %v2613_v9 = vadd.f32 %v2578_v31, %v2577_v62  ;;  %v7994_v36 = vld [vmem:[#allocation16 + $0xb0] ss:$8 sps:$4 sm:$0xff]  }
 0x3f4   : > { %13549 = vst [vmem:[#allocation52_spill] sm:$0xff] %v10223_v34  ;;  %4236 = vmatprep.subr.bf16.mxu1 %v7993_v28  ;;  %v2527_v26 = vmul.f32 0.00390625, %v2492_v37  ;;  %v2616_v30 = vadd.f32 %v2580_v22, %v2579_v12  ;;  %v7999_v22 = vld [vmem:[#allocation16 + $0xc4] ss:$8 sps:$4 sm:$0xff]  }
 0x3f5   : > { %13550 = vst [vmem:[#allocation53_spill] sm:$0xff] %v10229_v23  ;;  %v1941_v54 = vpop.f32.mrb[24].mxu1  ;;  %3981 = vmatprep.mubr.bf16.mxu1 %v10229_v23  ;;  %2614 = vadd.xlane.f32.xlu0 %v2613_v9  ;;  %v2495_v7 = vpop.xlane.xlu1 %2494 }
 0x3f6   : > { %v10233_v55 = vsub.f32 %v10025_v29, %v2527_v26  ;;  %v10236_v18 = vsub.f32 %v10028_v32, %v2527_v26  ;;  %v1943_v49 = vpop.f32.mrb[25].mxu1  ;;  %3982 = vmatmul.mubr.bf16.gmra.mrb[52].mxu1 %v10223_v34  ;;  %v2528_v25 = vmul.f32 0.00390625, %v2495_v7  ;;  %2617 = vadd.xlane.f32.xlu1 %v2616_v30  ;;  %v1942_v28 = vadd.f32 %v1941_v54, %v10108_v35 }
 0x3f7   : > { %4237 = vmatpush1.bf16.msra.mxu1 %v7991_v10  ;;  %v1945_v62 = vpop.f32.mrb[26].mxu1  ;;  %v1944_v9 = vadd.f32 %v1943_v49, %v10111_v20 }
 0x3f8   : > { %13551 = vst [vmem:[#allocation54_spill] sm:$0xff] %v10233_v55  ;;  %v1946_v31 = vadd.f32 %v1945_v62, %v10108_v35  ;;  %v10242_v12 = vsub.f32 %v10031_v15, %v2528_v25  ;;  %v10245_v29 = vsub.f32 %v10034_v2, %v2528_v25  ;;  %v1947_v32 = vpop.f32.mrb[27].mxu1  ;;  %4238 = vmatprep.subr.bf16.mxu1 %v7996_v47  ;;  %v7997_v47 = vld [vmem:[#allocation16 + $0xc0] ss:$8 sps:$4 sm:$0xff]  }
 0x3f9   : > { %v2581_v37 = vmul.f32 %v10233_v55, %v10233_v55  ;;  %v1948_v54 = vadd.f32 %v1947_v32, %v10111_v20  ;;  %v2582_v10 = vmul.f32 %v10236_v18, %v10236_v18  ;;  %v8002_v32 = vld [vmem:[#allocation16 + $0xd4] ss:$8 sps:$4 sm:$0xff]  }
 0x3fa   : > { %13552 = vst [vmem:[#allocation55_spill] sm:$0xff] %v10245_v29  ;;  %v10253_v26 = vpack.c.bf16 %v1946_v31, %v1942_v28  ;;  %v2583_v15 = vmul.f32 %v10242_v12, %v10242_v12  ;;  %v2584_v2 = vmul.f32 %v10245_v29, %v10245_v29 }
 0x3fb   : > { %v10259_v30 = vpack.c.bf16 %v1948_v54, %v1944_v9  ;;  %4239 = vmatpush1.bf16.msra.mxu1 %v7994_v36  ;;  %v2498_v7 = vpop.xlane.xlu0 %2497  ;;  %v2619_v25 = vadd.f32 %v2582_v10, %v2581_v37  ;;  %v8000_v54 = vld [vmem:[#allocation16 + $0xd0] ss:$8 sps:$4 sm:$0xff]  }
 0x3fc   : > { %13553 = vst [vmem:[#allocation56_spill] sm:$0xff] %v10253_v26  ;;  %4240 = vmatprep.subr.bf16.mxu1 %v7999_v22  ;;  %v2529_v49 = vmul.f32 0.00390625, %v2498_v7  ;;  %v2622_v62 = vadd.f32 %v2584_v2, %v2583_v15  ;;  %v8005_v2 = vld [vmem:[#allocation16 + $0xe4] ss:$8 sps:$4 sm:$0xff]  }
 0x3fd   : > { %13554 = vst [vmem:[#allocation57_spill] sm:$0xff] %v10259_v30  ;;  %v1951_v55 = vpop.f32.mrb[28].mxu1  ;;  %3991 = vmatprep.mubr.bf16.mxu1 %v10259_v30  ;;  %2620 = vadd.xlane.f32.xlu0 %v2619_v25  ;;  %v2501_v28 = vpop.xlane.xlu1 %2500 }
 0x3fe   : > { %v10263_v31 = vsub.f32 %v10041_v27, %v2529_v49  ;;  %v10266_v29 = vsub.f32 %v10044_v40, %v2529_v49  ;;  %v1953_v9 = vpop.f32.mrb[29].mxu1  ;;  %3992 = vmatmul.mubr.bf16.gmra.mrb[56].mxu1 %v10253_v26  ;;  %v2530_v36 = vmul.f32 0.00390625, %v2501_v28  ;;  %2623 = vadd.xlane.f32.xlu1 %v2622_v62  ;;  %v1952_v22 = vadd.f32 %v1951_v55, %v10108_v35  ;;  %v8003_v62 = vld [vmem:[#allocation16 + $0xe0] ss:$8 sps:$4 sm:$0xff]  }
 0x3ff   : > { %4241 = vmatpush1.bf16.msra.mxu1 %v7997_v47  ;;  %v1955_v37 = vpop.f32.mrb[30].mxu1  ;;  %v1954_v25 = vadd.f32 %v1953_v9, %v10111_v20 }
 0x400   : > { %v1956_v10 = vadd.f32 %v1955_v37, %v10108_v35  ;;  %v10272_v15 = vsub.f32 %v10047_v43, %v2530_v36  ;;  %v10275_v27 = vsub.f32 %v10050_v11, %v2530_v36  ;;  %v1957_v40 = vpop.f32.mrb[31].mxu1  ;;  %4242 = vmatprep.subr.bf16.mxu1 %v8002_v32  ;;  %v2585_v7 = vmul.f32 %v10263_v31, %v10263_v31  ;;  %v8008_v36 = vld [vmem:[#allocation16 + $0xf4] ss:$8 sps:$4 sm:$0xff]  }
 0x401   : > { %v1958_v55 = vadd.f32 %v1957_v40, %v10111_v20  ;;  %v2586_v47 = vmul.f32 %v10266_v29, %v10266_v29  ;;  %v8006_v40 = vld [vmem:[#allocation16 + $0xf0] ss:$8 sps:$4 sm:$0xff]  }
 0x402   : > { %v10283_v35 = vpack.c.bf16 %v1956_v10, %v1952_v22  ;;  %v2587_v43 = vmul.f32 %v10272_v15, %v10272_v15  ;;  %v2588_v11 = vmul.f32 %v10275_v27, %v10275_v27 }
 0x403   : > { %v10289_v49 = vpack.c.bf16 %v1958_v55, %v1954_v25  ;;  %4243 = vmatpush1.bf16.msra.mxu1 %v8000_v54  ;;  %v2504_v32 = vpop.xlane.xlu0 %2503  ;;  %v2625_v28 = vadd.f32 %v2586_v47, %v2585_v7 }
 0x404   : > { %13555 = vst [vmem:[#allocation58_spill] sm:$0xff] %v10283_v35  ;;  %4244 = vmatprep.subr.bf16.mxu1 %v8005_v2  ;;  %v2531_v9 = vmul.f32 0.00390625, %v2504_v32  ;;  %v2628_v20 = vadd.f32 %v2588_v11, %v2587_v43  ;;  %v8009_v11 = vld [vmem:[#allocation19] ss:$8 sps:$4 sm:$0xff]   ;;  %v8014_v32 = vld [vmem:[#allocation19 + $0x14] ss:$8 sps:$4 sm:$0xff]  }
 0x405   : > { %13556 = vst [vmem:[#allocation59_spill] sm:$0xff] %v10289_v49  ;;  %4001 = vmatprep.mubr.bf16.mxu1 %v10289_v49  ;;  %2626 = vadd.xlane.f32.xlu0 %v2625_v28  ;;  %v2507_v22 = vpop.xlane.xlu1 %2506 }
 0x406   : > { %v10293_v37 = vsub.f32 %v10057_v44, %v2531_v9  ;;  %v10296_v10 = vsub.f32 %v10060_v56, %v2531_v9  ;;  %4002 = vmatmul.mubr.bf16.gmra.mrb[60].mxu1 %v10283_v35  ;;  %v2532_v54 = vmul.f32 0.00390625, %v2507_v22  ;;  %2629 = vadd.xlane.f32.xlu1 %v2628_v20  ;;  %v8011_v44 = vld [vmem:[#allocation19 + $0x4] ss:$8 sps:$4 sm:$0xff]   ;;  %v8012_v22 = vld [vmem:[#allocation19 + $0x10] ss:$8 sps:$4 sm:$0xff]  }
 0x407   : > { %4245 = vmatpush1.bf16.msra.mxu1 %v8003_v62  ;;  %4248 = vmatprep.mubr.bf16.mxu1 %v10119_v61 }
 0x408   : > { %v10301_v2 = vsub.f32 %v10063_v50, %v2532_v54  ;;  %v10304_v7 = vsub.f32 %v10066_v51, %v2532_v54  ;;  %4246 = vmatprep.subr.bf16.mxu1 %v8008_v36  ;;  %v2589_v56 = vmul.f32 %v10293_v37, %v10293_v37  ;;  %v2590_v25 = vmul.f32 %v10296_v10, %v10296_v10 }
 0x40a   : > { %v2631_v55 = vadd.f32 %v2590_v25, %v2589_v56  ;;  %v2591_v47 = vmul.f32 %v10301_v2, %v10301_v2  ;;  %v2592_v43 = vmul.f32 %v10304_v7, %v10304_v7 }
 0x40b   : > { %4247 = vmatpush1.bf16.msra.mxu1 %v8006_v40  ;;  %v2510_v50 = vpop.xlane.xlu0 %2509 }
 0x40c   : > { %v2533_v51 = vmul.f32 0.00390625, %v2510_v50  ;;  %6170 = vmatprep.subr.bf16.mxu1 %v8011_v44  ;;  %2632 = vadd.xlane.f32.xlu0 %v2631_v55  ;;  %v2634_v62 = vadd.f32 %v2592_v43, %v2591_v47  ;;  %v8015_v47 = vld [vmem:[#allocation19 + $0x20] ss:$8 sps:$4 sm:$0xff]   ;;  %v8020_v50 = vld [vmem:[#allocation19 + $0x34] ss:$8 sps:$4 sm:$0xff]  }
 0x40d   : > { %v2513_v28 = vpop.xlane.xlu1 %2512 }
 0x40e   : > { %v10315_v9 = vsub.f32 %v10073_v14, %v2533_v51  ;;  %v10318_v20 = vsub.f32 %v10076_v63, %v2533_v51  ;;  %4249 = vmatmul.mubr.bf16.vlgmr.msra.gmra.mrb[64].mxu1 %v10117_v53  ;;  %v2534_v36 = vmul.f32 0.00390625, %v2513_v28  ;;  %2635 = vadd.xlane.f32.xlu1 %v2634_v62  ;;  %v8017_v14 = vld [vmem:[#allocation19 + $0x24] ss:$8 sps:$4 sm:$0xff]   ;;  %v8018_v28 = vld [vmem:[#allocation19 + $0x30] ss:$8 sps:$4 sm:$0xff]  }
 0x40f   : > { %4258 = vmatprep.mubr.bf16.mxu1 %v10129_v52  ;;  %6171 = vmatpush1.bf16.msra.mxu1 %v8009_v11 }
 0x410   : > { %v10323_v54 = vsub.f32 %v10079_v24, %v2534_v36  ;;  %v10326_v40 = vsub.f32 %v10082_v5, %v2534_v36  ;;  %6172 = vmatprep.subr.bf16.mxu1 %v8014_v32  ;;  %v2593_v63 = vmul.f32 %v10315_v9, %v10315_v9  ;;  %v2594_v44 = vmul.f32 %v10318_v20, %v10318_v20 }
 0x412   : > { %v2637_v56 = vadd.f32 %v2594_v44, %v2593_v63  ;;  %v2595_v25 = vmul.f32 %v10323_v54, %v10323_v54  ;;  %v2596_v55 = vmul.f32 %v10326_v40, %v10326_v40 }
 0x413   : > { %6173 = vmatpush1.bf16.msra.mxu1 %v8012_v22  ;;  %v2516_v24 = vpop.xlane.xlu0 %2515 }
 0x414   : > { %v2535_v5 = vmul.f32 0.00390625, %v2516_v24  ;;  %6174 = vmatprep.subr.bf16.mxu1 %v8017_v14  ;;  %2638 = vadd.xlane.f32.xlu0 %v2637_v56  ;;  %v2640_v43 = vadd.f32 %v2596_v55, %v2595_v25  ;;  %v8026_v25 = vld [vmem:[#allocation19 + $0x54] ss:$8 sps:$4 sm:$0xff]   ;;  %v8024_v55 = vld [vmem:[#allocation19 + $0x50] ss:$8 sps:$4 sm:$0xff]  }
 0x415   : > { %v2519_v11 = vpop.xlane.xlu1 %2518  ;;  %v8029_v24 = vld [vmem:[#allocation19 + $0x64] ss:$8 sps:$4 sm:$0xff]  }
 0x416   : > { %v10337_v51 = vsub.f32 %v10089_v13, %v2535_v5  ;;  %v10340_v62 = vsub.f32 %v10092_v8, %v2535_v5  ;;  %4259 = vmatmul.mubr.bf16.gmra.mrb[68].mxu1 %v10127_v16  ;;  %v2536_v32 = vmul.f32 0.00390625, %v2519_v11  ;;  %2641 = vadd.xlane.f32.xlu1 %v2640_v43  ;;  %v8023_v13 = vld [vmem:[#allocation19 + $0x44] ss:$8 sps:$4 sm:$0xff]   ;;  %v8032_v5 = vld [vmem:[#allocation19 + $0x74] ss:$8 sps:$4 sm:$0xff]  }
 0x417   : > { %4268 = vmatprep.mubr.bf16.mxu1 %v10139_v46  ;;  %6175 = vmatpush1.bf16.msra.mxu1 %v8015_v47  ;;  %v8027_v47 = vld [vmem:[#allocation19 + $0x60] ss:$8 sps:$4 sm:$0xff]   ;;  %v8030_v43 = vld [vmem:[#allocation19 + $0x70] ss:$8 sps:$4 sm:$0xff]  }
 0x418   : > { %13557 = vst [vmem:[#allocation60_spill] sm:$0xff] %v10337_v51  ;;  %13558 = vst [vmem:[#allocation61_spill] sm:$0xff] %v10340_v62  ;;  %v10345_v36 = vsub.f32 %v10095_v21, %v2536_v32  ;;  %v10348_v22 = vsub.f32 %v10098_v57, %v2536_v32  ;;  %6176 = vmatprep.subr.bf16.mxu1 %v8020_v50  ;;  %v2597_v8 = vmul.f32 %v10337_v51, %v10337_v51  ;;  %v8021_v21 = vld [vmem:[#allocation19 + $0x40] ss:$8 sps:$4 sm:$0xff]   ;;  %v8035_v50 = vld [vmem:[#allocation19 + $0x84] ss:$8 sps:$4 sm:$0xff]  }
 0x419   : > { %v2598_v14 = vmul.f32 %v10340_v62, %v10340_v62  ;;  %v8033_v11 = vld [vmem:[#allocation19 + $0x80] ss:$8 sps:$4 sm:$0xff]   ;;  %v8038_v32 = vld [vmem:[#allocation19 + $0x94] ss:$8 sps:$4 sm:$0xff]  }
 0x41a   : > { %13559 = vst [vmem:[#allocation62_spill] sm:$0xff] %v10345_v36  ;;  %13560 = vst [vmem:[#allocation63_spill] sm:$0xff] %v10348_v22  ;;  %v2599_v44 = vmul.f32 %v10345_v36, %v10345_v36  ;;  %v2600_v56 = vmul.f32 %v10348_v22, %v10348_v22 }
 0x41b   : > { %v2643_v63 = vadd.f32 %v2598_v14, %v2597_v8  ;;  %6177 = vmatpush1.bf16.msra.mxu1 %v8018_v28  ;;  %v8036_v28 = vld [vmem:[#allocation19 + $0x90] ss:$8 sps:$4 sm:$0xff]   ;;  %v8039_v8 = vld [vmem:[#allocation19 + $0xa0] ss:$8 sps:$4 sm:$0xff]   ;;  %v8044_v14 = vld [vmem:[#allocation19 + $0xb4] ss:$8 sps:$4 sm:$0xff]  }
 0x41c   : > { %6178 = vmatprep.subr.bf16.mxu1 %v8023_v13  ;;  %v2646_v57 = vadd.f32 %v2600_v56, %v2599_v44  ;;  %v8041_v13 = vld [vmem:[#allocation19 + $0xa4] ss:$8 sps:$4 sm:$0xff]   ;;  %v8045_v56 = vld [vmem:[#allocation19 + $0xc0] ss:$8 sps:$4 sm:$0xff]  }
 0x41d   : > { %2644 = vadd.xlane.f32.xlu0 %v2643_v63  ;;  %v8042_v63 = vld [vmem:[#allocation19 + $0xb0] ss:$8 sps:$4 sm:$0xff]   ;;  %v8047_v44 = vld [vmem:[#allocation19 + $0xc4] ss:$8 sps:$4 sm:$0xff]  }
 0x41e   : > { %4269 = vmatmul.mubr.bf16.gmra.mrb[72].mxu1 %v10137_v42  ;;  %2647 = vadd.xlane.f32.xlu1 %v2646_v57  ;;  %v8048_v57 = vld [vmem:[#allocation19 + $0xd0] ss:$8 sps:$4 sm:$0xff]  }
 0x41f   : > { %4278 = vmatprep.mubr.bf16.mxu1 %v10165_v60  ;;  %6179 = vmatpush1.bf16.msra.mxu1 %v8021_v21  ;;  %v8050_v21 = vld [vmem:[#allocation19 + $0xd4] ss:$8 sps:$4 sm:$0xff]  }
 0x420   : > { %6180 = vmatprep.subr.bf16.mxu1 %v8026_v25  ;;  %v8053_v25 = vld [vmem:[#allocation19 + $0xe4] ss:$8 sps:$4 sm:$0xff]  }
 0x423   : > { %6181 = vmatpush1.bf16.msra.mxu1 %v8024_v55  ;;  %v8051_v55 = vld [vmem:[#allocation19 + $0xe0] ss:$8 sps:$4 sm:$0xff]  }
 0x424   : > { %6182 = vmatprep.subr.bf16.mxu1 %v8029_v24  ;;  %v8056_v24 = vld [vmem:[#allocation19 + $0xf4] ss:$8 sps:$4 sm:$0xff]  }
 0x426   : > { %4279 = vmatmul.mubr.bf16.gmra.mrb[76].mxu1 %v10157_v39 }
 0x427   : > { %4288 = vmatprep.mubr.bf16.mxu1 %v10195_v19  ;;  %6183 = vmatpush1.bf16.msra.mxu1 %v8027_v47  ;;  %v8054_v47 = vld [vmem:[#allocation19 + $0xf0] ss:$8 sps:$4 sm:$0xff]  }
 0x428   : > { %6184 = vmatprep.subr.bf16.mxu1 %v8032_v5  ;;  %v8059_v5 = vld [vmem:[#allocation17 + $0x4] ss:$8 sps:$4 sm:$0xff]  }
 0x429   : > { %4645 = vmatprep.subr.bf16.mxu0 %v8059_v5 }
 0x42b   : > { %6185 = vmatpush1.bf16.msra.mxu1 %v8030_v43  ;;  %v8057_v43 = vld [vmem:[#allocation17] ss:$8 sps:$4 sm:$0xff]  }
 0x42c   : > { %6186 = vmatprep.subr.bf16.mxu1 %v8035_v50  ;;  %4646 = vmatpush1.bf16.msra.mxu0 %v8057_v43  ;;  %v8062_v50 = vld [vmem:[#allocation17 + $0x14] ss:$8 sps:$4 sm:$0xff]   ;;  %v2471_v43 = vld [vmem:[%s13345_s11] sm:$0x3] }
 0x42d   : > { %4647 = vmatprep.subr.bf16.mxu0 %v8062_v50 }
 0x42e   : > { %4289 = vmatmul.mubr.bf16.gmra.mrb[80].mxu1 %v10187_v58 }
 0x42f   : > { %4298 = vmatprep.mubr.bf16.mxu1 %v10229_v23  ;;  %6187 = vmatpush1.bf16.msra.mxu1 %v8033_v11  ;;  %v8060_v11 = vld [vmem:[#allocation17 + $0x10] ss:$8 sps:$4 sm:$0xff]  }
 0x430   : > { %6188 = vmatprep.subr.bf16.mxu1 %v8038_v32  ;;  %4648 = vmatpush1.bf16.msra.mxu0 %v8060_v11  ;;  %v8065_v32 = vld [vmem:[#allocation17 + $0x24] ss:$8 sps:$4 sm:$0xff]  }
 0x431   : > { %4649 = vmatprep.subr.bf16.mxu0 %v8065_v32 }
 0x433   : > { %6189 = vmatpush1.bf16.msra.mxu1 %v8036_v28  ;;  %v8063_v28 = vld [vmem:[#allocation17 + $0x20] ss:$8 sps:$4 sm:$0xff]  }
 0x434   : > { %6190 = vmatprep.subr.bf16.mxu1 %v8041_v13  ;;  %4650 = vmatpush1.bf16.msra.mxu0 %v8063_v28 }
 0x436   : > { %4299 = vmatmul.mubr.bf16.gmra.mrb[84].mxu1 %v10223_v34 }
 0x437   : > { %4308 = vmatprep.mubr.bf16.mxu1 %v10259_v30  ;;  %6191 = vmatpush1.bf16.msra.mxu1 %v8039_v8 }
 0x438   : > { %6192 = vmatprep.subr.bf16.mxu1 %v8044_v14 }
 0x43b   : > { %6193 = vmatpush1.bf16.msra.mxu1 %v8042_v63 }
 0x43c   : > { %6194 = vmatprep.subr.bf16.mxu1 %v8047_v44  ;;  %v8068_v44 = vld [vmem:[#allocation17 + $0x34] ss:$8 sps:$4 sm:$0xff]  }
 0x43d   : > { %4651 = vmatprep.subr.bf16.mxu0 %v8068_v44 }
 0x43e   : > { %4309 = vmatmul.mubr.bf16.gmra.mrb[88].mxu1 %v10253_v26 }
 0x43f   : > { %4318 = vmatprep.mubr.bf16.mxu1 %v10289_v49  ;;  %6195 = vmatpush1.bf16.msra.mxu1 %v8045_v56 }
 0x440   : > { %6196 = vmatprep.subr.bf16.mxu1 %v8050_v21  ;;  %v8066_v21 = vld [vmem:[#allocation17 + $0x30] ss:$8 sps:$4 sm:$0xff]  }
 0x441   : > { %4652 = vmatpush1.bf16.msra.mxu0 %v8066_v21 }
 0x443   : > { %6197 = vmatpush1.bf16.msra.mxu1 %v8048_v57 }
 0x444   : > { %6198 = vmatprep.subr.bf16.mxu1 %v8053_v25 }
 0x446   : > { %4319 = vmatmul.mubr.bf16.gmra.mrb[92].mxu1 %v10283_v35 }
 0x447   : > { %6199 = vmatpush1.bf16.msra.mxu1 %v8051_v55  ;;  %6202 = vmatprep.mubr.bf16.mxu1 %v10119_v61 }
 0x448   : > { %6200 = vmatprep.subr.bf16.mxu1 %v8056_v24 }
 0x44b   : > { %6201 = vmatpush1.bf16.msra.mxu1 %v8054_v47  ;;  %v2470_v47 = vld [vmem:[%s13561_s8] sm:$0x3]  ;;  %s13901_s8 = sld [smem:[#allocation145_spill]] }
 0x44c   : > { %v10391_v11 = vrot.slane %v2470_v47, %v9794_v4  ;;  %v10394_v32 = vrot.slane %v2470_v47, %v9799_v6 }
 0x44e   : > { %6203 = vmatmul.mubr.bf16.vlgmr.msra.gmra.mrb[96].mxu1 %v10117_v53 }
 0x44f   : > { %6212 = vmatprep.mubr.bf16.mxu1 %v10129_v52 }
 0x456   : > { %6213 = vmatmul.mubr.bf16.gmra.mrb[100].mxu1 %v10127_v16  ;;  %v13563_v16 = vmov -1.0  }
 0x457   : > { %6222 = vmatprep.mubr.bf16.mxu1 %v10139_v46 }
 0x45e   : > { %6223 = vmatmul.mubr.bf16.gmra.mrb[104].mxu1 %v10137_v42  ;;  %v13414_v42 = vmov -1.0  }
 0x45f   : > { %6232 = vmatprep.mubr.bf16.mxu1 %v10165_v60 }
 0x466   : > { %6233 = vmatmul.mubr.bf16.gmra.mrb[108].mxu1 %v10157_v39 }
 0x467   : > { %6242 = vmatprep.mubr.bf16.mxu1 %v10195_v19 }
 0x46e   : > { %6243 = vmatmul.mubr.bf16.gmra.mrb[112].mxu1 %v10187_v58 }
 0x46f   : > { %6252 = vmatprep.mubr.bf16.mxu1 %v10229_v23 }
 0x471   : > { %v2603_v13 = vpop.xlane.xlu0 %2602 }
 0x472   : > { %v2649_v8 = vmul.f32 0.00390625, %v2603_v13 }
 0x474   : > { %v2665_v14 = vadd.f32 1e-05, %v2649_v8 }
 0x475   : > { %v2606_v63 = vpop.xlane.xlu1 %2605 }
 0x476   : > { %8297 = vrsqrt.f32 %v2665_v14  ;;  %6253 = vmatmul.mubr.bf16.gmra.mrb[116].mxu1 %v10223_v34  ;;  %v2650_v56 = vmul.f32 0.00390625, %v2606_v63  ;;  %v10399_v63 = vrot.slane %v2471_v43, %v9794_v4 }
 0x477   : > { %6262 = vmatprep.mubr.bf16.mxu1 %v10259_v30 }
 0x478   : > { %v2666_v57 = vadd.f32 1e-05, %v2650_v56  ;;  %v10402_v56 = vrot.slane %v2471_v43, %v9799_v6  ;;  %v3727_v43 = vld [vmem:[%s13562_s0] sm:$0x3] }
 0x479   : > { %v2609_v25 = vpop.xlane.xlu0 %2608 }
 0x47a   : > { %8299 = vrsqrt.f32 %v2666_v57  ;;  %v2651_v55 = vmul.f32 0.00390625, %v2609_v25 }
 0x47c   : > { %v2667_v24 = vadd.f32 1e-05, %v2651_v55 }
 0x47e   : > { %6263 = vmatmul.mubr.bf16.gmra.mrb[120].mxu1 %v10253_v26  ;;  %v2612_v5 = vpop.xlane.xlu1 %2611  ;;  %8301 = vrsqrt.f32 %v2667_v24  ;;  %v10419_v26 = vrot.slane %v3727_v43, %v9799_v6 }
 0x47f   : > { %6272 = vmatprep.mubr.bf16.mxu1 %v10289_v49  ;;  %v2652_v50 = vmul.f32 0.00390625, %v2612_v5 }
 0x480   : > { %v8298_v28 = vpop.eup %8297 }
 0x481   : > { %v2697_v13 = vmul.f32 %v8298_v28, %v10143_v0  ;;  %v2698_v8 = vmul.f32 %v8298_v28, %v10146_v1  ;;  %v2668_v14 = vadd.f32 1e-05, %v2652_v50 }
 0x482   : > { %v2615_v44 = vpop.xlane.xlu0 %2614 }
 0x483   : > { %v2653_v21 = vmul.f32 0.00390625, %v2615_v44  ;;  %v2618_v57 = vpop.xlane.xlu1 %2617  ;;  %v2740_v25 = vmul.f32 %v10391_v11, %v2697_v13  ;;  %v2741_v55 = vmul.f32 %v10394_v32, %v2698_v8  ;;  %8303 = vrsqrt.f32 %v2668_v14 }
 0x484   : > { %v8300_v47 = vpop.eup %8299  ;;  %v2654_v24 = vmul.f32 0.00390625, %v2618_v57  ;;  %v8071_v57 = vld [vmem:[#allocation17 + $0x44] ss:$8 sps:$4 sm:$0xff]  }
 0x485   : > { %v2699_v0 = vmul.f32 %v8300_v47, %v10160_v41  ;;  %v2669_v1 = vadd.f32 1e-05, %v2653_v21  ;;  %v2783_v5 = vadd.f32 %v10399_v63, %v2740_v25  ;;  %v2784_v28 = vadd.f32 %v10402_v56, %v2741_v55  ;;  %v8069_v25 = vld [vmem:[#allocation17 + $0x40] ss:$8 sps:$4 sm:$0xff]   ;;  %4653 = vmatprep.subr.bf16.mxu0 %v8071_v57 }
 0x486   : > { %v2670_v50 = vadd.f32 1e-05, %v2654_v24  ;;  %6273 = vmatmul.mubr.bf16.gmra.mrb[124].mxu1 %v10283_v35  ;;  %v2700_v13 = vmul.f32 %v8300_v47, %v10163_v45  ;;  %v10416_v21 = vrot.slane %v3727_v43, %v9794_v4  ;;  %4654 = vmatpush1.bf16.msra.mxu0 %v8069_v25 }
 0x487   : > { %v2847_v8 = vmul.f32 0.70710677, %v2783_v5  ;;  %v2742_v14 = vmul.f32 %v10391_v11, %v2699_v0  ;;  %v2848_v44 = vmul.f32 0.70710677, %v2784_v28  ;;  %8305 = vrsqrt.f32 %v2669_v1 }
 0x488   : > { %v8302_v24 = vpop.eup %8301  ;;  %8307 = vrsqrt.f32 %v2670_v50  ;;  %v2743_v1 = vmul.f32 %v10394_v32, %v2700_v13  ;;  %v10425_v57 = vmul.f32 0.5, %v2783_v5 }
 0x489   : > { %v2943_v41 = vand.u32 2147483647, %v2847_v8  ;;  %v2944_v49 = vand.u32 2147483647, %v2848_v44  ;;  %v2785_v45 = vadd.f32 %v10399_v63, %v2742_v14  ;;  %vm2879_vm0 = vcmp.ge.f32.partialorder %v2847_v8, 0.0 }
 0x48a   : > { %v2621_v35 = vpop.xlane.xlu0 %2620  ;;  %vm2880_vm1 = vcmp.ge.f32.partialorder %v2848_v44, 0.0  ;;  %v2701_v50 = vmul.f32 %v8302_v24, %v10173_v17  ;;  %v2702_v14 = vmul.f32 %v8302_v24, %v10176_v33  ;;  %v10430_v13 = vsel %vm2879_vm0, 1.0, %v13414_v42 }
 0x48b   : > { %v2655_v55 = vmul.f32 0.00390625, %v2621_v35  ;;  %v2624_v47 = vpop.xlane.xlu1 %2623  ;;  %v2975_v0 = vmul.f32 0.3275911, %v2943_v41  ;;  %v3391_v30 = vsub.f32 0.0, %v2943_v41  ;;  %v2976_v23 = vmul.f32 0.3275911, %v2944_v49 }
 0x48c   : > { %v2656_v34 = vmul.f32 0.00390625, %v2624_v47  ;;  %v2849_v43 = vmul.f32 0.70710677, %v2785_v45  ;;  %v10427_v35 = vmul.f32 0.5, %v2784_v28  ;;  %v3392_v60 = vsub.f32 0.0, %v2944_v49 }
 0x48d   : > { %v2671_v58 = vadd.f32 1e-05, %v2655_v55  ;;  %v3007_v19 = vadd.f32 1.0, %v2975_v0  ;;  %v8304_v39 = vpop.eup %8303  ;;  %v3423_v8 = vmul.f32 %v3391_v30, %v2943_v41  ;;  %v10433_v44 = vsel %vm2880_vm1, 1.0, %v13414_v42 }
 0x48e   : > { %v3008_v17 = vadd.f32 1.0, %v2976_v23  ;;  %v2672_v25 = vadd.f32 1e-05, %v2656_v34  ;;  %v10435_v55 = vmul.f32 0.5, %v2785_v45  ;;  %v2945_v47 = vand.u32 2147483647, %v2849_v43 }
 0x48f   : > { %8309 = vrsqrt.f32 %v2671_v58  ;;  %v10438_v33 = vmul.f32 %v8304_v39, %v10190_v59  ;;  %v2786_v5 = vadd.f32 %v10402_v56, %v2743_v1  ;;  %v2744_v28 = vmul.f32 %v10391_v11, %v2701_v50 }
 0x490   : > { %8311 = vrcp.f32 %v3007_v19  ;;  %v10443_v24 = vmul.f32 %v8304_v39, %v10193_v3  ;;  %v3424_v41 = vmul.f32 %v3392_v60, %v2944_v49  ;;  %vm2881_vm2 = vcmp.ge.f32.partialorder %v2849_v43, 0.0  ;;  %v13564_v49 = vld [vmem:[#allocation50_spill] sm:$0xff] }
 0x491   : > { %v2977_v23 = vmul.f32 0.3275911, %v2945_v47  ;;  %v8306_v58 = vpop.eup %8305  ;;  %v3455_v0 = vmul.f32 1.442695, %v3423_v8  ;;  %8313 = vrcp.f32 %v3008_v17  ;;  %v2745_v59 = vmul.f32 %v10394_v32, %v2702_v14 }
 0x492   : > { %v2627_v30 = vpop.xlane.xlu0 %2626  ;;  %v8308_v42 = vpop.eup %8307  ;;  %8315 = vrsqrt.f32 %v2672_v25  ;;  %v3393_v46 = vsub.f32 0.0, %v2945_v47  ;;  %v10447_v39 = vsel %vm2881_vm2, 1.0, %v13563_v16  ;;  %v2850_v3 = vmul.f32 0.70710677, %v2786_v5 }
 0x493   : > { %v2657_v34 = vmul.f32 0.00390625, %v2627_v30  ;;  %v2630_v45 = vpop.xlane.xlu1 %2629  ;;  %v3009_v1 = vadd.f32 1.0, %v2977_v23  ;;  %v2787_v60 = vadd.f32 %v10399_v63, %v2744_v28  ;;  %v10451_v43 = vmul.f32 %v8306_v58, %v13564_v49 }
 0x494   : > { %v2658_v19 = vmul.f32 0.00390625, %v2630_v45  ;;  %v10454_v8 = vmul.f32 %v8306_v58, %v10206_v48  ;;  %v3457_v17 = vmul.f32 1.442695, %v3424_v41  ;;  %v3425_v14 = vmul.f32 %v3393_v46, %v2945_v47  ;;  %v13566_v41 = vld [vmem:[#allocation51_spill] sm:$0xff] }
 0x495   : > { %v2673_v50 = vadd.f32 1e-05, %v2657_v34  ;;  %8317 = vrcp.f32 %v3009_v1  ;;  %v2946_v25 = vand.u32 2147483647, %v2850_v3  ;;  %v2788_v30 = vadd.f32 %v10402_v56, %v2745_v59 }
 0x496   : > { %8319 = vpow2.f32 %v3455_v0  ;;  %v10458_v23 = vmul.f32 %v8308_v42, %v10212_v38  ;;  %v2674_v34 = vadd.f32 1e-05, %v2658_v19  ;;  %v10460_v45 = vmul.f32 0.5, %v2786_v5  ;;  %v8072_v0 = vld [vmem:[#allocation17 + $0x50] ss:$8 sps:$4 sm:$0xff]  }
 0x497   : > { %8321 = vrsqrt.f32 %v2673_v50  ;;  %vm2882_vm3 = vcmp.ge.f32.partialorder %v2850_v3, 0.0  ;;  %v2978_v49 = vmul.f32 0.3275911, %v2946_v25  ;;  %v3394_v52 = vsub.f32 0.0, %v2946_v25  ;;  %v8074_v38 = vld [vmem:[#allocation17 + $0x54] ss:$8 sps:$4 sm:$0xff]  }
 0x498   : > { %13565 = vst [vmem:[#allocation50_spill] sm:$0xff] %v10458_v23  ;;  %v2851_v48 = vmul.f32 0.70710677, %v2787_v60  ;;  %v10463_v1 = vmul.f32 %v8308_v42, %v13566_v41  ;;  %8323 = vpow2.f32 %v3457_v17  ;;  %v10465_v47 = vmul.f32 0.5, %v2787_v60  ;;  %4655 = vmatprep.subr.bf16.mxu0 %v8074_v38 }
 0x499   : > { %v2633_v28 = vpop.xlane.xlu0 %2632  ;;  %v8310_v58 = vpop.eup %8309  ;;  %v3459_v5 = vmul.f32 1.442695, %v3425_v14  ;;  %v3010_v50 = vadd.f32 1.0, %v2978_v49  ;;  %v3426_v53 = vmul.f32 %v3394_v52, %v2946_v25  ;;  %v10469_v61 = vmul.f32 0.70710677, %v2788_v30  ;;  %4656 = vmatpush1.bf16.msra.mxu0 %v8072_v0  ;;  %v13570_v14 = vld [vmem:[#allocation54_spill] sm:$0xff] }
 0x49a   : > { %13567 = vst [vmem:[#allocation51_spill] sm:$0xff] %v10463_v1  ;;  %v2659_v46 = vmul.f32 0.00390625, %v2633_v28  ;;  %13568 = vst [vmem:[#allocation64_spill] sm:$0xff] %v10465_v47  ;;  %v10467_v59 = vpop.eup %8311  ;;  %8325 = vrsqrt.f32 %v2674_v34  ;;  %v10476_v60 = vsel %vm2882_vm3, 1.0, %v13563_v16  ;;  %v2947_v17 = vand.u32 2147483647, %v2851_v48 }
 0x49b   : > { %v2636_v19 = vpop.xlane.xlu1 %2635  ;;  %v3103_v42 = vmul.f32 1.0614054, %v10467_v59  ;;  %v10472_v28 = vpop.eup %8313  ;;  %8327 = vrcp.f32 %v3010_v50  ;;  %v10478_v41 = vmul.f32 0.5, %v2788_v30  ;;  %v10481_v25 = vmul.f32 %v8310_v58, %v13570_v14 }
 0x49c   : > { %v2675_v6 = vadd.f32 1e-05, %v2659_v46  ;;  %v2660_v4 = vmul.f32 0.00390625, %v2636_v19  ;;  %v8316_v52 = vpop.eup %8315  ;;  %v3104_v49 = vmul.f32 1.0614054, %v10472_v28  ;;  %v10485_v38 = vmul.f32 %v8310_v58, %v10236_v18 }
 0x49d   : > { %13569 = vst [vmem:[#allocation65_spill] sm:$0xff] %v10478_v41  ;;  %13571 = vst [vmem:[#allocation54_spill] sm:$0xff] %v10481_v25  ;;  %v3135_v34 = vadd.f32 -1.4531521, %v3103_v42  ;;  %v3461_v46 = vmul.f32 1.442695, %v3426_v53  ;;  %v10494_v42 = vmul.f32 %v8316_v52, %v10242_v12 }
 0x49e   : > { %13572 = vst [vmem:[#allocation66_spill] sm:$0xff] %v10485_v38  ;;  %v2676_v19 = vadd.f32 1e-05, %v2660_v4  ;;  %vm2883_vm4 = vcmp.ge.f32.partialorder %v2851_v48, 0.0  ;;  %v2979_v3 = vmul.f32 0.3275911, %v2947_v17  ;;  %8329 = vrsqrt.f32 %v2675_v6 }
 0x49f   : > { %v10487_v22 = vpop.eup %8317  ;;  %v3167_v30 = vmul.f32 %v10467_v59, %v3135_v34  ;;  %v3136_v50 = vadd.f32 -1.4531521, %v3104_v49  ;;  %vm2884_vm5 = vcmp.ge.f32.partialorder %v10469_v61, 0.0  ;;  %13573 = vst [vmem:[#allocation67_spill] sm:$0xff] %v10494_v42  ;;  %8331 = vpow2.f32 %v3459_v5  ;;  %v13574_v38 = vld [vmem:[#allocation55_spill] sm:$0xff] }
 0x4a0   : > { %v3933_v0 = vpop.f32.mrb[32].mxu1  ;;  %v10491_v14 = vpop.eup %8319  ;;  %v3105_v18 = vmul.f32 1.0614054, %v10487_v22  ;;  %v3395_v4 = vsub.f32 0.0, %v2947_v17  ;;  %v10498_v41 = vmul.f32 %v8316_v52, %v13574_v38  ;;  %8333 = vpow2.f32 %v3461_v46 }
 0x4a1   : > { %v3935_v53 = vpop.f32.mrb[33].mxu1  ;;  %v8322_v58 = vpop.eup %8321  ;;  %v3199_v6 = vadd.f32 1.4214138, %v3167_v30  ;;  %v3168_v34 = vmul.f32 %v10472_v28, %v3136_v50  ;;  %8335 = vrsqrt.f32 %v2676_v19  ;;  %v10503_v12 = vsel %vm2883_vm4, 1.0, %v13563_v16 }
 0x4a2   : > { %13575 = vst [vmem:[#allocation55_spill] sm:$0xff] %v10498_v41  ;;  %v3937_v49 = vpop.f32.mrb[34].mxu1  ;;  %v2639_v25 = vpop.xlane.xlu0 %2638  ;;  %v3011_v42 = vadd.f32 1.0, %v2979_v3  ;;  %v10508_v5 = vsel %vm2884_vm5, 1.0, %v13563_v16  ;;  %v10514_v30 = vadd.f32 %v3933_v0, %v10416_v21  ;;  %v3137_v19 = vadd.f32 -1.4531521, %v3105_v18 }
 0x4a3   : > { %v3939_v36 = vpop.f32.mrb[35].mxu1  ;;  %v2642_v1 = vpop.xlane.xlu1 %2641  ;;  %13576 = vst [vmem:[#allocation68_spill] sm:$0xff] %v10508_v5  ;;  %v3231_v38 = vmul.f32 %v10467_v59, %v3199_v6  ;;  %v3200_v46 = vadd.f32 1.4214138, %v3168_v34  ;;  %v10517_v50 = vadd.f32 %v3935_v53, %v10419_v26  ;;  %v2661_v48 = vmul.f32 0.00390625, %v2639_v25 }
 0x4a4   : > { %v10510_v52 = vpop.eup %8323  ;;  %v2662_v41 = vmul.f32 0.00390625, %v2642_v1  ;;  %v3427_v3 = vmul.f32 %v3395_v4, %v2947_v17  ;;  %v10520_v62 = vmul.f32 %v8322_v58, %v10263_v31  ;;  %v3169_v6 = vmul.f32 %v10487_v22, %v3137_v19  ;;  %v8075_v34 = vld [vmem:[#allocation17 + $0x60] ss:$8 sps:$4 sm:$0xff]  }
 0x4a5   : > { %v8326_v47 = vpop.eup %8325  ;;  %v3263_v5 = vadd.f32 -0.28449672, %v3231_v38  ;;  %v3232_v51 = vmul.f32 %v10472_v28, %v3200_v46  ;;  %v10527_v0 = vmul.f32 %v8322_v58, %v10266_v29  ;;  %v10530_v53 = vadd.f32 %v3937_v49, %v10416_v21 }
 0x4a6   : > { %13577 = vst [vmem:[#allocation69_spill] sm:$0xff] %v10520_v62  ;;  %v10524_v23 = vpop.eup %8327  ;;  %v2677_v25 = vadd.f32 1e-05, %v2661_v48  ;;  %8337 = vrcp.f32 %v3011_v42  ;;  %v3201_v31 = vadd.f32 1.4214138, %v3169_v6  ;;  %v10537_v38 = vadd.f32 %v3939_v36, %v10419_v26 }
 0x4a7   : > { %13578 = vst [vmem:[#allocation70_spill] sm:$0xff] %v10527_v0  ;;  %v3295_v1 = vmul.f32 %v10467_v59, %v3263_v5  ;;  %v3264_v17 = vadd.f32 -0.28449672, %v3232_v51  ;;  %v3106_v18 = vmul.f32 1.0614054, %v10524_v23  ;;  %v10542_v6 = vmul.f32 %v8326_v47, %v10272_v15 }
 0x4a8   : > { %v2678_v29 = vadd.f32 1e-05, %v2662_v41  ;;  %v8330_v46 = vpop.eup %8329  ;;  %v3233_v42 = vmul.f32 %v10487_v22, %v3201_v31  ;;  %v10545_v4 = vmul.f32 %v8326_v47, %v10275_v27  ;;  %8339 = vrsqrt.f32 %v2677_v25 }
 0x4a9   : > { %v3943_v58 = vpop.f32.mrb[36].mxu1  ;;  %v3327_v49 = vadd.f32 0.2548296, %v3295_v1  ;;  %v3296_v19 = vmul.f32 %v10472_v28, %v3264_v17  ;;  %v3138_v5 = vadd.f32 -1.4531521, %v3106_v18  ;;  %v8332_v48 = vpop.eup %8331  ;;  %13579 = vst [vmem:[#allocation71_spill] sm:$0xff] %v10542_v6  ;;  %v10557_v27 = vmul.f32 %v8330_v46, %v10293_v37 }
 0x4aa   : > { %v3945_v51 = vpop.f32.mrb[37].mxu1  ;;  %v8077_v1 = vld [vmem:[#allocation17 + $0x64] ss:$8 sps:$4 sm:$0xff]   ;;  %v10550_v0 = vpop.eup %8333  ;;  %v3265_v18 = vadd.f32 -0.28449672, %v3233_v42  ;;  %8341 = vrsqrt.f32 %v2678_v29  ;;  %v10565_v42 = vadd.f32 %v3943_v58, %v10416_v21  ;;  %v2746_v47 = vmul.f32 %v10391_v11, %v10438_v33 }
 0x4ab   : > { %v10548_v41 = vpop.f32.mrb[38].mxu1  ;;  %v3359_v17 = vmul.f32 %v10467_v59, %v3327_v49  ;;  %v3328_v31 = vadd.f32 0.2548296, %v3296_v19  ;;  %v3170_v62 = vmul.f32 %v10524_v23, %v3138_v5  ;;  %v8336_v6 = vpop.eup %8335  ;;  %13580 = vst [vmem:[#allocation72_spill] sm:$0xff] %v10557_v27  ;;  %v2948_v25 = vand.u32 2147483647, %v10469_v61  ;;  %4657 = vmatprep.subr.bf16.mxu0 %v8077_v1 }
 0x4ac   : > { %v10554_v15 = vpop.f32.mrb[39].mxu1  ;;  %v3297_v49 = vmul.f32 %v10487_v22, %v3265_v18  ;;  %4658 = vmatpush1.bf16.msra.mxu0 %v8075_v34  ;;  %v10574_v34 = vadd.f32 %v3945_v51, %v10419_v26 }
 0x4ad   : > { %v3519_v36 = vmul.f32 %v10491_v14, %v3359_v17  ;;  %v3360_v59 = vmul.f32 %v10472_v28, %v3328_v31  ;;  %v3202_v19 = vadd.f32 1.4214138, %v3170_v62  ;;  %v2980_v5 = vmul.f32 0.3275911, %v2948_v25 }
 0x4ae   : > { %v3396_v37 = vsub.f32 0.0, %v2948_v25  ;;  %v3329_v1 = vadd.f32 0.2548296, %v3297_v49  ;;  %v3463_v28 = vmul.f32 1.442695, %v3427_v3  ;;  %v10590_v49 = vmul.f32 %v8336_v6, %v10301_v2 }
 0x4af   : > { %v3551_v29 = vsub.f32 1.0, %v3519_v36  ;;  %v3520_v61 = vmul.f32 %v10510_v52, %v3360_v59  ;;  %v3234_v14 = vmul.f32 %v10524_v23, %v3202_v19  ;;  %v3012_v31 = vadd.f32 1.0, %v2980_v5 }
 0x4b0   : > { %v10571_v17 = vpop.eup %8337  ;;  %v3428_v62 = vmul.f32 %v3396_v37, %v2948_v25  ;;  %v3361_v33 = vmul.f32 %v10487_v22, %v3329_v1  ;;  %v10583_v59 = vmul.f32 %v8330_v46, %v10296_v10  ;;  %v2789_v25 = vadd.f32 %v10399_v63, %v2746_v47  ;;  %13582 = vst [vmem:[#allocation74_spill] sm:$0xff] %v10590_v49  ;;  %v8080_v47 = vld [vmem:[#allocation17 + $0x74] ss:$8 sps:$4 sm:$0xff]  }
 0x4b1   : > { %v10576_v58 = vpop.f32.mrb[40].mxu1  ;;  %v3583_v18 = vmul.f32 %v3551_v29, %v10430_v13  ;;  %v3552_v27 = vsub.f32 1.0, %v3520_v61  ;;  %v3266_v36 = vadd.f32 -0.28449672, %v3234_v14  ;;  %v3107_v3 = vmul.f32 1.0614054, %v10571_v17  ;;  %4659 = vmatprep.subr.bf16.mxu0 %v8080_v47 }
 0x4b2   : > { %v10580_v52 = vpop.f32.mrb[41].mxu1  ;;  %13581 = vst [vmem:[#allocation73_spill] sm:$0xff] %v10583_v59  ;;  %8343 = vrcp.f32 %v3012_v31  ;;  %v10593_v13 = vmul.f32 %v8336_v6, %v10304_v7  ;;  %v3521_v22 = vmul.f32 %v8332_v48, %v3361_v33  ;;  %v8340_v10 = vpop.eup %8339  ;;  %v3465_v29 = vmul.f32 1.442695, %v3428_v62  ;;  %v8078_v7 = vld [vmem:[#allocation17 + $0x70] ss:$8 sps:$4 sm:$0xff]  }
 0x4b3   : > { %v10587_v51 = vpop.f32.mrb[42].mxu1  ;;  %v3298_v46 = vmul.f32 %v10524_v23, %v3266_v36  ;;  %v3139_v37 = vadd.f32 -1.4531521, %v3107_v3  ;;  %8345 = vpow2.f32 %v3463_v28  ;;  %v3615_v61 = vadd.f32 1.0, %v3583_v18  ;;  %v2645_v36 = vpop.xlane.xlu0 %2644  ;;  %4660 = vmatpush1.bf16.msra.mxu0 %v8078_v7 }
 0x4b4   : > { %13583 = vst [vmem:[#allocation75_spill] sm:$0xff] %v10593_v13  ;;  %v10596_v5 = vpop.f32.mrb[43].mxu1  ;;  %v3584_v1 = vmul.f32 %v3552_v27, %v10433_v44  ;;  %v3553_v2 = vsub.f32 1.0, %v3521_v22  ;;  %v8342_v6 = vpop.eup %8341  ;;  %v2853_v33 = vmul.f32 0.70710677, %v2789_v25  ;;  %v10604_v19 = vadd.f32 %v10548_v41, %v10416_v21 }
 0x4b5   : > { %v3330_v48 = vadd.f32 0.2548296, %v3298_v46  ;;  %v3171_v31 = vmul.f32 %v10571_v17, %v3139_v37  ;;  %v10608_v62 = vmul.f32 %v8340_v10, %v10315_v9  ;;  %v10611_v44 = vmul.f32 %v8340_v10, %v10318_v20 }
 0x4b6   : > { %v3585_v28 = vmul.f32 %v3553_v2, %v10447_v39  ;;  %v10613_v27 = vmul.f32 0.5, %v2789_v25  ;;  %8347 = vpow2.f32 %v3465_v29  ;;  %v2949_v22 = vand.u32 2147483647, %v2853_v33 }
 0x4b7   : > { %13584 = vst [vmem:[#allocation76_spill] sm:$0xff] %v10608_v62  ;;  %13585 = vst [vmem:[#allocation77_spill] sm:$0xff] %v10611_v44  ;;  %v3362_v18 = vmul.f32 %v10524_v23, %v3330_v48  ;;  %v3203_v3 = vadd.f32 1.4214138, %v3171_v31  ;;  %v3647_v46 = vmul.f32 %v3615_v61, %v10425_v57  ;;  %v3616_v37 = vadd.f32 1.0, %v3584_v1 }
 0x4b8   : > { %v10620_v39 = vmul.f32 %v8342_v6, %v10323_v54  ;;  %v2663_v9 = vmul.f32 0.00390625, %v2645_v36  ;;  %v2981_v10 = vmul.f32 0.3275911, %v2949_v22  ;;  %v3397_v23 = vsub.f32 0.0, %v2949_v22  ;;  %v8086_v44 = vld [vmem:[#allocation17 + $0x94] ss:$8 sps:$4 sm:$0xff]  }
 0x4b9   : > { %v10616_v41 = vpop.f32.mrb[44].mxu1  ;;  %v3522_v20 = vmul.f32 %v10550_v0, %v3362_v18  ;;  %v3235_v25 = vmul.f32 %v10571_v17, %v3203_v3  ;;  %v3617_v29 = vadd.f32 1.0, %v3585_v28  ;;  %v10629_v7 = vmul.f32 %v8342_v6, %v10326_v40 }
 0x4ba   : > { %13586 = vst [vmem:[#allocation78_spill] sm:$0xff] %v10620_v39  ;;  %v10622_v47 = vpop.f32.mrb[45].mxu1  ;;  %v2679_v57 = vadd.f32 1e-05, %v2663_v9  ;;  %v2747_v54 = vmul.f32 %v10394_v32, %v10443_v24  ;;  %v3013_v31 = vadd.f32 1.0, %v2981_v10  ;;  %v3429_v36 = vmul.f32 %v3397_v23, %v2949_v22 }
 0x4bb   : > { %v10626_v2 = vpop.f32.mrb[46].mxu1  ;;  %13587 = vst [vmem:[#allocation79_spill] sm:$0xff] %v10629_v7  ;;  %v3554_v48 = vsub.f32 1.0, %v3522_v20  ;;  %v3267_v0 = vadd.f32 -0.28449672, %v3235_v25  ;;  %v13588_v18 = vsub.f32 1.0, %v10514_v30  ;;  %v3648_v28 = vmul.f32 %v3616_v37, %v10427_v35  ;;  %v2648_v25 = vpop.xlane.xlu1 %2647 }
 0x4bc   : > { %v10633_v61 = vpop.f32.mrb[47].mxu1  ;;  %v10635_v1 = vpop.eup %8343  ;;  %v2790_v6 = vadd.f32 %v10402_v56, %v2747_v54  ;;  %8349 = vrcp.f32 %v3013_v31  ;;  %v3649_v22 = vmul.f32 %v3617_v29, %v10435_v55  ;;  %vm2885_vm6 = vcmp.ge.f32.partialorder %v2853_v33, 0.0 }
 0x4bd   : > { %v10639_v3 = vmul.f32 %v13588_v18, %v3647_v46  ;;  %v3108_v40 = vmul.f32 1.0614054, %v10635_v1  ;;  %v8346_v9 = vpop.eup %8345  ;;  %v3586_v24 = vmul.f32 %v3554_v48, %v10476_v60  ;;  %v3299_v14 = vmul.f32 %v10571_v17, %v3267_v0 }
 0x4be   : > { %v2854_v46 = vmul.f32 0.70710677, %v2790_v6  ;;  %v3467_v37 = vmul.f32 1.442695, %v3429_v36  ;;  %8351 = vrsqrt.f32 %v2679_v57  ;;  %v2664_v48 = vmul.f32 0.00390625, %v2648_v25 }
 0x4bf   : > { %13589 = vst [vmem:[#allocation80_spill] sm:$0xff] %v10639_v3  ;;  %v3140_v30 = vadd.f32 -1.4531521, %v3108_v40  ;;  %v3618_v10 = vadd.f32 1.0, %v3586_v24  ;;  %v3331_v35 = vadd.f32 0.2548296, %v3299_v14  ;;  %v2748_v0 = vmul.f32 %v10391_v11, %v10451_v43 }
 0x4c0   : > { %v2950_v60 = vand.u32 2147483647, %v2854_v46  ;;  %v10655_v18 = vpop.eup %8347  ;;  %v13590_v55 = vsub.f32 1.0, %v10517_v50  ;;  %v10663_v29 = vsel %vm2885_vm6, 1.0, %v13563_v16  ;;  %v10667_v57 = vadd.f32 %v10554_v15, %v10419_v26 }
 0x4c1   : > { %v10648_v23 = vpop.f32.mrb[48].mxu1  ;;  %v3172_v54 = vmul.f32 %v10635_v1, %v3140_v30  ;;  %v3363_v14 = vmul.f32 %v10571_v17, %v3331_v35  ;;  %v13592_v43 = vsub.f32 1.0, %v10530_v53  ;;  %v2791_v50 = vadd.f32 %v10399_v63, %v2748_v0  ;;  %v8083_v0 = vld [vmem:[#allocation17 + $0x84] ss:$8 sps:$4 sm:$0xff]  }
 0x4c2   : > { %v10653_v31 = vpop.f32.mrb[49].mxu1  ;;  %v10659_v33 = vmul.f32 %v13590_v55, %v3648_v28  ;;  %v2982_v25 = vmul.f32 0.3275911, %v2950_v60  ;;  %v3650_v17 = vmul.f32 %v3618_v10, %v10460_v45  ;;  %8353 = vpow2.f32 %v3467_v37  ;;  %v8081_v10 = vld [vmem:[#allocation17 + $0x80] ss:$8 sps:$4 sm:$0xff]   ;;  %4661 = vmatprep.subr.bf16.mxu0 %v8083_v0 }
 0x4c3   : > { %v10669_v36 = vpop.f32.mrb[50].mxu1  ;;  %v10673_v40 = vmul.f32 %v13592_v43, %v3649_v22  ;;  %v3204_v24 = vadd.f32 1.4214138, %v3172_v54  ;;  %v3523_v30 = vmul.f32 %v8346_v9, %v3363_v14  ;;  %v3398_v35 = vsub.f32 0.0, %v2950_v60  ;;  %4662 = vmatpush1.bf16.msra.mxu0 %v8081_v10 }
 0x4c4   : > { %13591 = vst [vmem:[#allocation81_spill] sm:$0xff] %v10659_v33  ;;  %v10676_v28 = vpop.f32.mrb[51].mxu1  ;;  %vm2886_vm7 = vcmp.ge.f32.partialorder %v2854_v46, 0.0  ;;  %v3014_v55 = vadd.f32 1.0, %v2982_v25  ;;  %v2680_v20 = vadd.f32 1e-05, %v2664_v48  ;;  %v10682_v22 = vadd.f32 %v10576_v58, %v10416_v21  ;;  %4663 = vmatprep.subr.bf16.mxu0 %v8086_v44 }
 0x4c5   : > { %13593 = vst [vmem:[#allocation82_spill] sm:$0xff] %v10673_v40  ;;  %13594 = vst [vmem:[#allocation83_spill] sm:$0xff] %v10676_v28  ;;  %v3236_v15 = vmul.f32 %v10635_v1, %v3204_v24  ;;  %v3555_v33 = vsub.f32 1.0, %v3523_v30  ;;  %v2855_v53 = vmul.f32 0.70710677, %v2791_v50  ;;  %v2749_v54 = vmul.f32 %v10394_v32, %v10454_v8 }
 0x4c6   : > { %v10686_v45 = vmul.f32 0.5, %v2790_v6  ;;  %8355 = vrcp.f32 %v3014_v55  ;;  %v10689_v37 = vpop.eup %8349  ;;  %v13595_v48 = vsub.f32 1.0, %v10537_v38  ;;  %v10698_v24 = vsel %vm2886_vm7, 1.0, %v13563_v16  ;;  %v8087_v28 = vld [vmem:[#allocation17 + $0xa0] ss:$8 sps:$4 sm:$0xff]  }
 0x4c7   : > { %v3268_v43 = vadd.f32 -0.28449672, %v3236_v15  ;;  %v3587_v58 = vmul.f32 %v3555_v33, %v10503_v12  ;;  %v3430_v8 = vmul.f32 %v3398_v35, %v2950_v60  ;;  %v3109_v30 = vmul.f32 1.0614054, %v10689_v37 }
 0x4c8   : > { %v10693_v14 = vmul.f32 %v13595_v48, %v3650_v17  ;;  %8357 = vrsqrt.f32 %v2680_v20  ;;  %v10704_v15 = vmul.f32 0.5, %v2791_v50  ;;  %v8352_v17 = vpop.eup %8351  ;;  %vm2887_vm8 = vcmp.ge.f32.partialorder %v2855_v53, 0.0 }
 0x4c9   : > { %v10700_v25 = vpop.f32.mrb[52].mxu1  ;;  %v3300_v6 = vmul.f32 %v10635_v1, %v3268_v43  ;;  %v2951_v12 = vand.u32 2147483647, %v2855_v53  ;;  %v2792_v60 = vadd.f32 %v10402_v56, %v2749_v54  ;;  %v3619_v35 = vadd.f32 1.0, %v3587_v58  ;;  %v13600_v43 = vld [vmem:[#allocation50_spill] sm:$0xff]  ;;  %v13601_v54 = vld [vmem:[#allocation60_spill] sm:$0xff] }
 0x4ca   : > { %13596 = vst [vmem:[#allocation84_spill] sm:$0xff] %v10693_v14  ;;  %13597 = vst [vmem:[#allocation85_spill] sm:$0xff] %v10700_v25  ;;  %v10706_v38 = vpop.f32.mrb[53].mxu1  ;;  %v3141_v0 = vadd.f32 -1.4531521, %v3109_v30  ;;  %v2750_v20 = vmul.f32 %v10391_v11, %v13600_v43  ;;  %v10716_v10 = vadd.f32 %v10580_v52, %v10419_v26  ;;  %v10721_v40 = vmul.f32 %v8352_v17, %v13601_v54  ;;  %v13603_v30 = vld [vmem:[#allocation61_spill] sm:$0xff] }
 0x4cb   : > { %13598 = vst [vmem:[#allocation86_spill] sm:$0xff] %v10706_v38  ;;  %v10710_v33 = vpop.f32.mrb[54].mxu1  ;;  %v3332_v55 = vadd.f32 0.2548296, %v3300_v6  ;;  %v3469_v50 = vmul.f32 1.442695, %v3430_v8  ;;  %v10724_v3 = vmul.f32 %v8352_v17, %v13603_v30  ;;  %v10736_v17 = vadd.f32 %v10587_v51, %v10416_v21 }
 0x4cc   : > { %13599 = vst [vmem:[#allocation87_spill] sm:$0xff] %v10710_v33  ;;  %v2983_v48 = vmul.f32 0.3275911, %v2951_v12  ;;  %v3399_v9 = vsub.f32 0.0, %v2951_v12  ;;  %v3173_v46 = vmul.f32 %v10689_v37, %v3141_v0  ;;  %13602 = vst [vmem:[#allocation50_spill] sm:$0xff] %v10721_v40  ;;  %v8354_v6 = vpop.eup %8353  ;;  %v10728_v8 = vsel %vm2887_vm8, 1.0, %v13563_v16 }
 0x4cd   : > { %v3364_v14 = vmul.f32 %v10635_v1, %v3332_v55  ;;  %v2856_v58 = vmul.f32 0.70710677, %v2792_v60  ;;  %13604 = vst [vmem:[#allocation60_spill] sm:$0xff] %v10724_v3  ;;  %v13605_v52 = vld [vmem:[#allocation64_spill] sm:$0xff]  ;;  %v2793_v0 = vadd.f32 %v10399_v63, %v2750_v20  ;;  %v10744_v20 = vpop.f32.mrb[55].mxu1  ;;  %v13607_v51 = vsub.f32 1.0, %v10565_v42 }
 0x4ce   : > { %v3015_v43 = vadd.f32 1.0, %v2983_v48  ;;  %v3431_v7 = vmul.f32 %v3399_v9, %v2951_v12  ;;  %v3651_v39 = vmul.f32 %v3619_v35, %v13605_v52  ;;  %v3205_v55 = vadd.f32 1.4214138, %v3173_v46  ;;  %13606 = vst [vmem:[#allocation61_spill] sm:$0xff] %v10744_v20  ;;  %v13610_v3 = vld [vmem:[#allocation51_spill] sm:$0xff] }
 0x4cf   : > { %v3524_v1 = vmul.f32 %v10655_v18, %v3364_v14  ;;  %v2952_v54 = vand.u32 2147483647, %v2856_v58  ;;  %v10741_v35 = vmul.f32 0.5, %v2792_v60  ;;  %vm2888_vm9 = vcmp.ge.f32.partialorder %v2856_v58, 0.0  ;;  %v8084_v42 = vld [vmem:[#allocation17 + $0x90] ss:$8 sps:$4 sm:$0xff]  }
 0x4d0   : > { %8359 = vrcp.f32 %v3015_v43  ;;  %v10738_v53 = vpop.eup %8355  ;;  %v3237_v9 = vmul.f32 %v10689_v37, %v3205_v55  ;;  %v3471_v12 = vmul.f32 1.442695, %v3431_v7  ;;  %v10750_v43 = vmul.f32 %v13607_v51, %v3651_v39  ;;  %v13609_v55 = vld [vmem:[#allocation68_spill] sm:$0xff]  ;;  %4664 = vmatpush1.bf16.msra.mxu0 %v8084_v42  ;;  %v13616_v42 = vld [vmem:[#allocation65_spill] sm:$0xff] }
 0x4d1   : > { %v3556_v30 = vsub.f32 1.0, %v3524_v1  ;;  %v3110_v18 = vmul.f32 1.0614054, %v10738_v53  ;;  %8361 = vpow2.f32 %v3469_v50  ;;  %v2984_v14 = vmul.f32 0.3275911, %v2952_v54 }
 0x4d2   : > { %v3400_v46 = vsub.f32 0.0, %v2952_v54  ;;  %v10746_v48 = vpop.eup %8357  ;;  %13608 = vst [vmem:[#allocation64_spill] sm:$0xff] %v10750_v43  ;;  %v3269_v52 = vadd.f32 -0.28449672, %v3237_v9  ;;  %v2857_v1 = vmul.f32 0.70710677, %v2793_v0  ;;  %v2751_v50 = vmul.f32 %v10394_v32, %v13610_v3 }
 0x4d3   : > { %v3588_v7 = vmul.f32 %v3556_v30, %v13609_v55  ;;  %v3142_v60 = vadd.f32 -1.4531521, %v3110_v18  ;;  %v3016_v40 = vadd.f32 1.0, %v2984_v14  ;;  %v13611_v9 = vld [vmem:[#allocation62_spill] sm:$0xff]  ;;  %v10763_v30 = vsel %vm2888_vm9, 1.0, %v13563_v16  ;;  %v10767_v14 = vpop.f32.mrb[56].mxu1 }
 0x4d4   : > { %v3301_v62 = vmul.f32 %v10689_v37, %v3269_v52  ;;  %v3432_v20 = vmul.f32 %v3400_v46, %v2952_v54  ;;  %v2953_v33 = vand.u32 2147483647, %v2857_v1  ;;  %v10760_v58 = vmul.f32 %v10746_v48, %v13611_v9  ;;  %13613 = vst [vmem:[#allocation51_spill] sm:$0xff] %v10767_v14 }
 0x4d5   : > { %v3174_v39 = vmul.f32 %v10738_v53, %v3142_v60  ;;  %8363 = vrcp.f32 %v3016_v40  ;;  %v10765_v18 = vmul.f32 0.5, %v2793_v0  ;;  %v3620_v46 = vadd.f32 1.0, %v3588_v7 }
 0x4d6   : > { %13612 = vst [vmem:[#allocation68_spill] sm:$0xff] %v10760_v58  ;;  %v3333_v3 = vadd.f32 0.2548296, %v3301_v62  ;;  %8365 = vpow2.f32 %v3471_v12  ;;  %v2985_v54 = vmul.f32 0.3275911, %v2953_v33  ;;  %vm2889_vm10 = vcmp.ge.f32.partialorder %v2857_v1, 0.0 }
 0x4d7   : > { %v3206_v51 = vadd.f32 1.4214138, %v3174_v39  ;;  %v2794_v52 = vadd.f32 %v10402_v56, %v2751_v50  ;;  %v3473_v60 = vmul.f32 1.442695, %v3432_v20  ;;  %v3401_v13 = vsub.f32 0.0, %v2953_v33  ;;  %v13615_v12 = vld [vmem:[#allocation54_spill] sm:$0xff] }
 0x4d8   : > { %v3365_v55 = vmul.f32 %v10689_v37, %v3333_v3  ;;  %v3017_v9 = vadd.f32 1.0, %v2985_v54  ;;  %v10776_v0 = vadd.f32 %v10596_v5, %v10419_v26  ;;  %v2752_v7 = vmul.f32 %v10391_v11, %v13615_v12 }
 0x4d9   : > { %v3238_v62 = vmul.f32 %v10738_v53, %v3206_v51  ;;  %v2858_v44 = vmul.f32 0.70710677, %v2794_v52  ;;  %v10782_v37 = vsel %vm2889_vm10, 1.0, %v13563_v16  ;;  %v3652_v39 = vmul.f32 %v3620_v46, %v13616_v42 }
 0x4da   : > { %v10771_v40 = vpop.eup %8359  ;;  %13614 = vst [vmem:[#allocation62_spill] sm:$0xff] %v10776_v0  ;;  %v3525_v1 = vmul.f32 %v8354_v6, %v3365_v55  ;;  %8367 = vrcp.f32 %v3017_v9  ;;  %v2795_v51 = vadd.f32 %v10399_v63, %v2752_v7  ;;  %v3433_v58 = vmul.f32 %v3401_v13, %v2953_v33 }
 0x4db   : > { %v3111_v50 = vmul.f32 1.0614054, %v10771_v40  ;;  %v8362_v20 = vpop.eup %8361  ;;  %v3270_v3 = vadd.f32 -0.28449672, %v3238_v62  ;;  %v2954_v54 = vand.u32 2147483647, %v2858_v44  ;;  %8369 = vpow2.f32 %v3473_v60 }
 0x4dc   : > { %v3557_v43 = vsub.f32 1.0, %v3525_v1  ;;  %v10789_v9 = vmul.f32 0.5, %v2794_v52  ;;  %vm2890_vm11 = vcmp.ge.f32.partialorder %v2858_v44, 0.0  ;;  %v2859_v46 = vmul.f32 0.70710677, %v2795_v51  ;;  %v13617_v60 = vld [vmem:[#allocation66_spill] sm:$0xff] }
 0x4dd   : > { %v3143_v5 = vadd.f32 -1.4531521, %v3111_v50  ;;  %v3302_v12 = vmul.f32 %v10738_v53, %v3270_v3  ;;  %v2986_v6 = vmul.f32 0.3275911, %v2954_v54  ;;  %v3402_v55 = vsub.f32 0.0, %v2954_v54 }
 0x4de   : > { %v3589_v7 = vmul.f32 %v3557_v43, %v10663_v29  ;;  %v2753_v13 = vmul.f32 %v10394_v32, %v13617_v60  ;;  %v3475_v14 = vmul.f32 1.442695, %v3433_v58  ;;  %v10799_v44 = vsel %vm2890_vm11, 1.0, %v13563_v16  ;;  %v10803_v29 = vpop.f32.mrb[57].mxu1 }
 0x4df   : > { %v3175_v38 = vmul.f32 %v10771_v40, %v3143_v5  ;;  %v10791_v62 = vpop.eup %8363  ;;  %v3334_v1 = vadd.f32 0.2548296, %v3302_v12  ;;  %v3018_v50 = vadd.f32 1.0, %v2986_v6  ;;  %v3434_v49 = vmul.f32 %v3402_v55, %v2954_v54  ;;  %13619 = vst [vmem:[#allocation65_spill] sm:$0xff] %v10803_v29  ;;  %v10819_v25 = vpop.f32.mrb[58].mxu1 }
 0x4e0   : > { %v8366_v33 = vpop.eup %8365  ;;  %v3112_v3 = vmul.f32 1.0614054, %v10791_v62  ;;  %v10801_v5 = vmul.f32 0.5, %v2795_v51  ;;  %vm2891_vm12 = vcmp.ge.f32.partialorder %v2859_v46, 0.0  ;;  %v2955_v6 = vand.u32 2147483647, %v2859_v46 }
 0x4e1   : > { %v3207_v42 = vadd.f32 1.4214138, %v3175_v38  ;;  %v3366_v52 = vmul.f32 %v10738_v53, %v3334_v1  ;;  %8371 = vrcp.f32 %v3018_v50  ;;  %v3621_v38 = vadd.f32 1.0, %v3589_v7 }
 0x4e2   : > { %13618 = vst [vmem:[#allocation54_spill] sm:$0xff] %v10801_v5  ;;  %v3144_v12 = vadd.f32 -1.4531521, %v3112_v3  ;;  %v10808_v58 = vadd.f32 %v10616_v41, %v10416_v21  ;;  %v2796_v53 = vadd.f32 %v10402_v56, %v2753_v13  ;;  %v3477_v1 = vmul.f32 1.442695, %v3434_v49  ;;  %v13622_v49 = vld [vmem:[#allocation63_spill] sm:$0xff] }
 0x4e3   : > { %v3239_v43 = vmul.f32 %v10771_v40, %v3207_v42  ;;  %v3526_v60 = vmul.f32 %v8362_v20, %v3366_v52  ;;  %v2987_v50 = vmul.f32 0.3275911, %v2955_v6  ;;  %v10816_v46 = vsel %vm2891_vm12, 1.0, %v13563_v16  ;;  %v8089_v5 = vld [vmem:[#allocation17 + $0xa4] ss:$8 sps:$4 sm:$0xff]  }
 0x4e4   : > { %v10811_v54 = vpop.eup %8367  ;;  %v3176_v51 = vmul.f32 %v10791_v62, %v3144_v12  ;;  %v3403_v20 = vsub.f32 0.0, %v2955_v6  ;;  %v2860_v13 = vmul.f32 0.70710677, %v2796_v53  ;;  %8373 = vpow2.f32 %v3475_v14  ;;  %4665 = vmatprep.subr.bf16.mxu0 %v8089_v5 }
 0x4e5   : > { %v3271_v55 = vadd.f32 -0.28449672, %v3239_v43  ;;  %v3558_v29 = vsub.f32 1.0, %v3526_v60  ;;  %v3113_v42 = vmul.f32 1.0614054, %v10811_v54  ;;  %v8370_v7 = vpop.eup %8369  ;;  %v3019_v52 = vadd.f32 1.0, %v2987_v50  ;;  %4666 = vmatpush1.bf16.msra.mxu0 %v8087_v28 }
 0x4e6   : > { %v3208_v3 = vadd.f32 1.4214138, %v3176_v51  ;;  %v13620_v43 = vsub.f32 1.0, %v10574_v34  ;;  %v10827_v60 = vmul.f32 %v10746_v48, %v13622_v49  ;;  %v3653_v0 = vmul.f32 %v3621_v38, %v10613_v27 }
 0x4e7   : > { %v3303_v41 = vmul.f32 %v10771_v40, %v3271_v55  ;;  %v3145_v59 = vadd.f32 -1.4531521, %v3113_v42  ;;  %8375 = vrcp.f32 %v3019_v52  ;;  %v3590_v50 = vmul.f32 %v3558_v29, %v10698_v24  ;;  %v13623_v24 = vld [vmem:[#allocation67_spill] sm:$0xff] }
 0x4e8   : > { %v10823_v12 = vmul.f32 %v13620_v43, %v3652_v39  ;;  %v3240_v51 = vmul.f32 %v10791_v62, %v3208_v3  ;;  %8377 = vpow2.f32 %v3477_v1  ;;  %v3435_v39 = vmul.f32 %v3403_v20, %v2955_v6 }
 0x4e9   : > { %v3335_v55 = vadd.f32 0.2548296, %v3303_v41  ;;  %v3177_v34 = vmul.f32 %v10811_v54, %v3145_v59  ;;  %v2956_v42 = vand.u32 2147483647, %v2860_v13  ;;  %vm2892_vm13 = vcmp.ge.f32.partialorder %v2860_v13, 0.0 }
 0x4ea   : > { %13621 = vst [vmem:[#allocation66_spill] sm:$0xff] %v10823_v12  ;;  %v3272_v43 = vadd.f32 -0.28449672, %v3240_v51  ;;  %v10839_v38 = vadd.f32 %v10622_v47, %v10419_v26  ;;  %v2754_v59 = vmul.f32 %v10391_v11, %v13623_v24  ;;  %v3622_v1 = vadd.f32 1.0, %v3590_v50  ;;  %v10853_v24 = vpop.f32.mrb[59].mxu1 }
 0x4eb   : > { %v3367_v48 = vmul.f32 %v10771_v40, %v3335_v55  ;;  %v10835_v49 = vpop.eup %8371  ;;  %v3209_v27 = vadd.f32 1.4214138, %v3177_v34  ;;  %v2988_v6 = vmul.f32 0.3275911, %v2956_v42  ;;  %v3479_v20 = vmul.f32 1.442695, %v3435_v39 }
 0x4ec   : > { %v3304_v5 = vmul.f32 %v10791_v62, %v3272_v43  ;;  %v3114_v40 = vmul.f32 1.0614054, %v10835_v49  ;;  %v2797_v41 = vadd.f32 %v10399_v63, %v2754_v59  ;;  %v13624_v51 = vsub.f32 1.0, %v10604_v19 }
 0x4ed   : > { %v3527_v29 = vmul.f32 %v8366_v33, %v3367_v48  ;;  %v3241_v28 = vmul.f32 %v10811_v54, %v3209_v27  ;;  %v3020_v47 = vadd.f32 1.0, %v2988_v6  ;;  %v10851_v48 = vmul.f32 0.5, %v2796_v53 }
 0x4ee   : > { %v3336_v52 = vadd.f32 0.2548296, %v3304_v5  ;;  %v3146_v55 = vadd.f32 -1.4531521, %v3114_v40  ;;  %v10849_v34 = vmul.f32 %v13624_v51, %v3653_v0  ;;  %v2861_v43 = vmul.f32 0.70710677, %v2797_v41  ;;  %v8374_v59 = vpop.eup %8373 }
 0x4ef   : > { %v3559_v3 = vsub.f32 1.0, %v3527_v29  ;;  %v3273_v33 = vadd.f32 -0.28449672, %v3241_v28  ;;  %8379 = vrcp.f32 %v3020_v47  ;;  %v3404_v27 = vsub.f32 0.0, %v2956_v42 }
 0x4f0   : > { %13625 = vst [vmem:[#allocation63_spill] sm:$0xff] %v10849_v34  ;;  %v3368_v50 = vmul.f32 %v10791_v62, %v3336_v52  ;;  %v3178_v39 = vmul.f32 %v10835_v49, %v3146_v55  ;;  %v3654_v29 = vmul.f32 %v3622_v1, %v10686_v45  ;;  %v10861_v19 = vsel %vm2892_vm13, 1.0, %v13563_v16  ;;  %v8090_v52 = vld [vmem:[#allocation17 + $0xb0] ss:$8 sps:$4 sm:$0xff]   ;;  %v8092_v34 = vld [vmem:[#allocation17 + $0xb4] ss:$8 sps:$4 sm:$0xff]  }
 0x4f1   : > { %v3305_v5 = vmul.f32 %v10811_v54, %v3273_v33  ;;  %v2957_v0 = vand.u32 2147483647, %v2861_v43  ;;  %v10863_v53 = vpop.eup %8375  ;;  %v3591_v40 = vmul.f32 %v3559_v3, %v10728_v8  ;;  %8381 = vpow2.f32 %v3479_v20  ;;  %4667 = vmatprep.subr.bf16.mxu0 %v8092_v34  ;;  %v13629_v34 = vld [vmem:[#allocation69_spill] sm:$0xff] }
 0x4f2   : > { %v3528_v6 = vmul.f32 %v8370_v7, %v3368_v50  ;;  %v3210_v62 = vadd.f32 1.4214138, %v3178_v39  ;;  %v8378_v55 = vpop.eup %8377  ;;  %v3115_v45 = vmul.f32 1.0614054, %v10863_v53  ;;  %v3436_v33 = vmul.f32 %v3404_v27, %v2956_v42  ;;  %v10874_v39 = vpop.f32.mrb[60].mxu1  ;;  %4668 = vmatpush1.bf16.msra.mxu0 %v8090_v52 }
 0x4f3   : > { %v3337_v47 = vadd.f32 0.2548296, %v3305_v5  ;;  %v2989_v1 = vmul.f32 0.3275911, %v2957_v0  ;;  %v3405_v14 = vsub.f32 0.0, %v2957_v0  ;;  %v13626_v12 = vsub.f32 1.0, %v10667_v57 }
 0x4f4   : > { %v3560_v51 = vsub.f32 1.0, %v3528_v6  ;;  %v3242_v13 = vmul.f32 %v10835_v49, %v3210_v62  ;;  %v3147_v3 = vadd.f32 -1.4531521, %v3115_v45  ;;  %v3623_v5 = vadd.f32 1.0, %v3591_v40 }
 0x4f5   : > { %v10871_v8 = vmul.f32 %v13626_v12, %v3654_v29  ;;  %v3369_v7 = vmul.f32 %v10811_v54, %v3337_v47  ;;  %v3021_v50 = vadd.f32 1.0, %v2989_v1  ;;  %vm2893_vm14 = vcmp.ge.f32.partialorder %v2861_v43, 0.0  ;;  %v13628_v29 = vld [vmem:[#allocation55_spill] sm:$0xff] }
 0x4f6   : > { %v3592_v20 = vmul.f32 %v3560_v51, %v10763_v30  ;;  %v3274_v28 = vadd.f32 -0.28449672, %v3242_v13  ;;  %v3179_v42 = vmul.f32 %v10863_v53, %v3147_v3  ;;  %v3437_v27 = vmul.f32 %v3405_v14, %v2957_v0 }
 0x4f7   : > { %13627 = vst [vmem:[#allocation67_spill] sm:$0xff] %v10871_v8  ;;  %v3529_v6 = vmul.f32 %v8374_v59, %v3369_v7  ;;  %8383 = vrcp.f32 %v3021_v50  ;;  %v3481_v12 = vmul.f32 1.442695, %v3436_v33  ;;  %v10879_v54 = vmul.f32 0.5, %v2797_v41 }
 0x4f8   : > { %v3306_v57 = vmul.f32 %v10835_v49, %v3274_v28  ;;  %v2755_v62 = vmul.f32 %v10394_v32, %v13628_v29  ;;  %v3624_v40 = vadd.f32 1.0, %v3592_v20  ;;  %v3211_v47 = vadd.f32 1.4214138, %v3179_v42 }
 0x4f9   : > { %v10884_v30 = vsel %vm2893_vm14, 1.0, %v13563_v16  ;;  %v2756_v43 = vmul.f32 %v10391_v11, %v13629_v34  ;;  %v10888_v59 = vpop.eup %8379  ;;  %v3655_v14 = vmul.f32 %v3623_v5, %v10704_v15  ;;  %v3561_v0 = vsub.f32 1.0, %v3529_v6  ;;  %v10907_v6 = vpop.f32.mrb[61].mxu1 }
 0x4fa   : > { %v3338_v28 = vadd.f32 0.2548296, %v3306_v57  ;;  %v2798_v41 = vadd.f32 %v10402_v56, %v2755_v62  ;;  %v3243_v52 = vmul.f32 %v10863_v53, %v3211_v47  ;;  %v3116_v45 = vmul.f32 1.0614054, %v10888_v59 }
 0x4fb   : > { %v3483_v1 = vmul.f32 1.442695, %v3437_v27  ;;  %v10896_v51 = vadd.f32 %v10626_v2, %v10416_v21  ;;  %8385 = vpow2.f32 %v3481_v12  ;;  %v10901_v15 = vadd.f32 %v10633_v61, %v10419_v26  ;;  %v8382_v7 = vpop.eup %8381 }
 0x4fc   : > { %v3370_v13 = vmul.f32 %v10835_v49, %v3338_v28  ;;  %v2862_v33 = vmul.f32 0.70710677, %v2798_v41  ;;  %v3656_v3 = vmul.f32 %v3624_v40, %v10741_v35  ;;  %v3275_v50 = vadd.f32 -0.28449672, %v3243_v52 }
 0x4fd   : > { %v3148_v5 = vadd.f32 -1.4531521, %v3116_v45  ;;  %v10905_v20 = vadd.f32 %v10399_v63, %v2756_v43  ;;  %v13630_v2 = vsub.f32 1.0, %v10682_v22  ;;  %v3593_v49 = vmul.f32 %v3561_v0, %v10782_v37 }
 0x4fe   : > { %v3530_v27 = vmul.f32 %v8378_v55, %v3370_v13  ;;  %v2958_v57 = vand.u32 2147483647, %v2862_v33  ;;  %v3307_v61 = vmul.f32 %v10863_v53, %v3275_v50  ;;  %8387 = vpow2.f32 %v3483_v1 }
 0x4ff   : > { %v10911_v42 = vmul.f32 %v13630_v2, %v3655_v14  ;;  %v3180_v12 = vmul.f32 %v10888_v59, %v3148_v5  ;;  %v13632_v22 = vsub.f32 1.0, %v10716_v10  ;;  %v2863_v14 = vmul.f32 0.70710677, %v10905_v20 }
 0x500   : > { %v3562_v29 = vsub.f32 1.0, %v3530_v27  ;;  %v2990_v62 = vmul.f32 0.3275911, %v2958_v57  ;;  %v3406_v40 = vsub.f32 0.0, %v2958_v57  ;;  %v3339_v37 = vadd.f32 0.2548296, %v3307_v61 }
 0x501   : > { %13631 = vst [vmem:[#allocation55_spill] sm:$0xff] %v10911_v42  ;;  %v10918_v34 = vpop.eup %8383  ;;  %v10922_v43 = vmul.f32 %v13632_v22, %v3656_v3  ;;  %v3212_v55 = vadd.f32 1.4214138, %v3180_v12  ;;  %v3625_v0 = vadd.f32 1.0, %v3593_v49  ;;  %vm2894_vm15 = vcmp.ge.f32.partialorder %v2862_v33, 0.0 }
 0x502   : > { %v3117_v28 = vmul.f32 1.0614054, %v10918_v34  ;;  %v3022_v52 = vadd.f32 1.0, %v2990_v62  ;;  %v3371_v45 = vmul.f32 %v10863_v53, %v3339_v37  ;;  %v10928_v13 = vmul.f32 0.5, %v2798_v41 }
 0x503   : > { %13633 = vst [vmem:[#allocation69_spill] sm:$0xff] %v10922_v43  ;;  %v3244_v1 = vmul.f32 %v10888_v59, %v3212_v55  ;;  %v2959_v50 = vand.u32 2147483647, %v2863_v14  ;;  %v3594_v10 = vmul.f32 %v3562_v29, %v10799_v44  ;;  %v3438_v5 = vmul.f32 %v3406_v40, %v2958_v57  ;;  %v10940_v44 = vpop.f32.mrb[62].mxu1  ;;  %v8093_v29 = vld [vmem:[#allocation17 + $0xc0] ss:$8 sps:$4 sm:$0xff]  }
 0x504   : > { %v3149_v3 = vadd.f32 -1.4531521, %v3117_v28  ;;  %8389 = vrcp.f32 %v3022_v52  ;;  %v3531_v2 = vmul.f32 %v8382_v7, %v3371_v45  ;;  %v10932_v49 = vsel %vm2894_vm15, 1.0, %v13563_v16  ;;  %v8095_v57 = vld [vmem:[#allocation17 + $0xc4] ss:$8 sps:$4 sm:$0xff]  }
 0x505   : > { %v3276_v27 = vadd.f32 -0.28449672, %v3244_v1  ;;  %v2991_v61 = vmul.f32 0.3275911, %v2959_v50  ;;  %v8386_v33 = vpop.eup %8385  ;;  %v3657_v12 = vmul.f32 %v3625_v0, %v10765_v18  ;;  %v3407_v62 = vsub.f32 0.0, %v2959_v50  ;;  %v13634_v18 = vld [vmem:[#allocation70_spill] sm:$0xff]  ;;  %4669 = vmatprep.subr.bf16.mxu0 %v8095_v57 }
 0x506   : > { %v3181_v53 = vmul.f32 %v10918_v34, %v3149_v3  ;;  %v10938_v41 = vadd.f32 %v10648_v23, %v10416_v21  ;;  %v3563_v7 = vsub.f32 1.0, %v3531_v2  ;;  %vm2895_vm0 = vcmp.ge.f32.partialorder %v2863_v14, 0.0  ;;  %4670 = vmatpush1.bf16.msra.mxu0 %v8093_v29 }
 0x507   : > { %v3308_v40 = vmul.f32 %v10888_v59, %v3276_v27  ;;  %v3023_v22 = vadd.f32 1.0, %v2991_v61  ;;  %v3626_v37 = vadd.f32 1.0, %v3594_v10  ;;  %v3485_v28 = vmul.f32 1.442695, %v3438_v5  ;;  %v13635_v5 = vld [vmem:[#allocation71_spill] sm:$0xff] }
 0x508   : > { %v3213_v55 = vadd.f32 1.4214138, %v3181_v53  ;;  %v2757_v0 = vmul.f32 %v10394_v32, %v13634_v18  ;;  %v8388_v52 = vpop.eup %8387  ;;  %v3595_v23 = vmul.f32 %v3563_v7, %v10816_v46  ;;  %v3439_v1 = vmul.f32 %v3407_v62, %v2959_v50 }
 0x509   : > { %v3340_v45 = vadd.f32 0.2548296, %v3308_v40  ;;  %8391 = vrcp.f32 %v3023_v22  ;;  %v10950_v10 = vadd.f32 %v10653_v31, %v10419_v26  ;;  %v2758_v27 = vmul.f32 %v10391_v11, %v13635_v5 }
 0x50a   : > { %v3245_v3 = vmul.f32 %v10918_v34, %v3213_v55  ;;  %v2800_v2 = vadd.f32 %v10402_v56, %v2757_v0  ;;  %v13636_v61 = vsub.f32 1.0, %v10736_v17  ;;  %v10960_v50 = vmul.f32 0.5, %v10905_v20 }
 0x50b   : > { %v3372_v46 = vmul.f32 %v10888_v59, %v3340_v45  ;;  %v10964_v62 = vsel %vm2895_vm0, 1.0, %v13563_v16  ;;  %v3658_v29 = vmul.f32 %v3626_v37, %v10789_v9  ;;  %8393 = vpow2.f32 %v3485_v28  ;;  %v10982_v28 = vpop.f32.mrb[63].mxu1 }
 0x50c   : > { %v10956_v53 = vmul.f32 %v13636_v61, %v3657_v12  ;;  %v3277_v31 = vadd.f32 -0.28449672, %v3245_v3  ;;  %v2864_v57 = vmul.f32 0.70710677, %v2800_v2  ;;  %v3627_v7 = vadd.f32 1.0, %v3595_v23  ;;  %13638 = vst [vmem:[#allocation71_spill] sm:$0xff] %v10982_v28 }
 0x50d   : > { %v3532_v40 = vmul.f32 %v8386_v33, %v3372_v46  ;;  %v10969_v12 = vadd.f32 %v10399_v63, %v2758_v27  ;;  %v3487_v22 = vmul.f32 1.442695, %v3439_v1  ;;  %v10978_v37 = vadd.f32 %v10669_v36, %v10416_v21  ;;  %v13639_v3 = vld [vmem:[#allocation62_spill] sm:$0xff] }
 0x50e   : > { %13637 = vst [vmem:[#allocation70_spill] sm:$0xff] %v10956_v53  ;;  %v10971_v59 = vpop.eup %8389  ;;  %v3309_v20 = vmul.f32 %v10918_v34, %v3277_v31  ;;  %v2960_v14 = vand.u32 2147483647, %v2864_v57  ;;  %v2759_v33 = vmul.f32 %v10394_v32, %v10545_v4  ;;  %v10984_v23 = vmul.f32 0.5, %v2800_v2  ;;  %v13642_v61 = vld [vmem:[#allocation54_spill] sm:$0xff] }
 0x50f   : > { %v3564_v18 = vsub.f32 1.0, %v3532_v40  ;;  %v3118_v9 = vmul.f32 1.0614054, %v10971_v59  ;;  %v13640_v5 = vsub.f32 1.0, %v13639_v3  ;;  %v3659_v46 = vmul.f32 %v3627_v7, %v13642_v61  ;;  %v8098_v40 = vld [vmem:[#allocation17 + $0xd4] ss:$8 sps:$4 sm:$0xff]  }
 0x510   : > { %v3341_v0 = vadd.f32 0.2548296, %v3309_v20  ;;  %v2992_v45 = vmul.f32 0.3275911, %v2960_v14  ;;  %v3408_v1 = vsub.f32 0.0, %v2960_v14  ;;  %vm2896_vm1 = vcmp.ge.f32.partialorder %v2864_v57, 0.0  ;;  %4671 = vmatprep.subr.bf16.mxu0 %v8098_v40 }
 0x511   : > { %v10988_v27 = vmul.f32 %v13640_v5, %v3658_v29  ;;  %v3150_v31 = vadd.f32 -1.4531521, %v3118_v9  ;;  %v2865_v36 = vmul.f32 0.70710677, %v10969_v12  ;;  %v3596_v55 = vmul.f32 %v3564_v18, %v10861_v19  ;;  %v8096_v2 = vld [vmem:[#allocation17 + $0xd0] ss:$8 sps:$4 sm:$0xff]  }
 0x512   : > { %v3373_v4 = vmul.f32 %v10918_v34, %v3341_v0  ;;  %v3024_v20 = vadd.f32 1.0, %v2992_v45  ;;  %v2802_v7 = vadd.f32 %v10402_v56, %v2759_v33  ;;  %v3440_v19 = vmul.f32 %v3408_v1, %v2960_v14  ;;  %4672 = vmatpush1.bf16.msra.mxu0 %v8096_v2  ;;  %v11000_v34 = vpop.f32.mrb[64].mxu1  ;;  %v8101_v2 = vld [vmem:[#allocation17 + $0xe4] ss:$8 sps:$4 sm:$0xff]  }
 0x513   : > { %13641 = vst [vmem:[#allocation62_spill] sm:$0xff] %v10988_v27  ;;  %v10994_v17 = vpop.eup %8391  ;;  %v3182_v47 = vmul.f32 %v10971_v59, %v3150_v31  ;;  %v2961_v3 = vand.u32 2147483647, %v2865_v36  ;;  %v11004_v0 = vsel %vm2896_vm1, 1.0, %v13563_v16  ;;  %v11006_v61 = vpop.f32.mrb[65].mxu1  ;;  %v3628_v33 = vadd.f32 1.0, %v3596_v55  ;;  %4673 = vmatprep.subr.bf16.mxu0 %v8101_v2 }
 0x514   : > { %v3533_v9 = vmul.f32 %v8388_v52, %v3373_v4  ;;  %v3119_v5 = vmul.f32 1.0614054, %v10994_v17  ;;  %8395 = vrcp.f32 %v3024_v20  ;;  %v11010_v20 = vpop.f32.mrb[66].mxu1  ;;  %v13643_v14 = vsub.f32 1.0, %v10808_v58  ;;  %v13645_v58 = vld [vmem:[#allocation72_spill] sm:$0xff] }
 0x515   : > { %v3214_v18 = vadd.f32 1.4214138, %v3182_v47  ;;  %8397 = vpow2.f32 %v3487_v22  ;;  %v2993_v45 = vmul.f32 0.3275911, %v2961_v3  ;;  %v11008_v31 = vpop.eup %8393  ;;  %v3409_v4 = vsub.f32 0.0, %v2961_v3 }
 0x516   : > { %v3565_v52 = vsub.f32 1.0, %v3533_v9  ;;  %v3151_v40 = vadd.f32 -1.4531521, %v3119_v5  ;;  %v11014_v1 = vmul.f32 %v13643_v14, %v3659_v46  ;;  %vm2897_vm2 = vcmp.ge.f32.partialorder %v2865_v36, 0.0  ;;  %v8099_v22 = vld [vmem:[#allocation17 + $0xe0] ss:$8 sps:$4 sm:$0xff]  }
 0x517   : > { %v3246_v47 = vmul.f32 %v10971_v59, %v3214_v18  ;;  %v3025_v57 = vadd.f32 1.0, %v2993_v45  ;;  %v3489_v35 = vmul.f32 1.442695, %v3440_v19  ;;  %v3441_v28 = vmul.f32 %v3409_v4, %v2961_v3  ;;  %v11018_v9 = vpop.f32.mrb[67].mxu1  ;;  %v8104_v18 = vld [vmem:[#allocation17 + $0xf4] ss:$8 sps:$4 sm:$0xff]   ;;  %4674 = vmatpush1.bf16.msra.mxu0 %v8099_v22 }
 0x518   : > { %13644 = vst [vmem:[#allocation54_spill] sm:$0xff] %v11014_v1  ;;  %v3183_v29 = vmul.f32 %v10994_v17, %v3151_v40  ;;  %v2866_v55 = vmul.f32 0.70710677, %v2802_v7  ;;  %v3597_v5 = vmul.f32 %v3565_v52, %v10884_v30  ;;  %v2760_v46 = vmul.f32 %v10391_v11, %v13645_v58  ;;  %v13646_v3 = vld [vmem:[#allocation83_spill] sm:$0xff]  ;;  %4675 = vmatprep.subr.bf16.mxu0 %v8104_v18 }
 0x519   : > { %v3278_v27 = vadd.f32 -0.28449672, %v3246_v47  ;;  %8399 = vrcp.f32 %v3025_v57  ;;  %v3660_v45 = vmul.f32 %v3628_v33, %v10851_v48  ;;  %v11025_v1 = vmul.f32 0.5, %v10969_v12  ;;  %v8102_v47 = vld [vmem:[#allocation17 + $0xf0] ss:$8 sps:$4 sm:$0xff]   ;;  %v11040_v33 = vpop.f32.mrb[68].mxu1 }
 0x51a   : > { %v3215_v14 = vadd.f32 1.4214138, %v3183_v29  ;;  %v11029_v19 = vadd.f32 %v13646_v3, %v10419_v26  ;;  %v11034_v52 = vsel %vm2897_vm2, 1.0, %v13563_v16  ;;  %v2962_v40 = vand.u32 2147483647, %v2866_v55 }
 0x51b   : > { %v3310_v30 = vmul.f32 %v10971_v59, %v3278_v27  ;;  %v2803_v4 = vadd.f32 %v10399_v63, %v2760_v46  ;;  %8401 = vpow2.f32 %v3489_v35  ;;  %v3491_v12 = vmul.f32 1.442695, %v3441_v28  ;;  %4676 = vmatpush1.bf16.msra.mxu0 %v8102_v47  ;;  %v11048_v35 = vpop.f32.mrb[69].mxu1  ;;  %v13651_v47 = vld [vmem:[#allocation73_spill] sm:$0xff] }
 0x51c   : > { %v3247_v48 = vmul.f32 %v10994_v17, %v3215_v14  ;;  %v11038_v29 = vmul.f32 0.5, %v2802_v7  ;;  %v3629_v57 = vadd.f32 1.0, %v3597_v5  ;;  %vm2898_vm3 = vcmp.ge.f32.partialorder %v2866_v55, 0.0  ;;  %13649 = vst [vmem:[#allocation83_spill] sm:$0xff] %v11048_v35  ;;  %v11053_v53 = vpop.f32.mrb[70].mxu1 }
 0x51d   : > { %v3342_v22 = vadd.f32 0.2548296, %v3310_v30  ;;  %v2994_v27 = vmul.f32 0.3275911, %v2962_v40  ;;  %v13647_v2 = vsub.f32 1.0, %v10839_v38  ;;  %v3410_v18 = vsub.f32 0.0, %v2962_v40 }
 0x51e   : > { %v11042_v36 = vpop.eup %8395  ;;  %v3279_v46 = vadd.f32 -0.28449672, %v3247_v48  ;;  %v2867_v3 = vmul.f32 0.70710677, %v2803_v4  ;;  %13650 = vst [vmem:[#allocation88_spill] sm:$0xff] %v11053_v53 }
 0x51f   : > { %v11046_v58 = vmul.f32 %v13647_v2, %v3660_v45  ;;  %v8398_v28 = vpop.eup %8397  ;;  %v3374_v7 = vmul.f32 %v10971_v59, %v3342_v22  ;;  %v3120_v5 = vmul.f32 1.0614054, %v11042_v36  ;;  %v3026_v14 = vadd.f32 1.0, %v2994_v27  ;;  %v8107_v59 = vld [vmem:[#allocation20 + $0x4] ss:$8 sps:$4 sm:$0xff]  }
 0x520   : > { %v3311_v38 = vmul.f32 %v10994_v17, %v3279_v46  ;;  %v11058_v45 = vsel %vm2898_vm3, 1.0, %v13563_v16  ;;  %v2963_v48 = vand.u32 2147483647, %v2867_v3  ;;  %v2761_v2 = vmul.f32 %v10394_v32, %v13651_v47  ;;  %6487 = vmatprep.subr.bf16.mxu0 %v8107_v59 }
 0x521   : > { %13648 = vst [vmem:[#allocation72_spill] sm:$0xff] %v11046_v58  ;;  %v11062_v58 = vpop.f32.mrb[71].mxu1  ;;  %v3661_v22 = vmul.f32 %v3629_v57, %v10879_v54  ;;  %v3534_v27 = vmul.f32 %v11008_v31, %v3374_v7  ;;  %v3152_v30 = vadd.f32 -1.4531521, %v3120_v5  ;;  %8403 = vrcp.f32 %v3026_v14  ;;  %v13653_v57 = vld [vmem:[#allocation85_spill] sm:$0xff] }
 0x522   : > { %13652 = vst [vmem:[#allocation73_spill] sm:$0xff] %v11062_v58  ;;  %v3343_v43 = vadd.f32 0.2548296, %v3311_v38  ;;  %8405 = vpow2.f32 %v3491_v12  ;;  %v3442_v46 = vmul.f32 %v3410_v18, %v2962_v40  ;;  %v2995_v42 = vmul.f32 0.3275911, %v2963_v48  ;;  %v11076_v40 = vpop.f32.mrb[72].mxu1 }
 0x523   : > { %v11066_v55 = vpop.eup %8399  ;;  %v3566_v8 = vsub.f32 1.0, %v3534_v27  ;;  %v3184_v53 = vmul.f32 %v11042_v36, %v3152_v30  ;;  %v3411_v47 = vsub.f32 0.0, %v2963_v48  ;;  %v2804_v58 = vadd.f32 %v10402_v56, %v2761_v2  ;;  %13654 = vst [vmem:[#allocation85_spill] sm:$0xff] %v11076_v40  ;;  %v11081_v30 = vpop.f32.mrb[73].mxu1 }
 0x524   : > { %v3375_v35 = vmul.f32 %v10994_v17, %v3343_v43  ;;  %v3121_v54 = vmul.f32 1.0614054, %v11066_v55  ;;  %v3027_v31 = vadd.f32 1.0, %v2995_v42  ;;  %v11074_v7 = vadd.f32 %v13653_v57, %v10416_v21  ;;  %13655 = vst [vmem:[#allocation89_spill] sm:$0xff] %v11081_v30  ;;  %v11083_v42 = vpop.f32.mrb[74].mxu1 }
 0x525   : > { %v3598_v12 = vmul.f32 %v3566_v8, %v10932_v49  ;;  %v3216_v18 = vadd.f32 1.4214138, %v3184_v53  ;;  %v11079_v5 = vmul.f32 0.5, %v2803_v4  ;;  %v2868_v14 = vmul.f32 0.70710677, %v2804_v58  ;;  %v8402_v38 = vpop.eup %8401  ;;  %13656 = vst [vmem:[#allocation90_spill] sm:$0xff] %v11083_v42 }
 0x526   : > { %v3535_v2 = vmul.f32 %v8398_v28, %v3375_v35  ;;  %v3153_v43 = vadd.f32 -1.4531521, %v3121_v54  ;;  %vm2899_vm4 = vcmp.ge.f32.partialorder %v2867_v3, 0.0  ;;  %8407 = vrcp.f32 %v3027_v31  ;;  %v11086_v40 = vpop.f32.mrb[75].mxu1 }
 0x527   : > { %v3248_v17 = vmul.f32 %v11042_v36, %v3216_v18  ;;  %v3493_v59 = vmul.f32 1.442695, %v3442_v46  ;;  %v3443_v27 = vmul.f32 %v3411_v47, %v2963_v48  ;;  %v2964_v57 = vand.u32 2147483647, %v2868_v14  ;;  %13657 = vst [vmem:[#allocation91_spill] sm:$0xff] %v11086_v40  ;;  %v11094_v30 = vpop.f32.mrb[76].mxu1 }
 0x528   : > { %v3630_v8 = vadd.f32 1.0, %v3598_v12  ;;  %v3567_v49 = vsub.f32 1.0, %v3535_v2  ;;  %v3185_v53 = vmul.f32 %v11066_v55, %v3153_v43  ;;  %v13658_v35 = vsub.f32 1.0, %v10896_v51  ;;  %13660 = vst [vmem:[#allocation93_spill] sm:$0xff] %v11094_v30  ;;  %v13661_v12 = vld [vmem:[#allocation74_spill] sm:$0xff] }
 0x529   : > { %v3280_v54 = vadd.f32 -0.28449672, %v3248_v17  ;;  %v2996_v31 = vmul.f32 0.3275911, %v2964_v57  ;;  %v3412_v42 = vsub.f32 0.0, %v2964_v57  ;;  %v11099_v47 = vsel %vm2899_vm4, 1.0, %v13563_v16 }
 0x52a   : > { %v11092_v28 = vmul.f32 %v13658_v35, %v3661_v22  ;;  %v3599_v48 = vmul.f32 %v3567_v49, %v10964_v62  ;;  %v3217_v46 = vadd.f32 1.4214138, %v3185_v53  ;;  %v2762_v18 = vmul.f32 %v10391_v11, %v13661_v12  ;;  %v11106_v17 = vpop.f32.mrb[77].mxu1 }
 0x52b   : > { %v11103_v2 = vpop.eup %8403  ;;  %v3312_v51 = vmul.f32 %v11042_v36, %v3280_v54  ;;  %8409 = vpow2.f32 %v3493_v59  ;;  %v3495_v22 = vmul.f32 1.442695, %v3443_v27  ;;  %v3028_v43 = vadd.f32 1.0, %v2996_v31  ;;  %13662 = vst [vmem:[#allocation74_spill] sm:$0xff] %v11106_v17  ;;  %v11110_v53 = vpop.f32.mrb[78].mxu1 }
 0x52c   : > { %13659 = vst [vmem:[#allocation92_spill] sm:$0xff] %v11092_v28  ;;  %v8406_v35 = vpop.eup %8405  ;;  %v3249_v62 = vmul.f32 %v11066_v55, %v3217_v46  ;;  %v3122_v49 = vmul.f32 1.0614054, %v11103_v2  ;;  %vm2900_vm5 = vcmp.ge.f32.partialorder %v2868_v14, 0.0  ;;  %v3444_v3 = vmul.f32 %v3412_v42, %v2964_v57  ;;  %13663 = vst [vmem:[#allocation94_spill] sm:$0xff] %v11110_v53  ;;  %v11114_v59 = vpop.f32.mrb[79].mxu1 }
 0x52d   : > { %v3662_v12 = vmul.f32 %v3630_v8, %v10928_v13  ;;  %v3344_v4 = vadd.f32 0.2548296, %v3312_v51  ;;  %8411 = vrcp.f32 %v3028_v43  ;;  %v2805_v54 = vadd.f32 %v10399_v63, %v2762_v18  ;;  %13664 = vst [vmem:[#allocation95_spill] sm:$0xff] %v11114_v59  ;;  %v11122_v57 = vpop.f32.mrb[80].mxu1  ;;  %v13666_v51 = vld [vmem:[#allocation86_spill] sm:$0xff]  ;;  %v13671_v59 = vld [vmem:[#allocation75_spill] sm:$0xff] }
 0x52e   : > { %v3631_v27 = vadd.f32 1.0, %v3599_v48  ;;  %v3281_v31 = vadd.f32 -0.28449672, %v3249_v62  ;;  %v3154_v28 = vadd.f32 -1.4531521, %v3122_v49  ;;  %v11116_v17 = vmul.f32 0.5, %v2804_v58 }
 0x52f   : > { %v3376_v46 = vmul.f32 %v11042_v36, %v3344_v4  ;;  %8413 = vpow2.f32 %v3495_v22  ;;  %v11120_v14 = vsel %vm2900_vm5, 1.0, %v13563_v16  ;;  %v2869_v42 = vmul.f32 0.70710677, %v2805_v54  ;;  %13665 = vst [vmem:[#allocation96_spill] sm:$0xff] %v11122_v57  ;;  %v11132_v43 = vpop.f32.mrb[81].mxu1 }
 0x530   : > { %v11124_v13 = vpop.eup %8407  ;;  %v3313_v8 = vmul.f32 %v11066_v55, %v3281_v31  ;;  %v3186_v18 = vmul.f32 %v11103_v2, %v3154_v28  ;;  %v3497_v48 = vmul.f32 1.442695, %v3444_v3  ;;  %v11130_v58 = vadd.f32 %v13666_v51, %v10419_v26  ;;  %13667 = vst [vmem:[#allocation86_spill] sm:$0xff] %v11132_v43  ;;  %v11139_v57 = vpop.f32.mrb[82].mxu1 }
 0x531   : > { %v13668_v36 = vsub.f32 1.0, %v10901_v15  ;;  %v3536_v22 = vmul.f32 %v8402_v38, %v3376_v46  ;;  %v3123_v62 = vmul.f32 1.0614054, %v11124_v13  ;;  %v2965_v49 = vand.u32 2147483647, %v2869_v42  ;;  %13670 = vst [vmem:[#allocation98_spill] sm:$0xff] %v11139_v57 }
 0x532   : > { %v3663_v31 = vmul.f32 %v3631_v27, %v10960_v50  ;;  %v3345_v28 = vadd.f32 0.2548296, %v3313_v8  ;;  %v3218_v3 = vadd.f32 1.4214138, %v3186_v18  ;;  %v2763_v51 = vmul.f32 %v10394_v32, %v13671_v59  ;;  %v11144_v53 = vpop.f32.mrb[83].mxu1 }
 0x533   : > { %v11136_v4 = vmul.f32 %v13668_v36, %v3662_v12  ;;  %13672 = vst [vmem:[#allocation75_spill] sm:$0xff] %v11144_v53  ;;  %v3568_v43 = vsub.f32 1.0, %v3536_v22  ;;  %v3155_v30 = vadd.f32 -1.4531521, %v3123_v62  ;;  %v2997_v15 = vmul.f32 0.3275911, %v2965_v49 }
 0x534   : > { %v3413_v12 = vsub.f32 0.0, %v2965_v49  ;;  %v3377_v38 = vmul.f32 %v11066_v55, %v3345_v28  ;;  %v3250_v46 = vmul.f32 %v11103_v2, %v3218_v3  ;;  %v13673_v36 = vld [vmem:[#allocation87_spill] sm:$0xff]  ;;  %v2806_v50 = vadd.f32 %v10402_v56, %v2763_v51  ;;  %v11153_v27 = vpop.f32.mrb[84].mxu1 }
 0x535   : > { %13669 = vst [vmem:[#allocation97_spill] sm:$0xff] %v11136_v4  ;;  %v11150_v57 = vadd.f32 %v13673_v36, %v10416_v21  ;;  %13674 = vst [vmem:[#allocation87_spill] sm:$0xff] %v11153_v27  ;;  %v8410_v8 = vpop.eup %8409  ;;  %v3600_v59 = vmul.f32 %v3568_v43, %v11004_v0  ;;  %v3187_v18 = vmul.f32 %v11124_v13, %v3155_v30  ;;  %8415 = vpow2.f32 %v3497_v48  ;;  %v11157_v62 = vpop.f32.mrb[85].mxu1 }
 0x536   : > { %v3029_v22 = vadd.f32 1.0, %v2997_v15  ;;  %13675 = vst [vmem:[#allocation99_spill] sm:$0xff] %v11157_v62  ;;  %v3537_v55 = vmul.f32 %v8406_v35, %v3377_v38  ;;  %v3282_v28 = vadd.f32 -0.28449672, %v3250_v46  ;;  %vm2901_vm6 = vcmp.ge.f32.partialorder %v2869_v42, 0.0  ;;  %v11159_v53 = vpop.f32.mrb[86].mxu1 }
 0x537   : > { %v2870_v3 = vmul.f32 0.70710677, %v2806_v50  ;;  %13676 = vst [vmem:[#allocation100_spill] sm:$0xff] %v11159_v53  ;;  %v11161_v36 = vpop.eup %8411  ;;  %v3219_v51 = vadd.f32 1.4214138, %v3187_v18  ;;  %v3445_v4 = vmul.f32 %v3413_v12, %v2965_v49  ;;  %v11164_v0 = vpop.f32.mrb[87].mxu1 }
 0x538   : > { %8417 = vrcp.f32 %v3029_v22  ;;  %13677 = vst [vmem:[#allocation101_spill] sm:$0xff] %v11164_v0  ;;  %v3569_v30 = vsub.f32 1.0, %v3537_v55  ;;  %v3314_v48 = vmul.f32 %v11103_v2, %v3282_v28  ;;  %v3124_v43 = vmul.f32 1.0614054, %v11161_v36  ;;  %v11176_v49 = vpop.f32.mrb[88].mxu1  ;;  %v13681_v42 = vld [vmem:[#allocation76_spill] sm:$0xff] }
 0x539   : > { %v11168_v35 = vmul.f32 0.5, %v2805_v54  ;;  %v8414_v15 = vpop.eup %8413  ;;  %v3632_v38 = vadd.f32 1.0, %v3600_v59  ;;  %v3251_v46 = vmul.f32 %v11124_v13, %v3219_v51  ;;  %v11173_v18 = vsel %vm2901_vm6, 1.0, %v13563_v16  ;;  %13678 = vst [vmem:[#allocation102_spill] sm:$0xff] %v11176_v49  ;;  %v13680_v59 = vld [vmem:[#allocation61_spill] sm:$0xff]  ;;  %v11188_v40 = vpop.f32.mrb[89].mxu1 }
 0x53a   : > { %v13679_v12 = vsub.f32 1.0, %v10938_v41  ;;  %v3346_v28 = vadd.f32 0.2548296, %v3314_v48  ;;  %v3156_v27 = vadd.f32 -1.4531521, %v3124_v43  ;;  %v11184_v51 = vadd.f32 %v13680_v59, %v10419_v26  ;;  %13682 = vst [vmem:[#allocation61_spill] sm:$0xff] %v11188_v40 }
 0x53b   : > { %v2966_v54 = vand.u32 2147483647, %v2870_v3  ;;  %v3283_v0 = vadd.f32 -0.28449672, %v3251_v46  ;;  %v3499_v53 = vmul.f32 1.442695, %v3445_v4  ;;  %v2764_v62 = vmul.f32 %v10391_v11, %v13681_v42 }
 0x53c   : > { %v11180_v55 = vmul.f32 %v13679_v12, %v3663_v31  ;;  %v3601_v22 = vmul.f32 %v3569_v30, %v11034_v52  ;;  %v3378_v41 = vmul.f32 %v11103_v2, %v3346_v28  ;;  %v3188_v31 = vmul.f32 %v11161_v36, %v3156_v27  ;;  %v11193_v43 = vpop.f32.mrb[90].mxu1 }
 0x53d   : > { %v2998_v48 = vmul.f32 0.3275911, %v2966_v54  ;;  %13683 = vst [vmem:[#allocation76_spill] sm:$0xff] %v11193_v43  ;;  %v3664_v4 = vmul.f32 %v3632_v38, %v10984_v23  ;;  %v3315_v46 = vmul.f32 %v11124_v13, %v3283_v0  ;;  %v11197_v12 = vmul.f32 0.5, %v2806_v50  ;;  %v11200_v42 = vpop.f32.mrb[91].mxu1 }
 0x53e   : > { %v2807_v59 = vadd.f32 %v10399_v63, %v2764_v62  ;;  %13684 = vst [vmem:[#allocation103_spill] sm:$0xff] %v11200_v42  ;;  %v3538_v40 = vmul.f32 %v8410_v8, %v3378_v41  ;;  %v3220_v49 = vadd.f32 1.4214138, %v3188_v31  ;;  %vm2902_vm7 = vcmp.ge.f32.partialorder %v2870_v3, 0.0  ;;  %v11202_v2 = vpop.f32.mrb[92].mxu1 }
 0x53f   : > { %v3030_v52 = vadd.f32 1.0, %v2998_v48  ;;  %13685 = vst [vmem:[#allocation104_spill] sm:$0xff] %v11202_v2  ;;  %v8416_v27 = vpop.eup %8415  ;;  %v3347_v30 = vadd.f32 0.2548296, %v3315_v46  ;;  %8419 = vpow2.f32 %v3499_v53  ;;  %v3414_v28 = vsub.f32 0.0, %v2966_v54  ;;  %v11204_v23 = vpop.f32.mrb[93].mxu1 }
 0x540   : > { %v2871_v43 = vmul.f32 0.70710677, %v2807_v59  ;;  %13686 = vst [vmem:[#allocation105_spill] sm:$0xff] %v11204_v23  ;;  %v3633_v0 = vadd.f32 1.0, %v3601_v22  ;;  %v3570_v50 = vsub.f32 1.0, %v3538_v40  ;;  %v3252_v38 = vmul.f32 %v11161_v36, %v3220_v49  ;;  %v11207_v62 = vpop.f32.mrb[94].mxu1 }
 0x541   : > { %8421 = vrcp.f32 %v3030_v52  ;;  %13687 = vst [vmem:[#allocation106_spill] sm:$0xff] %v11207_v62  ;;  %v13688_v41 = vsub.f32 1.0, %v10950_v10  ;;  %v3379_v48 = vmul.f32 %v11124_v13, %v3347_v30  ;;  %v11218_v53 = vsel %vm2902_vm7, 1.0, %v13563_v16  ;;  %v11220_v22 = vpop.f32.mrb[95].mxu1 }
 0x542   : > { %v11209_v8 = vpop.eup %8417  ;;  %v2967_v46 = vand.u32 2147483647, %v2871_v43  ;;  %13689 = vst [vmem:[#allocation107_spill] sm:$0xff] %v11220_v22  ;;  %v3602_v40 = vmul.f32 %v3570_v50, %v11058_v45  ;;  %v3284_v49 = vadd.f32 -0.28449672, %v3252_v38  ;;  %v11225_v23 = vpop.f32.mrb[96].mxu1  ;;  %v3665_v3 = vmul.f32 %v3633_v0, %v11025_v1 }
 0x543   : > { %v11213_v31 = vmul.f32 %v13688_v41, %v3664_v4  ;;  %v3125_v52 = vmul.f32 1.0614054, %v11209_v8  ;;  %13690 = vst [vmem:[#allocation108_spill] sm:$0xff] %v11225_v23  ;;  %v3539_v10 = vmul.f32 %v8414_v15, %v3379_v48  ;;  %v3446_v4 = vmul.f32 %v3414_v28, %v2966_v54  ;;  %v11227_v30 = vpop.f32.mrb[97].mxu1  ;;  %v13692_v45 = vld [vmem:[#allocation51_spill] sm:$0xff]  ;;  %v13694_v15 = vld [vmem:[#allocation77_spill] sm:$0xff] }
 0x544   : > { %v2999_v41 = vmul.f32 0.3275911, %v2967_v46  ;;  %v3415_v13 = vsub.f32 0.0, %v2967_v46  ;;  %13691 = vst [vmem:[#allocation109_spill] sm:$0xff] %v11227_v30  ;;  %v3316_v2 = vmul.f32 %v11161_v36, %v3284_v49  ;;  %v11233_v50 = vadd.f32 %v13692_v45, %v10416_v21  ;;  %v11235_v38 = vpop.f32.mrb[98].mxu1 }
 0x545   : > { %v3157_v22 = vadd.f32 -1.4531521, %v3125_v52  ;;  %13693 = vst [vmem:[#allocation51_spill] sm:$0xff] %v11235_v38  ;;  %v3634_v62 = vadd.f32 1.0, %v3602_v40  ;;  %v3571_v42 = vsub.f32 1.0, %v3539_v10  ;;  %v2765_v54 = vmul.f32 %v10394_v32, %v13694_v15  ;;  %v11239_v28 = vpop.f32.mrb[99].mxu1 }
 0x546   : > { %v3031_v23 = vadd.f32 1.0, %v2999_v41  ;;  %13695 = vst [vmem:[#allocation77_spill] sm:$0xff] %v11239_v28  ;;  %v3348_v48 = vadd.f32 0.2548296, %v3316_v2  ;;  %vm2903_vm8 = vcmp.ge.f32.partialorder %v2871_v43, 0.0  ;;  %v3447_v0 = vmul.f32 %v3415_v13, %v2967_v46  ;;  %v11245_v30 = vpop.f32.mrb[100].mxu1 }
 0x547   : > { %v3189_v1 = vmul.f32 %v11209_v8, %v3157_v22  ;;  %v3501_v49 = vmul.f32 1.442695, %v3446_v4  ;;  %v11242_v52 = vmul.f32 0.5, %v2807_v59  ;;  %v2808_v45 = vadd.f32 %v10402_v56, %v2765_v54  ;;  %13696 = vst [vmem:[#allocation110_spill] sm:$0xff] %v11245_v30  ;;  %v11253_v22 = vpop.f32.mrb[101].mxu1  ;;  %v13700_v4 = vld [vmem:[#allocation65_spill] sm:$0xff] }
 0x548   : > { %8423 = vrcp.f32 %v3031_v23  ;;  %v13697_v40 = vsub.f32 1.0, %v10978_v37  ;;  %v3603_v41 = vmul.f32 %v3571_v42, %v11099_v47  ;;  %v3380_v2 = vmul.f32 %v11161_v36, %v3348_v48  ;;  %13699 = vst [vmem:[#allocation112_spill] sm:$0xff] %v11253_v22  ;;  %v11263_v37 = vpop.f32.mrb[102].mxu1  ;;  %v13702_v54 = vld [vmem:[#allocation78_spill] sm:$0xff] }
 0x549   : > { %v3221_v15 = vadd.f32 1.4214138, %v3189_v1  ;;  %v8420_v43 = vpop.eup %8419  ;;  %v3666_v59 = vmul.f32 %v3634_v62, %v11038_v29  ;;  %v11257_v23 = vsel %vm2903_vm8, 1.0, %v13563_v16  ;;  %v2872_v46 = vmul.f32 0.70710677, %v2808_v45  ;;  %13701 = vst [vmem:[#allocation65_spill] sm:$0xff] %v11263_v37 }
 0x54a   : > { %v11249_v10 = vmul.f32 %v13697_v40, %v3665_v3  ;;  %v11261_v13 = vadd.f32 %v13700_v4, %v10419_v26  ;;  %v3540_v47 = vmul.f32 %v8416_v27, %v3380_v2  ;;  %v3503_v42 = vmul.f32 1.442695, %v3447_v0  ;;  %v11270_v29 = vpop.f32.mrb[103].mxu1 }
 0x54b   : > { %v11265_v3 = vpop.eup %8421  ;;  %v3253_v36 = vmul.f32 %v11209_v8, %v3221_v15  ;;  %v2766_v48 = vmul.f32 %v10391_v11, %v13702_v54  ;;  %13703 = vst [vmem:[#allocation78_spill] sm:$0xff] %v11270_v29  ;;  %8425 = vpow2.f32 %v3501_v49  ;;  %v2968_v40 = vand.u32 2147483647, %v2872_v46  ;;  %v11274_v4 = vpop.f32.mrb[104].mxu1 }
 0x54c   : > { %13698 = vst [vmem:[#allocation111_spill] sm:$0xff] %v11249_v10  ;;  %v3126_v62 = vmul.f32 1.0614054, %v11265_v3  ;;  %13704 = vst [vmem:[#allocation113_spill] sm:$0xff] %v11274_v4  ;;  %v3635_v37 = vadd.f32 1.0, %v3603_v41  ;;  %v3572_v22 = vsub.f32 1.0, %v3540_v47  ;;  %8427 = vpow2.f32 %v3503_v42 }
 0x54d   : > { %v3285_v28 = vadd.f32 -0.28449672, %v3253_v36  ;;  %v2809_v27 = vadd.f32 %v10399_v63, %v2766_v48  ;;  %v11277_v2 = vpop.f32.mrb[105].mxu1  ;;  %v13706_v0 = vsub.f32 1.0, %v11029_v19  ;;  %v3000_v29 = vmul.f32 0.3275911, %v2968_v40 }
 0x54e   : > { %13705 = vst [vmem:[#allocation114_spill] sm:$0xff] %v11277_v2  ;;  %v3158_v54 = vadd.f32 -1.4531521, %v3126_v62  ;;  %v3416_v30 = vsub.f32 0.0, %v2968_v40  ;;  %v11283_v49 = vpop.f32.mrb[106].mxu1  ;;  %v3604_v48 = vmul.f32 %v3572_v22, %v11120_v14  ;;  %vm2904_vm9 = vcmp.ge.f32.partialorder %v2872_v46, 0.0 }
 0x54f   : > { %v11281_v15 = vmul.f32 %v13706_v0, %v3666_v59  ;;  %13708 = vst [vmem:[#allocation116_spill] sm:$0xff] %v11283_v49  ;;  %v3317_v1 = vmul.f32 %v11209_v8, %v3285_v28  ;;  %v2873_v47 = vmul.f32 0.70710677, %v2809_v27  ;;  %v11287_v36 = vpop.f32.mrb[107].mxu1  ;;  %v3032_v19 = vadd.f32 1.0, %v3000_v29 }
 0x550   : > { %13709 = vst [vmem:[#allocation117_spill] sm:$0xff] %v11287_v36  ;;  %v3190_v2 = vmul.f32 %v11265_v3, %v3158_v54  ;;  %v11291_v59 = vpop.f32.mrb[108].mxu1  ;;  %v3667_v62 = vmul.f32 %v3635_v37, %v11079_v5  ;;  %v11294_v38 = vmul.f32 0.5, %v2808_v45  ;;  %v3448_v49 = vmul.f32 %v3416_v30, %v2968_v40  ;;  %v13713_v40 = vld [vmem:[#allocation79_spill] sm:$0xff] }
 0x551   : > { %13707 = vst [vmem:[#allocation115_spill] sm:$0xff] %v11281_v15  ;;  %13710 = vst [vmem:[#allocation118_spill] sm:$0xff] %v11291_v59  ;;  %v3349_v0 = vadd.f32 0.2548296, %v3317_v1  ;;  %v2969_v28 = vand.u32 2147483647, %v2873_v47  ;;  %8429 = vrcp.f32 %v3032_v19  ;;  %v11300_v14 = vadd.f32 %v10819_v25, %v10416_v21 }
 0x552   : > { %v11296_v42 = vpop.eup %8423  ;;  %v3222_v41 = vadd.f32 1.4214138, %v3190_v2  ;;  %v11302_v22 = vpop.f32.mrb[109].mxu1  ;;  %v11307_v5 = vsel %vm2904_vm9, 1.0, %v13563_v16  ;;  %v3636_v1 = vadd.f32 1.0, %v3604_v48  ;;  %v2767_v25 = vmul.f32 %v10394_v32, %v13713_v40  ;;  %v13716_v40 = vld [vmem:[#allocation50_spill] sm:$0xff] }
 0x553   : > { %13711 = vst [vmem:[#allocation119_spill] sm:$0xff] %v11302_v22  ;;  %v3381_v46 = vmul.f32 %v11209_v8, %v3349_v0  ;;  %v3127_v29 = vmul.f32 1.0614054, %v11296_v42  ;;  %v3001_v45 = vmul.f32 0.3275911, %v2969_v28  ;;  %v11309_v37 = vpop.f32.mrb[110].mxu1 }
 0x554   : > { %13712 = vst [vmem:[#allocation120_spill] sm:$0xff] %v11309_v37  ;;  %v3254_v2 = vmul.f32 %v11265_v3, %v3222_v41  ;;  %v3417_v30 = vsub.f32 0.0, %v2969_v28  ;;  %v11314_v54 = vpop.f32.mrb[111].mxu1  ;;  %v13715_v19 = vsub.f32 1.0, %v11074_v7  ;;  %v3505_v15 = vmul.f32 1.442695, %v3448_v49 }
 0x555   : > { %13714 = vst [vmem:[#allocation79_spill] sm:$0xff] %v11314_v54  ;;  %v3541_v0 = vmul.f32 %v8420_v43, %v3381_v46  ;;  %v3159_v36 = vadd.f32 -1.4531521, %v3127_v29  ;;  %v3033_v22 = vadd.f32 1.0, %v3001_v45  ;;  %v8426_v59 = vpop.eup %8425  ;;  %v2810_v48 = vadd.f32 %v10402_v56, %v2767_v25  ;;  %v11326_v46 = vpop.f32.mrb[112].mxu1 }
 0x556   : > { %v11318_v8 = vmul.f32 %v13715_v19, %v3667_v62  ;;  %v3286_v4 = vadd.f32 -0.28449672, %v3254_v2  ;;  %v3449_v37 = vmul.f32 %v3417_v30, %v2969_v28  ;;  %v2768_v54 = vmul.f32 %v10391_v11, %v13716_v40  ;;  %13717 = vst [vmem:[#allocation50_spill] sm:$0xff] %v11326_v46  ;;  %v8428_v29 = vpop.eup %8427 }
 0x557   : > { %v3573_v41 = vsub.f32 1.0, %v3541_v0  ;;  %v3191_v10 = vmul.f32 %v11296_v42, %v3159_v36  ;;  %8431 = vrcp.f32 %v3033_v22  ;;  %v3668_v7 = vmul.f32 %v3636_v1, %v11116_v17  ;;  %v11332_v22 = vpop.f32.mrb[113].mxu1 }
 0x558   : > { %v3318_v62 = vmul.f32 %v11265_v3, %v3286_v4  ;;  %vm2905_vm10 = vcmp.ge.f32.partialorder %v2873_v47, 0.0  ;;  %v2874_v43 = vmul.f32 0.70710677, %v2810_v48  ;;  %v11329_v45 = vmul.f32 0.5, %v2809_v27  ;;  %13718 = vst [vmem:[#allocation121_spill] sm:$0xff] %v11332_v22  ;;  %v11339_v1 = vpop.f32.mrb[114].mxu1 }
 0x559   : > { %v3605_v49 = vmul.f32 %v3573_v41, %v11173_v18  ;;  %v3223_v28 = vadd.f32 1.4214138, %v3191_v10  ;;  %v2811_v36 = vadd.f32 %v10399_v63, %v2768_v54  ;;  %v11337_v4 = vadd.f32 %v10853_v24, %v10419_v26  ;;  %13719 = vst [vmem:[#allocation122_spill] sm:$0xff] %v11339_v1  ;;  %v11346_v27 = vpop.f32.mrb[115].mxu1 }
 0x55a   : > { %v3350_v2 = vadd.f32 0.2548296, %v3318_v62  ;;  %v2970_v17 = vand.u32 2147483647, %v2874_v43  ;;  %8433 = vpow2.f32 %v3505_v15  ;;  %v11344_v18 = vsel %vm2905_vm10, 1.0, %v13563_v16  ;;  %13720 = vst [vmem:[#allocation123_spill] sm:$0xff] %v11346_v27 }
 0x55b   : > { %v3255_v25 = vmul.f32 %v11296_v42, %v3223_v28  ;;  %v3507_v10 = vmul.f32 1.442695, %v3449_v37  ;;  %v11348_v54 = vpop.eup %8429  ;;  %v13721_v19 = vsub.f32 1.0, %v11130_v58  ;;  %v2875_v40 = vmul.f32 0.70710677, %v2811_v36 }
 0x55c   : > { %v3382_v24 = vmul.f32 %v11265_v3, %v3350_v2  ;;  %v3002_v41 = vmul.f32 0.3275911, %v2970_v17  ;;  %v3637_v62 = vadd.f32 1.0, %v3605_v49  ;;  %v3128_v15 = vmul.f32 1.0614054, %v11348_v54  ;;  %v11363_v2 = vpop.f32.mrb[116].mxu1 }
 0x55d   : > { %v11352_v0 = vmul.f32 %v13721_v19, %v3668_v7  ;;  %v3287_v28 = vadd.f32 -0.28449672, %v3255_v25  ;;  %vm2906_vm11 = vcmp.ge.f32.partialorder %v2874_v43, 0.0  ;;  %v11356_v30 = vmul.f32 0.5, %v2810_v48  ;;  %13723 = vst [vmem:[#allocation125_spill] sm:$0xff] %v11363_v2 }
 0x55e   : > { %v3542_v47 = vmul.f32 %v8426_v59, %v3382_v24  ;;  %v3034_v37 = vadd.f32 1.0, %v3002_v41  ;;  %v3160_v58 = vadd.f32 -1.4531521, %v3128_v15  ;;  %8435 = vpow2.f32 %v3507_v10  ;;  %v13724_v24 = vld [vmem:[#allocation60_spill] sm:$0xff]  ;;  %v11371_v10 = vpop.f32.mrb[117].mxu1 }
 0x55f   : > { %13722 = vst [vmem:[#allocation124_spill] sm:$0xff] %v11352_v0  ;;  %v3319_v1 = vmul.f32 %v11296_v42, %v3287_v28  ;;  %v3418_v7 = vsub.f32 0.0, %v2970_v17  ;;  %v11361_v3 = vsel %vm2906_vm11, 1.0, %v13563_v16  ;;  %v2971_v49 = vand.u32 2147483647, %v2875_v40  ;;  %13725 = vst [vmem:[#allocation60_spill] sm:$0xff] %v11371_v10 }
 0x560   : > { %v3574_v19 = vsub.f32 1.0, %v3542_v47  ;;  %8437 = vrcp.f32 %v3034_v37  ;;  %v3669_v59 = vmul.f32 %v3637_v62, %v11168_v35  ;;  %v3192_v25 = vmul.f32 %v11348_v54, %v3160_v58  ;;  %v11379_v27 = vpop.f32.mrb[118].mxu1 }
 0x561   : > { %v11365_v43 = vpop.eup %8431  ;;  %v3351_v48 = vadd.f32 0.2548296, %v3319_v1  ;;  %v2769_v41 = vmul.f32 %v10394_v32, %v13724_v24  ;;  %v3003_v47 = vmul.f32 0.3275911, %v2971_v49  ;;  %v11377_v37 = vadd.f32 %v10874_v39, %v10416_v21  ;;  %13726 = vst [vmem:[#allocation126_spill] sm:$0xff] %v11379_v27  ;;  %v11383_v24 = vpop.f32.mrb[119].mxu1 }
 0x562   : > { %v3606_v28 = vmul.f32 %v3574_v19, %v11218_v53  ;;  %v3129_v15 = vmul.f32 1.0614054, %v11365_v43  ;;  %v3224_v1 = vadd.f32 1.4214138, %v3192_v25  ;;  %v3450_v62 = vmul.f32 %v3418_v7, %v2970_v17 }
 0x563   : > { %v3383_v35 = vmul.f32 %v11296_v42, %v3351_v48  ;;  %v2812_v58 = vadd.f32 %v10402_v56, %v2769_v41  ;;  %vm2907_vm12 = vcmp.ge.f32.partialorder %v2875_v40, 0.0  ;;  %v3035_v53 = vadd.f32 1.0, %v3003_v47  ;;  %v11397_v47 = vpop.f32.mrb[120].mxu1 }
 0x564   : > { %v3161_v10 = vadd.f32 -1.4531521, %v3129_v15  ;;  %v3419_v19 = vsub.f32 0.0, %v2971_v49  ;;  %v8434_v2 = vpop.eup %8433  ;;  %v3638_v22 = vadd.f32 1.0, %v3606_v28  ;;  %v3256_v39 = vmul.f32 %v11348_v54, %v3224_v1 }
 0x565   : > { %v3543_v46 = vmul.f32 %v8428_v29, %v3383_v35  ;;  %v11386_v0 = vmul.f32 0.5, %v2811_v36  ;;  %v13727_v27 = vsub.f32 1.0, %v11150_v57  ;;  %8439 = vrcp.f32 %v3035_v53  ;;  %v11407_v35 = vpop.f32.mrb[121].mxu1 }
 0x566   : > { %v3193_v17 = vmul.f32 %v11365_v43, %v3161_v10  ;;  %v2876_v7 = vmul.f32 0.70710677, %v2812_v58  ;;  %v3288_v25 = vadd.f32 -0.28449672, %v3256_v39  ;;  %v3509_v40 = vmul.f32 1.442695, %v3450_v62 }
 0x567   : > { %v11390_v42 = vmul.f32 %v13727_v27, %v3669_v59  ;;  %v3575_v48 = vsub.f32 1.0, %v3543_v46  ;;  %v11394_v41 = vsel %vm2907_vm12, 1.0, %v13563_v16  ;;  %v3451_v29 = vmul.f32 %v3419_v19, %v2971_v49  ;;  %13728 = vst [vmem:[#allocation127_spill] sm:$0xff] %v11407_v35  ;;  %v13729_v19 = vld [vmem:[#allocation68_spill] sm:$0xff] }
 0x568   : > { %v3225_v28 = vadd.f32 1.4214138, %v3193_v17  ;;  %v2972_v36 = vand.u32 2147483647, %v2876_v7  ;;  %v8436_v57 = vpop.eup %8435  ;;  %v3670_v27 = vmul.f32 %v3638_v22, %v11197_v12  ;;  %v3320_v59 = vmul.f32 %v11348_v54, %v3288_v25  ;;  %v11415_v22 = vpop.f32.mrb[122].mxu1 }
 0x569   : > { %v11401_v10 = vmul.f32 0.5, %v2812_v58  ;;  %v11405_v46 = vadd.f32 %v10907_v6, %v10419_v26  ;;  %v3607_v49 = vmul.f32 %v3575_v48, %v11257_v23  ;;  %v2770_v12 = vmul.f32 %v10391_v11, %v13729_v19  ;;  %13730 = vst [vmem:[#allocation68_spill] sm:$0xff] %v11415_v22  ;;  %v11418_v17 = vpop.f32.mrb[123].mxu1 }
 0x56a   : > { %v11409_v1 = vpop.eup %8437  ;;  %v3257_v62 = vmul.f32 %v11365_v43, %v3225_v28  ;;  %v3004_v53 = vmul.f32 0.3275911, %v2972_v36  ;;  %v3352_v58 = vadd.f32 0.2548296, %v3320_v59  ;;  %8441 = vpow2.f32 %v3509_v40  ;;  %13731 = vst [vmem:[#allocation128_spill] sm:$0xff] %v11418_v17  ;;  %v13739_v59 = vld [vmem:[#allocation81_spill] sm:$0xff] }
 0x56b   : > { %v3130_v39 = vmul.f32 1.0614054, %v11409_v1  ;;  %v3420_v6 = vsub.f32 0.0, %v2972_v36  ;;  %v3511_v15 = vmul.f32 1.442695, %v3451_v29  ;;  %v2813_v23 = vadd.f32 %v10399_v63, %v2770_v12 }
 0x56c   : > { %v3289_v25 = vadd.f32 -0.28449672, %v3257_v62  ;;  %v3036_v35 = vadd.f32 1.0, %v3004_v53  ;;  %v13732_v48 = vsub.f32 1.0, %v11184_v51  ;;  %v3384_v11 = vmul.f32 %v11348_v54, %v3352_v58 }
 0x56d   : > { %v3162_v19 = vadd.f32 -1.4531521, %v3130_v39  ;;  %v3639_v22 = vadd.f32 1.0, %v3607_v49  ;;  %vm2908_vm13 = vcmp.ge.f32.partialorder %v2876_v7, 0.0  ;;  %v3452_v62 = vmul.f32 %v3420_v6, %v2972_v36  ;;  %v11437_v49 = vpop.f32.mrb[124].mxu1 }
 0x56e   : > { %v11423_v28 = vmul.f32 %v13732_v48, %v3670_v27  ;;  %v3321_v40 = vmul.f32 %v11365_v43, %v3289_v25  ;;  %8443 = vrcp.f32 %v3036_v35  ;;  %v3544_v17 = vmul.f32 %v8434_v2, %v3384_v11 }
 0x56f   : > { %v3194_v29 = vmul.f32 %v11409_v1, %v3162_v19  ;;  %v2877_v53 = vmul.f32 0.70710677, %v2813_v23  ;;  %v11429_v63 = vpop.eup %8439  ;;  %8445 = vpow2.f32 %v3511_v15  ;;  %v11433_v54 = vadd.f32 %v10940_v44, %v10416_v21 }
 0x570   : > { %v3353_v51 = vadd.f32 0.2548296, %v3321_v40  ;;  %v2771_v27 = vmul.f32 %v10394_v32, %v10827_v60  ;;  %v3576_v7 = vsub.f32 1.0, %v3544_v17  ;;  %v3131_v2 = vmul.f32 1.0614054, %v11429_v63  ;;  %v11451_v60 = vpop.f32.mrb[125].mxu1 }
 0x571   : > { %v3226_v35 = vadd.f32 1.4214138, %v3194_v29  ;;  %v11441_v36 = vsel %vm2908_vm13, 1.0, %v13563_v16  ;;  %v3671_v12 = vmul.f32 %v3639_v22, %v11242_v52  ;;  %v2973_v58 = vand.u32 2147483647, %v2877_v53  ;;  %v11455_v25 = vpop.f32.mrb[126].mxu1 }
 0x572   : > { %v3385_v15 = vmul.f32 %v11365_v43, %v3353_v51  ;;  %v11446_v21 = vadd.f32 %v10402_v56, %v2771_v27  ;;  %v4044_v32 = vld [vmem:[%s13733_s4] sm:$0x3]  ;;  %v3608_v44 = vmul.f32 %v3576_v7, %v11307_v5  ;;  %v3163_v6 = vadd.f32 -1.4531521, %v3131_v2  ;;  %v11458_v48 = vpop.f32.mrb[127].mxu1  ;;  %s7505_s4 = sshll.u32 %s9259_s29, 11 }
 0x573   : > { %v3258_v39 = vmul.f32 %v11409_v1, %v3226_v35  ;;  %v3513_v17 = vmul.f32 1.442695, %v3452_v62  ;;  %v3005_v43 = vmul.f32 0.3275911, %v2973_v58  ;;  %v3421_v22 = vsub.f32 0.0, %v2973_v58  ;;  %v13734_v7 = vld [vmem:[#allocation38_spill] sm:$0xff]  ;;  %s13285_s15 = scalar_lea.hbm %s14036_s30, %s7505_s4 }
 0x574   : > { %v3545_v52 = vmul.f32 %v8436_v57, %v3385_v15  ;;  %v8442_v11 = vpop.eup %8441  ;;  %v3640_v19 = vadd.f32 1.0, %v3608_v44  ;;  %v3195_v29 = vmul.f32 %v11429_v63, %v3163_v6  ;;  %v11462_v5 = vmul.f32 0.70710677, %v11446_v21  ;;  %s6961_s29 = scalar_lea.sflag [#allocation4], %s9670_s23 }
 0x575   : > { %v3290_v40 = vadd.f32 -0.28449672, %v3258_v39  ;;  %v3037_v27 = vadd.f32 1.0, %v3005_v43  ;;  %v3453_v62 = vmul.f32 %v3421_v22, %v2973_v58  ;;  %v11465_v35 = vrot.slane %v4044_v32, %v13734_v7 }
 0x576   : > { %v3577_v51 = vsub.f32 1.0, %v3545_v52  ;;  %v3227_v2 = vadd.f32 1.4214138, %v3195_v29  ;;  %8447 = vpow2.f32 %v3513_v17  ;;  %v11468_v15 = vmul.f32 0.5, %v2813_v23 }
 0x577   : > { %v3322_v57 = vmul.f32 %v11409_v1, %v3290_v40  ;;  %v13735_v44 = vsub.f32 1.0, %v11233_v50  ;;  %v3672_v6 = vmul.f32 %v3640_v19, %v11294_v38  ;;  %8449 = vrcp.f32 %v3037_v27 }
 0x578   : > { %v11470_v56 = vpop.eup %8443  ;;  %v3609_v52 = vmul.f32 %v3577_v51, %v11344_v18  ;;  %v3259_v43 = vmul.f32 %v11429_v63, %v3227_v2  ;;  %vm2909_vm14 = vcmp.ge.f32.partialorder %v2877_v53, 0.0  ;;  %v3515_v40 = vmul.f32 1.442695, %v3453_v62  ;;  %v13736_v18 = vld [vmem:[#allocation39_spill] sm:$0xff]  ;;  %v13738_v2 = vld [vmem:[#allocation80_spill] sm:$0xff] }
 0x579   : > { %v11474_v39 = vmul.f32 %v13735_v44, %v3671_v12  ;;  %v3354_v58 = vadd.f32 0.2548296, %v3322_v57  ;;  %v3132_v22 = vmul.f32 1.0614054, %v11470_v56  ;;  %v8446_v17 = vpop.eup %8445  ;;  %v2974_v29 = vand.u32 2147483647, %v11462_v5 }
 0x57a   : > { %v3641_v23 = vadd.f32 1.0, %v3609_v52  ;;  %v4251_v50 = vadd.f32 %v11000_v34, %v11465_v35  ;;  %v3291_v38 = vadd.f32 -0.28449672, %v3259_v43  ;;  %v11485_v51 = vrot.slane %v4044_v32, %v13736_v18 }
 0x57b   : > { %v3386_v12 = vmul.f32 %v11409_v1, %v3354_v58  ;;  %v3164_v19 = vadd.f32 -1.4531521, %v3132_v22  ;;  %v13737_v27 = vsub.f32 1.0, %v11261_v13  ;;  %v11492_v53 = vsel %vm2909_vm14, 1.0, %v13563_v16 }
 0x57c   : > { %v3006_v62 = vmul.f32 0.3275911, %v2974_v29  ;;  %v4393_v44 = vadd.f32 %v13738_v2, %v4251_v50  ;;  %v3323_v34 = vmul.f32 %v11429_v63, %v3291_v38  ;;  %v4253_v58 = vadd.f32 %v11006_v61, %v11485_v51 }
 0x57d   : > { %v11489_v57 = vmul.f32 %v13737_v27, %v3672_v6  ;;  %v3546_v52 = vmul.f32 %v8442_v11, %v3386_v12  ;;  %v3196_v1 = vmul.f32 %v11470_v56, %v3164_v19  ;;  %v3673_v32 = vmul.f32 %v3641_v23, %v11329_v45  ;;  %v13740_v12 = vld [vmem:[#allocation82_spill] sm:$0xff] }
 0x57e   : > { %8451 = vpow2.f32 %v3515_v40  ;;  %v3038_v13 = vadd.f32 1.0, %v3006_v62  ;;  %v4255_v6 = vadd.f32 %v11010_v20, %v11465_v35  ;;  %v3355_v22 = vadd.f32 0.2548296, %v3323_v34  ;;  %v13742_v34 = vld [vmem:[#allocation84_spill] sm:$0xff] }
 0x57f   : > { %v3578_v43 = vsub.f32 1.0, %v3546_v52  ;;  %v3228_v27 = vadd.f32 1.4214138, %v3196_v1  ;;  %v4394_v50 = vadd.f32 %v13739_v59, %v4253_v58  ;;  %v3422_v11 = vsub.f32 0.0, %v2974_v29 }
 0x580   : > { %8453 = vrcp.f32 %v3038_v13  ;;  %v4395_v38 = vadd.f32 %v13740_v12, %v4255_v6  ;;  %v4257_v19 = vadd.f32 %v11018_v9, %v11485_v51  ;;  %v8448_v61 = vpop.eup %8447  ;;  %v3387_v23 = vmul.f32 %v11429_v63, %v3355_v22  ;;  %v13743_v9 = vld [vmem:[#allocation83_spill] sm:$0xff]  ;;  %v13746_v12 = vld [vmem:[#allocation88_spill] sm:$0xff] }
 0x581   : > { %v3610_v45 = vmul.f32 %v3578_v43, %v11361_v3  ;;  %v3260_v40 = vmul.f32 %v11470_v56, %v3228_v27  ;;  %v4261_v20 = vadd.f32 %v11040_v33, %v11465_v35  ;;  %v11511_v62 = vpop.eup %8449  ;;  %v13741_v59 = vsub.f32 1.0, %v11300_v14  ;;  %v13744_v43 = vld [vmem:[#allocation64_spill] sm:$0xff]  ;;  %v13745_v33 = vld [vmem:[#allocation66_spill] sm:$0xff] }
 0x582   : > { %v4425_v52 = vpack.c.bf16 %v4395_v38, %v4393_v44  ;;  %v4396_v1 = vadd.f32 %v13742_v34, %v4257_v19  ;;  %v4263_v58 = vadd.f32 %v13743_v9, %v11485_v51  ;;  %v3547_v13 = vmul.f32 %v8446_v17, %v3387_v23  ;;  %v8110_v9 = vld [vmem:[#allocation20 + $0x14] ss:$8 sps:$4 sm:$0xff]  }
 0x583   : > { %v11515_v2 = vmul.f32 %v13741_v59, %v3673_v32  ;;  %v3642_v3 = vadd.f32 1.0, %v3610_v45  ;;  %v3292_v63 = vadd.f32 -0.28449672, %v3260_v40  ;;  %v3133_v6 = vmul.f32 1.0614054, %v11511_v62  ;;  %v13747_v45 = vld [vmem:[#allocation63_spill] sm:$0xff] }
 0x584   : > { %v4397_v22 = vadd.f32 %v13744_v43, %v4261_v20  ;;  %v4398_v27 = vadd.f32 %v13745_v33, %v4263_v58  ;;  %v4265_v14 = vadd.f32 %v13746_v12, %v11465_v35  ;;  %v4426_v32 = vpack.c.bf16 %v4396_v1, %v4394_v50  ;;  %v8105_v59 = vld [vmem:[#allocation20] ss:$8 sps:$4 sm:$0xff]   ;;  %v13748_v23 = vld [vmem:[#allocation73_spill] sm:$0xff] }
 0x585   : > { %v3579_v44 = vsub.f32 1.0, %v3547_v13  ;;  %v3324_v38 = vmul.f32 %v11470_v56, %v3292_v63  ;;  %v3165_v19 = vadd.f32 -1.4531521, %v3133_v6  ;;  %v3454_v34 = vmul.f32 %v3422_v11, %v2974_v29  ;;  %v13749_v20 = vld [vmem:[#allocation85_spill] sm:$0xff]  ;;  %v13751_v63 = vld [vmem:[#allocation67_spill] sm:$0xff] }
 0x586   : > { %v4399_v17 = vadd.f32 %v13747_v45, %v4265_v14  ;;  %4677 = vmatprep.mubr.bf16.mxu0 %v4426_v32  ;;  %v4267_v40 = vadd.f32 %v13748_v23, %v11485_v51  ;;  %v4271_v58 = vadd.f32 %v13749_v20, %v11465_v35  ;;  %v13750_v43 = vld [vmem:[#allocation89_spill] sm:$0xff]  ;;  %v3674_v50 = vmul.f32 %v3642_v3, %v11356_v30  ;;  %v13752_v14 = vld [vmem:[#allocation55_spill] sm:$0xff]  ;;  %v13754_v20 = vld [vmem:[#allocation90_spill] sm:$0xff] }
 0x587   : > { %v4273_v33 = vadd.f32 %v13750_v43, %v11485_v51  ;;  %v3611_v1 = vmul.f32 %v3579_v44, %v11394_v41  ;;  %v3356_v13 = vadd.f32 0.2548296, %v3324_v38  ;;  %v3197_v29 = vmul.f32 %v11511_v62, %v3165_v19  ;;  %4678 = vmatmul.mubr.bf16.vlgmr.msra.gmra.mrb[64].mxu0 %v4425_v52  ;;  %v8108_v12 = vld [vmem:[#allocation20 + $0x10] ss:$8 sps:$4 sm:$0xff]   ;;  %v13755_v52 = vld [vmem:[#allocation91_spill] sm:$0xff] }
 0x588   : > { %v11536_v11 = vpop.eup %8451  ;;  %v4400_v6 = vadd.f32 %v13751_v63, %v4267_v40  ;;  %6488 = vmatpush1.bf16.msra.mxu0 %v8105_v59  ;;  %v11540_v32 = vadd.f32 %v13752_v14, %v4271_v58  ;;  %v13753_v45 = vld [vmem:[#allocation69_spill] sm:$0xff]  ;;  %v4275_v30 = vadd.f32 %v13754_v20, %v11465_v35  ;;  %v4277_v38 = vadd.f32 %v13755_v52, %v11485_v51  ;;  %v8113_v19 = vld [vmem:[#allocation20 + $0x24] ss:$8 sps:$4 sm:$0xff]   ;;  %v8111_v52 = vld [vmem:[#allocation20 + $0x20] ss:$8 sps:$4 sm:$0xff]  }
 0x589   : > { %v4402_v23 = vadd.f32 %v13753_v45, %v4273_v33  ;;  %v3643_v3 = vadd.f32 1.0, %v3611_v1  ;;  %v3388_v41 = vmul.f32 %v11470_v56, %v3356_v13  ;;  %v3229_v44 = vadd.f32 1.4214138, %v3197_v29  ;;  %6489 = vmatprep.subr.bf16.mxu0 %v8110_v9  ;;  %v13756_v59 = vld [vmem:[#allocation70_spill] sm:$0xff]  ;;  %v13757_v33 = vld [vmem:[#allocation93_spill] sm:$0xff] }
 0x58a   : > { %v11548_v40 = vpop.eup %8453  ;;  %v11551_v43 = vadd.f32 %v13756_v59, %v4275_v30  ;;  %v4428_v58 = vpack.c.bf16 %v4400_v6, %v4398_v27  ;;  %v4427_v63 = vpack.c.bf16 %v4399_v17, %v4397_v22  ;;  %v4281_v14 = vadd.f32 %v13757_v33, %v11465_v35  ;;  %v13759_v20 = vld [vmem:[#allocation62_spill] sm:$0xff]  ;;  %v8116_v27 = vld [vmem:[#allocation20 + $0x34] ss:$8 sps:$4 sm:$0xff]   ;;  %v13764_v33 = vld [vmem:[#allocation95_spill] sm:$0xff] }
 0x58b   : > { %v13758_v1 = vsub.f32 1.0, %v11337_v4  ;;  %v3548_v56 = vmul.f32 %v8448_v61, %v3388_v41  ;;  %v3261_v9 = vmul.f32 %v11511_v62, %v3229_v44  ;;  %v3134_v13 = vmul.f32 1.0614054, %v11548_v40  ;;  %v13760_v22 = vld [vmem:[#allocation54_spill] sm:$0xff]  ;;  %v13762_v59 = vld [vmem:[#allocation72_spill] sm:$0xff] }
 0x58c   : > { %v3517_v29 = vmul.f32 1.442695, %v3454_v34  ;;  %6490 = vmatpush1.bf16.msra.mxu0 %v8108_v12  ;;  %4687 = vmatprep.mubr.bf16.mxu0 %v4428_v58  ;;  %v4404_v30 = vadd.f32 %v13759_v20, %v4277_v38  ;;  %v11563_v17 = vadd.f32 %v13760_v22, %v4281_v14  ;;  %v13761_v6 = vld [vmem:[#allocation74_spill] sm:$0xff]  ;;  %vm2910_vm15 = vcmp.ge.f32.partialorder %v11462_v5, 0.0 }
 0x58d   : > { %v11557_v45 = vmul.f32 %v13758_v1, %v3674_v50  ;;  %v4283_v4 = vadd.f32 %v13761_v6, %v11485_v51  ;;  %v3675_v50 = vmul.f32 %v3643_v3, %v11386_v0  ;;  %v3580_v61 = vsub.f32 1.0, %v3548_v56  ;;  %6491 = vmatprep.subr.bf16.mxu0 %v8113_v19  ;;  %v13763_v12 = vld [vmem:[#allocation94_spill] sm:$0xff]  ;;  %v8114_v3 = vld [vmem:[#allocation20 + $0x30] ss:$8 sps:$4 sm:$0xff]  }
 0x58e   : > { %v3293_v41 = vadd.f32 -0.28449672, %v3261_v9  ;;  %v3166_v44 = vadd.f32 -1.4531521, %v3134_v13  ;;  %v4285_v58 = vadd.f32 %v13763_v12, %v11465_v35  ;;  %v4430_v38 = vpack.c.bf16 %v4404_v30, %v4402_v23  ;;  %v13765_v19 = vld [vmem:[#allocation92_spill] sm:$0xff]  ;;  %v13766_v23 = vld [vmem:[#allocation97_spill] sm:$0xff] }
 0x58f   : > { %v4406_v34 = vadd.f32 %v13762_v59, %v4283_v4  ;;  %v4287_v1 = vadd.f32 %v13764_v33, %v11485_v51  ;;  %v3612_v14 = vmul.f32 %v3580_v61, %v11441_v36  ;;  %4688 = vmatmul.mubr.bf16.gmra.mrb[68].mxu0 %v4427_v63  ;;  %v4429_v0 = vpack.c.bf16 %v11551_v43, %v11540_v32  ;;  %v8119_v13 = vld [vmem:[#allocation20 + $0x44] ss:$8 sps:$4 sm:$0xff]   ;;  %v13767_v36 = vld [vmem:[#allocation96_spill] sm:$0xff] }
 0x590   : > { %v3325_v20 = vmul.f32 %v11511_v62, %v3293_v41  ;;  %v3198_v22 = vmul.f32 %v11548_v40, %v3166_v44  ;;  %8455 = vpow2.f32 %v3517_v29  ;;  %6492 = vmatpush1.bf16.msra.mxu0 %v8111_v52  ;;  %v11579_v56 = vadd.f32 %v13765_v19, %v4285_v58  ;;  %4697 = vmatprep.mubr.bf16.mxu0 %v4430_v38  ;;  %v13768_v63 = vld [vmem:[#allocation86_spill] sm:$0xff]  ;;  %v13770_v44 = vld [vmem:[#allocation75_spill] sm:$0xff] }
 0x591   : > { %v4408_v9 = vadd.f32 %v13766_v23, %v4287_v1  ;;  %v4291_v30 = vadd.f32 %v13767_v36, %v11465_v35  ;;  %v3644_v6 = vadd.f32 1.0, %v3612_v14  ;;  %6493 = vmatprep.subr.bf16.mxu0 %v8116_v27  ;;  %v4293_v32 = vadd.f32 %v13768_v63, %v11485_v51  ;;  %v13769_v29 = vld [vmem:[#allocation98_spill] sm:$0xff]  ;;  %v13772_v1 = vld [vmem:[#allocation111_spill] sm:$0xff] }
 0x592   : > { %v3357_v4 = vadd.f32 0.2548296, %v3325_v20  ;;  %v3230_v61 = vadd.f32 1.4214138, %v3198_v22  ;;  %v4295_v52 = vadd.f32 %v13769_v29, %v11465_v35  ;;  %v4297_v59 = vadd.f32 %v13770_v44, %v11485_v51  ;;  %v13773_v20 = vld [vmem:[#allocation115_spill] sm:$0xff] }
 0x593   : > { %v11587_v43 = vadd.f32 %v11180_v55, %v4291_v30  ;;  %v4432_v41 = vpack.c.bf16 %v4408_v9, %v4406_v34  ;;  %v13771_v12 = vsub.f32 1.0, %v11377_v37  ;;  %v11598_v33 = vadd.f32 %v11213_v31, %v4293_v32  ;;  %v8117_v55 = vld [vmem:[#allocation20 + $0x40] ss:$8 sps:$4 sm:$0xff]   ;;  %v8122_v31 = vld [vmem:[#allocation20 + $0x54] ss:$8 sps:$4 sm:$0xff]  }
 0x594   : > { %v3389_v38 = vmul.f32 %v11511_v62, %v3357_v4  ;;  %v3262_v27 = vmul.f32 %v11548_v40, %v3230_v61  ;;  %6494 = vmatpush1.bf16.msra.mxu0 %v8114_v3  ;;  %v11601_v14 = vadd.f32 %v13772_v1, %v4295_v52  ;;  %v4412_v34 = vadd.f32 %v13773_v20, %v4297_v59  ;;  %v13774_v37 = vld [vmem:[#allocation87_spill] sm:$0xff]  ;;  %v13776_v30 = vld [vmem:[#allocation100_spill] sm:$0xff]  ;;  %v13779_v52 = vld [vmem:[#allocation102_spill] sm:$0xff] }
 0x595   : > { %v4389_v58 = vmul.f32 %v13771_v12, %v3675_v50  ;;  %v4431_v22 = vpack.c.bf16 %v11579_v56, %v11563_v17  ;;  %v4301_v50 = vadd.f32 %v13774_v37, %v11465_v35  ;;  %v3676_v62 = vmul.f32 %v3644_v6, %v11401_v10  ;;  %6495 = vmatprep.subr.bf16.mxu0 %v8119_v13  ;;  %v13775_v3 = vld [vmem:[#allocation99_spill] sm:$0xff]  ;;  %v13777_v56 = vld [vmem:[#allocation101_spill] sm:$0xff]  ;;  %v13778_v13 = vld [vmem:[#allocation124_spill] sm:$0xff] }
 0x596   : > { %v3549_v19 = vmul.f32 %v11536_v11, %v3389_v38  ;;  %v3294_v23 = vadd.f32 -0.28449672, %v3262_v27  ;;  %v4303_v9 = vadd.f32 %v13775_v3, %v11485_v51  ;;  %v4305_v4 = vadd.f32 %v13776_v30, %v11465_v35  ;;  %v8125_v12 = vld [vmem:[#allocation20 + $0x64] ss:$8 sps:$4 sm:$0xff]   ;;  %v13780_v38 = vld [vmem:[#allocation61_spill] sm:$0xff] }
 0x597   : > { %v11613_v36 = vadd.f32 %v11318_v8, %v4301_v50  ;;  %v4434_v17 = vpack.c.bf16 %v4412_v34, %v11598_v33  ;;  %v4307_v61 = vadd.f32 %v13777_v56, %v11485_v51  ;;  %4698 = vmatmul.mubr.bf16.gmra.mrb[72].mxu0 %v4429_v0  ;;  %v4433_v63 = vpack.c.bf16 %v11601_v14, %v11587_v43  ;;  %v8120_v8 = vld [vmem:[#allocation20 + $0x50] ss:$8 sps:$4 sm:$0xff]   ;;  %v13782_v1 = vld [vmem:[#allocation103_spill] sm:$0xff]  ;;  %v13803_v43 = vld [vmem:[#allocation50_spill] sm:$0xff] }
 0x598   : > { %v3581_v10 = vsub.f32 1.0, %v3549_v19  ;;  %v3326_v11 = vmul.f32 %v11548_v40, %v3294_v23  ;;  %v11622_v6 = vadd.f32 %v13778_v13, %v4303_v9  ;;  %6496 = vmatpush1.bf16.msra.mxu0 %v8117_v55  ;;  %4707 = vmatprep.mubr.bf16.mxu0 %v4432_v41  ;;  %v11628_v32 = vadd.f32 %v11390_v42, %v4305_v4  ;;  %v13781_v33 = vld [vmem:[#allocation76_spill] sm:$0xff]  ;;  %v13785_v4 = vld [vmem:[#allocation105_spill] sm:$0xff] }
 0x599   : > { %v11631_v29 = vadd.f32 %v11423_v28, %v4307_v61  ;;  %v4311_v0 = vadd.f32 %v13779_v52, %v11465_v35  ;;  %6497 = vmatprep.subr.bf16.mxu0 %v8122_v31  ;;  %v4313_v27 = vadd.f32 %v13780_v38, %v11485_v51  ;;  %v4315_v41 = vadd.f32 %v13781_v33, %v11465_v35  ;;  %v8123_v31 = vld [vmem:[#allocation20 + $0x60] ss:$8 sps:$4 sm:$0xff]   ;;  %v13784_v9 = vld [vmem:[#allocation104_spill] sm:$0xff] }
 0x59a   : > { %v3613_v44 = vmul.f32 %v3581_v10, %v11492_v53  ;;  %v3358_v59 = vadd.f32 0.2548296, %v3326_v11  ;;  %v8456_v55 = vpop.eup %8455  ;;  %v4317_v20 = vadd.f32 %v13782_v1, %v11485_v51  ;;  %v4435_v53 = vpack.c.bf16 %v11628_v32, %v11613_v36  ;;  %v13786_v61 = vld [vmem:[#allocation106_spill] sm:$0xff]  ;;  %v13789_v52 = vld [vmem:[#allocation71_spill] sm:$0xff] }
 0x59b   : > { %v11641_v42 = vadd.f32 %v11474_v39, %v4311_v0  ;;  %v4436_v28 = vpack.c.bf16 %v11631_v29, %v11622_v6  ;;  %v11651_v50 = vadd.f32 %v11489_v57, %v4313_v27  ;;  %v11654_v19 = vadd.f32 %v11515_v2, %v4315_v41  ;;  %v8128_v2 = vld [vmem:[#allocation20 + $0x74] ss:$8 sps:$4 sm:$0xff]   ;;  %v8129_v38 = vld [vmem:[#allocation20 + $0x80] ss:$8 sps:$4 sm:$0xff]  }
 0x59c   : > { %v3645_v34 = vadd.f32 1.0, %v3613_v44  ;;  %v3390_v37 = vmul.f32 %v11548_v40, %v3358_v59  ;;  %v13783_v39 = vsub.f32 1.0, %v11405_v46  ;;  %6498 = vmatpush1.bf16.msra.mxu0 %v8120_v8  ;;  %v11659_v3 = vadd.f32 %v11557_v45, %v4317_v20  ;;  %v5998_v8 = vld [vmem:[%s13788_s22] sm:$0x3]  ;;  %v8134_v41 = vld [vmem:[#allocation20 + $0x94] ss:$8 sps:$4 sm:$0xff]  }
 0x59d   : > { %v4321_v30 = vadd.f32 %v13784_v9, %v11465_v35  ;;  %v4323_v40 = vadd.f32 %v13785_v4, %v11485_v51  ;;  %6499 = vmatprep.subr.bf16.mxu0 %v8125_v12  ;;  %v4325_v46 = vadd.f32 %v13786_v61, %v11465_v35  ;;  %v13787_v13 = vsub.f32 1.0, %v11433_v54  ;;  %v8131_v54 = vld [vmem:[#allocation20 + $0x84] ss:$8 sps:$4 sm:$0xff]   ;;  %v13793_v20 = vld [vmem:[#allocation116_spill] sm:$0xff]  ;;  %v8141_v32 = vld [vmem:[#allocation20 + $0xc0] ss:$8 sps:$4 sm:$0xff]  }
 0x59e   : > { %v4390_v23 = vmul.f32 %v13783_v39, %v3676_v62  ;;  %v3677_v57 = vmul.f32 %v3645_v34, %v11468_v15  ;;  %v3550_v56 = vmul.f32 %v8456_v55, %v3390_v37  ;;  %v4437_v62 = vpack.c.bf16 %v11654_v19, %v11641_v42  ;;  %v13792_v55 = vld [vmem:[#allocation107_spill] sm:$0xff]  ;;  %v13795_v37 = vld [vmem:[#allocation118_spill] sm:$0xff]  ;;  %v13830_v42 = vld [vmem:[#allocation40_spill] sm:$0xff] }
 0x59f   : > { %v11670_v10 = vadd.f32 %v4389_v58, %v4321_v30  ;;  %v4438_v11 = vpack.c.bf16 %v11659_v3, %v11651_v50  ;;  %4708 = vmatmul.mubr.bf16.gmra.mrb[76].mxu0 %v4431_v22  ;;  %v2942_v35 = vsel %vm2910_vm15, 1.0, %v13563_v16  ;;  %v8126_v58 = vld [vmem:[#allocation20 + $0x70] ss:$8 sps:$4 sm:$0xff]   ;;  %v4010_v0 = vadd.f32 %v13789_v52, %v10419_v26  ;;  %v13801_v30 = vld [vmem:[#allocation79_spill] sm:$0xff] }
 0x5a0   : > { %v11672_v45 = vadd.f32 %v4390_v23, %v4323_v40  ;;  %v4391_v6 = vmul.f32 %v13787_v13, %v3677_v57  ;;  %v3582_v15 = vsub.f32 1.0, %v3550_v56  ;;  %6500 = vmatpush1.bf16.msra.mxu0 %v8123_v31  ;;  %4717 = vmatprep.mubr.bf16.mxu0 %v4434_v17  ;;  %v11689_v22 = vrot.slane %v5998_v8, %v13734_v7  ;;  %v13790_v17 = vld [vmem:[#allocation113_spill] sm:$0xff]  ;;  %v13799_v3 = vld [vmem:[#allocation120_spill] sm:$0xff]  ;;  %v8137_v40 = vld [vmem:[#allocation20 + $0xa4] ss:$8 sps:$4 sm:$0xff]  }
 0x5a1   : > { %6501 = vmatprep.subr.bf16.mxu0 %v8128_v2  ;;  %v2846_v59 = vmul.f32 0.5, %v11446_v21  ;;  %v4360_v33 = vsub.f32 1.0, %v4010_v0  ;;  %v4327_v1 = vadd.f32 %v13792_v55, %v11485_v51  ;;  %v11705_v34 = vrot.slane %v5998_v8, %v13736_v18  ;;  %v8132_v23 = vld [vmem:[#allocation20 + $0x90] ss:$8 sps:$4 sm:$0xff]   ;;  %v13797_v51 = vld [vmem:[#allocation119_spill] sm:$0xff]  ;;  %v13807_v56 = vld [vmem:[#allocation122_spill] sm:$0xff] }
 0x5a2   : > { %v3614_v29 = vmul.f32 %v3582_v15, %v2942_v35  ;;  %v11686_v44 = vadd.f32 %v4391_v6, %v4325_v46  ;;  %v11696_v27 = vadd.f32 %v13790_v17, %v11689_v22  ;;  %v11702_v21 = vadd.f32 %v13793_v20, %v11689_v22  ;;  %v13809_v61 = vld [vmem:[#allocation123_spill] sm:$0xff]  ;;  %v13811_v15 = vld [vmem:[#allocation125_spill] sm:$0xff]  ;;  %v13813_v35 = vld [vmem:[#allocation60_spill] sm:$0xff] }
 0x5a3   : > { %v11709_v50 = vadd.f32 %v13795_v37, %v11689_v22  ;;  %v11716_v31 = vadd.f32 %v13797_v51, %v11705_v34  ;;  %v11720_v9 = vadd.f32 %v13799_v3, %v11689_v22  ;;  %v11724_v4 = vadd.f32 %v13801_v30, %v11705_v34  ;;  %v8135_v6 = vld [vmem:[#allocation20 + $0xa0] ss:$8 sps:$4 sm:$0xff]   ;;  %v8140_v0 = vld [vmem:[#allocation20 + $0xb4] ss:$8 sps:$4 sm:$0xff]   ;;  %v8150_v20 = vld [vmem:[#allocation20 + $0xf0] ss:$8 sps:$4 sm:$0xff]  }
 0x5a4   : > { %v3646_v12 = vadd.f32 1.0, %v3614_v29  ;;  %v4439_v5 = vpack.c.bf16 %v11686_v44, %v11670_v10  ;;  %6502 = vmatpush1.bf16.msra.mxu0 %v8126_v58  ;;  %13791 = vst [vmem:[#allocation38_spill] sm:$0xff] %v11696_v27  ;;  %13794 = vst [vmem:[#allocation39_spill] sm:$0xff] %v11702_v21  ;;  %v11728_v14 = vadd.f32 %v13803_v43, %v11689_v22  ;;  %v13815_v29 = vld [vmem:[#allocation126_spill] sm:$0xff]  ;;  %v13831_v19 = vld [vmem:[#allocation43_spill] sm:$0xff] }
 0x5a5   : > { %6503 = vmatprep.subr.bf16.mxu0 %v8131_v54  ;;  %13796 = vst [vmem:[#allocation80_spill] sm:$0xff] %v11709_v50  ;;  %13798 = vst [vmem:[#allocation81_spill] sm:$0xff] %v11716_v31  ;;  %v11736_v2 = vadd.f32 %v13807_v56, %v11689_v22  ;;  %v11740_v46 = vadd.f32 %v13809_v61, %v11705_v34  ;;  %v11745_v8 = vadd.f32 %v13811_v15, %v11689_v22  ;;  %v13833_v37 = vld [vmem:[#allocation45_spill] sm:$0xff]  ;;  %v13836_v10 = vld [vmem:[#allocation46_spill] sm:$0xff] }
 0x5a6   : > { %v3678_v26 = vmul.f32 %v3646_v12, %v2846_v59  ;;  %13800 = vst [vmem:[#allocation82_spill] sm:$0xff] %v11720_v9  ;;  %13802 = vst [vmem:[#allocation84_spill] sm:$0xff] %v11724_v4  ;;  %v11749_v58 = vadd.f32 %v13813_v35, %v11705_v34  ;;  %v11753_v52 = vadd.f32 %v13815_v29, %v11689_v22  ;;  %v13819_v59 = vld [vmem:[#allocation127_spill] sm:$0xff]  ;;  %v13837_v44 = vld [vmem:[#allocation49_spill] sm:$0xff] }
 0x5a7   : > { %4718 = vmatmul.mubr.bf16.gmra.mrb[80].mxu0 %v4433_v63  ;;  %13804 = vst [vmem:[#allocation83_spill] sm:$0xff] %v11728_v14  ;;  %v13805_v63 = vld [vmem:[#allocation121_spill] sm:$0xff]  ;;  %13808 = vst [vmem:[#allocation66_spill] sm:$0xff] %v11736_v2  ;;  %v11757_v54 = vadd.f32 %v11383_v24, %v11705_v34  ;;  %v11765_v12 = vadd.f32 %v13819_v59, %v11705_v34  ;;  %v11788_v55 = vadd.f32 %v11455_v25, %v11689_v22  ;;  %v8147_v25 = vld [vmem:[#allocation20 + $0xe0] ss:$8 sps:$4 sm:$0xff]  }
 0x5a8   : > { %v4392_v39 = vmul.f32 %v4360_v33, %v3678_v26  ;;  %6504 = vmatpush1.bf16.msra.mxu0 %v8129_v38  ;;  %4727 = vmatprep.mubr.bf16.mxu0 %v4436_v28  ;;  %v11732_v28 = vadd.f32 %v13805_v63, %v11705_v34  ;;  %13810 = vst [vmem:[#allocation88_spill] sm:$0xff] %v11740_v46  ;;  %13812 = vst [vmem:[#allocation63_spill] sm:$0xff] %v11745_v8  ;;  %v13821_v38 = vld [vmem:[#allocation68_spill] sm:$0xff]  ;;  %v13839_v51 = vld [vmem:[#allocation53_spill] sm:$0xff] }
 0x5a9   : > { %6505 = vmatprep.subr.bf16.mxu0 %v8134_v41  ;;  %13814 = vst [vmem:[#allocation73_spill] sm:$0xff] %v11749_v58  ;;  %13816 = vst [vmem:[#allocation85_spill] sm:$0xff] %v11753_v52  ;;  %v11769_v17 = vadd.f32 %v13821_v38, %v11689_v22  ;;  %v13823_v26 = vld [vmem:[#allocation128_spill] sm:$0xff]  ;;  %v11784_v41 = vadd.f32 %v11451_v60, %v11705_v34  ;;  %v11792_v36 = vadd.f32 %v11458_v48, %v11705_v34  ;;  %v8149_v60 = vld [vmem:[#allocation20 + $0xe4] ss:$8 sps:$4 sm:$0xff]  }
 0x5aa   : > { %v4424_v57 = vadd.f32 %v4392_v39, %v4327_v1  ;;  %13806 = vst [vmem:[#allocation64_spill] sm:$0xff] %v11732_v28  ;;  %13817 = vst [vmem:[#allocation89_spill] sm:$0xff] %v11757_v54  ;;  %v11773_v33 = vadd.f32 %v13823_v26, %v11705_v34  ;;  %v8138_v24 = vld [vmem:[#allocation20 + $0xb0] ss:$8 sps:$4 sm:$0xff]   ;;  %v8143_v1 = vld [vmem:[#allocation20 + $0xc4] ss:$8 sps:$4 sm:$0xff]  }
 0x5ab   : > { %13820 = vst [vmem:[#allocation55_spill] sm:$0xff] %v11765_v12  ;;  %13822 = vst [vmem:[#allocation69_spill] sm:$0xff] %v11769_v17  ;;  %v13829_v48 = vld [vmem:[#allocation41_spill] sm:$0xff]  ;;  %v13834_v39 = vld [vmem:[#allocation44_spill] sm:$0xff] }
 0x5ac   : > { %v4440_v13 = vpack.c.bf16 %v4424_v57, %v11672_v45  ;;  %6506 = vmatpush1.bf16.msra.mxu0 %v8132_v23  ;;  %v11761_v45 = vadd.f32 %v11397_v47, %v11689_v22  ;;  %13824 = vst [vmem:[#allocation90_spill] sm:$0xff] %v11773_v33  ;;  %v11780_v47 = vadd.f32 %v11437_v49, %v11689_v22  ;;  %13826 = vst [vmem:[#allocation70_spill] sm:$0xff] %v11784_v41  ;;  %v8144_v49 = vld [vmem:[#allocation20 + $0xd0] ss:$8 sps:$4 sm:$0xff]   ;;  %v13835_v23 = vld [vmem:[#allocation47_spill] sm:$0xff] }
 0x5ad   : > { %6507 = vmatprep.subr.bf16.mxu0 %v8137_v40  ;;  %13827 = vst [vmem:[#allocation93_spill] sm:$0xff] %v11788_v55  ;;  %13828 = vst [vmem:[#allocation62_spill] sm:$0xff] %v11792_v36  ;;  %v13840_v3 = vld [vmem:[#allocation52_spill] sm:$0xff]  ;;  %v13841_v30 = vld [vmem:[#allocation57_spill] sm:$0xff] }
 0x5ae   : > { %13818 = vst [vmem:[#allocation67_spill] sm:$0xff] %v11761_v45  ;;  %13825 = vst [vmem:[#allocation91_spill] sm:$0xff] %v11780_v47  ;;  %v13842_v40 = vld [vmem:[#allocation56_spill] sm:$0xff]  ;;  %v13843_v57 = vld [vmem:[#allocation59_spill] sm:$0xff] }
 0x5af   : > { %4728 = vmatmul.mubr.bf16.gmra.mrb[84].mxu0 %v4435_v53  ;;  %v8146_v53 = vld [vmem:[#allocation20 + $0xd4] ss:$8 sps:$4 sm:$0xff]   ;;  %v13844_v43 = vld [vmem:[#allocation58_spill] sm:$0xff] }
 0x5b0   : > { %6508 = vmatpush1.bf16.msra.mxu0 %v8135_v6  ;;  %4737 = vmatprep.mubr.bf16.mxu0 %v4438_v11  ;;  %v8152_v11 = vld [vmem:[#allocation20 + $0xf4] ss:$8 sps:$4 sm:$0xff]   ;;  %v4473_v63 = vld [vmem:[%s13845_s12] sm:$0x3]  ;;  %s8987_s12 = scalar_lea.vmem %s13287_s26, 2048 }
 0x5b1   : > { %6509 = vmatprep.subr.bf16.mxu0 %v8140_v0  ;;  %v11820_v56 = vrot.slane %v4473_v63, %v13734_v7  ;;  %v11823_v61 = vrot.slane %v4473_v63, %v13736_v18  ;;  %p8988_p10 = scmp.ne.s32.totalorder %s13287_s26, %s8987_s12 }
 0x5b3   : > { %p8989_p6 = pnand %p8988_p10, %p14037_p11 }
 0x5b4   : > { %6510 = vmatpush1.bf16.msra.mxu0 %v8138_v24 }
 0x5b5   : > { %6511 = vmatprep.subr.bf16.mxu0 %v8143_v1  ;;  %p8990_p2 = pneg %p8989_p6 }
 0x5b7   : > { %4738 = vmatmul.mubr.bf16.gmra.mrb[88].mxu0 %v4437_v62  ;;  %v13832_v62 = vld [vmem:[#allocation42_spill] sm:$0xff] }
 0x5b8   : > { %6512 = vmatpush1.bf16.msra.mxu0 %v8141_v32  ;;  %4747 = vmatprep.mubr.bf16.mxu0 %v4440_v13 }
 0x5b9   : > { %6513 = vmatprep.subr.bf16.mxu0 %v8146_v53 }
 0x5bc   : > { %6514 = vmatpush1.bf16.msra.mxu0 %v8144_v49 }
 0x5bd   : > { %6515 = vmatprep.subr.bf16.mxu0 %v8149_v60 }
 0x5bf   : > { %4748 = vmatmul.mubr.bf16.gmra.mrb[92].mxu0 %v4439_v5  ;;  %v13838_v5 = vld [vmem:[#allocation48_spill] sm:$0xff] }
 0x5c0   : > { %6516 = vmatpush1.bf16.msra.mxu0 %v8147_v25  ;;  %6519 = vmatprep.mubr.bf16.mxu0 %v13829_v48 }
 0x5c1   : > { %6517 = vmatprep.subr.bf16.mxu0 %v8152_v11 }
 0x5c4   : > { %6518 = vmatpush1.bf16.msra.mxu0 %v8150_v20 }
 0x5c7   : > { %6520 = vmatmul.mubr.bf16.vlgmr.msra.gmra.mrb[96].mxu0 %v13830_v42 }
 0x5c8   : > { %6529 = vmatprep.mubr.bf16.mxu0 %v13831_v19 }
 0x5cf   : > { %6530 = vmatmul.mubr.bf16.gmra.mrb[100].mxu0 %v13832_v62 }
 0x5d0   : > { %6539 = vmatprep.mubr.bf16.mxu0 %v13833_v37 }
 0x5d7   : > { %6540 = vmatmul.mubr.bf16.gmra.mrb[104].mxu0 %v13834_v39 }
 0x5d8   : > { %6549 = vmatprep.mubr.bf16.mxu0 %v13835_v23 }
 0x5df   : > { %6550 = vmatmul.mubr.bf16.gmra.mrb[108].mxu0 %v13836_v10 }
 0x5e0   : > { %6559 = vmatprep.mubr.bf16.mxu0 %v13837_v44 }
 0x5e7   : > { %6560 = vmatmul.mubr.bf16.gmra.mrb[112].mxu0 %v13838_v5 }
 0x5e8   : > { %6569 = vmatprep.mubr.bf16.mxu0 %v13839_v51 }
 0x5ef   : > { %6570 = vmatmul.mubr.bf16.gmra.mrb[116].mxu0 %v13840_v3 }
 0x5f0   : > { %6579 = vmatprep.mubr.bf16.mxu0 %v13841_v30 }
 0x5f7   : > { %6580 = vmatmul.mubr.bf16.gmra.mrb[120].mxu0 %v13842_v40 }
 0x5f8   : > { %6589 = vmatprep.mubr.bf16.mxu0 %v13843_v57 }
 0x5ff   : > { %6590 = vmatmul.mubr.bf16.gmra.mrb[124].mxu0 %v13844_v43 }
 0x65a   : > { %v4679_v13 = vpop.f32.mrb[64].mxu0 }
 0x65b   : > { %v11826_v6 = vadd.f32 %v4679_v13, %v11820_v56  ;;  %v4681_v15 = vpop.f32.mrb[65].mxu0 }
 0x65c   : > { %v11829_v35 = vadd.f32 %v4681_v15, %v11823_v61  ;;  %v4683_v29 = vpop.f32.mrb[66].mxu0 }
 0x65d   : > { %v11832_v0 = vadd.f32 %v4683_v29, %v11820_v56  ;;  %v4685_v59 = vpop.f32.mrb[67].mxu0 }
 0x65e   : > { %v11835_v38 = vadd.f32 %v4685_v59, %v11823_v61  ;;  %v4760_v26 = vadd.f32 %v11829_v35, %v11826_v6 }
 0x660   : > { %4761 = vadd.xlane.f32.xlu0 %v4760_v26  ;;  %v4763_v24 = vadd.f32 %v11835_v38, %v11832_v0 }
 0x662   : > { %v4689_v1 = vpop.f32.mrb[68].mxu0  ;;  %4764 = vadd.xlane.f32.xlu1 %v4763_v24 }
 0x663   : > { %v11842_v32 = vadd.f32 %v4689_v1, %v11820_v56  ;;  %v4691_v53 = vpop.f32.mrb[69].mxu0 }
 0x664   : > { %v11845_v49 = vadd.f32 %v4691_v53, %v11823_v61  ;;  %v4693_v60 = vpop.f32.mrb[70].mxu0 }
 0x665   : > { %v11848_v25 = vadd.f32 %v4693_v60, %v11820_v56  ;;  %v4695_v11 = vpop.f32.mrb[71].mxu0 }
 0x666   : > { %v11851_v48 = vadd.f32 %v4695_v11, %v11823_v61  ;;  %v4766_v20 = vadd.f32 %v11845_v49, %v11842_v32 }
 0x668   : > { %4767 = vadd.xlane.f32.xlu0 %v4766_v20  ;;  %v4769_v42 = vadd.f32 %v11851_v48, %v11848_v25 }
 0x66a   : > { %v4699_v19 = vpop.f32.mrb[72].mxu0  ;;  %4770 = vadd.xlane.f32.xlu1 %v4769_v42 }
 0x66b   : > { %v11858_v62 = vadd.f32 %v4699_v19, %v11820_v56  ;;  %v4701_v37 = vpop.f32.mrb[73].mxu0 }
 0x66c   : > { %v11861_v39 = vadd.f32 %v4701_v37, %v11823_v61  ;;  %v4703_v23 = vpop.f32.mrb[74].mxu0 }
 0x66d   : > { %v11864_v10 = vadd.f32 %v4703_v23, %v11820_v56  ;;  %v4705_v44 = vpop.f32.mrb[75].mxu0 }
 0x66e   : > { %v11867_v5 = vadd.f32 %v4705_v44, %v11823_v61  ;;  %v4772_v51 = vadd.f32 %v11861_v39, %v11858_v62 }
 0x670   : > { %4773 = vadd.xlane.f32.xlu0 %v4772_v51  ;;  %v4775_v3 = vadd.f32 %v11867_v5, %v11864_v10 }
 0x672   : > { %v4709_v30 = vpop.f32.mrb[76].mxu0  ;;  %4776 = vadd.xlane.f32.xlu1 %v4775_v3 }
 0x673   : > { %v11874_v40 = vadd.f32 %v4709_v30, %v11820_v56  ;;  %v4711_v57 = vpop.f32.mrb[77].mxu0 }
 0x674   : > { %v11877_v43 = vadd.f32 %v4711_v57, %v11823_v61  ;;  %v4713_v63 = vpop.f32.mrb[78].mxu0 }
 0x675   : > { %v11880_v13 = vadd.f32 %v4713_v63, %v11820_v56  ;;  %v4715_v15 = vpop.f32.mrb[79].mxu0 }
 0x676   : > { %v11883_v29 = vadd.f32 %v4715_v15, %v11823_v61  ;;  %v4778_v59 = vadd.f32 %v11877_v43, %v11874_v40 }
 0x678   : > { %4779 = vadd.xlane.f32.xlu0 %v4778_v59  ;;  %v4781_v26 = vadd.f32 %v11883_v29, %v11880_v13 }
 0x67a   : > { %v4719_v24 = vpop.f32.mrb[80].mxu0  ;;  %4782 = vadd.xlane.f32.xlu1 %v4781_v26 }
 0x67b   : > { %v11890_v1 = vadd.f32 %v4719_v24, %v11820_v56  ;;  %v4721_v53 = vpop.f32.mrb[81].mxu0 }
 0x67c   : > { %v11893_v60 = vadd.f32 %v4721_v53, %v11823_v61  ;;  %v4723_v11 = vpop.f32.mrb[82].mxu0 }
 0x67d   : > { %v11896_v20 = vadd.f32 %v4723_v11, %v11820_v56  ;;  %v4725_v42 = vpop.f32.mrb[83].mxu0 }
 0x67e   : > { %v11899_v19 = vadd.f32 %v4725_v42, %v11823_v61  ;;  %v4784_v37 = vadd.f32 %v11893_v60, %v11890_v1 }
 0x680   : > { %4785 = vadd.xlane.f32.xlu0 %v4784_v37  ;;  %v4787_v23 = vadd.f32 %v11899_v19, %v11896_v20 }
 0x682   : > { %v4729_v44 = vpop.f32.mrb[84].mxu0  ;;  %4788 = vadd.xlane.f32.xlu1 %v4787_v23 }
 0x683   : > { %v11906_v51 = vadd.f32 %v4729_v44, %v11820_v56  ;;  %v4731_v3 = vpop.f32.mrb[85].mxu0 }
 0x684   : > { %v11909_v30 = vadd.f32 %v4731_v3, %v11823_v61  ;;  %v4733_v57 = vpop.f32.mrb[86].mxu0 }
 0x685   : > { %v11912_v63 = vadd.f32 %v4733_v57, %v11820_v56  ;;  %v4735_v15 = vpop.f32.mrb[87].mxu0 }
 0x686   : > { %v11915_v59 = vadd.f32 %v4735_v15, %v11823_v61  ;;  %v4790_v26 = vadd.f32 %v11909_v30, %v11906_v51 }
 0x688   : > { %4791 = vadd.xlane.f32.xlu0 %v4790_v26  ;;  %v4793_v24 = vadd.f32 %v11915_v59, %v11912_v63 }
 0x68a   : > { %v4739_v53 = vpop.f32.mrb[88].mxu0  ;;  %4794 = vadd.xlane.f32.xlu1 %v4793_v24 }
 0x68b   : > { %v11922_v11 = vadd.f32 %v4739_v53, %v11820_v56  ;;  %v4741_v42 = vpop.f32.mrb[89].mxu0 }
 0x68c   : > { %v11925_v37 = vadd.f32 %v4741_v42, %v11823_v61  ;;  %v4743_v23 = vpop.f32.mrb[90].mxu0 }
 0x68d   : > { %v11928_v44 = vadd.f32 %v4743_v23, %v11820_v56  ;;  %v4745_v3 = vpop.f32.mrb[91].mxu0 }
 0x68e   : > { %v11931_v57 = vadd.f32 %v4745_v3, %v11823_v61  ;;  %v4796_v15 = vadd.f32 %v11925_v37, %v11922_v11 }
 0x690   : > { %4797 = vadd.xlane.f32.xlu0 %v4796_v15  ;;  %v4799_v26 = vadd.f32 %v11931_v57, %v11928_v44 }
 0x692   : > { %v4749_v24 = vpop.f32.mrb[92].mxu0  ;;  %4800 = vadd.xlane.f32.xlu1 %v4799_v26 }
 0x693   : > { %v11938_v53 = vadd.f32 %v4749_v24, %v11820_v56  ;;  %v4751_v42 = vpop.f32.mrb[93].mxu0 }
 0x694   : > { %v11941_v23 = vadd.f32 %v4751_v42, %v11823_v61  ;;  %v4753_v55 = vpop.f32.mrb[94].mxu0 }
 0x695   : > { %v11944_v3 = vadd.f32 %v4753_v55, %v11820_v56  ;;  %v4755_v47 = vpop.f32.mrb[95].mxu0 }
 0x696   : > { %v11947_v36 = vadd.f32 %v4755_v47, %v11823_v61  ;;  %v4802_v15 = vadd.f32 %v11941_v23, %v11938_v53 }
 0x698   : > { %4803 = vadd.xlane.f32.xlu0 %v4802_v15  ;;  %v4805_v26 = vadd.f32 %v11947_v36, %v11944_v3  ;;  %v6315_v15 = vld [vmem:[%s13854_s2] sm:$0x3]  ;;  %s8993_s2 = scalar_lea.vmem %s8992_s5, 4096 }
 0x699   : > { %p8995_p1 = scmp.lt.s32.totalorder %s8993_s2, %s8987_s12 }
 0x69a   : > { %v11953_v24 = vpop.f32.mrb[96].mxu0  ;;  %4806 = vadd.xlane.f32.xlu1 %v4805_v26  ;;  %v11973_v26 = vrot.slane %v6315_v15, %v13734_v7 }
 0x69b   : > { %13846 = vst [vmem:[#allocation54_spill] sm:$0xff] %v11953_v24  ;;  %v11955_v42 = vpop.f32.mrb[97].mxu0  ;;  %p8996_p0 = por %p8995_p1, %p8994_p9 }
 0x69c   : > { %13847 = vst [vmem:[#allocation74_spill] sm:$0xff] %v11955_v42  ;;  %v11957_v41 = vpop.f32.mrb[98].mxu0 }
 0x69d   : > { %13848 = vst [vmem:[#allocation72_spill] sm:$0xff] %v11957_v41  ;;  %v11959_v55 = vpop.f32.mrb[99].mxu0  ;;  %p8997_p5 = pnand %p8996_p0, %p8990_p2 }
 0x69e   : > { %13849 = vst [vmem:[#allocation94_spill] sm:$0xff] %v11959_v55 }
 0x6a2   : > { %v11961_v56 = vpop.f32.mrb[100].mxu0 }
 0x6a3   : > { %13850 = vst [vmem:[#allocation95_spill] sm:$0xff] %v11961_v56  ;;  %v11963_v47 = vpop.f32.mrb[101].mxu0 }
 0x6a4   : > { %13851 = vst [vmem:[#allocation92_spill] sm:$0xff] %v11963_v47  ;;  %v11965_v61 = vpop.f32.mrb[102].mxu0  ;;  %v13912_v54 = vld [vmem:[#allocation72_spill] sm:$0xff] }
 0x6a5   : > { %13852 = vst [vmem:[#allocation97_spill] sm:$0xff] %v11965_v61  ;;  %v11967_v17 = vpop.f32.mrb[103].mxu0  ;;  %v12319_v58 = vadd.f32 %v13912_v54, %v11973_v26 }
 0x6a6   : > { %13853 = vst [vmem:[#allocation96_spill] sm:$0xff] %v11967_v17  ;;  %v11986_v17 = vrot.slane %v6315_v15, %v13736_v18 }
 0x6aa   : > { %v6541_v45 = vpop.f32.mrb[104].mxu0 }
 0x6ab   : > { %v11976_v33 = vadd.f32 %v6541_v45, %v11973_v26  ;;  %v11978_v16 = vpop.f32.mrb[105].mxu0 }
 0x6ac   : > { %13856 = vst [vmem:[#allocation98_spill] sm:$0xff] %v11978_v16  ;;  %v6545_v56 = vpop.f32.mrb[106].mxu0  ;;  %v13918_v2 = vld [vmem:[#allocation97_spill] sm:$0xff] }
 0x6ad   : > { %13855 = vst [vmem:[#allocation86_spill] sm:$0xff] %v11976_v33  ;;  %v11981_v47 = vadd.f32 %v6545_v56, %v11973_v26  ;;  %v11983_v61 = vpop.f32.mrb[107].mxu0  ;;  %v12335_v14 = vadd.f32 %v13918_v2, %v11973_v26  ;;  %v13920_v54 = vld [vmem:[#allocation96_spill] sm:$0xff] }
 0x6ae   : > { %13858 = vst [vmem:[#allocation111_spill] sm:$0xff] %v11983_v61  ;;  %v12339_v46 = vadd.f32 %v13920_v54, %v11986_v17 }
 0x6af   : > { %13857 = vst [vmem:[#allocation75_spill] sm:$0xff] %v11981_v47  ;;  %13919 = vst [vmem:[#allocation48_spill] sm:$0xff] %v12335_v14 }
 0x6b0   : > { %13921 = vst [vmem:[#allocation53_spill] sm:$0xff] %v12339_v46 }
 0x6b2   : > { %v6551_v55 = vpop.f32.mrb[108].mxu0 }
 0x6b3   : > { %v11989_v41 = vadd.f32 %v6551_v55, %v11973_v26  ;;  %v6553_v42 = vpop.f32.mrb[109].mxu0 }
 0x6b4   : > { %v11992_v24 = vadd.f32 %v6553_v42, %v11986_v17  ;;  %v6555_v45 = vpop.f32.mrb[110].mxu0 }
 0x6b5   : > { %13859 = vst [vmem:[#allocation115_spill] sm:$0xff] %v11989_v41  ;;  %v11995_v33 = vadd.f32 %v6555_v45, %v11973_v26  ;;  %v6557_v16 = vpop.f32.mrb[111].mxu0 }
 0x6b6   : > { %13860 = vst [vmem:[#allocation87_spill] sm:$0xff] %v11992_v24  ;;  %v11998_v56 = vadd.f32 %v6557_v16, %v11986_v17 }
 0x6b7   : > { %13861 = vst [vmem:[#allocation99_spill] sm:$0xff] %v11995_v33 }
 0x6b8   : > { %13862 = vst [vmem:[#allocation100_spill] sm:$0xff] %v11998_v56 }
 0x6ba   : > { %v6561_v47 = vpop.f32.mrb[112].mxu0 }
 0x6bb   : > { %v12001_v15 = vadd.f32 %v6561_v47, %v11973_v26  ;;  %v6563_v61 = vpop.f32.mrb[113].mxu0 }
 0x6bc   : > { %v12004_v55 = vadd.f32 %v6563_v61, %v11986_v17  ;;  %v6565_v41 = vpop.f32.mrb[114].mxu0 }
 0x6bd   : > { %13863 = vst [vmem:[#allocation101_spill] sm:$0xff] %v12001_v15  ;;  %v12007_v42 = vadd.f32 %v6565_v41, %v11973_v26  ;;  %v6567_v24 = vpop.f32.mrb[115].mxu0 }
 0x6be   : > { %13864 = vst [vmem:[#allocation124_spill] sm:$0xff] %v12004_v55  ;;  %v12010_v45 = vadd.f32 %v6567_v24, %v11986_v17 }
 0x6bf   : > { %13865 = vst [vmem:[#allocation102_spill] sm:$0xff] %v12007_v42 }
 0x6c0   : > { %13866 = vst [vmem:[#allocation61_spill] sm:$0xff] %v12010_v45 }
 0x6c2   : > { %v6571_v33 = vpop.f32.mrb[116].mxu0 }
 0x6c3   : > { %v12013_v16 = vadd.f32 %v6571_v33, %v11973_v26  ;;  %v6573_v56 = vpop.f32.mrb[117].mxu0 }
 0x6c4   : > { %v12016_v47 = vadd.f32 %v6573_v56, %v11986_v17  ;;  %v6575_v15 = vpop.f32.mrb[118].mxu0 }
 0x6c5   : > { %13867 = vst [vmem:[#allocation76_spill] sm:$0xff] %v12013_v16  ;;  %v12019_v61 = vadd.f32 %v6575_v15, %v11973_v26  ;;  %v6577_v55 = vpop.f32.mrb[119].mxu0 }
 0x6c6   : > { %13868 = vst [vmem:[#allocation103_spill] sm:$0xff] %v12016_v47  ;;  %v12022_v41 = vadd.f32 %v6577_v55, %v11986_v17 }
 0x6c7   : > { %13869 = vst [vmem:[#allocation104_spill] sm:$0xff] %v12019_v61 }
 0x6c8   : > { %13870 = vst [vmem:[#allocation105_spill] sm:$0xff] %v12022_v41 }
 0x6ca   : > { %v6581_v42 = vpop.f32.mrb[120].mxu0 }
 0x6cb   : > { %v12025_v24 = vadd.f32 %v6581_v42, %v11973_v26  ;;  %v6583_v45 = vpop.f32.mrb[121].mxu0 }
 0x6cc   : > { %v12028_v33 = vadd.f32 %v6583_v45, %v11986_v17  ;;  %v6585_v16 = vpop.f32.mrb[122].mxu0 }
 0x6cd   : > { %13871 = vst [vmem:[#allocation106_spill] sm:$0xff] %v12025_v24  ;;  %v12031_v56 = vadd.f32 %v6585_v16, %v11973_v26  ;;  %v6587_v47 = vpop.f32.mrb[123].mxu0 }
 0x6ce   : > { %13872 = vst [vmem:[#allocation71_spill] sm:$0xff] %v12028_v33  ;;  %v12034_v15 = vadd.f32 %v6587_v47, %v11986_v17 }
 0x6cf   : > { %13873 = vst [vmem:[#allocation113_spill] sm:$0xff] %v12031_v56 }
 0x6d0   : > { %13874 = vst [vmem:[#allocation107_spill] sm:$0xff] %v12034_v15 }
 0x6d2   : > { %v6591_v61 = vpop.f32.mrb[124].mxu0 }
 0x6d3   : > { %v12037_v55 = vadd.f32 %v6591_v61, %v11973_v26  ;;  %v6593_v41 = vpop.f32.mrb[125].mxu0 }
 0x6d4   : > { %v12040_v42 = vadd.f32 %v6593_v41, %v11986_v17  ;;  %v6595_v24 = vpop.f32.mrb[126].mxu0 }
 0x6d5   : > { %13875 = vst [vmem:[#allocation116_spill] sm:$0xff] %v12037_v55  ;;  %v12043_v45 = vadd.f32 %v6595_v24, %v11973_v26  ;;  %v6597_v33 = vpop.f32.mrb[127].mxu0 }
 0x6d6   : > { %13876 = vst [vmem:[#allocation118_spill] sm:$0xff] %v12040_v42  ;;  %v12046_v16 = vadd.f32 %v6597_v33, %v11986_v17 }
 0x6d7   : > { %13877 = vst [vmem:[#allocation119_spill] sm:$0xff] %v12043_v45 }
 0x6d8   : > { %13878 = vst [vmem:[#allocation120_spill] sm:$0xff] %v12046_v16 }
 0x6ed   : > { %v4762_v56 = vpop.xlane.xlu0 %4761 }
 0x6ee   : > { %v4808_v12 = vmul.f32 0.00390625, %v4762_v56 }
 0x6ef   : > { %v4765_v47 = vpop.xlane.xlu1 %4764 }
 0x6f0   : > { %v12049_v15 = vsub.f32 %v11826_v6, %v4808_v12  ;;  %v12052_v61 = vsub.f32 %v11829_v35, %v4808_v12  ;;  %v4809_v55 = vmul.f32 0.00390625, %v4765_v47 }
 0x6f2   : > { %v12055_v41 = vsub.f32 %v11832_v0, %v4809_v55  ;;  %v12058_v24 = vsub.f32 %v11835_v38, %v4809_v55  ;;  %v4856_v33 = vmul.f32 %v12049_v15, %v12049_v15  ;;  %v4857_v56 = vmul.f32 %v12052_v61, %v12052_v61 }
 0x6f4   : > { %v4888_v45 = vadd.f32 %v4857_v56, %v4856_v33  ;;  %v4858_v6 = vmul.f32 %v12055_v41, %v12055_v41  ;;  %v4859_v12 = vmul.f32 %v12058_v24, %v12058_v24 }
 0x6f5   : > { %v4768_v35 = vpop.xlane.xlu0 %4767 }
 0x6f6   : > { %v4810_v47 = vmul.f32 0.00390625, %v4768_v35  ;;  %4889 = vadd.xlane.f32.xlu0 %v4888_v45  ;;  %v4891_v0 = vadd.f32 %v4859_v12, %v4858_v6 }
 0x6f7   : > { %v4771_v16 = vpop.xlane.xlu1 %4770 }
 0x6f8   : > { %v12069_v38 = vsub.f32 %v11842_v32, %v4810_v47  ;;  %v12072_v55 = vsub.f32 %v11845_v49, %v4810_v47  ;;  %v4811_v42 = vmul.f32 0.00390625, %v4771_v16  ;;  %4892 = vadd.xlane.f32.xlu1 %v4891_v0 }
 0x6fa   : > { %v12075_v33 = vsub.f32 %v11848_v25, %v4811_v42  ;;  %v12078_v56 = vsub.f32 %v11851_v48, %v4811_v42  ;;  %v4860_v35 = vmul.f32 %v12069_v38, %v12069_v38  ;;  %v4861_v45 = vmul.f32 %v12072_v55, %v12072_v55 }
 0x6fc   : > { %v4894_v6 = vadd.f32 %v4861_v45, %v4860_v35  ;;  %v4862_v32 = vmul.f32 %v12075_v33, %v12075_v33  ;;  %v4863_v49 = vmul.f32 %v12078_v56, %v12078_v56 }
 0x6fd   : > { %v4774_v16 = vpop.xlane.xlu0 %4773 }
 0x6fe   : > { %v4812_v12 = vmul.f32 0.00390625, %v4774_v16  ;;  %4895 = vadd.xlane.f32.xlu0 %v4894_v6  ;;  %v4897_v25 = vadd.f32 %v4863_v49, %v4862_v32 }
 0x6ff   : > { %v4777_v47 = vpop.xlane.xlu1 %4776 }
 0x700   : > { %v12089_v48 = vsub.f32 %v11858_v62, %v4812_v12  ;;  %v12092_v42 = vsub.f32 %v11861_v39, %v4812_v12  ;;  %v4813_v0 = vmul.f32 0.00390625, %v4777_v47  ;;  %4898 = vadd.xlane.f32.xlu1 %v4897_v25 }
 0x702   : > { %v12095_v35 = vsub.f32 %v11864_v10, %v4813_v0  ;;  %v12098_v45 = vsub.f32 %v11867_v5, %v4813_v0  ;;  %v4864_v16 = vmul.f32 %v12089_v48, %v12089_v48  ;;  %v4865_v6 = vmul.f32 %v12092_v42, %v12092_v42 }
 0x704   : > { %v4900_v32 = vadd.f32 %v4865_v6, %v4864_v16  ;;  %v4866_v62 = vmul.f32 %v12095_v35, %v12095_v35  ;;  %v4867_v39 = vmul.f32 %v12098_v45, %v12098_v45 }
 0x705   : > { %v4780_v49 = vpop.xlane.xlu0 %4779 }
 0x706   : > { %v4814_v12 = vmul.f32 0.00390625, %v4780_v49  ;;  %4901 = vadd.xlane.f32.xlu0 %v4900_v32  ;;  %v4903_v10 = vadd.f32 %v4867_v39, %v4866_v62 }
 0x707   : > { %v4783_v25 = vpop.xlane.xlu1 %4782 }
 0x708   : > { %v12109_v5 = vsub.f32 %v11874_v40, %v4814_v12  ;;  %v12112_v47 = vsub.f32 %v11877_v43, %v4814_v12  ;;  %v4815_v0 = vmul.f32 0.00390625, %v4783_v25  ;;  %4904 = vadd.xlane.f32.xlu1 %v4903_v10 }
 0x70a   : > { %v12115_v16 = vsub.f32 %v11880_v13, %v4815_v0  ;;  %v12118_v6 = vsub.f32 %v11883_v29, %v4815_v0  ;;  %v4868_v49 = vmul.f32 %v12109_v5, %v12109_v5  ;;  %v4869_v32 = vmul.f32 %v12112_v47, %v12112_v47 }
 0x70c   : > { %v4906_v62 = vadd.f32 %v4869_v32, %v4868_v49  ;;  %v4870_v40 = vmul.f32 %v12115_v16, %v12115_v16  ;;  %v4871_v43 = vmul.f32 %v12118_v6, %v12118_v6 }
 0x70d   : > { %v4786_v39 = vpop.xlane.xlu0 %4785 }
 0x70e   : > { %v4816_v12 = vmul.f32 0.00390625, %v4786_v39  ;;  %4907 = vadd.xlane.f32.xlu0 %v4906_v62  ;;  %v4909_v13 = vadd.f32 %v4871_v43, %v4870_v40 }
 0x70f   : > { %v4789_v10 = vpop.xlane.xlu1 %4788 }
 0x710   : > { %v12129_v29 = vsub.f32 %v11890_v1, %v4816_v12  ;;  %v12132_v25 = vsub.f32 %v11893_v60, %v4816_v12  ;;  %v4817_v0 = vmul.f32 0.00390625, %v4789_v10  ;;  %4910 = vadd.xlane.f32.xlu1 %v4909_v13 }
 0x712   : > { %v12135_v49 = vsub.f32 %v11896_v20, %v4817_v0  ;;  %v12138_v32 = vsub.f32 %v11899_v19, %v4817_v0  ;;  %v4872_v39 = vmul.f32 %v12129_v29, %v12129_v29  ;;  %v4873_v62 = vmul.f32 %v12132_v25, %v12132_v25 }
 0x714   : > { %v4912_v40 = vadd.f32 %v4873_v62, %v4872_v39  ;;  %v4874_v1 = vmul.f32 %v12135_v49, %v12135_v49  ;;  %v4875_v60 = vmul.f32 %v12138_v32, %v12138_v32 }
 0x715   : > { %v4792_v43 = vpop.xlane.xlu0 %4791 }
 0x716   : > { %v4818_v12 = vmul.f32 0.00390625, %v4792_v43  ;;  %4913 = vadd.xlane.f32.xlu0 %v4912_v40  ;;  %v4915_v20 = vadd.f32 %v4875_v60, %v4874_v1 }
 0x717   : > { %v4795_v13 = vpop.xlane.xlu1 %4794 }
 0x718   : > { %v12149_v19 = vsub.f32 %v11906_v51, %v4818_v12  ;;  %v12152_v10 = vsub.f32 %v11909_v30, %v4818_v12  ;;  %v4819_v0 = vmul.f32 0.00390625, %v4795_v13  ;;  %4916 = vadd.xlane.f32.xlu1 %v4915_v20 }
 0x71a   : > { %v12155_v39 = vsub.f32 %v11912_v63, %v4819_v0  ;;  %v12158_v62 = vsub.f32 %v11915_v59, %v4819_v0  ;;  %v4876_v43 = vmul.f32 %v12149_v19, %v12149_v19  ;;  %v4877_v40 = vmul.f32 %v12152_v10, %v12152_v10 }
 0x71c   : > { %13879 = vst [vmem:[#allocation79_spill] sm:$0xff] %v12158_v62  ;;  %v4918_v1 = vadd.f32 %v4877_v40, %v4876_v43  ;;  %v4878_v51 = vmul.f32 %v12155_v39, %v12155_v39  ;;  %v4879_v30 = vmul.f32 %v12158_v62, %v12158_v62 }
 0x71d   : > { %v4798_v60 = vpop.xlane.xlu0 %4797 }
 0x71e   : > { %v4820_v12 = vmul.f32 0.00390625, %v4798_v60  ;;  %4919 = vadd.xlane.f32.xlu0 %v4918_v1  ;;  %v4921_v63 = vadd.f32 %v4879_v30, %v4878_v51 }
 0x71f   : > { %v4801_v20 = vpop.xlane.xlu1 %4800 }
 0x720   : > { %v12169_v59 = vsub.f32 %v11922_v11, %v4820_v12  ;;  %v12172_v13 = vsub.f32 %v11925_v37, %v4820_v12  ;;  %v4821_v0 = vmul.f32 0.00390625, %v4801_v20  ;;  %4922 = vadd.xlane.f32.xlu1 %v4921_v63  ;;  %v8153_v12 = vld [vmem:[#allocation22 + $0x40] sm:$0xff]  }
 0x721   : > { %7506 = vmatprep.subr.bf16.mxu1 %v8153_v12  ;;  %v8158_v12 = vld [vmem:[#allocation22 + $0x10] sm:$0xff]  }
 0x722   : > { %13880 = vst [vmem:[#allocation50_spill] sm:$0xff] %v12169_v59  ;;  %13881 = vst [vmem:[#allocation121_spill] sm:$0xff] %v12172_v13  ;;  %v12175_v43 = vsub.f32 %v11928_v44, %v4821_v0  ;;  %v12178_v40 = vsub.f32 %v11931_v57, %v4821_v0  ;;  %v4880_v60 = vmul.f32 %v12169_v59, %v12169_v59  ;;  %v8154_v44 = vld [vmem:[#allocation22] sm:$0xff]  }
 0x723   : > { %v4881_v1 = vmul.f32 %v12172_v13, %v12172_v13  ;;  %7507 = vmatpush3.bf16.msra.mxu1 %v8154_v44  ;;  %v8159_v44 = vld [vmem:[#allocation22 + $0x58] sm:$0xff]  }
 0x724   : > { %13882 = vst [vmem:[#allocation122_spill] sm:$0xff] %v12175_v43  ;;  %13883 = vst [vmem:[#allocation123_spill] sm:$0xff] %v12178_v40  ;;  %v4882_v11 = vmul.f32 %v12175_v43, %v12175_v43  ;;  %v4883_v37 = vmul.f32 %v12178_v40, %v12178_v40  ;;  %v8156_v43 = vld [vmem:[#allocation22 + $0x8] sm:$0xff]  }
 0x725   : > { %v4924_v51 = vadd.f32 %v4881_v1, %v4880_v60  ;;  %v4804_v30 = vpop.xlane.xlu0 %4803  ;;  %v8155_v1 = vld [vmem:[#allocation22 + $0x48] sm:$0xff]  }
 0x726   : > { %v4822_v63 = vmul.f32 0.00390625, %v4804_v30  ;;  %v4927_v57 = vadd.f32 %v4883_v37, %v4882_v11  ;;  %7508 = vmatprep.subr.bf16.mxu1 %v8155_v1  ;;  %v8164_v1 = vld [vmem:[#allocation22 + $0x28] sm:$0xff]  }
 0x727   : > { %4925 = vadd.xlane.f32.xlu0 %v4924_v51  ;;  %v4807_v20 = vpop.xlane.xlu1 %4806  ;;  %7509 = vmatpush3.bf16.msra.mxu1 %v8156_v43  ;;  %v8165_v43 = vld [vmem:[#allocation22 + $0x70] sm:$0xff]  }
 0x728   : > { %v12189_v0 = vsub.f32 %v11938_v53, %v4822_v63  ;;  %v12192_v13 = vsub.f32 %v11941_v23, %v4822_v63  ;;  %v4823_v60 = vmul.f32 0.00390625, %v4807_v20  ;;  %4928 = vadd.xlane.f32.xlu1 %v4927_v57  ;;  %v8160_v63 = vld [vmem:[#allocation22 + $0x18] sm:$0xff]   ;;  %v8161_v57 = vld [vmem:[#allocation22 + $0x60] sm:$0xff]  }
 0x729   : > { %v8162_v20 = vld [vmem:[#allocation22 + $0x20] sm:$0xff]  }
 0x72a   : > { %13884 = vst [vmem:[#allocation125_spill] sm:$0xff] %v12189_v0  ;;  %13885 = vst [vmem:[#allocation60_spill] sm:$0xff] %v12192_v13  ;;  %v12195_v40 = vsub.f32 %v11944_v3, %v4823_v60  ;;  %v12198_v30 = vsub.f32 %v11947_v36, %v4823_v60  ;;  %v4884_v51 = vmul.f32 %v12189_v0, %v12189_v0  ;;  %v8157_v36 = vld [vmem:[#allocation22 + $0x50] sm:$0xff]   ;;  %v8163_v60 = vld [vmem:[#allocation22 + $0x68] sm:$0xff]  }
 0x72b   : > { %v4885_v53 = vmul.f32 %v12192_v13, %v12192_v13  ;;  %7510 = vmatprep.subr.bf16.mxu1 %v8157_v36 }
 0x72c   : > { %13886 = vst [vmem:[#allocation126_spill] sm:$0xff] %v12195_v40  ;;  %13887 = vst [vmem:[#allocation127_spill] sm:$0xff] %v12198_v30  ;;  %v4886_v11 = vmul.f32 %v12195_v40, %v12195_v40  ;;  %v4887_v37 = vmul.f32 %v12198_v30, %v12198_v30  ;;  %7511 = vmatpush3.bf16.msra.mxu1 %v8158_v12 }
 0x72d   : > { %v4930_v23 = vadd.f32 %v4885_v53, %v4884_v51  ;;  %7512 = vmatprep.subr.bf16.mxu1 %v8159_v44  ;;  %v8166_v51 = vld [vmem:[#allocation22 + $0x30] sm:$0xff]   ;;  %v8167_v53 = vld [vmem:[#allocation22 + $0x78] sm:$0xff]  }
 0x72e   : > { %v4933_v3 = vadd.f32 %v4887_v37, %v4886_v11 }
 0x72f   : > { %4931 = vadd.xlane.f32.xlu0 %v4930_v23  ;;  %v8168_v23 = vld [vmem:[#allocation22 + $0x38] sm:$0xff]  }
 0x730   : > { %4934 = vadd.xlane.f32.xlu1 %v4933_v3  ;;  %7513 = vmatpush3.bf16.msra.mxu1 %v8160_v63 }
 0x731   : > { %7514 = vmatprep.subr.bf16.mxu1 %v8161_v57  ;;  %v13888_v57 = vld [vmem:[#allocation108_spill] sm:$0xff] }
 0x734   : > { %7515 = vmatpush3.bf16.msra.mxu1 %v8162_v20  ;;  %v12210_v20 = vadd.f32 %v13888_v57, %v11689_v22  ;;  %v4758_v57 = vld [vmem:[%s13901_s8] sm:$0x3] }
 0x735   : > { %7516 = vmatprep.subr.bf16.mxu1 %v8163_v60  ;;  %v13890_v60 = vld [vmem:[#allocation51_spill] sm:$0xff] }
 0x736   : > { %13889 = vst [vmem:[#allocation68_spill] sm:$0xff] %v12210_v20 }
 0x738   : > { %7517 = vmatpush3.bf16.msra.mxu1 %v8164_v1  ;;  %v12214_v1 = vadd.f32 %v13890_v60, %v11689_v22 }
 0x739   : > { %7518 = vmatprep.subr.bf16.mxu1 %v8165_v43  ;;  %v13892_v43 = vld [vmem:[#allocation109_spill] sm:$0xff] }
 0x73a   : > { %13891 = vst [vmem:[#allocation128_spill] sm:$0xff] %v12214_v1 }
 0x73c   : > { %7519 = vmatpush3.bf16.msra.mxu1 %v8166_v51  ;;  %v12218_v51 = vadd.f32 %v13892_v43, %v11705_v34 }
 0x73d   : > { %7520 = vmatprep.subr.bf16.mxu1 %v8167_v53  ;;  %v13894_v53 = vld [vmem:[#allocation110_spill] sm:$0xff] }
 0x73e   : > { %13893 = vst [vmem:[#allocation41_spill] sm:$0xff] %v12218_v51 }
 0x740   : > { %7521 = vmatpush3.bf16.msra.mxu1 %v8168_v23  ;;  %v12222_v23 = vadd.f32 %v13894_v53, %v11689_v22  ;;  %v13902_v53 = vld [vmem:[#allocation78_spill] sm:$0xff] }
 0x741   : > { %v12241_v30 = vadd.f32 %v13902_v53, %v11705_v34 }
 0x742   : > { %13895 = vst [vmem:[#allocation40_spill] sm:$0xff] %v12222_v23 }
 0x743   : > { %13903 = vst [vmem:[#allocation45_spill] sm:$0xff] %v12241_v30 }
 0x783   : > { %v4890_v11 = vpop.xlane.xlu0 %4889 }
 0x784   : > { %v4936_v37 = vmul.f32 0.00390625, %v4890_v11  ;;  %v13896_v11 = vld [vmem:[#allocation77_spill] sm:$0xff] }
 0x785   : > { %v4893_v3 = vpop.xlane.xlu1 %4892 }
 0x786   : > { %v4952_v36 = vadd.f32 1e-05, %v4936_v37  ;;  %v4937_v12 = vmul.f32 0.00390625, %v4893_v3  ;;  %v12226_v37 = vadd.f32 %v13896_v11, %v11705_v34  ;;  %v13897_v3 = vld [vmem:[#allocation112_spill] sm:$0xff]  ;;  %v12259_v11 = vrot.slane %v4758_v57, %v13734_v7 }
 0x788   : > { %8457 = vrsqrt.f32 %v4952_v36  ;;  %v4953_v44 = vadd.f32 1e-05, %v4937_v12  ;;  %v12230_v36 = vadd.f32 %v13897_v3, %v11705_v34  ;;  %v13899_v12 = vld [vmem:[#allocation65_spill] sm:$0xff]  ;;  %v13904_v3 = vld [vmem:[#allocation114_spill] sm:$0xff] }
 0x789   : > { %v12247_v13 = vadd.f32 %v13904_v3, %v11705_v34 }
 0x78a   : > { %8459 = vrsqrt.f32 %v4953_v44  ;;  %13898 = vst [vmem:[#allocation43_spill] sm:$0xff] %v12230_v36  ;;  %v12234_v44 = vadd.f32 %v13899_v12, %v11689_v22  ;;  %v13906_v22 = vld [vmem:[#allocation117_spill] sm:$0xff] }
 0x78b   : > { %v4896_v63 = vpop.xlane.xlu0 %4895  ;;  %13905 = vst [vmem:[#allocation44_spill] sm:$0xff] %v12247_v13  ;;  %v12251_v12 = vadd.f32 %v13906_v22, %v11705_v34 }
 0x78c   : > { %13900 = vst [vmem:[#allocation42_spill] sm:$0xff] %v12234_v44  ;;  %v4938_v60 = vmul.f32 0.00390625, %v4896_v63  ;;  %v4759_v63 = vld [vmem:[%s13908_s6] sm:$0x3] }
 0x78d   : > { %v4899_v43 = vpop.xlane.xlu1 %4898  ;;  %13907 = vst [vmem:[#allocation47_spill] sm:$0xff] %v12251_v12  ;;  %v12267_v0 = vrot.slane %v4759_v63, %v13734_v7 }
 0x78e   : > { %v4939_v40 = vmul.f32 0.00390625, %v4899_v43  ;;  %v4954_v22 = vadd.f32 1e-05, %v4938_v60 }
 0x790   : > { %v4955_v7 = vadd.f32 1e-05, %v4939_v40  ;;  %8461 = vrsqrt.f32 %v4954_v22 }
 0x792   : > { %v8458_v59 = vpop.eup %8457  ;;  %8463 = vrsqrt.f32 %v4955_v7 }
 0x793   : > { %v4984_v53 = vmul.f32 %v8458_v59, %v12049_v15  ;;  %v4902_v23 = vpop.xlane.xlu0 %4901  ;;  %v12278_v15 = vrot.slane %v4758_v57, %v13736_v18  ;;  %v4985_v44 = vmul.f32 %v8458_v59, %v12052_v61 }
 0x794   : > { %v8460_v51 = vpop.eup %8459  ;;  %v4940_v43 = vmul.f32 0.00390625, %v4902_v23 }
 0x795   : > { %v5027_v20 = vmul.f32 %v12259_v11, %v4984_v53  ;;  %v4986_v62 = vmul.f32 %v8460_v51, %v12055_v41  ;;  %v4905_v27 = vpop.xlane.xlu1 %4904  ;;  %v4987_v1 = vmul.f32 %v8460_v51, %v12058_v24  ;;  %v13911_v24 = vld [vmem:[#allocation74_spill] sm:$0xff] }
 0x796   : > { %v4941_v60 = vmul.f32 0.00390625, %v4905_v27  ;;  %v4956_v27 = vadd.f32 1e-05, %v4940_v43  ;;  %v12315_v43 = vadd.f32 %v13911_v24, %v11986_v17 }
 0x797   : > { %v5070_v3 = vadd.f32 %v12267_v0, %v5027_v20  ;;  %v5029_v34 = vmul.f32 %v12259_v11, %v4986_v62  ;;  %v5028_v62 = vmul.f32 %v12278_v15, %v4985_v44  ;;  %v12295_v20 = vrot.slane %v4759_v63, %v13736_v18 }
 0x798   : > { %v5030_v23 = vmul.f32 %v12278_v15, %v4987_v1  ;;  %v4957_v50 = vadd.f32 1e-05, %v4941_v60  ;;  %v13910_v1 = vld [vmem:[#allocation54_spill] sm:$0xff]  ;;  %8465 = vrsqrt.f32 %v4956_v27 }
 0x799   : > { %v12289_v61 = vmul.f32 0.70710677, %v5070_v3  ;;  %v5072_v59 = vadd.f32 %v12267_v0, %v5029_v34  ;;  %v12309_v41 = vadd.f32 %v13910_v1, %v11973_v26  ;;  %v5071_v57 = vadd.f32 %v12295_v20, %v5028_v62  ;;  %v13913_v27 = vld [vmem:[#allocation94_spill] sm:$0xff]  ;;  %v13914_v62 = vld [vmem:[#allocation95_spill] sm:$0xff] }
 0x79a   : > { %8467 = vrsqrt.f32 %v4957_v50  ;;  %v5073_v44 = vadd.f32 %v12295_v20, %v5030_v23  ;;  %v8462_v52 = vpop.eup %8461  ;;  %v13916_v50 = vld [vmem:[#allocation92_spill] sm:$0xff] }
 0x79b   : > { %v5230_v51 = vand.u32 2147483647, %v12289_v61  ;;  %v12299_v22 = vmul.f32 0.70710677, %v5072_v59  ;;  %v4908_v40 = vpop.xlane.xlu0 %4907  ;;  %v12331_v23 = vadd.f32 %v13916_v50, %v11986_v17  ;;  %v4988_v2 = vmul.f32 %v8462_v52, %v12069_v38 }
 0x79c   : > { %v4942_v60 = vmul.f32 0.00390625, %v4908_v40  ;;  %v12323_v40 = vadd.f32 %v13913_v27, %v11986_v17  ;;  %v8464_v9 = vpop.eup %8463  ;;  %v12357_v21 = vmul.f32 0.5, %v5072_v59  ;;  %v12360_v13 = vmul.f32 0.5, %v5073_v44 }
 0x79d   : > { %v5262_v18 = vmul.f32 0.3275911, %v5230_v51  ;;  %v5678_v63 = vsub.f32 0.0, %v5230_v51  ;;  %v5232_v53 = vand.u32 2147483647, %v12299_v22  ;;  %v4911_v7 = vpop.xlane.xlu1 %4910  ;;  %13917 = vst [vmem:[#allocation49_spill] sm:$0xff] %v12331_v23 }
 0x79e   : > { %v4958_v27 = vadd.f32 1e-05, %v4942_v60  ;;  %v4943_v28 = vmul.f32 0.00390625, %v4911_v7  ;;  %v12353_v7 = vmul.f32 0.5, %v5070_v3  ;;  %vm5166_vm0 = vcmp.ge.f32.partialorder %v12289_v61, 0.0 }
 0x79f   : > { %v5294_v8 = vadd.f32 1.0, %v5262_v18  ;;  %v5264_v34 = vmul.f32 0.3275911, %v5232_v53  ;;  %v12327_v18 = vadd.f32 %v13914_v62, %v11973_v26  ;;  %v5710_v1 = vmul.f32 %v5678_v63, %v5230_v51  ;;  %v13922_v62 = vld [vmem:[#allocation98_spill] sm:$0xff]  ;;  %v13924_v63 = vld [vmem:[#allocation111_spill] sm:$0xff] }
 0x7a0   : > { %v12343_v4 = vadd.f32 %v13922_v62, %v11986_v17  ;;  %v5680_v50 = vsub.f32 0.0, %v5232_v53  ;;  %v12345_v51 = vmul.f32 0.70710677, %v5073_v44  ;;  %v4989_v26 = vmul.f32 %v8462_v52, %v12072_v55 }
 0x7a1   : > { %13915 = vst [vmem:[#allocation46_spill] sm:$0xff] %v12327_v18  ;;  %8469 = vrcp.f32 %v5294_v8  ;;  %v5296_v24 = vadd.f32 1.0, %v5264_v34  ;;  %v5135_v8 = vmul.f32 0.70710677, %v5071_v57  ;;  %v12351_v60 = vadd.f32 %v13924_v63, %v11986_v17 }
 0x7a2   : > { %13923 = vst [vmem:[#allocation52_spill] sm:$0xff] %v12343_v4  ;;  %v5742_v54 = vmul.f32 1.442695, %v5710_v1  ;;  %v12355_v62 = vmul.f32 0.5, %v5071_v57  ;;  %v4990_v4 = vmul.f32 %v8464_v9, %v12075_v33  ;;  %v5712_v38 = vmul.f32 %v5680_v50, %v5232_v53  ;;  %v8466_v17 = vpop.eup %8465 }
 0x7a3   : > { %v4914_v31 = vpop.xlane.xlu0 %4913  ;;  %8471 = vrcp.f32 %v5296_v24  ;;  %13925 = vst [vmem:[#allocation57_spill] sm:$0xff] %v12351_v60  ;;  %v4959_v24 = vadd.f32 1e-05, %v4943_v28  ;;  %v5233_v52 = vand.u32 2147483647, %v12345_v51  ;;  %v12364_v55 = vmul.f32 %v12259_v11, %v4988_v2 }
 0x7a4   : > { %v4944_v34 = vmul.f32 0.00390625, %v4914_v31  ;;  %8473 = vrsqrt.f32 %v4958_v27  ;;  %v5231_v31 = vand.u32 2147483647, %v5135_v8  ;;  %v5032_v3 = vmul.f32 %v12278_v15, %v4989_v26  ;;  %v8468_v1 = vpop.eup %8467 }
 0x7a5   : > { %v4917_v12 = vpop.xlane.xlu1 %4916  ;;  %v4991_v57 = vmul.f32 %v8464_v9, %v12078_v56  ;;  %8475 = vpow2.f32 %v5742_v54  ;;  %vm5168_vm1 = vcmp.ge.f32.partialorder %v12299_v22, 0.0  ;;  %v5265_v53 = vmul.f32 0.3275911, %v5233_v52 }
 0x7a6   : > { %v4960_v59 = vadd.f32 1e-05, %v4944_v34  ;;  %v4945_v28 = vmul.f32 0.00390625, %v4917_v12  ;;  %v5263_v33 = vmul.f32 0.3275911, %v5231_v31  ;;  %v12371_v44 = vmul.f32 %v12259_v11, %v4990_v4 }
 0x7a7   : > { %8477 = vrsqrt.f32 %v4959_v24  ;;  %vm5167_vm2 = vcmp.ge.f32.partialorder %v5135_v8, 0.0  ;;  %v5679_v27 = vsub.f32 0.0, %v5231_v31  ;;  %v5746_v2 = vmul.f32 1.442695, %v5712_v38 }
 0x7a8   : > { %v4992_v9 = vmul.f32 %v8466_v17, %v12089_v48  ;;  %v5295_v56 = vadd.f32 1.0, %v5263_v33  ;;  %v5297_v26 = vadd.f32 1.0, %v5265_v53  ;;  %v4993_v34 = vmul.f32 %v8466_v17, %v12092_v42 }
 0x7a9   : > { %v4994_v63 = vmul.f32 %v8468_v1, %v12095_v35  ;;  %8479 = vrsqrt.f32 %v4960_v59  ;;  %v5034_v4 = vmul.f32 %v12278_v15, %v4991_v57  ;;  %v4961_v24 = vadd.f32 1e-05, %v4945_v28 }
 0x7aa   : > { %8481 = vrcp.f32 %v5295_v56  ;;  %v5681_v60 = vsub.f32 0.0, %v5233_v52  ;;  %vm5169_vm3 = vcmp.ge.f32.partialorder %v12345_v51, 0.0  ;;  %v13926_v48 = vmov -1.0  }
 0x7ab   : > { %v12373_v50 = vpop.eup %8469  ;;  %v4920_v12 = vpop.xlane.xlu0 %4919  ;;  %v12385_v38 = vsel %vm5167_vm2, 1.0, %v13926_v48  ;;  %8483 = vrcp.f32 %v5297_v26  ;;  %v5711_v42 = vmul.f32 %v5679_v27, %v5231_v31  ;;  %v4995_v35 = vmul.f32 %v8468_v1, %v12098_v45 }
 0x7ac   : > { %v5390_v54 = vmul.f32 1.0614054, %v12373_v50  ;;  %8485 = vpow2.f32 %v5746_v2  ;;  %v4946_v17 = vmul.f32 0.00390625, %v4920_v12  ;;  %v12390_v33 = vmul.f32 %v12259_v11, %v4992_v9 }
 0x7ad   : > { %v12380_v14 = vpop.eup %8471  ;;  %v4923_v59 = vpop.xlane.xlu1 %4922  ;;  %v12393_v53 = vmul.f32 %v12278_v15, %v4993_v34  ;;  %v12396_v8 = vmul.f32 %v12259_v11, %v4994_v63  ;;  %8487 = vrsqrt.f32 %v4961_v24  ;;  %v5713_v31 = vmul.f32 %v5681_v60, %v5233_v52 }
 0x7ae   : > { %v5392_v57 = vmul.f32 1.0614054, %v12380_v14  ;;  %v8474_v28 = vpop.eup %8473  ;;  %v5422_v56 = vadd.f32 -1.4531521, %v5390_v54  ;;  %v5075_v45 = vadd.f32 %v12295_v20, %v5032_v3  ;;  %v4947_v1 = vmul.f32 0.00390625, %v4923_v59 }
 0x7af   : > { %v12402_v2 = vsel %vm5169_vm3, 1.0, %v13926_v48  ;;  %v5744_v9 = vmul.f32 1.442695, %v5711_v42  ;;  %v12405_v34 = vpop.eup %8475  ;;  %v12408_v63 = vmul.f32 %v12278_v15, %v4995_v35  ;;  %v4996_v12 = vmul.f32 %v8474_v28, %v12109_v5 }
 0x7b0   : > { %v5424_v27 = vadd.f32 -1.4531521, %v5392_v57  ;;  %v5454_v26 = vmul.f32 %v12373_v50, %v5422_v56  ;;  %v4962_v60 = vadd.f32 1e-05, %v4946_v17  ;;  %v5077_v52 = vadd.f32 %v12295_v20, %v5034_v4 }
 0x7b1   : > { %v8478_v3 = vpop.eup %8477  ;;  %v12415_v51 = vsel %vm5166_vm0, 1.0, %v13926_v48  ;;  %v12420_v54 = vsel %vm5168_vm1, 1.0, %v13926_v48  ;;  %v4997_v35 = vmul.f32 %v8474_v28, %v12112_v47  ;;  %v5748_v5 = vmul.f32 1.442695, %v5713_v31 }
 0x7b2   : > { %v5456_v24 = vmul.f32 %v12380_v14, %v5424_v27  ;;  %v5486_v42 = vadd.f32 1.4214138, %v5454_v26  ;;  %v12424_v17 = vmul.f32 0.5, %v5075_v45  ;;  %v12426_v4 = vmul.f32 0.70710677, %v5075_v45 }
 0x7b3   : > { %v8480_v59 = vpop.eup %8479  ;;  %v4963_v57 = vadd.f32 1e-05, %v4947_v1  ;;  %8489 = vpow2.f32 %v5744_v9  ;;  %v12432_v22 = vmul.f32 %v12259_v11, %v4996_v12  ;;  %v4998_v27 = vmul.f32 %v8478_v3, %v12115_v16 }
 0x7b4   : > { %v5488_v61 = vadd.f32 1.4214138, %v5456_v24  ;;  %v5518_v56 = vmul.f32 %v12373_v50, %v5486_v42  ;;  %v12429_v18 = vpop.eup %8481  ;;  %8491 = vrsqrt.f32 %v4962_v60  ;;  %v12435_v47 = vmul.f32 0.5, %v5077_v52  ;;  %v4926_v24 = vpop.xlane.xlu0 %4925 }
 0x7b5   : > { %13927 = vst [vmem:[#allocation56_spill] sm:$0xff] %v12432_v22  ;;  %v12437_v28 = vpop.eup %8483  ;;  %v4999_v31 = vmul.f32 %v8478_v3, %v12118_v6  ;;  %v5391_v45 = vmul.f32 1.0614054, %v12429_v18  ;;  %v5141_v9 = vmul.f32 0.70710677, %v5077_v52  ;;  %8493 = vpow2.f32 %v5748_v5 }
 0x7b6   : > { %13928 = vst [vmem:[#allocation59_spill] sm:$0xff] %v12435_v47  ;;  %v5520_v1 = vmul.f32 %v12380_v14, %v5488_v61  ;;  %v8486_v26 = vpop.eup %8485  ;;  %v5393_v42 = vmul.f32 1.0614054, %v12437_v28  ;;  %v5550_v12 = vadd.f32 -0.28449672, %v5518_v56  ;;  %v12447_v60 = vmul.f32 %v12278_v15, %v4997_v35 }
 0x7b7   : > { %v12444_v16 = vand.u32 2147483647, %v12426_v4  ;;  %8495 = vrsqrt.f32 %v4963_v57  ;;  %v5423_v22 = vadd.f32 -1.4531521, %v5391_v45  ;;  %v8488_v3 = vpop.eup %8487  ;;  %v5000_v46 = vmul.f32 %v8480_v59, %v12129_v29 }
 0x7b8   : > { %13929 = vst [vmem:[#allocation58_spill] sm:$0xff] %v12447_v60  ;;  %v5552_v6 = vadd.f32 -0.28449672, %v5520_v1  ;;  %v5425_v61 = vadd.f32 -1.4531521, %v5393_v42  ;;  %v5582_v52 = vmul.f32 %v12373_v50, %v5550_v12  ;;  %vm5171_vm4 = vcmp.ge.f32.partialorder %v12426_v4, 0.0  ;;  %v4929_v1 = vpop.xlane.xlu1 %4928 }
 0x7b9   : > { %v12453_v5 = vmul.f32 %v12259_v11, %v4998_v27  ;;  %v4948_v56 = vmul.f32 0.00390625, %v4926_v24  ;;  %v5455_v30 = vmul.f32 %v12429_v18, %v5423_v22  ;;  %v12458_v57 = vmul.f32 %v12278_v15, %v4999_v31 }
 0x7ba   : > { %v5584_v35 = vmul.f32 %v12380_v14, %v5552_v6  ;;  %v5001_v45 = vmul.f32 %v8480_v59, %v12132_v25  ;;  %v12461_v29 = vand.u32 2147483647, %v5141_v9  ;;  %v5267_v42 = vmul.f32 0.3275911, %v12444_v16 }
 0x7bb   : > { %13930 = vst [vmem:[#allocation108_spill] sm:$0xff] %v12453_v5  ;;  %13931 = vst [vmem:[#allocation51_spill] sm:$0xff] %v12458_v57  ;;  %v5002_v12 = vmul.f32 %v8488_v3, %v12135_v49  ;;  %v5457_v27 = vmul.f32 %v12437_v28, %v5425_v61  ;;  %v5487_v5 = vadd.f32 1.4214138, %v5455_v30  ;;  %vm5173_vm5 = vcmp.ge.f32.partialorder %v5141_v9, 0.0 }
 0x7bc   : > { %v12467_v22 = vmul.f32 %v12259_v11, %v5000_v46  ;;  %v5003_v24 = vmul.f32 %v8488_v3, %v12138_v32  ;;  %v5614_v31 = vadd.f32 0.2548296, %v5582_v52  ;;  %v5616_v6 = vadd.f32 0.2548296, %v5584_v35  ;;  %v4932_v3 = vpop.xlane.xlu0 %4931 }
 0x7bd   : > { %v8490_v57 = vpop.eup %8489  ;;  %v4964_v25 = vadd.f32 1e-05, %v4948_v56  ;;  %v4949_v59 = vmul.f32 0.00390625, %v4929_v1  ;;  %v5489_v60 = vadd.f32 1.4214138, %v5457_v27  ;;  %v5519_v23 = vmul.f32 %v12429_v18, %v5487_v5 }
 0x7be   : > { %v8492_v47 = vpop.eup %8491  ;;  %v5646_v49 = vmul.f32 %v12373_v50, %v5614_v31  ;;  %v5648_v61 = vmul.f32 %v12380_v14, %v5616_v6  ;;  %v5269_v30 = vmul.f32 0.3275911, %v12461_v29  ;;  %v5299_v36 = vadd.f32 1.0, %v5267_v42 }
 0x7bf   : > { %v12475_v46 = vmul.f32 %v12278_v15, %v5001_v45  ;;  %v12478_v32 = vmul.f32 %v12259_v11, %v5002_v12  ;;  %v5521_v52 = vmul.f32 %v12437_v28, %v5489_v60  ;;  %v5551_v56 = vadd.f32 -0.28449672, %v5519_v23  ;;  %v8494_v35 = vpop.eup %8493 }
 0x7c0   : > { %v12482_v5 = vmul.f32 %v12278_v15, %v5003_v24  ;;  %v5806_v50 = vmul.f32 %v12405_v34, %v5646_v49  ;;  %v5808_v14 = vmul.f32 %v8486_v26, %v5648_v61  ;;  %v12488_v1 = vsel %vm5171_vm4, 1.0, %v13926_v48 }
 0x7c1   : > { %v8496_v45 = vpop.eup %8495  ;;  %v5553_v42 = vadd.f32 -0.28449672, %v5521_v52  ;;  %v5583_v12 = vmul.f32 %v12429_v18, %v5551_v56  ;;  %v5301_v27 = vadd.f32 1.0, %v5269_v30  ;;  %8497 = vrcp.f32 %v5299_v36 }
 0x7c2   : > { %8499 = vrsqrt.f32 %v4964_v25  ;;  %v4965_v23 = vadd.f32 1e-05, %v4949_v59  ;;  %v4950_v60 = vmul.f32 0.00390625, %v4932_v3  ;;  %v12493_v24 = vsel %vm5173_vm5, 1.0, %v13926_v48  ;;  %v4935_v25 = vpop.xlane.xlu1 %4934 }
 0x7c3   : > { %v5585_v34 = vmul.f32 %v12437_v28, %v5553_v42  ;;  %v5615_v26 = vadd.f32 0.2548296, %v5583_v12  ;;  %v5838_v31 = vsub.f32 1.0, %v5806_v50  ;;  %v5840_v4 = vsub.f32 1.0, %v5808_v14 }
 0x7c4   : > { %v5004_v6 = vmul.f32 %v8492_v47, %v12149_v19  ;;  %v5005_v49 = vmul.f32 %v8492_v47, %v12152_v10  ;;  %8501 = vrcp.f32 %v5301_v27  ;;  %v12500_v36 = vadd.f32 %v12267_v0, %v12364_v55 }
 0x7c5   : > { %v5617_v59 = vadd.f32 0.2548296, %v5585_v34  ;;  %v5647_v9 = vmul.f32 %v12429_v18, %v5615_v26  ;;  %v5870_v61 = vmul.f32 %v5838_v31, %v12415_v51  ;;  %v5872_v30 = vmul.f32 %v5840_v4, %v12420_v54  ;;  %v13932_v51 = vld [vmem:[#allocation79_spill] sm:$0xff]  ;;  %v13933_v26 = vld [vmem:[#allocation68_spill] sm:$0xff] }
 0x7c6   : > { %v5006_v3 = vmul.f32 %v8496_v45, %v12155_v39  ;;  %8503 = vrsqrt.f32 %v4965_v23  ;;  %v4966_v52 = vadd.f32 1e-05, %v4950_v60  ;;  %v5683_v19 = vsub.f32 0.0, %v12444_v16  ;;  %v13935_v4 = vld [vmem:[#allocation128_spill] sm:$0xff] }
 0x7c7   : > { %v5649_v10 = vmul.f32 %v12437_v28, %v5617_v59  ;;  %v5807_v47 = vmul.f32 %v8490_v57, %v5647_v9  ;;  %v5902_v56 = vadd.f32 1.0, %v5870_v61  ;;  %v5904_v55 = vadd.f32 1.0, %v5872_v30 }
 0x7c8   : > { %v12509_v50 = vmul.f32 %v12259_v11, %v5004_v6  ;;  %v12512_v18 = vmul.f32 %v12278_v15, %v5005_v49  ;;  %v5007_v14 = vmul.f32 %v8496_v45, %v13932_v51  ;;  %v4951_v54 = vmul.f32 0.00390625, %v4935_v25 }
 0x7c9   : > { %v5809_v42 = vmul.f32 %v8494_v35, %v5649_v10  ;;  %v5839_v39 = vsub.f32 1.0, %v5807_v47  ;;  %v5934_v12 = vmul.f32 %v5902_v56, %v12353_v7  ;;  %v5936_v27 = vmul.f32 %v5904_v55, %v12357_v21 }
 0x7ca   : > { %v12518_v28 = vmul.f32 %v12259_v11, %v5006_v3  ;;  %8505 = vrsqrt.f32 %v4966_v52  ;;  %v5685_v57 = vsub.f32 0.0, %v12461_v29  ;;  %v5715_v23 = vmul.f32 %v5683_v19, %v12444_v16 }
 0x7cb   : > { %v12522_v60 = vpop.eup %8497  ;;  %v5841_v34 = vsub.f32 1.0, %v5809_v42  ;;  %v5871_v45 = vmul.f32 %v5839_v39, %v12385_v38  ;;  %v13934_v35 = vsub.f32 1.0, %v13933_v26  ;;  %v13936_v7 = vsub.f32 1.0, %v13935_v4  ;;  %v13938_v39 = vld [vmem:[#allocation41_spill] sm:$0xff] }
 0x7cc   : > { %v8500_v21 = vpop.eup %8499  ;;  %v12530_v49 = vmul.f32 %v12278_v15, %v5007_v14  ;;  %v4967_v25 = vadd.f32 1e-05, %v4951_v54  ;;  %v5395_v59 = vmul.f32 1.0614054, %v12522_v60  ;;  %v12535_v16 = vadd.f32 %v12267_v0, %v12371_v44 }
 0x7cd   : > { %v6632_v31 = vmul.f32 %v13934_v35, %v5934_v12  ;;  %v6634_v6 = vmul.f32 %v13936_v7, %v5936_v27  ;;  %v5873_v9 = vmul.f32 %v5841_v34, %v12402_v2  ;;  %v5903_v38 = vadd.f32 1.0, %v5871_v45 }
 0x7ce   : > { %v12540_v3 = vpop.eup %8501  ;;  %v5427_v52 = vadd.f32 -1.4531521, %v5395_v59  ;;  %v5717_v19 = vmul.f32 %v5685_v57, %v12461_v29  ;;  %v5752_v10 = vmul.f32 1.442695, %v5715_v23  ;;  %v12544_v47 = vmul.f32 0.70710677, %v12500_v36 }
 0x7cf   : > { %v6664_v61 = vadd.f32 %v6632_v31, %v12309_v41  ;;  %v6666_v30 = vadd.f32 %v6634_v6, %v12319_v58  ;;  %v5905_v56 = vadd.f32 1.0, %v5873_v9  ;;  %v5935_v44 = vmul.f32 %v5903_v38, %v12355_v62  ;;  %v13937_v29 = vld [vmem:[#allocation50_spill] sm:$0xff]  ;;  %v13940_v57 = vld [vmem:[#allocation121_spill] sm:$0xff] }
 0x7d0   : > { %v5397_v2 = vmul.f32 1.0614054, %v12540_v3  ;;  %v8504_v51 = vpop.eup %8503  ;;  %8507 = vrsqrt.f32 %v4967_v25  ;;  %v5459_v41 = vmul.f32 %v12522_v60, %v5427_v52  ;;  %v12550_v58 = vmul.f32 0.70710677, %v12535_v16 }
 0x7d1   : > { %v6696_v55 = vpack.c.bf16 %v6666_v30, %v6664_v61  ;;  %v5234_v14 = vand.u32 2147483647, %v12544_v47  ;;  %v5008_v54 = vmul.f32 %v8500_v21, %v13937_v29  ;;  %v5937_v42 = vmul.f32 %v5905_v56, %v12360_v13  ;;  %v13942_v13 = vld [vmem:[#allocation122_spill] sm:$0xff] }
 0x7d2   : > { %v13939_v12 = vsub.f32 1.0, %v13938_v39  ;;  %v5429_v62 = vadd.f32 -1.4531521, %v5397_v2  ;;  %v5009_v23 = vmul.f32 %v8500_v21, %v13940_v57  ;;  %v5491_v34 = vadd.f32 1.4214138, %v5459_v41  ;;  %v13943_v21 = vld [vmem:[#allocation123_spill] sm:$0xff] }
 0x7d3   : > { %v5756_v45 = vmul.f32 1.442695, %v5717_v19  ;;  %v5236_v26 = vand.u32 2147483647, %v12550_v58  ;;  %v13941_v35 = vsub.f32 1.0, %v12226_v37  ;;  %8509 = vpow2.f32 %v5752_v10  ;;  %v13944_v41 = vld [vmem:[#allocation125_spill] sm:$0xff] }
 0x7d4   : > { %v6633_v27 = vmul.f32 %v13939_v12, %v5935_v44  ;;  %v5461_v7 = vmul.f32 %v12540_v3, %v5429_v62  ;;  %v8506_v6 = vpop.eup %8505  ;;  %v5010_v25 = vmul.f32 %v8504_v51, %v13942_v13  ;;  %v5523_v59 = vmul.f32 %v12522_v60, %v5491_v34 }
 0x7d5   : > { %v6635_v31 = vmul.f32 %v13941_v35, %v5937_v42  ;;  %v5266_v9 = vmul.f32 0.3275911, %v5234_v14  ;;  %v5268_v38 = vmul.f32 0.3275911, %v5236_v26  ;;  %v5011_v61 = vmul.f32 %v8504_v51, %v13943_v21 }
 0x7d6   : > { %v6665_v4 = vadd.f32 %v6633_v27, %v12315_v43  ;;  %v5493_v52 = vadd.f32 1.4214138, %v5461_v7  ;;  %v12569_v37 = vadd.f32 %v12295_v20, %v12393_v53  ;;  %v5555_v43 = vadd.f32 -0.28449672, %v5523_v59 }
 0x7d7   : > { %v6667_v30 = vadd.f32 %v6635_v31, %v12323_v40  ;;  %8511 = vpow2.f32 %v5756_v45  ;;  %v5298_v19 = vadd.f32 1.0, %v5266_v9  ;;  %v5300_v10 = vadd.f32 1.0, %v5268_v38 }
 0x7d8   : > { %v12572_v56 = vmul.f32 %v12259_v11, %v5008_v54  ;;  %v5525_v2 = vmul.f32 %v12540_v3, %v5493_v52  ;;  %v5081_v51 = vadd.f32 %v12295_v20, %v12408_v63  ;;  %v12578_v40 = vmul.f32 %v12278_v15, %v5009_v23  ;;  %v13945_v23 = vld [vmem:[#allocation60_spill] sm:$0xff] }
 0x7d9   : > { %v6697_v44 = vpack.c.bf16 %v6667_v30, %v6665_v4  ;;  %v5012_v29 = vmul.f32 %v8506_v6, %v13944_v41  ;;  %v5587_v53 = vmul.f32 %v12522_v60, %v5555_v43  ;;  %8513 = vrcp.f32 %v5298_v19 }
 0x7da   : > { %v5557_v42 = vadd.f32 -0.28449672, %v5525_v2  ;;  %8515 = vrcp.f32 %v5300_v10  ;;  %v5682_v39 = vsub.f32 0.0, %v5234_v14  ;;  %v12583_v54 = vmul.f32 0.70710677, %v12569_v37  ;;  %v12585_v12 = vpop.eup %8507 }
 0x7db   : > { %6879 = vmatprep.mubr.bf16.mxu1 %v6697_v44  ;;  %v12588_v27 = vmul.f32 %v12259_v11, %v5010_v25  ;;  %v12591_v63 = vmul.f32 %v12278_v15, %v5011_v61  ;;  %v5619_v62 = vadd.f32 0.2548296, %v5587_v53  ;;  %v12593_v57 = vmul.f32 0.70710677, %v5081_v51 }
 0x7dc   : > { %6880 = vmatmul.mubr.bf16.vlgmr.msra.gmra.mrb[128].mxu1 %v6696_v55  ;;  %v5013_v34 = vmul.f32 %v8506_v6, %v13945_v23  ;;  %v5589_v45 = vmul.f32 %v12540_v3, %v5557_v42  ;;  %v5684_v35 = vsub.f32 0.0, %v5236_v26  ;;  %v5239_v31 = vand.u32 2147483647, %v12583_v54 }
 0x7dd   : > { %v12599_v4 = vmul.f32 %v12259_v11, %v5012_v29  ;;  %v5651_v7 = vmul.f32 %v12522_v60, %v5619_v62  ;;  %v12603_v13 = vmul.f32 0.5, %v12500_v36  ;;  %v12606_v55 = vand.u32 2147483647, %v12593_v57  ;;  %v8510_v25 = vpop.eup %8509 }
 0x7de   : > { %v5621_v59 = vadd.f32 0.2548296, %v5589_v45  ;;  %vm5170_vm6 = vcmp.ge.f32.partialorder %v12544_v47, 0.0  ;;  %v5714_v6 = vmul.f32 %v5682_v39, %v5234_v14  ;;  %v5271_v9 = vmul.f32 0.3275911, %v5239_v31 }
 0x7df   : > { %13946 = vst [vmem:[#allocation109_spill] sm:$0xff] %v12599_v4  ;;  %v5811_v38 = vmul.f32 %v8510_v25, %v5651_v7  ;;  %v5273_v21 = vmul.f32 0.3275911, %v12606_v55  ;;  %v12612_v61 = vadd.f32 %v12267_v0, %v12390_v33  ;;  %v12616_v36 = vadd.f32 %v12267_v0, %v12396_v8 }
 0x7e0   : > { %v12619_v60 = vmul.f32 %v12278_v15, %v5013_v34  ;;  %v5653_v30 = vmul.f32 %v12540_v3, %v5621_v59  ;;  %v5716_v52 = vmul.f32 %v5684_v35, %v5236_v26  ;;  %v5303_v43 = vadd.f32 1.0, %v5271_v9 }
 0x7e1   : > { %v8512_v14 = vpop.eup %8511  ;;  %v5843_v19 = vsub.f32 1.0, %v5811_v38  ;;  %v12623_v10 = vmul.f32 0.5, %v12535_v16  ;;  %vm5172_vm7 = vcmp.ge.f32.partialorder %v12550_v58, 0.0  ;;  %v5305_v33 = vadd.f32 1.0, %v5273_v21 }
 0x7e2   : > { %13947 = vst [vmem:[#allocation110_spill] sm:$0xff] %v12619_v60  ;;  %v5813_v44 = vmul.f32 %v8512_v14, %v5653_v30  ;;  %v12629_v8 = vsel %vm5170_vm6, 1.0, %v13926_v48  ;;  %v5750_v2 = vmul.f32 1.442695, %v5714_v6  ;;  %8517 = vrcp.f32 %v5303_v43  ;;  %v13950_v14 = vld [vmem:[#allocation59_spill] sm:$0xff] }
 0x7e3   : > { %v12631_v41 = vpop.eup %8513  ;;  %v5875_v3 = vmul.f32 %v5843_v19, %v12488_v1  ;;  %8519 = vrcp.f32 %v5305_v33  ;;  %v12635_v26 = vmul.f32 0.70710677, %v12612_v61  ;;  %v12638_v16 = vmul.f32 0.70710677, %v12616_v36 }
 0x7e4   : > { %v12640_v58 = vpop.eup %8515  ;;  %v5845_v29 = vsub.f32 1.0, %v5813_v44  ;;  %v12643_v47 = vsel %vm5172_vm7, 1.0, %v13926_v48  ;;  %v5394_v53 = vmul.f32 1.0614054, %v12631_v41  ;;  %v5754_v42 = vmul.f32 1.442695, %v5716_v52 }
 0x7e5   : > { %v5907_v39 = vadd.f32 1.0, %v5875_v3  ;;  %v5396_v62 = vmul.f32 1.0614054, %v12640_v58  ;;  %v12648_v1 = vmul.f32 0.5, %v12569_v37  ;;  %v12650_v23 = vmul.f32 0.5, %v5081_v51  ;;  %v13948_v51 = vld [vmem:[#allocation43_spill] sm:$0xff] }
 0x7e6   : > { %v5877_v34 = vmul.f32 %v5845_v29, %v12493_v24  ;;  %v5426_v45 = vadd.f32 -1.4531521, %v5394_v53  ;;  %8521 = vpow2.f32 %v5750_v2  ;;  %v5687_v35 = vsub.f32 0.0, %v5239_v31  ;;  %v13951_v44 = vld [vmem:[#allocation49_spill] sm:$0xff] }
 0x7e7   : > { %v5939_v7 = vmul.f32 %v5907_v39, %v12424_v17  ;;  %v5428_v25 = vadd.f32 -1.4531521, %v5396_v62  ;;  %v5238_v59 = vand.u32 2147483647, %v12635_v26  ;;  %v5240_v6 = vand.u32 2147483647, %v12638_v16 }
 0x7e8   : > { %v5909_v9 = vadd.f32 1.0, %v5877_v34  ;;  %v5458_v38 = vmul.f32 %v12631_v41, %v5426_v45  ;;  %8523 = vpow2.f32 %v5754_v42  ;;  %v5689_v37 = vsub.f32 0.0, %v12606_v55  ;;  %v13952_v39 = vld [vmem:[#allocation45_spill] sm:$0xff] }
 0x7e9   : > { %v13949_v21 = vsub.f32 1.0, %v13948_v51  ;;  %v5460_v24 = vmul.f32 %v12640_v58, %v5428_v25  ;;  %v5270_v52 = vmul.f32 0.3275911, %v5238_v59  ;;  %v5272_v43 = vmul.f32 0.3275911, %v5240_v6  ;;  %v13954_v25 = vld [vmem:[#allocation58_spill] sm:$0xff] }
 0x7ea   : > { %v5941_v17 = vmul.f32 %v5909_v9, %v13950_v14  ;;  %v5490_v19 = vadd.f32 1.4214138, %v5458_v38  ;;  %vm5175_vm8 = vcmp.ge.f32.partialorder %v12583_v54, 0.0  ;;  %v5719_v33 = vmul.f32 %v5687_v35, %v5239_v31  ;;  %v13956_v14 = vld [vmem:[#allocation51_spill] sm:$0xff] }
 0x7eb   : > { %v6637_v30 = vmul.f32 %v13949_v21, %v5939_v7  ;;  %v5492_v3 = vadd.f32 1.4214138, %v5460_v24  ;;  %v5302_v29 = vadd.f32 1.0, %v5270_v52  ;;  %v5304_v53 = vadd.f32 1.0, %v5272_v43  ;;  %v13955_v21 = vld [vmem:[#allocation53_spill] sm:$0xff] }
 0x7ec   : > { %v12664_v42 = vpop.eup %8517  ;;  %v13953_v62 = vsub.f32 1.0, %v13952_v39  ;;  %v5522_v45 = vmul.f32 %v12631_v41, %v5490_v19  ;;  %v5721_v7 = vmul.f32 %v5689_v37, %v12606_v55  ;;  %v12672_v9 = vadd.f32 %v12295_v20, %v13954_v25 }
 0x7ed   : > { %v6669_v2 = vadd.f32 %v6637_v30, %v13951_v44  ;;  %v12674_v38 = vpop.eup %8519  ;;  %v5524_v31 = vmul.f32 %v12640_v58, %v5492_v3  ;;  %v5399_v35 = vmul.f32 1.0614054, %v12664_v42  ;;  %8525 = vrcp.f32 %v5302_v29 }
 0x7ee   : > { %v6639_v34 = vmul.f32 %v13953_v62, %v5941_v17  ;;  %v5686_v51 = vsub.f32 0.0, %v5238_v59  ;;  %v5554_v24 = vadd.f32 -0.28449672, %v5522_v45  ;;  %v5401_v52 = vmul.f32 1.0614054, %v12674_v38 }
 0x7ef   : > { %8527 = vrcp.f32 %v5304_v53  ;;  %v5556_v43 = vadd.f32 -0.28449672, %v5524_v31  ;;  %v5431_v55 = vadd.f32 -1.4531521, %v5399_v35  ;;  %v5688_v37 = vsub.f32 0.0, %v5240_v6 }
 0x7f0   : > { %v6671_v30 = vadd.f32 %v6639_v34, %v13955_v21  ;;  %v12682_v17 = vadd.f32 %v12295_v20, %v13956_v14  ;;  %v8522_v19 = vpop.eup %8521  ;;  %v5586_v3 = vmul.f32 %v12631_v41, %v5554_v24  ;;  %v5433_v39 = vadd.f32 -1.4531521, %v5401_v52 }
 0x7f1   : > { %v5760_v29 = vmul.f32 1.442695, %v5719_v33  ;;  %v5588_v62 = vmul.f32 %v12640_v58, %v5556_v43  ;;  %vm5177_vm9 = vcmp.ge.f32.partialorder %v12593_v57, 0.0  ;;  %v5463_v34 = vmul.f32 %v12664_v42, %v5431_v55 }
 0x7f2   : > { %v6699_v44 = vpack.c.bf16 %v6671_v30, %v6669_v2  ;;  %v5764_v53 = vmul.f32 1.442695, %v5721_v7  ;;  %v8524_v45 = vpop.eup %8523  ;;  %v5618_v25 = vadd.f32 0.2548296, %v5586_v3  ;;  %v5465_v31 = vmul.f32 %v12674_v38, %v5433_v39 }
 0x7f3   : > { %v5718_v35 = vmul.f32 %v5686_v51, %v5238_v59  ;;  %v12690_v21 = vmul.f32 0.70710677, %v12672_v9  ;;  %v5620_v2 = vadd.f32 0.2548296, %v5588_v62  ;;  %v5495_v30 = vadd.f32 1.4214138, %v5463_v34 }
 0x7f4   : > { %6887 = vmatprep.mubr.bf16.mxu1 %v6699_v44  ;;  %v5720_v24 = vmul.f32 %v5688_v37, %v5240_v6  ;;  %v12693_v33 = vmul.f32 0.70710677, %v12682_v17  ;;  %v5650_v52 = vmul.f32 %v12631_v41, %v5618_v25  ;;  %v5497_v43 = vadd.f32 1.4214138, %v5465_v31 }
 0x7f5   : > { %8529 = vpow2.f32 %v5760_v29  ;;  %v12697_v7 = vand.u32 2147483647, %v12690_v21  ;;  %v5652_v55 = vmul.f32 %v12640_v58, %v5620_v2  ;;  %v5207_v59 = vsel %vm5175_vm8, 1.0, %v13926_v48 }
 0x7f6   : > { %v5527_v51 = vmul.f32 %v12664_v42, %v5495_v30  ;;  %8531 = vpow2.f32 %v5764_v53  ;;  %v5810_v6 = vmul.f32 %v8522_v19, %v5650_v52  ;;  %v5529_v37 = vmul.f32 %v12674_v38, %v5497_v43 }
 0x7f7   : > { %v5758_v14 = vmul.f32 1.442695, %v5718_v35  ;;  %v12706_v41 = vand.u32 2147483647, %v12693_v33  ;;  %v12708_v44 = vpop.eup %8525  ;;  %v5812_v3 = vmul.f32 %v8524_v45, %v5652_v55  ;;  %v5762_v29 = vmul.f32 1.442695, %v5720_v24 }
 0x7f8   : > { %v5559_v39 = vadd.f32 -0.28449672, %v5527_v51  ;;  %v5275_v58 = vmul.f32 0.3275911, %v12697_v7  ;;  %v5842_v54 = vsub.f32 1.0, %v5810_v6  ;;  %v5209_v19 = vsel %vm5177_vm9, 1.0, %v13926_v48 }
 0x7f9   : > { %v12711_v62 = vpop.eup %8527  ;;  %v5561_v34 = vadd.f32 -0.28449672, %v5529_v37  ;;  %v5398_v53 = vmul.f32 1.0614054, %v12708_v44  ;;  %v5844_v25 = vsub.f32 1.0, %v5812_v3  ;;  %vm5174_vm10 = vcmp.ge.f32.partialorder %v12635_v26, 0.0 }
 0x7fa   : > { %v5591_v31 = vmul.f32 %v12664_v42, %v5559_v39  ;;  %v5400_v45 = vmul.f32 1.0614054, %v12711_v62  ;;  %v5277_v35 = vmul.f32 0.3275911, %v12706_v41  ;;  %v5874_v2 = vmul.f32 %v5842_v54, %v12629_v8 }
 0x7fb   : > { %v5593_v30 = vmul.f32 %v12674_v38, %v5561_v34  ;;  %v5430_v24 = vadd.f32 -1.4531521, %v5398_v53  ;;  %v5307_v52 = vadd.f32 1.0, %v5275_v58  ;;  %v5876_v57 = vmul.f32 %v5844_v25, %v12643_v47 }
 0x7fc   : > { %v5623_v43 = vadd.f32 0.2548296, %v5591_v31  ;;  %v5432_v55 = vadd.f32 -1.4531521, %v5400_v45  ;;  %v5309_v51 = vadd.f32 1.0, %v5277_v35  ;;  %v5906_v6 = vadd.f32 1.0, %v5874_v2 }
 0x7fd   : > { %v5625_v37 = vadd.f32 0.2548296, %v5593_v30  ;;  %v5462_v3 = vmul.f32 %v12708_v44, %v5430_v24  ;;  %8533 = vrcp.f32 %v5307_v52  ;;  %v5908_v39 = vadd.f32 1.0, %v5876_v57  ;;  %v13957_v45 = vld [vmem:[#allocation40_spill] sm:$0xff]  ;;  %v13959_v24 = vld [vmem:[#allocation42_spill] sm:$0xff] }
 0x7fe   : > { %v5655_v4 = vmul.f32 %v12664_v42, %v5623_v43  ;;  %v5464_v60 = vmul.f32 %v12711_v62, %v5432_v55  ;;  %8535 = vrcp.f32 %v5309_v51  ;;  %v5938_v54 = vmul.f32 %v5906_v6, %v12603_v13  ;;  %v13961_v55 = vld [vmem:[#allocation46_spill] sm:$0xff]  ;;  %v13962_v51 = vld [vmem:[#allocation48_spill] sm:$0xff] }
 0x7ff   : > { %v8530_v8 = vpop.eup %8529  ;;  %v5657_v58 = vmul.f32 %v12674_v38, %v5625_v37  ;;  %vm5176_vm11 = vcmp.ge.f32.partialorder %v12638_v16, 0.0  ;;  %v5494_v47 = vadd.f32 1.4214138, %v5462_v3  ;;  %v5940_v53 = vmul.f32 %v5908_v39, %v12623_v10  ;;  %v13963_v39 = vld [vmem:[#allocation56_spill] sm:$0xff] }
 0x800   : > { %v8532_v34 = vpop.eup %8531  ;;  %v5815_v25 = vmul.f32 %v8530_v8, %v5655_v4  ;;  %v5496_v31 = vadd.f32 1.4214138, %v5464_v60  ;;  %8537 = vpow2.f32 %v5758_v14  ;;  %v13958_v35 = vsub.f32 1.0, %v13957_v45 }
 0x801   : > { %v5817_v2 = vmul.f32 %v8532_v34, %v5657_v58  ;;  %v5526_v30 = vmul.f32 %v12708_v44, %v5494_v47  ;;  %8539 = vpow2.f32 %v5762_v29  ;;  %v13960_v13 = vsub.f32 1.0, %v13959_v24  ;;  %v13964_v47 = vld [vmem:[#allocation108_spill] sm:$0xff] }
 0x802   : > { %v6636_v42 = vmul.f32 %v13958_v35, %v5938_v54  ;;  %v5847_v38 = vsub.f32 1.0, %v5815_v25  ;;  %v5528_v57 = vmul.f32 %v12711_v62, %v5496_v31  ;;  %v5691_v43 = vsub.f32 0.0, %v12697_v7 }
 0x803   : > { %v6638_v52 = vmul.f32 %v13960_v13, %v5940_v53  ;;  %v5849_v4 = vsub.f32 1.0, %v5817_v2  ;;  %v5558_v60 = vadd.f32 -0.28449672, %v5526_v30  ;;  %v5693_v14 = vsub.f32 0.0, %v12706_v41 }
 0x804   : > { %v6668_v10 = vadd.f32 %v6636_v42, %v13961_v55  ;;  %v5879_v37 = vmul.f32 %v5847_v38, %v5207_v59  ;;  %v5560_v3 = vadd.f32 -0.28449672, %v5528_v57  ;;  %v12743_v29 = vadd.f32 %v12267_v0, %v13963_v39  ;;  %v13969_v39 = vld [vmem:[#allocation52_spill] sm:$0xff] }
 0x805   : > { %v6670_v6 = vadd.f32 %v6638_v52, %v13962_v51  ;;  %v5881_v8 = vmul.f32 %v5849_v4, %v5209_v19  ;;  %v5206_v54 = vsel %vm5174_vm10, 1.0, %v13926_v48  ;;  %v5590_v58 = vmul.f32 %v12708_v44, %v5558_v60  ;;  %v13967_v51 = vld [vmem:[#allocation47_spill] sm:$0xff] }
 0x806   : > { %v12751_v34 = vadd.f32 %v12267_v0, %v13964_v47  ;;  %v5911_v25 = vadd.f32 1.0, %v5879_v37  ;;  %v5592_v59 = vmul.f32 %v12711_v62, %v5560_v3  ;;  %v5723_v31 = vmul.f32 %v5691_v43, %v12697_v7  ;;  %v13965_v43 = vld [vmem:[#allocation44_spill] sm:$0xff] }
 0x807   : > { %v6698_v53 = vpack.c.bf16 %v6670_v6, %v6668_v10  ;;  %v12755_v45 = vpop.eup %8533  ;;  %v5913_v35 = vadd.f32 1.0, %v5881_v8  ;;  %v5208_v26 = vsel %vm5176_vm11, 1.0, %v13926_v48  ;;  %v5622_v19 = vadd.f32 0.2548296, %v5590_v58 }
 0x808   : > { %v5725_v42 = vmul.f32 %v5693_v14, %v12706_v41  ;;  %v12761_v2 = vpop.eup %8535  ;;  %v5943_v30 = vmul.f32 %v5911_v25, %v12648_v1  ;;  %v5624_v24 = vadd.f32 0.2548296, %v5592_v59  ;;  %v5403_v13 = vmul.f32 1.0614054, %v12755_v45  ;;  %v13970_v25 = vld [vmem:[#allocation57_spill] sm:$0xff] }
 0x809   : > { %6888 = vmatmul.mubr.bf16.gmra.mrb[132].mxu1 %v6698_v53  ;;  %v12766_v7 = vmul.f32 0.70710677, %v12743_v29  ;;  %v5945_v52 = vmul.f32 %v5913_v35, %v12650_v23  ;;  %v5654_v38 = vmul.f32 %v12708_v44, %v5622_v19  ;;  %v5405_v16 = vmul.f32 1.0614054, %v12761_v2 }
 0x80a   : > { %v12772_v57 = vmul.f32 0.70710677, %v12751_v34  ;;  %v8538_v41 = vpop.eup %8537  ;;  %v13966_v55 = vsub.f32 1.0, %v13965_v43  ;;  %v5656_v1 = vmul.f32 %v12711_v62, %v5624_v24  ;;  %v5435_v4 = vadd.f32 -1.4531521, %v5403_v13 }
 0x80b   : > { %v5768_v60 = vmul.f32 1.442695, %v5723_v31  ;;  %v8540_v14 = vpop.eup %8539  ;;  %v13968_v6 = vsub.f32 1.0, %v13967_v51  ;;  %v5814_v23 = vmul.f32 %v8538_v41, %v5654_v38  ;;  %v5437_v3 = vadd.f32 -1.4531521, %v5405_v16 }
 0x80c   : > { %v6641_v10 = vmul.f32 %v13966_v55, %v5943_v30  ;;  %v5772_v44 = vmul.f32 1.442695, %v5725_v42  ;;  %v5816_v58 = vmul.f32 %v8540_v14, %v5656_v1  ;;  %v5467_v47 = vmul.f32 %v12755_v45, %v5435_v4 }
 0x80d   : > { %v6643_v37 = vmul.f32 %v13968_v6, %v5945_v52  ;;  %v5242_v53 = vand.u32 2147483647, %v12766_v7  ;;  %v5846_v35 = vsub.f32 1.0, %v5814_v23  ;;  %v5469_v62 = vmul.f32 %v12761_v2, %v5437_v3 }
 0x80e   : > { %v6673_v8 = vadd.f32 %v6641_v10, %v13969_v39  ;;  %v12785_v31 = vand.u32 2147483647, %v12772_v57  ;;  %v5848_v19 = vsub.f32 1.0, %v5816_v58  ;;  %v5499_v30 = vadd.f32 1.4214138, %v5467_v47 }
 0x80f   : > { %v6675_v59 = vadd.f32 %v6643_v37, %v13970_v25  ;;  %8541 = vpow2.f32 %v5768_v60  ;;  %v5274_v24 = vmul.f32 0.3275911, %v5242_v53  ;;  %v5878_v13 = vmul.f32 %v5846_v35, %v5206_v54  ;;  %v13971_v37 = vld [vmem:[#allocation126_spill] sm:$0xff]  ;;  %v13975_v25 = vld [vmem:[#allocation39_spill] sm:$0xff] }
 0x810   : > { %v5501_v52 = vadd.f32 1.4214138, %v5469_v62  ;;  %v5276_v38 = vmul.f32 0.3275911, %v12785_v31  ;;  %v5880_v16 = vmul.f32 %v5848_v19, %v5208_v26  ;;  %v5531_v41 = vmul.f32 %v12755_v45, %v5499_v30 }
 0x811   : > { %v6701_v42 = vpack.c.bf16 %v6675_v59, %v6673_v8  ;;  %8543 = vpow2.f32 %v5772_v44  ;;  %v5306_v43 = vadd.f32 1.0, %v5274_v24  ;;  %v5110_v55 = vmul.f32 0.5, %v12612_v61  ;;  %v13972_v44 = vld [vmem:[#allocation127_spill] sm:$0xff]  ;;  %v13973_v8 = vld [vmem:[#allocation38_spill] sm:$0xff] }
 0x812   : > { %v5910_v10 = vadd.f32 1.0, %v5878_v13  ;;  %v5533_v1 = vmul.f32 %v12761_v2, %v5501_v52  ;;  %v5308_v4 = vadd.f32 1.0, %v5276_v38  ;;  %v5112_v60 = vmul.f32 0.5, %v12616_v36  ;;  %v13978_v52 = vld [vmem:[#allocation75_spill] sm:$0xff] }
 0x813   : > { %6895 = vmatprep.mubr.bf16.mxu1 %v6701_v42  ;;  %v5912_v14 = vadd.f32 1.0, %v5880_v16  ;;  %v5563_v51 = vadd.f32 -0.28449672, %v5531_v41  ;;  %8545 = vrcp.f32 %v5306_v43  ;;  %v12794_v26 = vadd.f32 %v12295_v20, %v12475_v46 }
 0x814   : > { %v5942_v54 = vmul.f32 %v5910_v10, %v5110_v55  ;;  %v5565_v6 = vadd.f32 -0.28449672, %v5533_v1  ;;  %8547 = vrcp.f32 %v5308_v4  ;;  %v12798_v23 = vmul.f32 %v12585_v12, %v13971_v37 }
 0x815   : > { %v5944_v61 = vmul.f32 %v5912_v14, %v5112_v60  ;;  %v5595_v3 = vmul.f32 %v12755_v45, %v5563_v51  ;;  %v12803_v36 = vadd.f32 %v12295_v20, %v12482_v5  ;;  %v12807_v39 = vmul.f32 %v12585_v12, %v13972_v44  ;;  %v13977_v5 = vld [vmem:[#allocation86_spill] sm:$0xff] }
 0x816   : > { %v13974_v58 = vsub.f32 1.0, %v13973_v8  ;;  %vm5179_vm12 = vcmp.ge.f32.partialorder %v12690_v21, 0.0  ;;  %v5597_v46 = vmul.f32 %v12761_v2, %v5565_v6  ;;  %v13976_v59 = vsub.f32 1.0, %v13975_v25 }
 0x817   : > { %vm5181_vm13 = vcmp.ge.f32.partialorder %v12693_v33, 0.0  ;;  %v5627_v62 = vadd.f32 0.2548296, %v5595_v3  ;;  %v5690_v19 = vsub.f32 0.0, %v5242_v53  ;;  %v12818_v12 = vmul.f32 0.70710677, %v12794_v26 }
 0x818   : > { %v6640_v47 = vmul.f32 %v13974_v58, %v5942_v54  ;;  %v6642_v35 = vmul.f32 %v13976_v59, %v5944_v61  ;;  %v5629_v24 = vadd.f32 0.2548296, %v5597_v46  ;;  %v12821_v42 = vmul.f32 0.70710677, %v12803_v36 }
 0x819   : > { %v8542_v13 = vpop.eup %8541  ;;  %v5115_v16 = vmul.f32 0.5, %v12672_v9  ;;  %v5659_v41 = vmul.f32 %v12755_v45, %v5627_v62  ;;  %v5692_v43 = vsub.f32 0.0, %v12785_v31  ;;  %v5117_v55 = vmul.f32 0.5, %v12682_v17 }
 0x81a   : > { %v6672_v30 = vadd.f32 %v6640_v47, %v13977_v5  ;;  %v6674_v38 = vadd.f32 %v6642_v35, %v13978_v52  ;;  %v5211_v10 = vsel %vm5179_vm12, 1.0, %v13926_v48  ;;  %v5661_v1 = vmul.f32 %v12761_v2, %v5629_v24 }
 0x81b   : > { %v12833_v4 = vand.u32 2147483647, %v12818_v12  ;;  %v8544_v60 = vpop.eup %8543  ;;  %v5213_v9 = vsel %vm5181_vm13, 1.0, %v13926_v48  ;;  %v5819_v45 = vmul.f32 %v8542_v13, %v5659_v41  ;;  %v5722_v51 = vmul.f32 %v5690_v19, %v5242_v53 }
 0x81c   : > { %v6700_v14 = vpack.c.bf16 %v6674_v38, %v6672_v30  ;;  %v5821_v54 = vmul.f32 %v8544_v60, %v5661_v1  ;;  %v12839_v17 = vmul.f32 0.5, %v12743_v29  ;;  %v5249_v21 = vand.u32 2147483647, %v12821_v42 }
 0x81d   : > { %v5279_v6 = vmul.f32 0.3275911, %v12833_v4  ;;  %v12843_v2 = vpop.eup %8545  ;;  %v5851_v37 = vsub.f32 1.0, %v5819_v45  ;;  %v12846_v61 = vmul.f32 0.5, %v12751_v34  ;;  %v5724_v33 = vmul.f32 %v5692_v43, %v12785_v31  ;;  %v13979_v43 = vld [vmem:[#allocation81_spill] sm:$0xff] }
 0x81e   : > { %6896 = vmatmul.mubr.bf16.gmra.mrb[136].mxu1 %v6700_v14  ;;  %v12851_v53 = vadd.f32 %v12267_v0, %v12467_v22  ;;  %v12853_v3 = vpop.eup %8547  ;;  %v5853_v29 = vsub.f32 1.0, %v5821_v54  ;;  %v5402_v44 = vmul.f32 1.0614054, %v12843_v2  ;;  %v5281_v8 = vmul.f32 0.3275911, %v5249_v21  ;;  %v13981_v14 = vld [vmem:[#allocation84_spill] sm:$0xff] }
 0x81f   : > { %v5311_v58 = vadd.f32 1.0, %v5279_v6  ;;  %v5883_v47 = vmul.f32 %v5851_v37, %v5211_v10  ;;  %v5404_v46 = vmul.f32 1.0614054, %v12853_v3  ;;  %v5766_v25 = vmul.f32 1.442695, %v5722_v51  ;;  %v13983_v6 = vld [vmem:[#allocation87_spill] sm:$0xff] }
 0x820   : > { %v12859_v34 = vadd.f32 %v12267_v0, %v12478_v32  ;;  %v5885_v31 = vmul.f32 %v5853_v29, %v5213_v9  ;;  %v5434_v59 = vadd.f32 -1.4531521, %v5402_v44  ;;  %v5313_v35 = vadd.f32 1.0, %v5281_v8  ;;  %v13984_v8 = vld [vmem:[#allocation100_spill] sm:$0xff] }
 0x821   : > { %8549 = vrcp.f32 %v5311_v58  ;;  %v5915_v22 = vadd.f32 1.0, %v5883_v47  ;;  %vm5178_vm14 = vcmp.ge.f32.partialorder %v12766_v7, 0.0  ;;  %v5436_v62 = vadd.f32 -1.4531521, %v5404_v46 }
 0x822   : > { %v5770_v19 = vmul.f32 1.442695, %v5724_v33  ;;  %v5917_v5 = vadd.f32 1.0, %v5885_v31  ;;  %v5466_v30 = vmul.f32 %v12843_v2, %v5434_v59  ;;  %8551 = vrcp.f32 %v5313_v35 }
 0x823   : > { %v12864_v24 = vmul.f32 0.70710677, %v12851_v53  ;;  %v5947_v13 = vmul.f32 %v5915_v22, %v5115_v16  ;;  %vm5180_vm15 = vcmp.ge.f32.partialorder %v12772_v57, 0.0  ;;  %v5468_v32 = vmul.f32 %v12853_v3, %v5436_v62 }
 0x824   : > { %v12869_v52 = vmul.f32 0.70710677, %v12859_v34  ;;  %v5949_v38 = vmul.f32 %v5917_v5, %v5117_v55  ;;  %v12872_v7 = vsel %vm5178_vm14, 1.0, %v13926_v48  ;;  %v5498_v41 = vadd.f32 1.4214138, %v5466_v30 }
 0x825   : > { %8553 = vpow2.f32 %v5766_v25  ;;  %v13980_v10 = vsub.f32 1.0, %v13979_v43  ;;  %v5500_v60 = vadd.f32 1.4214138, %v5468_v32  ;;  %v5695_v16 = vsub.f32 0.0, %v12833_v4 }
 0x826   : > { %8555 = vpow2.f32 %v5770_v19  ;;  %v13982_v9 = vsub.f32 1.0, %v13981_v14  ;;  %v5530_v51 = vmul.f32 %v12843_v2, %v5498_v41  ;;  %v5697_v54 = vsub.f32 0.0, %v5249_v21 }
 0x827   : > { %v6645_v1 = vmul.f32 %v13980_v10, %v5947_v13  ;;  %v5246_v55 = vand.u32 2147483647, %v12864_v24  ;;  %v5212_v33 = vsel %vm5180_vm15, 1.0, %v13926_v48  ;;  %v5532_v29 = vmul.f32 %v12853_v3, %v5500_v60 }
 0x828   : > { %v6647_v45 = vmul.f32 %v13982_v9, %v5949_v38  ;;  %v5248_v44 = vand.u32 2147483647, %v12869_v52  ;;  %v5562_v47 = vadd.f32 -0.28449672, %v5530_v51  ;;  %v12889_v59 = vmul.f32 0.5, %v12794_v26 }
 0x829   : > { %v6677_v37 = vadd.f32 %v6645_v1, %v13983_v6  ;;  %v5278_v46 = vmul.f32 0.3275911, %v5246_v55  ;;  %v5694_v25 = vsub.f32 0.0, %v5246_v55  ;;  %v5564_v31 = vadd.f32 -0.28449672, %v5532_v29 }
 0x82a   : > { %v6679_v58 = vadd.f32 %v6647_v45, %v13984_v8  ;;  %v5727_v35 = vmul.f32 %v5695_v16, %v12833_v4  ;;  %v5280_v22 = vmul.f32 0.3275911, %v5248_v44  ;;  %v5594_v19 = vmul.f32 %v12843_v2, %v5562_v47 }
 0x82b   : > { %v12892_v62 = vpop.eup %8549  ;;  %v5729_v5 = vmul.f32 %v5697_v54, %v5249_v21  ;;  %v5310_v30 = vadd.f32 1.0, %v5278_v46  ;;  %v5596_v13 = vmul.f32 %v12853_v3, %v5564_v31  ;;  %v12899_v41 = vadd.f32 %v12295_v20, %v12512_v18 }
 0x82c   : > { %v6703_v57 = vpack.c.bf16 %v6679_v58, %v6677_v37  ;;  %v5407_v32 = vmul.f32 1.0614054, %v12892_v62  ;;  %v5312_v38 = vadd.f32 1.0, %v5280_v22  ;;  %v12901_v26 = vpop.eup %8551  ;;  %v5626_v4 = vadd.f32 0.2548296, %v5594_v19 }
 0x82d   : > { %8557 = vrcp.f32 %v5310_v30  ;;  %v5726_v43 = vmul.f32 %v5694_v25, %v5246_v55  ;;  %v12905_v10 = vadd.f32 %v12295_v20, %v12530_v49  ;;  %v5628_v21 = vadd.f32 0.2548296, %v5596_v13 }
 0x82e   : > { %6903 = vmatprep.mubr.bf16.mxu1 %v6703_v57  ;;  %v5409_v1 = vmul.f32 1.0614054, %v12901_v26  ;;  %v5439_v60 = vadd.f32 -1.4531521, %v5407_v32  ;;  %8559 = vrcp.f32 %v5312_v38  ;;  %v5658_v14 = vmul.f32 %v12843_v2, %v5626_v4 }
 0x82f   : > { %v8554_v16 = vpop.eup %8553  ;;  %v12910_v18 = vmul.f32 0.5, %v12803_v36  ;;  %v5776_v9 = vmul.f32 1.442695, %v5727_v35  ;;  %v5696_v45 = vsub.f32 0.0, %v5248_v44  ;;  %v5660_v54 = vmul.f32 %v12853_v3, %v5628_v21 }
 0x830   : > { %v8556_v51 = vpop.eup %8555  ;;  %v5441_v55 = vadd.f32 -1.4531521, %v5409_v1  ;;  %v5471_v49 = vmul.f32 %v12892_v62, %v5439_v60  ;;  %v12915_v6 = vmul.f32 0.70710677, %v12899_v41  ;;  %v5818_v37 = vmul.f32 %v8554_v16, %v5658_v14 }
 0x831   : > { %vm5183_vm0 = vcmp.ge.f32.partialorder %v12818_v12, 0.0  ;;  %v5780_v29 = vmul.f32 1.442695, %v5729_v5  ;;  %v12919_v2 = vmul.f32 0.70710677, %v12905_v10  ;;  %v5820_v36 = vmul.f32 %v8556_v51, %v5660_v54 }
 0x832   : > { %v5473_v8 = vmul.f32 %v12901_v26, %v5441_v55  ;;  %v5503_v58 = vadd.f32 1.4214138, %v5471_v49  ;;  %v5774_v47 = vmul.f32 1.442695, %v5726_v43  ;;  %v5850_v46 = vsub.f32 1.0, %v5818_v37  ;;  %v13985_v37 = vld [vmem:[#allocation80_spill] sm:$0xff] }
 0x833   : > { %8561 = vpow2.f32 %v5776_v9  ;;  %v5728_v3 = vmul.f32 %v5696_v45, %v5248_v44  ;;  %v5251_v25 = vand.u32 2147483647, %v12915_v6  ;;  %v5852_v31 = vsub.f32 1.0, %v5820_v36 }
 0x834   : > { %v12924_v35 = vsel %vm5183_vm0, 1.0, %v13926_v48  ;;  %v5505_v22 = vadd.f32 1.4214138, %v5473_v8  ;;  %v5535_v12 = vmul.f32 %v12892_v62, %v5503_v58  ;;  %v5882_v57 = vmul.f32 %v5850_v46, %v12872_v7 }
 0x835   : > { %8563 = vpow2.f32 %v5780_v29  ;;  %v12929_v19 = vand.u32 2147483647, %v12919_v2  ;;  %v5283_v5 = vmul.f32 0.3275911, %v5251_v25  ;;  %v5884_v30 = vmul.f32 %v5852_v31, %v5212_v33 }
 0x836   : > { %vm5185_vm1 = vcmp.ge.f32.partialorder %v12821_v42, 0.0  ;;  %v5537_v44 = vmul.f32 %v12901_v26, %v5505_v22  ;;  %v5567_v13 = vadd.f32 -0.28449672, %v5535_v12  ;;  %8565 = vpow2.f32 %v5774_v47  ;;  %v13987_v47 = vld [vmem:[#allocation82_spill] sm:$0xff] }
 0x837   : > { %v12933_v32 = vpop.eup %8557  ;;  %v5914_v38 = vadd.f32 1.0, %v5882_v57  ;;  %v5778_v4 = vmul.f32 1.442695, %v5728_v3  ;;  %v5285_v43 = vmul.f32 0.3275911, %v12929_v19  ;;  %v5315_v21 = vadd.f32 1.0, %v5283_v5 }
 0x838   : > { %v12936_v7 = vpop.eup %8559  ;;  %v5916_v1 = vadd.f32 1.0, %v5884_v30  ;;  %v5569_v60 = vadd.f32 -0.28449672, %v5537_v44  ;;  %v5599_v16 = vmul.f32 %v12892_v62, %v5567_v13  ;;  %vm5182_vm2 = vcmp.ge.f32.partialorder %v12864_v24, 0.0  ;;  %v13990_v13 = vld [vmem:[#allocation99_spill] sm:$0xff] }
 0x839   : > { %v5406_v33 = vmul.f32 1.0614054, %v12933_v32  ;;  %v5946_v14 = vmul.f32 %v5914_v38, %v12839_v17  ;;  %v5408_v9 = vmul.f32 1.0614054, %v12936_v7  ;;  %v5317_v45 = vadd.f32 1.0, %v5285_v43 }
 0x83a   : > { %8567 = vrcp.f32 %v5315_v21  ;;  %v5948_v51 = vmul.f32 %v5916_v1, %v12846_v61  ;;  %v5601_v54 = vmul.f32 %v12901_v26, %v5569_v60  ;;  %v5631_v55 = vadd.f32 0.2548296, %v5599_v16  ;;  %v13989_v61 = vld [vmem:[#allocation115_spill] sm:$0xff] }
 0x83b   : > { %v5438_v49 = vadd.f32 -1.4531521, %v5406_v33  ;;  %v13986_v29 = vsub.f32 1.0, %v13985_v37  ;;  %v5440_v8 = vadd.f32 -1.4531521, %v5408_v9  ;;  %8569 = vrcp.f32 %v5317_v45 }
 0x83c   : > { %v5699_v58 = vsub.f32 0.0, %v5251_v25  ;;  %v13988_v46 = vsub.f32 1.0, %v13987_v47  ;;  %v5633_v17 = vadd.f32 0.2548296, %v5601_v54  ;;  %v5663_v31 = vmul.f32 %v12892_v62, %v5631_v55 }
 0x83d   : > { %v6644_v36 = vmul.f32 %v13986_v29, %v5946_v14  ;;  %v5470_v22 = vmul.f32 %v12933_v32, %v5438_v49  ;;  %v8562_v12 = vpop.eup %8561  ;;  %v5472_v5 = vmul.f32 %v12936_v7, %v5440_v8  ;;  %v12955_v30 = vadd.f32 %v12267_v0, %v12509_v50 }
 0x83e   : > { %v6646_v3 = vmul.f32 %v13988_v46, %v5948_v51  ;;  %v12959_v44 = vadd.f32 %v12267_v0, %v12518_v28  ;;  %v5665_v43 = vmul.f32 %v12901_v26, %v5633_v17  ;;  %v5823_v62 = vmul.f32 %v8562_v12, %v5663_v31 }
 0x83f   : > { %v6676_v57 = vadd.f32 %v6644_v36, %v13989_v61  ;;  %v5502_v21 = vadd.f32 1.4214138, %v5470_v22  ;;  %v8564_v1 = vpop.eup %8563  ;;  %v5504_v60 = vadd.f32 1.4214138, %v5472_v5  ;;  %8571 = vpow2.f32 %v5778_v4 }
 0x840   : > { %v6678_v38 = vadd.f32 %v6646_v3, %v13990_v13  ;;  %v5701_v16 = vsub.f32 0.0, %v12929_v19  ;;  %v5731_v33 = vmul.f32 %v5699_v58, %v5251_v25  ;;  %v8566_v14 = vpop.eup %8565  ;;  %v5825_v50 = vmul.f32 %v8564_v1, %v5665_v43  ;;  %v13991_v43 = vld [vmem:[#allocation64_spill] sm:$0xff] }
 0x841   : > { %v5855_v45 = vsub.f32 1.0, %v5823_v62  ;;  %v5534_v51 = vmul.f32 %v12933_v32, %v5502_v21  ;;  %v5217_v28 = vsel %vm5185_vm1, 1.0, %v13926_v48  ;;  %vm5184_vm3 = vcmp.ge.f32.partialorder %v12869_v52, 0.0 }
 0x842   : > { %v6702_v9 = vpack.c.bf16 %v6678_v38, %v6676_v57  ;;  %v5536_v26 = vmul.f32 %v12936_v7, %v5504_v60  ;;  %v12971_v54 = vmul.f32 0.70710677, %v12955_v30  ;;  %v5857_v4 = vsub.f32 1.0, %v5825_v50 }
 0x843   : > { %v5887_v25 = vmul.f32 %v5855_v45, %v12924_v35  ;;  %v5566_v55 = vadd.f32 -0.28449672, %v5534_v51  ;;  %v12975_v49 = vmul.f32 0.70710677, %v12959_v44  ;;  %v5214_v42 = vsel %vm5182_vm2, 1.0, %v13926_v48  ;;  %v13993_v45 = vld [vmem:[#allocation88_spill] sm:$0xff] }
 0x844   : > { %6904 = vmatmul.mubr.bf16.gmra.mrb[140].mxu1 %v6702_v9  ;;  %v12977_v37 = vpop.eup %8567  ;;  %v5568_v29 = vadd.f32 -0.28449672, %v5536_v26  ;;  %v5733_v36 = vmul.f32 %v5701_v16, %v12929_v19  ;;  %v5784_v8 = vmul.f32 1.442695, %v5731_v33  ;;  %v5889_v58 = vmul.f32 %v5857_v4, %v5217_v28  ;;  %v13995_v26 = vld [vmem:[#allocation124_spill] sm:$0xff] }
 0x845   : > { %v5919_v47 = vadd.f32 1.0, %v5887_v25  ;;  %v5598_v46 = vmul.f32 %v12933_v32, %v5566_v55  ;;  %v5411_v35 = vmul.f32 1.0614054, %v12977_v37  ;;  %v12985_v3 = vpop.eup %8569  ;;  %v5216_v17 = vsel %vm5184_vm3, 1.0, %v13926_v48 }
 0x846   : > { %v5600_v31 = vmul.f32 %v12936_v7, %v5568_v29  ;;  %v12992_v24 = vand.u32 2147483647, %v12971_v54  ;;  %v12995_v19 = vand.u32 2147483647, %v12975_v49  ;;  %v5921_v22 = vadd.f32 1.0, %v5889_v58 }
 0x847   : > { %v5951_v12 = vmul.f32 %v5919_v47, %v12889_v59  ;;  %v5630_v61 = vadd.f32 0.2548296, %v5598_v46  ;;  %v5413_v57 = vmul.f32 1.0614054, %v12985_v3  ;;  %v5443_v13 = vadd.f32 -1.4531521, %v5411_v35 }
 0x848   : > { %v5632_v5 = vadd.f32 0.2548296, %v5600_v31  ;;  %8573 = vpow2.f32 %v5784_v8  ;;  %v5788_v38 = vmul.f32 1.442695, %v5733_v36  ;;  %v5953_v52 = vmul.f32 %v5921_v22, %v12910_v18  ;;  %v13996_v8 = vld [vmem:[#allocation61_spill] sm:$0xff] }
 0x849   : > { %v13992_v62 = vsub.f32 1.0, %v13991_v43  ;;  %v5662_v1 = vmul.f32 %v12933_v32, %v5630_v61  ;;  %v5445_v60 = vadd.f32 -1.4531521, %v5413_v57  ;;  %v8572_v16 = vpop.eup %8571  ;;  %v5475_v59 = vmul.f32 %v12977_v37, %v5443_v13 }
 0x84a   : > { %v5664_v33 = vmul.f32 %v12936_v7, %v5632_v5  ;;  %v5282_v9 = vmul.f32 0.3275911, %v12992_v24  ;;  %v5284_v50 = vmul.f32 0.3275911, %v12995_v19  ;;  %v13994_v51 = vsub.f32 1.0, %v13993_v45 }
 0x84b   : > { %v6649_v21 = vmul.f32 %v13992_v62, %v5951_v12  ;;  %v5822_v4 = vmul.f32 %v8566_v14, %v5662_v1  ;;  %v5477_v25 = vmul.f32 %v12985_v3, %v5445_v60  ;;  %v5507_v32 = vadd.f32 1.4214138, %v5475_v59 }
 0x84c   : > { %v6651_v28 = vmul.f32 %v13994_v51, %v5953_v52  ;;  %v5824_v55 = vmul.f32 %v8572_v16, %v5664_v33  ;;  %v5314_v29 = vadd.f32 1.0, %v5282_v9  ;;  %v5316_v36 = vadd.f32 1.0, %v5284_v50  ;;  %v13999_v51 = vld [vmem:[#allocation66_spill] sm:$0xff] }
 0x84d   : > { %v6681_v18 = vadd.f32 %v6649_v21, %v13995_v26  ;;  %v5854_v58 = vsub.f32 1.0, %v5822_v4  ;;  %v5509_v47 = vadd.f32 1.4214138, %v5477_v25  ;;  %8575 = vpow2.f32 %v5788_v38 }
 0x84e   : > { %v6683_v7 = vadd.f32 %v6651_v28, %v13996_v8  ;;  %v5856_v46 = vsub.f32 1.0, %v5824_v55  ;;  %v5539_v35 = vmul.f32 %v12977_v37, %v5507_v32  ;;  %8577 = vrcp.f32 %v5314_v29  ;;  %v14001_v55 = vld [vmem:[#allocation101_spill] sm:$0xff] }
 0x84f   : > { %v13015_v31 = vadd.f32 %v12295_v20, %v12578_v40  ;;  %v5886_v22 = vmul.f32 %v5854_v58, %v5214_v42  ;;  %v5541_v12 = vmul.f32 %v12985_v3, %v5509_v47  ;;  %8579 = vrcp.f32 %v5316_v36 }
 0x850   : > { %v6705_v14 = vpack.c.bf16 %v6683_v7, %v6681_v18  ;;  %v13020_v61 = vmul.f32 %v12259_v11, %v12798_v23  ;;  %v5118_v57 = vmul.f32 0.5, %v12851_v53  ;;  %v5888_v5 = vmul.f32 %v5856_v46, %v5216_v17  ;;  %v14002_v7 = vld [vmem:[#allocation102_spill] sm:$0xff] }
 0x851   : > { %v5571_v13 = vadd.f32 -0.28449672, %v5539_v35  ;;  %v5120_v38 = vmul.f32 0.5, %v12859_v34  ;;  %v5918_v52 = vadd.f32 1.0, %v5886_v22  ;;  %v5573_v43 = vadd.f32 -0.28449672, %v5541_v12 }
 0x852   : > { %6911 = vmatprep.mubr.bf16.mxu1 %v6705_v14  ;;  %v13026_v40 = vadd.f32 %v12295_v20, %v12591_v63  ;;  %v8574_v42 = vpop.eup %8573  ;;  %v5920_v62 = vadd.f32 1.0, %v5888_v5  ;;  %v5123_v21 = vmul.f32 0.5, %v12899_v41  ;;  %vm5187_vm4 = vcmp.ge.f32.partialorder %v12915_v6, 0.0  ;;  %v13997_v41 = vld [vmem:[#allocation83_spill] sm:$0xff] }
 0x853   : > { %v5603_v11 = vmul.f32 %v12977_v37, %v5571_v13  ;;  %v5950_v23 = vmul.f32 %v5918_v52, %v5118_v57  ;;  %v5605_v53 = vmul.f32 %v12985_v3, %v5573_v43  ;;  %v5698_v17 = vsub.f32 0.0, %v12992_v24 }
 0x854   : > { %v13034_v34 = vmul.f32 0.70710677, %v13015_v31  ;;  %v5952_v1 = vmul.f32 %v5920_v62, %v5120_v38  ;;  %v5700_v63 = vsub.f32 0.0, %v12995_v19  ;;  %v13038_v16 = vmul.f32 0.70710677, %v13026_v40 }
 0x855   : > { %v5635_v60 = vadd.f32 0.2548296, %v5603_v11  ;;  %v13998_v33 = vsub.f32 1.0, %v13997_v41  ;;  %v5125_v9 = vmul.f32 0.5, %v12905_v10  ;;  %v5637_v50 = vadd.f32 0.2548296, %v5605_v53 }
 0x856   : > { %v5255_v45 = vand.u32 2147483647, %v13034_v34  ;;  %v14000_v28 = vsub.f32 1.0, %v13999_v51  ;;  %vm5189_vm5 = vcmp.ge.f32.partialorder %v12919_v2, 0.0  ;;  %v5219_v18 = vsel %vm5187_vm4, 1.0, %v13926_v48 }
 0x857   : > { %v6648_v59 = vmul.f32 %v13998_v33, %v5950_v23  ;;  %v5667_v4 = vmul.f32 %v12977_v37, %v5635_v60  ;;  %v8576_v25 = vpop.eup %8575  ;;  %v5669_v29 = vmul.f32 %v12985_v3, %v5637_v50  ;;  %v5730_v10 = vmul.f32 %v5698_v17, %v12992_v24 }
 0x858   : > { %v6650_v26 = vmul.f32 %v14000_v28, %v5952_v1  ;;  %v5257_v36 = vand.u32 2147483647, %v13038_v16  ;;  %v13055_v8 = vpop.eup %8577  ;;  %v5732_v47 = vmul.f32 %v5700_v63, %v12995_v19  ;;  %v5287_v6 = vmul.f32 0.3275911, %v5255_v45 }
 0x859   : > { %v6680_v32 = vadd.f32 %v6648_v59, %v14001_v55  ;;  %v5827_v2 = vmul.f32 %v8574_v42, %v5667_v4  ;;  %v13059_v46 = vpop.eup %8579  ;;  %v5221_v37 = vsel %vm5189_vm5, 1.0, %v13926_v48  ;;  %v5829_v35 = vmul.f32 %v8576_v25, %v5669_v29  ;;  %v14005_v29 = vld [vmem:[#allocation89_spill] sm:$0xff] }
 0x85a   : > { %v6682_v58 = vadd.f32 %v6650_v26, %v14002_v7  ;;  %v5410_v14 = vmul.f32 1.0614054, %v13055_v8  ;;  %v5289_v3 = vmul.f32 0.3275911, %v5257_v36  ;;  %v5412_v12 = vmul.f32 1.0614054, %v13059_v46 }
 0x85b   : > { %v5859_v24 = vsub.f32 1.0, %v5827_v2  ;;  %v5319_v57 = vadd.f32 1.0, %v5287_v6  ;;  %v5861_v5 = vsub.f32 1.0, %v5829_v35  ;;  %v5782_v38 = vmul.f32 1.442695, %v5730_v10  ;;  %v14008_v6 = vld [vmem:[#allocation105_spill] sm:$0xff] }
 0x85c   : > { %v6704_v22 = vpack.c.bf16 %v6682_v58, %v6680_v32  ;;  %v5442_v13 = vadd.f32 -1.4531521, %v5410_v14  ;;  %v5321_v52 = vadd.f32 1.0, %v5289_v3  ;;  %v5444_v43 = vadd.f32 -1.4531521, %v5412_v12  ;;  %v14007_v58 = vld [vmem:[#allocation103_spill] sm:$0xff] }
 0x85d   : > { %v5891_v19 = vmul.f32 %v5859_v24, %v5219_v18  ;;  %v5786_v42 = vmul.f32 1.442695, %v5732_v47  ;;  %8581 = vrcp.f32 %v5319_v57  ;;  %v5893_v62 = vmul.f32 %v5861_v5, %v5221_v37 }
 0x85e   : > { %6912 = vmatmul.mubr.bf16.gmra.mrb[144].mxu1 %v6704_v22  ;;  %v5474_v11 = vmul.f32 %v13055_v8, %v5442_v13  ;;  %8583 = vrcp.f32 %v5321_v52  ;;  %v5703_v23 = vsub.f32 0.0, %v5255_v45  ;;  %v5476_v17 = vmul.f32 %v13059_v46, %v5444_v43  ;;  %v14009_v43 = vld [vmem:[#allocation110_spill] sm:$0xff] }
 0x85f   : > { %v5923_v53 = vadd.f32 1.0, %v5891_v19  ;;  %v5705_v1 = vsub.f32 0.0, %v5257_v36  ;;  %v13068_v60 = vadd.f32 %v12267_v0, %v12572_v56  ;;  %v5925_v63 = vadd.f32 1.0, %v5893_v62  ;;  %v14003_v56 = vld [vmem:[#allocation73_spill] sm:$0xff] }
 0x860   : > { %v5506_v41 = vadd.f32 1.4214138, %v5474_v11  ;;  %8585 = vpow2.f32 %v5782_v38  ;;  %v13072_v33 = vadd.f32 %v12267_v0, %v12588_v27  ;;  %vm5186_vm6 = vcmp.ge.f32.partialorder %v12971_v54, 0.0 }
 0x861   : > { %v5955_v59 = vmul.f32 %v5923_v53, %v5123_v21  ;;  %v5508_v50 = vadd.f32 1.4214138, %v5476_v17  ;;  %8587 = vpow2.f32 %v5786_v42  ;;  %v5957_v51 = vmul.f32 %v5925_v63, %v5125_v9 }
 0x862   : > { %v5538_v28 = vmul.f32 %v13055_v8, %v5506_v41  ;;  %v5735_v26 = vmul.f32 %v5703_v23, %v5255_v45  ;;  %v13077_v18 = vmul.f32 0.70710677, %v13068_v60  ;;  %v14004_v4 = vsub.f32 1.0, %v14003_v56 }
 0x863   : > { %v5540_v55 = vmul.f32 %v13059_v46, %v5508_v50  ;;  %v5737_v32 = vmul.f32 %v5705_v1, %v5257_v36  ;;  %v13083_v27 = vmul.f32 0.70710677, %v13072_v33  ;;  %v5058_v21 = vmul.f32 %v12278_v15, %v12807_v39 }
 0x864   : > { %v6653_v25 = vmul.f32 %v14004_v4, %v5955_v59  ;;  %v14006_v9 = vsub.f32 1.0, %v14005_v29  ;;  %v5570_v7 = vadd.f32 -0.28449672, %v5538_v28  ;;  %v5254_v45 = vand.u32 2147483647, %v13077_v18 }
 0x865   : > { %v13092_v47 = vmul.f32 0.5, %v12955_v30  ;;  %vm5188_vm7 = vcmp.ge.f32.partialorder %v12975_v49, 0.0  ;;  %v5572_v36 = vadd.f32 -0.28449672, %v5540_v55  ;;  %v5218_v15 = vsel %vm5186_vm6, 1.0, %v13926_v48 }
 0x866   : > { %v6655_v10 = vmul.f32 %v14006_v9, %v5957_v51  ;;  %v6685_v2 = vadd.f32 %v6653_v25, %v14007_v58  ;;  %v5602_v39 = vmul.f32 %v13055_v8, %v5570_v7  ;;  %v5256_v35 = vand.u32 2147483647, %v13083_v27 }
 0x867   : > { %v13101_v14 = vpop.eup %8581  ;;  %v5604_v3 = vmul.f32 %v13059_v46, %v5572_v36  ;;  %v5792_v22 = vmul.f32 1.442695, %v5735_v26  ;;  %v5796_v30 = vmul.f32 1.442695, %v5737_v32  ;;  %v5286_v24 = vmul.f32 0.3275911, %v5254_v45 }
 0x868   : > { %v6687_v37 = vadd.f32 %v6655_v10, %v14008_v6  ;;  %v13104_v12 = vpop.eup %8583  ;;  %v5634_v5 = vadd.f32 0.2548296, %v5602_v39  ;;  %v5415_v13 = vmul.f32 1.0614054, %v13101_v14  ;;  %v5288_v38 = vmul.f32 0.3275911, %v5256_v35 }
 0x869   : > { %v5636_v54 = vadd.f32 0.2548296, %v5604_v3  ;;  %v5417_v52 = vmul.f32 1.0614054, %v13104_v12  ;;  %v5318_v19 = vadd.f32 1.0, %v5286_v24  ;;  %v13110_v42 = vadd.f32 %v12295_v20, %v14009_v43 }
 0x86a   : > { %v6707_v57 = vpack.c.bf16 %v6687_v37, %v6685_v2  ;;  %v8586_v62 = vpop.eup %8585  ;;  %v5666_v11 = vmul.f32 %v13055_v8, %v5634_v5  ;;  %v5447_v23 = vadd.f32 -1.4531521, %v5415_v13  ;;  %v5320_v53 = vadd.f32 1.0, %v5288_v38 }
 0x86b   : > { %v5702_v17 = vsub.f32 0.0, %v5254_v45  ;;  %v8588_v1 = vpop.eup %8587  ;;  %v5668_v63 = vmul.f32 %v13059_v46, %v5636_v54  ;;  %v5449_v41 = vadd.f32 -1.4531521, %v5417_v52  ;;  %8589 = vrcp.f32 %v5318_v19 }
 0x86c   : > { %6919 = vmatprep.mubr.bf16.mxu1 %v6707_v57  ;;  %v13115_v59 = vadd.f32 %v12295_v20, %v5058_v21  ;;  %v5826_v50 = vmul.f32 %v8586_v62, %v5666_v11  ;;  %v5479_v51 = vmul.f32 %v13101_v14, %v5447_v23  ;;  %8591 = vrcp.f32 %v5320_v53  ;;  %v14012_v11 = vld [vmem:[#allocation85_spill] sm:$0xff] }
 0x86d   : > { %v5704_v28 = vsub.f32 0.0, %v5256_v35  ;;  %v5220_v8 = vsel %vm5188_vm7, 1.0, %v13926_v48  ;;  %v5828_v26 = vmul.f32 %v8588_v1, %v5668_v63  ;;  %vm5191_vm8 = vcmp.ge.f32.partialorder %v13034_v34, 0.0  ;;  %v14010_v34 = vld [vmem:[#allocation63_spill] sm:$0xff] }
 0x86e   : > { %v5481_v56 = vmul.f32 %v13104_v12, %v5449_v41  ;;  %v5858_v46 = vsub.f32 1.0, %v5826_v50  ;;  %v5511_v4 = vadd.f32 1.4214138, %v5479_v51  ;;  %8593 = vpow2.f32 %v5792_v22  ;;  %v14014_v50 = vld [vmem:[#allocation76_spill] sm:$0xff] }
 0x86f   : > { %v5734_v25 = vmul.f32 %v5702_v17, %v5254_v45  ;;  %v5860_v20 = vsub.f32 1.0, %v5828_v26  ;;  %8595 = vpow2.f32 %v5796_v30  ;;  %v13124_v32 = vmul.f32 0.70710677, %v13110_v42 }
 0x870   : > { %v5513_v55 = vadd.f32 1.4214138, %v5481_v56  ;;  %v5890_v21 = vmul.f32 %v5858_v46, %v5218_v15  ;;  %v5543_v29 = vmul.f32 %v13101_v14, %v5511_v4  ;;  %v5736_v49 = vmul.f32 %v5704_v28, %v5256_v35  ;;  %v14015_v56 = vld [vmem:[#allocation104_spill] sm:$0xff] }
 0x871   : > { %v13128_v9 = vmul.f32 0.70710677, %v13115_v59  ;;  %v5124_v10 = vmul.f32 0.5, %v12959_v44  ;;  %v5892_v7 = vmul.f32 %v5860_v20, %v5220_v8  ;;  %v5259_v45 = vand.u32 2147483647, %v13124_v32 }
 0x872   : > { %v5545_v58 = vmul.f32 %v13104_v12, %v5513_v55  ;;  %v5922_v2 = vadd.f32 1.0, %v5890_v21  ;;  %vm5193_vm9 = vcmp.ge.f32.partialorder %v13038_v16, 0.0  ;;  %v5575_v36 = vadd.f32 -0.28449672, %v5543_v29  ;;  %v14016_v29 = vld [vmem:[#allocation109_spill] sm:$0xff] }
 0x873   : > { %v5790_v6 = vmul.f32 1.442695, %v5734_v25  ;;  %v5924_v37 = vadd.f32 1.0, %v5892_v7  ;;  %v5223_v15 = vsel %vm5191_vm8, 1.0, %v13926_v48  ;;  %v5261_v35 = vand.u32 2147483647, %v13128_v9 }
 0x874   : > { %v5577_v39 = vadd.f32 -0.28449672, %v5545_v58  ;;  %v5954_v44 = vmul.f32 %v5922_v2, %v13092_v47  ;;  %v5607_v3 = vmul.f32 %v13101_v14, %v5575_v36  ;;  %v5794_v22 = vmul.f32 1.442695, %v5736_v49 }
 0x875   : > { %v5291_v30 = vmul.f32 0.3275911, %v5259_v45  ;;  %v13140_v24 = vpop.eup %8589  ;;  %v5956_v57 = vmul.f32 %v5924_v37, %v5124_v10  ;;  %v5293_v13 = vmul.f32 0.3275911, %v5261_v35  ;;  %v5707_v38 = vsub.f32 0.0, %v5259_v45 }
 0x876   : > { %v5609_v5 = vmul.f32 %v13104_v12, %v5577_v39  ;;  %v13143_v54 = vpop.eup %8591  ;;  %v14011_v52 = vsub.f32 1.0, %v14010_v34  ;;  %v5639_v43 = vadd.f32 0.2548296, %v5607_v3  ;;  %v5414_v62 = vmul.f32 1.0614054, %v13140_v24 }
 0x877   : > { %v5323_v47 = vadd.f32 1.0, %v5291_v30  ;;  %v14013_v23 = vsub.f32 1.0, %v14012_v11  ;;  %v5416_v1 = vmul.f32 1.0614054, %v13143_v54  ;;  %v5325_v63 = vadd.f32 1.0, %v5293_v13 }
 0x878   : > { %v6652_v19 = vmul.f32 %v14011_v52, %v5954_v44  ;;  %v5641_v17 = vadd.f32 0.2548296, %v5609_v5  ;;  %v8594_v41 = vpop.eup %8593  ;;  %v5671_v28 = vmul.f32 %v13101_v14, %v5639_v43  ;;  %v5446_v8 = vadd.f32 -1.4531521, %v5414_v62 }
 0x879   : > { %v6654_v53 = vmul.f32 %v14013_v23, %v5956_v57  ;;  %8597 = vrcp.f32 %v5323_v47  ;;  %v8596_v26 = vpop.eup %8595  ;;  %v5448_v25 = vadd.f32 -1.4531521, %v5416_v1  ;;  %v5709_v21 = vsub.f32 0.0, %v5261_v35 }
 0x87a   : > { %v6684_v51 = vadd.f32 %v6652_v19, %v14014_v50  ;;  %v5673_v4 = vmul.f32 %v13104_v12, %v5641_v17  ;;  %8599 = vrcp.f32 %v5325_v63  ;;  %v5831_v20 = vmul.f32 %v8594_v41, %v5671_v28  ;;  %v14018_v63 = vld [vmem:[#allocation55_spill] sm:$0xff] }
 0x87b   : > { %v6686_v46 = vadd.f32 %v6654_v53, %v14015_v56  ;;  %v5478_v55 = vmul.f32 %v13140_v24, %v5446_v8  ;;  %v13158_v49 = vadd.f32 %v12267_v0, %v14016_v29  ;;  %v5480_v14 = vmul.f32 %v13143_v54, %v5448_v25 }
 0x87c   : > { %v5833_v7 = vmul.f32 %v8596_v26, %v5673_v4  ;;  %v13163_v58 = vadd.f32 %v12267_v0, %v13020_v61  ;;  %v5225_v12 = vsel %vm5193_vm9, 1.0, %v13926_v48  ;;  %v5863_v2 = vsub.f32 1.0, %v5831_v20  ;;  %v14017_v0 = vld [vmem:[#allocation90_spill] sm:$0xff]  ;;  %v14020_v20 = vld [vmem:[#allocation71_spill] sm:$0xff] }
 0x87d   : > { %v6706_v10 = vpack.c.bf16 %v6686_v46, %v6684_v51  ;;  %v5510_v36 = vadd.f32 1.4214138, %v5478_v55  ;;  %8601 = vpow2.f32 %v5790_v6  ;;  %v5512_v39 = vadd.f32 1.4214138, %v5480_v14  ;;  %v14021_v14 = vld [vmem:[#allocation107_spill] sm:$0xff] }
 0x87e   : > { %v5865_v37 = vsub.f32 1.0, %v5833_v7  ;;  %8603 = vpow2.f32 %v5794_v22  ;;  %v5739_v44 = vmul.f32 %v5707_v38, %v5259_v45  ;;  %v5895_v3 = vmul.f32 %v5863_v2, %v5223_v15 }
 0x87f   : > { %6920 = vmatmul.mubr.bf16.gmra.mrb[148].mxu1 %v6706_v10  ;;  %v5542_v30 = vmul.f32 %v13140_v24, %v5510_v36  ;;  %v5741_v57 = vmul.f32 %v5709_v21, %v5261_v35  ;;  %v13170_v5 = vmul.f32 0.70710677, %v13158_v49  ;;  %v6627_v61 = vsub.f32 1.0, %v14017_v0 }
 0x880   : > { %v5897_v13 = vmul.f32 %v5865_v37, %v5225_v12  ;;  %v5544_v16 = vmul.f32 %v13143_v54, %v5512_v39  ;;  %v13175_v34 = vmul.f32 0.70710677, %v13163_v58  ;;  %v5127_v6 = vmul.f32 0.5, %v13015_v31 }
 0x881   : > { %v5927_v52 = vadd.f32 1.0, %v5895_v3  ;;  %v5574_v22 = vadd.f32 -0.28449672, %v5542_v30  ;;  %v13179_v45 = vand.u32 2147483647, %v13170_v5  ;;  %v5129_v15 = vmul.f32 0.5, %v13026_v40 }
 0x882   : > { %v5929_v35 = vadd.f32 1.0, %v5897_v13  ;;  %v5576_v38 = vadd.f32 -0.28449672, %v5544_v16  ;;  %v5800_v19 = vmul.f32 1.442695, %v5739_v44  ;;  %v14019_v41 = vsub.f32 1.0, %v14018_v63 }
 0x883   : > { %v13182_v43 = vpop.eup %8597  ;;  %v5959_v62 = vmul.f32 %v5927_v52, %v5127_v6  ;;  %v5606_v47 = vmul.f32 %v13140_v24, %v5574_v22  ;;  %v5804_v11 = vmul.f32 1.442695, %v5741_v57  ;;  %v13186_v23 = vand.u32 2147483647, %v13175_v34  ;;  %v14023_v63 = vld [vmem:[#allocation69_spill] sm:$0xff] }
 0x884   : > { %v13188_v31 = vpop.eup %8599  ;;  %v5961_v53 = vmul.f32 %v5929_v35, %v5129_v15  ;;  %v5608_v17 = vmul.f32 %v13143_v54, %v5576_v38  ;;  %v5419_v1 = vmul.f32 1.0614054, %v13182_v43  ;;  %v5290_v40 = vmul.f32 0.3275911, %v13179_v45 }
 0x885   : > { %v6657_v50 = vmul.f32 %v14019_v41, %v5959_v62  ;;  %v5638_v51 = vadd.f32 0.2548296, %v5606_v47  ;;  %v5421_v28 = vmul.f32 1.0614054, %v13188_v31  ;;  %v5292_v8 = vmul.f32 0.3275911, %v13186_v23 }
 0x886   : > { %v6659_v26 = vmul.f32 %v6627_v61, %v5961_v53  ;;  %v5640_v56 = vadd.f32 0.2548296, %v5608_v17  ;;  %v5451_v46 = vadd.f32 -1.4531521, %v5419_v1  ;;  %v5322_v4 = vadd.f32 1.0, %v5290_v40 }
 0x887   : > { %v8602_v25 = vpop.eup %8601  ;;  %v6689_v55 = vadd.f32 %v6657_v50, %v14020_v20  ;;  %v5670_v21 = vmul.f32 %v13140_v24, %v5638_v51  ;;  %v5453_v29 = vadd.f32 -1.4531521, %v5421_v28  ;;  %v5324_v10 = vadd.f32 1.0, %v5292_v8 }
 0x888   : > { %v8604_v7 = vpop.eup %8603  ;;  %v6691_v12 = vadd.f32 %v6659_v26, %v14021_v14  ;;  %v5672_v2 = vmul.f32 %v13143_v54, %v5640_v56  ;;  %v5483_v36 = vmul.f32 %v13182_v43, %v5451_v46  ;;  %8605 = vrcp.f32 %v5322_v4 }
 0x889   : > { %vm5190_vm10 = vcmp.ge.f32.partialorder %v13077_v18, 0.0  ;;  %v5830_v37 = vmul.f32 %v8602_v25, %v5670_v21  ;;  %v5485_v39 = vmul.f32 %v13188_v31, %v5453_v29  ;;  %8607 = vrcp.f32 %v5324_v10 }
 0x88a   : > { %v6709_v44 = vpack.c.bf16 %v6691_v12, %v6689_v55  ;;  %vm5192_vm11 = vcmp.ge.f32.partialorder %v13083_v27, 0.0  ;;  %v5832_v24 = vmul.f32 %v8604_v7, %v5672_v2  ;;  %v5515_v3 = vadd.f32 1.4214138, %v5483_v36  ;;  %v14024_v55 = vld [vmem:[#allocation106_spill] sm:$0xff] }
 0x88b   : > { %v5862_v30 = vsub.f32 1.0, %v5830_v37  ;;  %v5517_v57 = vadd.f32 1.4214138, %v5485_v39  ;;  %8609 = vpow2.f32 %v5800_v19  ;;  %v5222_v54 = vsel %vm5190_vm10, 1.0, %v13926_v48 }
 0x88c   : > { %6927 = vmatprep.mubr.bf16.mxu1 %v6709_v44  ;;  %v5864_v0 = vsub.f32 1.0, %v5832_v24  ;;  %v5547_v61 = vmul.f32 %v13182_v43, %v5515_v3  ;;  %8611 = vpow2.f32 %v5804_v11  ;;  %v5224_v18 = vsel %vm5192_vm11, 1.0, %v13926_v48  ;;  %v14022_v11 = vld [vmem:[#allocation67_spill] sm:$0xff] }
 0x88d   : > { %v5894_v13 = vmul.f32 %v5862_v30, %v5222_v54  ;;  %v5549_v16 = vmul.f32 %v13188_v31, %v5517_v57  ;;  %v5706_v27 = vsub.f32 0.0, %v13179_v45  ;;  %v5126_v22 = vmul.f32 0.5, %v13068_v60 }
 0x88e   : > { %v5896_v6 = vmul.f32 %v5864_v0, %v5224_v18  ;;  %v5579_v52 = vadd.f32 -0.28449672, %v5547_v61  ;;  %v5708_v38 = vsub.f32 0.0, %v13186_v23  ;;  %v5128_v19 = vmul.f32 0.5, %v13072_v33 }
 0x88f   : > { %v5926_v15 = vadd.f32 1.0, %v5894_v13  ;;  %v5581_v35 = vadd.f32 -0.28449672, %v5549_v16  ;;  %v6624_v53 = vsub.f32 1.0, %v14022_v11  ;;  %v6626_v41 = vsub.f32 1.0, %v14023_v63  ;;  %v14028_v63 = vld [vmem:[#allocation118_spill] sm:$0xff] }
 0x890   : > { %v5928_v62 = vadd.f32 1.0, %v5896_v6  ;;  %v5611_v47 = vmul.f32 %v13182_v43, %v5579_v52  ;;  %v5738_v60 = vmul.f32 %v5706_v27, %v13179_v45  ;;  %v5740_v33 = vmul.f32 %v5708_v38, %v13186_v23  ;;  %v14025_v45 = vld [vmem:[#allocation113_spill] sm:$0xff]  ;;  %v14026_v27 = vld [vmem:[#allocation70_spill] sm:$0xff] }
 0x891   : > { %v5958_v17 = vmul.f32 %v5926_v15, %v5126_v22  ;;  %v5613_v1 = vmul.f32 %v13188_v31, %v5581_v35  ;;  %vm5195_vm12 = vcmp.ge.f32.partialorder %v13124_v32, 0.0  ;;  %vm5197_vm13 = vcmp.ge.f32.partialorder %v13128_v9, 0.0  ;;  %v14027_v38 = vld [vmem:[#allocation62_spill] sm:$0xff] }
 0x892   : > { %v8606_v40 = vpop.eup %8605  ;;  %v5960_v50 = vmul.f32 %v5928_v62, %v5128_v19  ;;  %v5643_v51 = vadd.f32 0.2548296, %v5611_v47  ;;  %v5798_v36 = vmul.f32 1.442695, %v5738_v60  ;;  %v5227_v3 = vsel %vm5195_vm12, 1.0, %v13926_v48 }
 0x893   : > { %v8608_v28 = vpop.eup %8607  ;;  %v6656_v8 = vmul.f32 %v6624_v53, %v5958_v17  ;;  %v5645_v26 = vadd.f32 0.2548296, %v5613_v1  ;;  %v5418_v56 = vmul.f32 1.0614054, %v8606_v40  ;;  %v5131_v9 = vmul.f32 0.5, %v13110_v42 }
 0x894   : > { %v6658_v46 = vmul.f32 %v6626_v41, %v5960_v50  ;;  %v5675_v4 = vmul.f32 %v13182_v43, %v5643_v51  ;;  %v5420_v25 = vmul.f32 1.0614054, %v8608_v28  ;;  %v5802_v43 = vmul.f32 1.442695, %v5740_v33  ;;  %v14029_v50 = vld [vmem:[#allocation120_spill] sm:$0xff] }
 0x895   : > { %v8610_v20 = vpop.eup %8609  ;;  %v6688_v21 = vadd.f32 %v6656_v8, %v14024_v55  ;;  %v5677_v29 = vmul.f32 %v13188_v31, %v5645_v26  ;;  %v5450_v10 = vadd.f32 -1.4531521, %v5418_v56  ;;  %v5229_v31 = vsel %vm5197_vm13, 1.0, %v13926_v48 }
 0x896   : > { %v8612_v7 = vpop.eup %8611  ;;  %v6690_v14 = vadd.f32 %v6658_v46, %v14025_v45  ;;  %v5835_v12 = vmul.f32 %v8610_v20, %v5675_v4  ;;  %v5452_v2 = vadd.f32 -1.4531521, %v5420_v25  ;;  %8613 = vpow2.f32 %v5798_v36 }
 0x897   : > { %v5837_v23 = vmul.f32 %v8612_v7, %v5677_v29  ;;  %v5482_v37 = vmul.f32 %v8606_v40, %v5450_v10  ;;  %8615 = vpow2.f32 %v5802_v43  ;;  %v5133_v16 = vmul.f32 0.5, %v13115_v59 }
 0x898   : > { %v6708_v39 = vpack.c.bf16 %v6690_v14, %v6688_v21  ;;  %v5867_v44 = vsub.f32 1.0, %v5835_v12  ;;  %v5484_v24 = vmul.f32 %v8608_v28, %v5452_v2  ;;  %v6629_v22 = vsub.f32 1.0, %v14026_v27 }
 0x899   : > { %v5869_v32 = vsub.f32 1.0, %v5837_v23  ;;  %v5514_v30 = vadd.f32 1.4214138, %v5482_v37  ;;  %v6631_v19 = vsub.f32 1.0, %v14027_v38  ;;  %vm5194_vm14 = vcmp.ge.f32.partialorder %v13170_v5, 0.0  ;;  %v14030_v5 = vld [vmem:[#allocation91_spill] sm:$0xff] }
 0x89a   : > { %6928 = vmatmul.mubr.bf16.gmra.mrb[152].mxu1 %v6708_v39  ;;  %v5899_v57 = vmul.f32 %v5867_v44, %v5227_v3  ;;  %v5516_v54 = vadd.f32 1.4214138, %v5484_v24  ;;  %vm5196_vm15 = vcmp.ge.f32.partialorder %v13175_v34, 0.0  ;;  %v5226_v25 = vsel %vm5194_vm14, 1.0, %v13926_v48  ;;  %v14031_v34 = vld [vmem:[#allocation93_spill] sm:$0xff]  ;;  %v14032_v37 = vld [vmem:[#allocation116_spill] sm:$0xff] }
 0x89b   : > { %v5901_v0 = vmul.f32 %v5869_v32, %v5229_v31  ;;  %v5546_v61 = vmul.f32 %v8606_v40, %v5514_v30  ;;  %v5228_v55 = vsel %vm5196_vm15, 1.0, %v13926_v48  ;;  %v5132_v10 = vmul.f32 0.5, %v13163_v58  ;;  %v14033_v48 = vld [vmem:[#allocation119_spill] sm:$0xff] }
 0x89c   : > { %v5931_v18 = vadd.f32 1.0, %v5899_v57  ;;  %v5548_v13 = vmul.f32 %v8608_v28, %v5516_v54  ;;  %v6628_v45 = vsub.f32 1.0, %v14030_v5  ;;  %v6630_v12 = vsub.f32 1.0, %v14031_v34 }
 0x89d   : > { %v5933_v6 = vadd.f32 1.0, %v5901_v0  ;;  %v5578_v52 = vadd.f32 -0.28449672, %v5546_v61 }
 0x89e   : > { %v5963_v15 = vmul.f32 %v5931_v18, %v5131_v9  ;;  %v5580_v35 = vadd.f32 -0.28449672, %v5548_v13 }
 0x89f   : > { %v5965_v62 = vmul.f32 %v5933_v6, %v5133_v16  ;;  %v5610_v47 = vmul.f32 %v8606_v40, %v5578_v52 }
 0x8a0   : > { %v6661_v11 = vmul.f32 %v6629_v22, %v5963_v15  ;;  %v5612_v53 = vmul.f32 %v8608_v28, %v5580_v35  ;;  %v8614_v60 = vpop.eup %8613 }
 0x8a1   : > { %v6663_v17 = vmul.f32 %v6631_v19, %v5965_v62  ;;  %v5642_v1 = vadd.f32 0.2548296, %v5610_v47  ;;  %v8616_v26 = vpop.eup %8615 }
 0x8a2   : > { %v6693_v42 = vadd.f32 %v6661_v11, %v14028_v63  ;;  %v5644_v41 = vadd.f32 0.2548296, %v5612_v53 }
 0x8a3   : > { %v6695_v51 = vadd.f32 %v6663_v17, %v14029_v50  ;;  %v5674_v59 = vmul.f32 %v8606_v40, %v5642_v1  ;;  %v5130_v40 = vmul.f32 0.5, %v13158_v49  ;;  %v13246_v49 = vld [vmem:[%s14034_s17] ss:$0 sm:$0xff] }
 0x8a4   : > { %v5676_v8 = vmul.f32 %v8608_v28, %v5644_v41 }
 0x8a5   : > { %v6711_v56 = vpack.c.bf16 %v6695_v51, %v6693_v42  ;;  %v5834_v33 = vmul.f32 %v8614_v60, %v5674_v59 }
 0x8a6   : > { %v5836_v46 = vmul.f32 %v8616_v26, %v5676_v8 }
 0x8a7   : > { %6935 = vmatprep.mubr.bf16.mxu1 %v6711_v56  ;;  %v5866_v4 = vsub.f32 1.0, %v5834_v33 }
 0x8a8   : > { %v5868_v20 = vsub.f32 1.0, %v5836_v46 }
 0x8a9   : > { %v5898_v21 = vmul.f32 %v5866_v4, %v5226_v25 }
 0x8aa   : > { %v5900_v29 = vmul.f32 %v5868_v20, %v5228_v55 }
 0x8ab   : > { %v5930_v28 = vadd.f32 1.0, %v5898_v21 }
 0x8ac   : > { %v5932_v7 = vadd.f32 1.0, %v5900_v29 }
 0x8ad   : > { %v5962_v14 = vmul.f32 %v5930_v28, %v5130_v40 }
 0x8ae   : > { %v5964_v2 = vmul.f32 %v5932_v7, %v5132_v10 }
 0x8af   : > { %v6660_v36 = vmul.f32 %v6628_v45, %v5962_v14  ;;  %v7522_v24 = vpop.f32.mrb[128].mxu1 }
 0x8b0   : > { %v6662_v23 = vmul.f32 %v6630_v12, %v5964_v2  ;;  %v7523_v58 = vpop.f32.mrb[129].mxu1 }
 0x8b1   : > { %v6692_v43 = vadd.f32 %v6660_v36, %v14032_v37  ;;  %v7524_v3 = vadd.f32 %v7523_v58, %v7522_v24  ;;  %v7525_v32 = vpop.f32.mrb[130].mxu1 }
 0x8b2   : > { %v6694_v39 = vadd.f32 %v6662_v23, %v14033_v48  ;;  %v7526_v30 = vpop.f32.mrb[131].mxu1 }
 0x8b3   : > { %v6882_v31 = vadd.f32 %v7524_v3, %v13246_v49  ;;  %v7527_v57 = vadd.f32 %v7526_v30, %v7525_v32 }
 0x8b4   : > { %v6710_v44 = vpack.c.bf16 %v6694_v39, %v6692_v43 }
 0x8b5   : > { %6944 = vst [vmem:[%s13250_s25] sm:$0xff] %v6882_v31  ;;  %v6885_v54 = vadd.f32 %v7527_v57, %v13246_v49 }
 0x8b6   : > { %6936 = vmatmul.mubr.bf16.gmra.mrb[156].mxu1 %v6710_v44 }
 0x8b7   : > { %6945 = vst [vmem:[%s13250_s25 + $0x8] sm:$0xff] %v6885_v54 }
 0x8dc   : > { %v7528_v0 = vpop.f32.mrb[132].mxu1 }
 0x8dd   : > { %v7529_v61 = vpop.f32.mrb[133].mxu1 }
 0x8de   : > { %v7530_v9 = vadd.f32 %v7529_v61, %v7528_v0  ;;  %v7531_v18 = vpop.f32.mrb[134].mxu1 }
 0x8df   : > { %v7532_v13 = vpop.f32.mrb[135].mxu1 }
 0x8e0   : > { %v6890_v16 = vadd.f32 %v7530_v9, %v13246_v49  ;;  %v7533_v6 = vadd.f32 %v7532_v13, %v7531_v18 }
 0x8e2   : > { %6946 = vst [vmem:[%s13250_s25 + $0x10] sm:$0xff] %v6890_v16  ;;  %v6893_v52 = vadd.f32 %v7533_v6, %v13246_v49 }
 0x8e4   : > { %6947 = vst [vmem:[%s13250_s25 + $0x18] sm:$0xff] %v6893_v52 }
 0x8f1   : > { %v7534_v27 = vpop.f32.mrb[136].mxu1 }
 0x8f2   : > { %v7535_v22 = vpop.f32.mrb[137].mxu1 }
 0x8f3   : > { %v7536_v15 = vadd.f32 %v7535_v22, %v7534_v27  ;;  %v7537_v35 = vpop.f32.mrb[138].mxu1 }
 0x8f4   : > { %v7538_v38 = vpop.f32.mrb[139].mxu1 }
 0x8f5   : > { %v6898_v19 = vadd.f32 %v7536_v15, %v13246_v49  ;;  %v7539_v62 = vadd.f32 %v7538_v38, %v7537_v35 }
 0x8f7   : > { %6948 = vst [vmem:[%s13250_s25 + $0x20] sm:$0xff] %v6898_v19  ;;  %v6901_v47 = vadd.f32 %v7539_v62, %v13246_v49 }
 0x8f9   : > { %6949 = vst [vmem:[%s13250_s25 + $0x28] sm:$0xff] %v6901_v47 }
 0x917   : > { %v7540_v11 = vpop.f32.mrb[140].mxu1 }
 0x918   : > { %v7541_v53 = vpop.f32.mrb[141].mxu1 }
 0x919   : > { %v7542_v17 = vadd.f32 %v7541_v53, %v7540_v11  ;;  %v7543_v1 = vpop.f32.mrb[142].mxu1 }
 0x91a   : > { %v7544_v63 = vpop.f32.mrb[143].mxu1 }
 0x91b   : > { %v6906_v42 = vadd.f32 %v7542_v17, %v13246_v49  ;;  %v7545_v41 = vadd.f32 %v7544_v63, %v7543_v1 }
 0x91d   : > { %6950 = vst [vmem:[%s13250_s25 + $0x30] sm:$0xff] %v6906_v42  ;;  %v6909_v50 = vadd.f32 %v7545_v41, %v13246_v49 }
 0x91f   : > { %6951 = vst [vmem:[%s13250_s25 + $0x38] sm:$0xff] %v6909_v50 }
 0x931   : > { %v7546_v51 = vpop.f32.mrb[144].mxu1 }
 0x932   : > { %v7547_v59 = vpop.f32.mrb[145].mxu1 }
 0x933   : > { %v7548_v60 = vadd.f32 %v7547_v59, %v7546_v51  ;;  %v7549_v8 = vpop.f32.mrb[146].mxu1 }
 0x934   : > { %v7550_v26 = vpop.f32.mrb[147].mxu1 }
 0x935   : > { %v6914_v56 = vadd.f32 %v7548_v60, %v13246_v49  ;;  %v7551_v33 = vadd.f32 %v7550_v26, %v7549_v8 }
 0x937   : > { %6952 = vst [vmem:[%s13250_s25 + $0x40] sm:$0xff] %v6914_v56  ;;  %v6917_v46 = vadd.f32 %v7551_v33, %v13246_v49 }
 0x939   : > { %6953 = vst [vmem:[%s13250_s25 + $0x48] sm:$0xff] %v6917_v46 }
 0x952   : > { %v7552_v4 = vpop.f32.mrb[148].mxu1 }
 0x953   : > { %v7553_v25 = vpop.f32.mrb[149].mxu1 }
 0x954   : > { %v7554_v20 = vadd.f32 %v7553_v25, %v7552_v4  ;;  %v7555_v55 = vpop.f32.mrb[150].mxu1 }
 0x955   : > { %v7556_v21 = vpop.f32.mrb[151].mxu1 }
 0x956   : > { %v6922_v29 = vadd.f32 %v7554_v20, %v13246_v49  ;;  %v7557_v40 = vadd.f32 %v7556_v21, %v7555_v55 }
 0x958   : > { %6954 = vst [vmem:[%s13250_s25 + $0x50] sm:$0xff] %v6922_v29  ;;  %v6925_v28 = vadd.f32 %v7557_v40, %v13246_v49 }
 0x95a   : > { %6955 = vst [vmem:[%s13250_s25 + $0x58] sm:$0xff] %v6925_v28 }
 0x96d   : > { %v7558_v10 = vpop.f32.mrb[152].mxu1 }
 0x96e   : > { %v7559_v7 = vpop.f32.mrb[153].mxu1 }
 0x96f   : > { %v7560_v5 = vadd.f32 %v7559_v7, %v7558_v10  ;;  %v7561_v45 = vpop.f32.mrb[154].mxu1 }
 0x970   : > { %v7562_v14 = vpop.f32.mrb[155].mxu1 }
 0x971   : > { %v6930_v34 = vadd.f32 %v7560_v5, %v13246_v49  ;;  %v7563_v12 = vadd.f32 %v7562_v14, %v7561_v45 }
 0x973   : > { %6956 = vst [vmem:[%s13250_s25 + $0x60] sm:$0xff] %v6930_v34  ;;  %v6933_v2 = vadd.f32 %v7563_v12, %v13246_v49 }
 0x975   : > { %6957 = vst [vmem:[%s13250_s25 + $0x68] sm:$0xff] %v6933_v2 }
 0x989   : > { %v7564_v36 = vpop.f32.mrb[156].mxu1 }
 0x98a   : > { %v7565_v23 = vpop.f32.mrb[157].mxu1 }
 0x98b   : > { %v7566_v37 = vadd.f32 %v7565_v23, %v7564_v36  ;;  %v7567_v43 = vpop.f32.mrb[158].mxu1 }
 0x98c   : > { %v7568_v48 = vpop.f32.mrb[159].mxu1 }
 0x98d   : > { %v6938_v39 = vadd.f32 %v7566_v37, %v13246_v49  ;;  %v7569_v44 = vadd.f32 %v7568_v48, %v7567_v43 }
 0x98f   : > { %6958 = vst [vmem:[%s13250_s25 + $0x70] sm:$0xff] %v6938_v39  ;;  %v6941_v24 = vadd.f32 %v7569_v44, %v13246_v49 }
 0x991   : > { %6959 = vst [vmem:[%s13250_s25 + $0x78] sm:$0xff] %v6941_v24 }
 0x992   : > { %9000 = shalt.err (!%p8997_p5)
}
 0x993   : > { %s9001_s7 = scalar_lea.hbm %s13285_s15, 2048  ;;  %s9005_s1 = scalar_lea.hbm %s14036_s30, 4096 }
 0x994   : > { %p9002_p7 = scmp.ne.s32.totalorder %s13285_s15, %s9001_s7  ;;  %p9006_p3 = scmp.lt.u32.totalorder %s13285_s15, %s14036_s30 }
 0x995   : > { %p9007_p4 = scmp.lt.u32.totalorder %s9005_s1, %s9001_s7  ;;  %p9009_p10 = scmp.lt.u32.totalorder %s9001_s7, %s13285_s15 }
 0x996   : > { %p9003_p8 = pnand %p9002_p7, %p14037_p11 }
 0x997   : > { %p9008_p12 = por %p9007_p4, %p9006_p3 }
 0x998   : > { %p9004_p13 = pneg %p9003_p8 }
 0x999   : > { %p9010_p6 = por %p9009_p10, %p9008_p12 }
 0x99b   : > { %p9011_p2 = pnand %p9010_p6, %p9004_p13 }
 0x99d   : > { %9014 = shalt.err (!%p9011_p2)
}
 0x99e   : > { %s9101_s16 = smov 128   ;;  %s9102_s0 = smov 8  }
 0x99f   : > { %7648 = dma.vmem_to_hbm [thread:$0]  (%p14037_p11), %s13287_s26, 2048, %s13285_s15, %s6961_s29, %s9101_s16, %s9101_s16, %s9102_s0  }
 0x9a0 PF: > { %s14038_s17 = sld [smem:[#allocation32_spill]]  ;;  %s14039_s25 = sld [smem:[#allocation37_spill]] }
 0x9a1   : > { %p14041_p1 = scmp.ge.s32.totalorder %s9077_s28, 2 }
 0x9a6   : > { %s6989_s4 = sand.u32 1, %s14038_s17   ;;  %p14040_p9 = scmp.ne.s32.totalorder %s14039_s25, 0 }
 0x9a7   : > { %s6990_s9 = scalar_lea.sflag [#allocation4], %s6989_s4 }
 0x9a8   : > { %p7692_p0 = pnand %p14041_p1, %p14040_p9 }
 0x9aa   : > { %9060 = dma.done.wait (!%p7692_p0), %s6990_s9, 2048  }
 0x9ab   : > { %9062 = vsyncadd (!%p7692_p0), %s6990_s9, 4294965248  ;;  %s14042_s28 = sld [smem:[#allocation34_spill]]  ;;  %s14043_s22 = sld [smem:[#allocation33_spill]] }
 0x9ac   : > { %s14044_s7 = sld [smem:[#allocation35_spill]]  ;;  %s14045_s27 = smov %s9069_s3 }
 0x9b1   : > { %p47_p5 = scmp.ge.s32.totalorder %s14042_s28, 4   ;;  %s14046_s3 = smov %s14043_s22 }
 0x9b3   :  { %49 = sbr.rel (!%p47_p5) target bundleno = 36 (0x24), region = 233 }
 0x9ba   :  { %6995 = vsyncpa [#allocation3], 1 }
 0x9bb   :  { %6997 = vsyncpa [#allocation3 + $0x1], 1 }
 0x9bc   :  { %6998 = vsyncpa [#allocation6], 1 }
 0x9bd   :  { %7000 = vsyncpa [#allocation6 + $0x1], 1 }
 0x9be   :  { %7001 = vsyncpa [#allocation9], 1 }
 0x9bf   :  { %7002 = vsyncpa [#allocation12], 1 }
 0x9c0   :  { %7003 = vsyncpa [#allocation15], 1 }
 0x9c1   :  { %7004 = vsyncpa [#allocation18], 1 }
 0x9c2   :  { %7005 = vsyncpa [#allocation21], 1 }
 0x9c3   :  { %7006 = vsyncpa [#allocation4], 1 }
 0x9c4   :  { %7008 = vsyncpa [#allocation4 + $0x1], 1 }

</bundles_post_ra>
